<compile_context>
chip_gen: v6e
topology: v6e:2x2x1
jax: 0.10.0
libtpu: 0.0.40
codegen_flags: <defaults>
</compile_context>

<pallas_src>
import functools
import math

import jax
import jax.numpy as jnp
import numpy as np
from jax import lax
from jax.experimental import pallas as pl
from jax.experimental.pallas import tpu as pltpu


def _round_up(x, m):
    return (x + m - 1) // m * m


# ---------------------------------------------------------------------------
# Fused kernel: conv1 + ReLU, 18 x (conv + ReLU), conv2 + residual add.
#
# Flat layout: activations of one batch element live in a zero-padded flat
# (row*Wp + col, 64) buffer, Wp = round_up(W + 2, 8).  Output pixel (0,0) sits
# at flat offset START = Wp + 1.  For a 3x3 conv, tap (dy, dx) of output pixel
# m reads buffer position dy*Wp + dx + m.  Columns >= W of every row are
# "garbage"/padding columns and are masked to zero before each store so the
# implicit zero padding of the next layer stays intact.
# ---------------------------------------------------------------------------
def _vdsr_fused_kernel(xp_ref, w1_ref, wres_ref, w2_ref, o_ref, buf_a, buf_b,
                       *, H, W, Wp, n_res, cin):
    """Refs (per batch element, leading batch dim squeezed away):
      xp_ref  : (M, 9*Cin)          one-time im2col patches of the padded input
      w1_ref  : (9*Cin, 64)         conv1, tap-major rows (dy, dx, cin)
      wres_ref: (n_res*3, 192, 64)  residual layers, dx-packed per dy
      w2_ref  : (3, 192, Cout)      conv2, dx-packed per dy
      o_ref   : (M, Cout)           output in padded-width flat layout
      buf_a/b : (pad_rows, 64) cdt  VMEM ping-pong activation buffers
    """
    M = H * Wp                      # flat rows of one layer output (incl. garbage)
    L = 2 * Wp + M                  # rows of the dx-packed patch
    START = Wp + 1                  # flat offset of output pixel (0, 0)
    cdt = buf_a.dtype               # MXU compute / activation-storage dtype

    # Row r of the flat grid is a real pixel iff (r mod Wp) < W.
    col = lax.broadcasted_iota(jnp.int32, (M, 1), 0) % Wp
    valid = col < W

    # Establish zero padding once; overwritten cells are always masked zeros.
    buf_a[...] = jnp.zeros_like(buf_a)
    buf_b[...] = jnp.zeros_like(buf_b)

    def dx_packed_conv(src, w_of_dy, cout):
        # Build the lane-concatenated patch once:
        #   P[r, dx*64 + c] = src[r + dx, c]        dx in {0, 1, 2}
        # then 3 MXU dots with K = 192 (one per dy); sublane-aligned slices
        # (offsets 0, Wp, 2*Wp are multiples of 8); pure chained f32 accumulation.
        p = jnp.concatenate(
            [src[0:L, :], src[1:1 + L, :], src[2:2 + L, :]], axis=-1)
        acc = jnp.dot(p[0:M, :], w_of_dy(0), preferred_element_type=jnp.float32)
        for dy in (1, 2):
            acc = acc + jnp.dot(p[dy * Wp:dy * Wp + M, :], w_of_dy(dy),
                                preferred_element_type=jnp.float32)
        return acc

    # ---- conv1 (Cin -> 64) + ReLU: single im2col dot, K = 9*Cin --------------
    a = jnp.dot(xp_ref[...].astype(cdt), w1_ref[...],
                preferred_element_type=jnp.float32)
    a = jnp.where(valid, jnp.maximum(a, 0.0), 0.0)
    buf_a[START:START + M, :] = a.astype(cdt)       # single cast at the store

    # ---- 18 residual layers (64 -> 64) + ReLU, ping-pong A <-> B -------------
    def res_layer(src, dst, lidx):
        a = dx_packed_conv(src, lambda dy: wres_ref[lidx * 3 + dy], 64)
        a = jnp.where(valid, jnp.maximum(a, 0.0), 0.0)
        dst[START:START + M, :] = a.astype(cdt)

    def body(j, carry):
        res_layer(buf_a, buf_b, 2 * j)              # layer 2j   : A -> B
        res_layer(buf_b, buf_a, 2 * j + 1)          # layer 2j+1 : B -> A
        return carry

    lax.fori_loop(0, n_res // 2, body, 0)           # result ends up in buf_a

    # ---- conv2 (64 -> Cout) + residual add (f32) ------------------------------
    cout = w2_ref.shape[-1]
    acc = dx_packed_conv(buf_a, lambda dy: w2_ref[dy], cout)
    # Centre tap (dy=1, dx=1) of the conv1 patch is the original input pixel.
    residual = xp_ref[:, 4 * cin:5 * cin].astype(jnp.float32)
    o_ref[...] = (acc + residual).astype(o_ref.dtype)


# ---------------------------------------------------------------------------
# VMEM budget from the actual footprint, capped per generation.
# ---------------------------------------------------------------------------
def _vmem_limit_bytes(*, M, Cin, Cout, n_res, pad_rows, L, cdt, io_dtype):
    csz = jnp.dtype(cdt).itemsize
    isz = jnp.dtype(io_dtype).itemsize

    def blk(rows, cols, itemsize):                  # (8,128)-tiled VMEM block
        return _round_up(rows, 8) * _round_up(cols, 128) * itemsize

    io = 2 * (blk(M, 9 * Cin, isz) + blk(M, Cout, isz))          # double-buffered
    weights = 2 * (blk(9 * Cin, 64, csz)
                   + blk(n_res * 3 * 192, 64, csz)
                   + blk(3 * 192, Cout, csz))
    scratch = 2 * blk(pad_rows, 64, csz)
    temps = blk(L, 192, csz) + 3 * blk(M, 64, 4) + blk(M, 192, csz)
    need = int((io + weights + scratch + temps) * 1.25) + (4 << 20)

    try:
        cap = int(pltpu.get_tpu_info().vmem_capacity_bytes * 0.9)
    except Exception:                               # not on a TPU / old API
        cap = 96 << 20
    return max(32 << 20, min(need, cap))


# ---------------------------------------------------------------------------
# Wrapper: one pallas_call for the whole network, grid over batch.
# ---------------------------------------------------------------------------
def vdsr_pallas(x_nchw, params, *, compute_dtype=jnp.bfloat16):
    """x_nchw: (N, C, H, W) -> (N, C, H, W).  Residual add requires Cin == Cout."""
    x = jnp.transpose(x_nchw, (0, 2, 3, 1))                  # NCHW -> NHWC
    N, H, W, Cin = x.shape
    cdt = jnp.dtype(compute_dtype)

    n_res = len(params["res"])
    assert n_res % 2 == 0, "ping-pong layer loop assumes an even layer count"

    w1f = params["conv1"]
    w2f = params["conv2"]
    Cout = w2f.shape[-1]
    assert Cin == Cout, "residual add requires in_channels == out_channels"

    # Tap-major packed weights (cast once to the MXU compute dtype):
    #   w1  : rows ordered (dy, dx, cin)                          -> (9*Cin, 64)
    #   wres: per (layer, dy), dx packed along K (dx*64 + cin)    -> (n_res*3, 192, 64)
    #   w2  : per dy, dx packed along K                           -> (3, 192, Cout)
    w1 = w1f.astype(cdt).reshape(9 * Cin, 64)
    wres = jnp.stack(params["res"]).astype(cdt).reshape(n_res * 3, 192, 64)
    w2 = w2f.astype(cdt).reshape(3, 192, Cout)

    # Sublane-aligned flat geometry.
    Wp = _round_up(W + 2, 8)        # padded row width (>= W+2), multiple of 8
    M = H * Wp
    L = 2 * Wp + M
    pad_rows = _round_up(L + 2, 8)

    # One-time im2col patches for conv1 (K = 9*Cin), in the padded-width flat
    # layout; the centre tap is reused for the residual add inside the kernel.
    xw = jnp.zeros((N, H + 2, Wp + 2, Cin), x.dtype)
    xw = xw.at[:, 1:H + 1, 1:W + 1, :].set(x)
    taps = [xw[:, dy:dy + H, dx:dx + Wp, :] for dy in range(3) for dx in range(3)]
    xp = jnp.concatenate(taps, axis=-1).reshape(N, M, 9 * Cin)

    kernel = functools.partial(_vdsr_fused_kernel, H=H, W=W, Wp=Wp,
                               n_res=n_res, cin=Cin)

    vmem_limit = _vmem_limit_bytes(M=M, Cin=Cin, Cout=Cout, n_res=n_res,
                                   pad_rows=pad_rows, L=L, cdt=cdt,
                                   io_dtype=x.dtype)

    out_flat = pl.pallas_call(
        kernel,
        out_shape=jax.ShapeDtypeStruct((N, M, Cout), x.dtype),
        grid=(N,),
        in_specs=[
            pl.BlockSpec((None, M, 9 * Cin), lambda n: (n, 0, 0)),
            pl.BlockSpec((9 * Cin, 64), lambda n: (0, 0)),
            pl.BlockSpec((n_res * 3, 192, 64), lambda n: (0, 0, 0)),
            pl.BlockSpec((3, 192, Cout), lambda n: (0, 0, 0)),
        ],
        out_specs=pl.BlockSpec((None, M, Cout), lambda n: (n, 0, 0)),
        scratch_shapes=[
            pltpu.VMEM((pad_rows, 64), cdt),        # activation ping (compute dtype)
            pltpu.VMEM((pad_rows, 64), cdt),        # activation pong
        ],
        compiler_params=pltpu.CompilerParams(
            dimension_semantics=("parallel",),
            vmem_limit_bytes=vmem_limit,
        ),
    )(xp, w1, wres, w2)

    # Drop the garbage (padded-width) columns and return NCHW.
    out = out_flat.reshape(N, H, Wp, Cout)[:, :, :W, :]
    return jnp.transpose(out, (0, 3, 1, 2))


@functools.partial(jax.jit, static_argnames=("compute_dtype",))
def vdsr_forward(x_nchw, params, compute_dtype=jnp.bfloat16):
    return vdsr_pallas(x_nchw, params, compute_dtype=compute_dtype)


# ---------------------------------------------------------------------------
# Parameters (same init as the PyTorch module: N(0, sqrt(2 / (k*k*out_ch)))).
# ---------------------------------------------------------------------------
def init_vdsr_params(key, in_channels, out_channels, dtype=jnp.float32):
    def mk(k, cin, cout):
        std = math.sqrt(2.0 / (3 * 3 * cout))
        return (jax.random.normal(k, (3, 3, cin, cout), jnp.float32) * std
                ).astype(dtype)

    keys = jax.random.split(key, 20)
    return {
        "conv1": mk(keys[0], in_channels, 64),
        "res": [mk(keys[1 + i], 64, 64) for i in range(18)],
        "conv2": mk(keys[19], 64, out_channels),
    }


# ---------------------------------------------------------------------------
# Pure-JAX reference (full-precision convolutions).
# ---------------------------------------------------------------------------
def vdsr_reference(x_nchw, params):
    x = jnp.transpose(x_nchw, (0, 2, 3, 1))
    dn = ("NHWC", "HWIO", "NHWC")

    def conv(v, w):
        return lax.conv_general_dilated(v, w, (1, 1), "SAME",
                                        dimension_numbers=dn,
                                        precision=lax.Precision.HIGHEST)

    y = jax.nn.relu(conv(x, params["conv1"]))
    for w in params["res"]:
        y = jax.nn.relu(conv(y, w))
    y = conv(y, params["conv2"]) + x
    return jnp.transpose(y, (0, 3, 1, 2))


if __name__ == "__main__":
    key = jax.random.PRNGKey(0)
    k_x, k_p = jax.random.split(key)

    # Residual add requires in_channels == out_channels.
    N, C, H, W = 2, 4, 16, 16
    x = jax.random.normal(k_x, (N, C, H, W), jnp.float32)
    params = init_vdsr_params(k_p, in_channels=C, out_channels=C)

    ref = np.asarray(vdsr_reference(x, params))

    # Exact path (f32 MXU operands / f32 scratch) vs. the XLA conv reference.
    out_f32 = jax.block_until_ready(
        vdsr_forward(x, params, compute_dtype=jnp.float32))
    assert out_f32.shape == (N, C, H, W)
    np.testing.assert_allclose(np.asarray(out_f32), ref, rtol=5e-3, atol=5e-3)

    # Default fast path (bf16 MXU operands + bf16 activation scratch, f32
    # accumulation / ReLU / residual).  20 chained bf16 convolutions drift from
    # the f32 reference, so the tolerance is sized for bf16 operand rounding.
    out_bf16 = jax.block_until_ready(vdsr_forward(x, params))
    assert out_bf16.shape == (N, C, H, W)
    np.testing.assert_allclose(np.asarray(out_bf16), ref, rtol=0.1, atol=0.3)

    print("KERNEL_OK")
</pallas_src>

<mosaic_0001>
module attributes {stable_mosaic.version = 11 : i64} {
  func.func @_vdsr_fused_kernel(%arg0: i32, %arg1: memref<1x384x36xf32, #tpu.memory_space<vmem>>, %arg2: memref<36x64xf32, #tpu.memory_space<vmem>>, %arg3: memref<54x192x64xf32, #tpu.memory_space<vmem>>, %arg4: memref<3x192x4xf32, #tpu.memory_space<vmem>>, %arg5: memref<1x384x4xf32, #tpu.memory_space<vmem>>, %arg6: memref<440x64xf32, #tpu.memory_space<vmem>>, %arg7: memref<440x64xf32, #tpu.memory_space<vmem>>) attributes {dimension_semantics = [#tpu.dimension_semantics<parallel>], iteration_bounds = array<i64: 2>, scalar_prefetch = 0 : i64, scratch_operands = 2 : i64, tpu.core_type = #tpu.core_type<tc>, window_params = [{transform_indices = @transform_0, window_bounds = array<i64: 1, 384, 36>}, {pipeline_mode = #tpu.pipeline_mode<synchronous>, transform_indices = @transform_1, window_bounds = array<i64: 36, 64>}, {pipeline_mode = #tpu.pipeline_mode<synchronous>, transform_indices = @transform_2, window_bounds = array<i64: 54, 192, 64>}, {pipeline_mode = #tpu.pipeline_mode<synchronous>, transform_indices = @transform_3, window_bounds = array<i64: 3, 192, 4>}, {transform_indices = @transform_4, window_bounds = array<i64: 1, 384, 4>}]} {
    %0 = tpu.iota {dimensions = array<i32: 0>} : vector<384x1xi32>
    %c24_i32 = arith.constant 24 : i32
    %c0_i32 = arith.constant 0 : i32
    %1 = arith.cmpi eq, %c24_i32, %c0_i32 : i32
    %c1_i32 = arith.constant 1 : i32
    %2 = arith.select %1, %c1_i32, %c24_i32 : i32
    %3 = vector.broadcast %2 : i32 to vector<384x1xi32>
    %4 = arith.remsi %0, %3 : vector<384x1xi32>
    %c0_i32_0 = arith.constant 0 : i32
    %5 = vector.broadcast %c0_i32_0 : i32 to vector<384x1xi32>
    %6 = arith.cmpi ne, %4, %5 : vector<384x1xi32>
    %c0_i32_1 = arith.constant 0 : i32
    %7 = vector.broadcast %c0_i32_1 : i32 to vector<384x1xi32>
    %8 = arith.cmpi slt, %4, %7 : vector<384x1xi32>
    %c0_i32_2 = arith.constant 0 : i32
    %9 = arith.cmpi slt, %2, %c0_i32_2 : i32
    %10 = vector.broadcast %9 : i1 to vector<384x1xi1>
    %11 = vector.broadcast %10 : vector<384x1xi1> to vector<384x1xi1>
    %12 = arith.xori %8, %11 : vector<384x1xi1>
    %13 = arith.andi %12, %6 : vector<384x1xi1>
    %14 = vector.broadcast %2 : i32 to vector<384x1xi32>
    %15 = arith.addi %4, %14 : vector<384x1xi32>
    %16 = arith.select %13, %15, %4 : vector<384x1xi1>, vector<384x1xi32>
    %c16_i32 = arith.constant 16 : i32
    %17 = vector.broadcast %c16_i32 : i32 to vector<384x1xi32>
    %18 = arith.cmpi slt, %16, %17 : vector<384x1xi32>
    %cst = arith.constant 0.000000e+00 : f32
    %19 = vector.broadcast %cst : f32 to vector<440x64xf32>
    %c0 = arith.constant 0 : index
    %c0_3 = arith.constant 0 : index
    %20 = vector.load %arg6[%c0, %c0_3] : memref<440x64xf32, #tpu.memory_space<vmem>>, vector<440x64xf32>
    tpu.vector_store %arg6[%c0, %c0_3], %19 {strides = array<i32>} : memref<440x64xf32, #tpu.memory_space<vmem>>, vector<440x64xf32>,
    %cst_4 = arith.constant 0.000000e+00 : f32
    %21 = vector.broadcast %cst_4 : f32 to vector<440x64xf32>
    %c0_5 = arith.constant 0 : index
    %c0_6 = arith.constant 0 : index
    %22 = vector.load %arg7[%c0_5, %c0_6] : memref<440x64xf32, #tpu.memory_space<vmem>>, vector<440x64xf32>
    tpu.vector_store %arg7[%c0_5, %c0_6], %21 {strides = array<i32>} : memref<440x64xf32, #tpu.memory_space<vmem>>, vector<440x64xf32>,
    %c0_7 = arith.constant 0 : index
    %c0_8 = arith.constant 0 : index
    %c0_9 = arith.constant 0 : index
    %23 = vector.load %arg1[%c0_7, %c0_8, %c0_9] : memref<1x384x36xf32, #tpu.memory_space<vmem>>, vector<1x384x36xf32>
    %24 = vector.shape_cast %23 : vector<1x384x36xf32> to vector<384x36xf32>
    %c0_10 = arith.constant 0 : index
    %c0_11 = arith.constant 0 : index
    %25 = vector.load %arg2[%c0_10, %c0_11] : memref<36x64xf32, #tpu.memory_space<vmem>>, vector<36x64xf32>
    %cst_12 = arith.constant dense<0.000000e+00> : vector<384x64xf32>
    %26 = tpu.matmul %24, %25, %cst_12 {dimension_numbers = #tpu.dot_dimension_numbers<[1], [0], [0], [1], [0, 0, 1, 1], [], []>} : vector<384x36xf32>, vector<36x64xf32>, vector<384x64xf32> -> vector<384x64xf32>
    %cst_13 = arith.constant 0.000000e+00 : f32
    %27 = vector.broadcast %cst_13 : f32 to vector<384x64xf32>
    %28 = arith.maximumf %26, %27 : vector<384x64xf32>
    %cst_14 = arith.constant 0.000000e+00 : f32
    %29 = vector.shape_cast %18 : vector<384x1xi1> to vector<384x1xi1>
    %30 = vector.broadcast %29 : vector<384x1xi1> to vector<384x64xi1>
    %31 = vector.broadcast %cst_14 : f32 to vector<384x64xf32>
    %32 = arith.select %30, %28, %31 : vector<384x64xi1>, vector<384x64xf32>
    %c25 = arith.constant 25 : index
    %c0_15 = arith.constant 0 : index
    %33 = vector.load %arg6[%c25, %c0_15] : memref<440x64xf32, #tpu.memory_space<vmem>>, vector<384x64xf32>
    tpu.vector_store %arg6[%c25, %c0_15], %32 {strides = array<i32>} : memref<440x64xf32, #tpu.memory_space<vmem>>, vector<384x64xf32>,
    %c0_i32_16 = arith.constant 0 : i32
    %c9_i32 = arith.constant 9 : i32
    %34 = arith.addi %c0_i32_16, %c9_i32 : i32
    %c1_i32_17 = arith.constant 1 : i32
    scf.for %arg8 = %c0_i32_16 to %34 step %c1_i32_17  : i32 {
      %c2_i32 = arith.constant 2 : i32
      %59 = arith.muli %c2_i32, %arg8 : i32
      %c0_40 = arith.constant 0 : index
      %c0_41 = arith.constant 0 : index
      %60 = vector.load %arg6[%c0_40, %c0_41] : memref<440x64xf32, #tpu.memory_space<vmem>>, vector<432x64xf32>
      %c1_42 = arith.constant 1 : index
      %c0_43 = arith.constant 0 : index
      %61 = vector.load %arg6[%c1_42, %c0_43] : memref<440x64xf32, #tpu.memory_space<vmem>>, vector<432x64xf32>
      %c2_44 = arith.constant 2 : index
      %c0_45 = arith.constant 0 : index
      %62 = vector.load %arg6[%c2_44, %c0_45] : memref<440x64xf32, #tpu.memory_space<vmem>>, vector<432x64xf32>
      %63 = tpu.concatenate %60, %61, %62 in 1 : vector<432x64xf32>, vector<432x64xf32>, vector<432x64xf32> -> vector<432x192xf32>
      %64 = vector.extract_strided_slice %63 {offsets = [0, 0], sizes = [384, 192], strides = [1, 1]} : vector<432x192xf32> to vector<384x192xf32>
      %c3_i32 = arith.constant 3 : i32
      %65 = arith.muli %59, %c3_i32 : i32
      %c0_i32_46 = arith.constant 0 : i32
      %66 = arith.addi %65, %c0_i32_46 : i32
      %67 = arith.index_cast %66 : i32 to index
      %c0_47 = arith.constant 0 : index
      %c0_48 = arith.constant 0 : index
      %68 = vector.load %arg3[%67, %c0_47, %c0_48] : memref<54x192x64xf32, #tpu.memory_space<vmem>>, vector<1x192x64xf32>
      %69 = vector.shape_cast %68 : vector<1x192x64xf32> to vector<192x64xf32>
      %cst_49 = arith.constant dense<0.000000e+00> : vector<384x64xf32>
      %70 = tpu.matmul %64, %69, %cst_49 {dimension_numbers = #tpu.dot_dimension_numbers<[1], [0], [0], [1], [0, 0, 1, 1], [], []>} : vector<384x192xf32>, vector<192x64xf32>, vector<384x64xf32> -> vector<384x64xf32>
      %71 = vector.extract_strided_slice %63 {offsets = [24, 0], sizes = [384, 192], strides = [1, 1]} : vector<432x192xf32> to vector<384x192xf32>
      %c3_i32_50 = arith.constant 3 : i32
      %72 = arith.muli %59, %c3_i32_50 : i32
      %c1_i32_51 = arith.constant 1 : i32
      %73 = arith.addi %72, %c1_i32_51 : i32
      %74 = arith.index_cast %73 : i32 to index
      %c0_52 = arith.constant 0 : index
      %c0_53 = arith.constant 0 : index
      %75 = vector.load %arg3[%74, %c0_52, %c0_53] : memref<54x192x64xf32, #tpu.memory_space<vmem>>, vector<1x192x64xf32>
      %76 = vector.shape_cast %75 : vector<1x192x64xf32> to vector<192x64xf32>
      %cst_54 = arith.constant dense<0.000000e+00> : vector<384x64xf32>
      %77 = tpu.matmul %71, %76, %cst_54 {dimension_numbers = #tpu.dot_dimension_numbers<[1], [0], [0], [1], [0, 0, 1, 1], [], []>} : vector<384x192xf32>, vector<192x64xf32>, vector<384x64xf32> -> vector<384x64xf32>
      %78 = arith.addf %70, %77 : vector<384x64xf32>
      %79 = vector.extract_strided_slice %63 {offsets = [48, 0], sizes = [384, 192], strides = [1, 1]} : vector<432x192xf32> to vector<384x192xf32>
      %c3_i32_55 = arith.constant 3 : i32
      %80 = arith.muli %59, %c3_i32_55 : i32
      %c2_i32_56 = arith.constant 2 : i32
      %81 = arith.addi %80, %c2_i32_56 : i32
      %82 = arith.index_cast %81 : i32 to index
      %c0_57 = arith.constant 0 : index
      %c0_58 = arith.constant 0 : index
      %83 = vector.load %arg3[%82, %c0_57, %c0_58] : memref<54x192x64xf32, #tpu.memory_space<vmem>>, vector<1x192x64xf32>
      %84 = vector.shape_cast %83 : vector<1x192x64xf32> to vector<192x64xf32>
      %cst_59 = arith.constant dense<0.000000e+00> : vector<384x64xf32>
      %85 = tpu.matmul %79, %84, %cst_59 {dimension_numbers = #tpu.dot_dimension_numbers<[1], [0], [0], [1], [0, 0, 1, 1], [], []>} : vector<384x192xf32>, vector<192x64xf32>, vector<384x64xf32> -> vector<384x64xf32>
      %86 = arith.addf %78, %85 : vector<384x64xf32>
      %cst_60 = arith.constant 0.000000e+00 : f32
      %87 = vector.broadcast %cst_60 : f32 to vector<384x64xf32>
      %88 = arith.maximumf %86, %87 : vector<384x64xf32>
      %cst_61 = arith.constant 0.000000e+00 : f32
      %89 = vector.shape_cast %18 : vector<384x1xi1> to vector<384x1xi1>
      %90 = vector.broadcast %89 : vector<384x1xi1> to vector<384x64xi1>
      %91 = vector.broadcast %cst_61 : f32 to vector<384x64xf32>
      %92 = arith.select %90, %88, %91 : vector<384x64xi1>, vector<384x64xf32>
      %c25_62 = arith.constant 25 : index
      %c0_63 = arith.constant 0 : index
      %93 = vector.load %arg7[%c25_62, %c0_63] : memref<440x64xf32, #tpu.memory_space<vmem>>, vector<384x64xf32>
      tpu.vector_store %arg7[%c25_62, %c0_63], %92 {strides = array<i32>} : memref<440x64xf32, #tpu.memory_space<vmem>>, vector<384x64xf32>,
      %c2_i32_64 = arith.constant 2 : i32
      %94 = arith.muli %c2_i32_64, %arg8 : i32
      %c1_i32_65 = arith.constant 1 : i32
      %95 = arith.addi %94, %c1_i32_65 : i32
      %c0_66 = arith.constant 0 : index
      %c0_67 = arith.constant 0 : index
      %96 = vector.load %arg7[%c0_66, %c0_67] : memref<440x64xf32, #tpu.memory_space<vmem>>, vector<432x64xf32>
      %c1_68 = arith.constant 1 : index
      %c0_69 = arith.constant 0 : index
      %97 = vector.load %arg7[%c1_68, %c0_69] : memref<440x64xf32, #tpu.memory_space<vmem>>, vector<432x64xf32>
      %c2_70 = arith.constant 2 : index
      %c0_71 = arith.constant 0 : index
      %98 = vector.load %arg7[%c2_70, %c0_71] : memref<440x64xf32, #tpu.memory_space<vmem>>, vector<432x64xf32>
      %99 = tpu.concatenate %96, %97, %98 in 1 : vector<432x64xf32>, vector<432x64xf32>, vector<432x64xf32> -> vector<432x192xf32>
      %100 = vector.extract_strided_slice %99 {offsets = [0, 0], sizes = [384, 192], strides = [1, 1]} : vector<432x192xf32> to vector<384x192xf32>
      %c3_i32_72 = arith.constant 3 : i32
      %101 = arith.muli %95, %c3_i32_72 : i32
      %c0_i32_73 = arith.constant 0 : i32
      %102 = arith.addi %101, %c0_i32_73 : i32
      %103 = arith.index_cast %102 : i32 to index
      %c0_74 = arith.constant 0 : index
      %c0_75 = arith.constant 0 : index
      %104 = vector.load %arg3[%103, %c0_74, %c0_75] : memref<54x192x64xf32, #tpu.memory_space<vmem>>, vector<1x192x64xf32>
      %105 = vector.shape_cast %104 : vector<1x192x64xf32> to vector<192x64xf32>
      %cst_76 = arith.constant dense<0.000000e+00> : vector<384x64xf32>
      %106 = tpu.matmul %100, %105, %cst_76 {dimension_numbers = #tpu.dot_dimension_numbers<[1], [0], [0], [1], [0, 0, 1, 1], [], []>} : vector<384x192xf32>, vector<192x64xf32>, vector<384x64xf32> -> vector<384x64xf32>
      %107 = vector.extract_strided_slice %99 {offsets = [24, 0], sizes = [384, 192], strides = [1, 1]} : vector<432x192xf32> to vector<384x192xf32>
      %c3_i32_77 = arith.constant 3 : i32
      %108 = arith.muli %95, %c3_i32_77 : i32
      %c1_i32_78 = arith.constant 1 : i32
      %109 = arith.addi %108, %c1_i32_78 : i32
      %110 = arith.index_cast %109 : i32 to index
      %c0_79 = arith.constant 0 : index
      %c0_80 = arith.constant 0 : index
      %111 = vector.load %arg3[%110, %c0_79, %c0_80] : memref<54x192x64xf32, #tpu.memory_space<vmem>>, vector<1x192x64xf32>
      %112 = vector.shape_cast %111 : vector<1x192x64xf32> to vector<192x64xf32>
      %cst_81 = arith.constant dense<0.000000e+00> : vector<384x64xf32>
      %113 = tpu.matmul %107, %112, %cst_81 {dimension_numbers = #tpu.dot_dimension_numbers<[1], [0], [0], [1], [0, 0, 1, 1], [], []>} : vector<384x192xf32>, vector<192x64xf32>, vector<384x64xf32> -> vector<384x64xf32>
      %114 = arith.addf %106, %113 : vector<384x64xf32>
      %115 = vector.extract_strided_slice %99 {offsets = [48, 0], sizes = [384, 192], strides = [1, 1]} : vector<432x192xf32> to vector<384x192xf32>
      %c3_i32_82 = arith.constant 3 : i32
      %116 = arith.muli %95, %c3_i32_82 : i32
      %c2_i32_83 = arith.constant 2 : i32
      %117 = arith.addi %116, %c2_i32_83 : i32
      %118 = arith.index_cast %117 : i32 to index
      %c0_84 = arith.constant 0 : index
      %c0_85 = arith.constant 0 : index
      %119 = vector.load %arg3[%118, %c0_84, %c0_85] : memref<54x192x64xf32, #tpu.memory_space<vmem>>, vector<1x192x64xf32>
      %120 = vector.shape_cast %119 : vector<1x192x64xf32> to vector<192x64xf32>
      %cst_86 = arith.constant dense<0.000000e+00> : vector<384x64xf32>
      %121 = tpu.matmul %115, %120, %cst_86 {dimension_numbers = #tpu.dot_dimension_numbers<[1], [0], [0], [1], [0, 0, 1, 1], [], []>} : vector<384x192xf32>, vector<192x64xf32>, vector<384x64xf32> -> vector<384x64xf32>
      %122 = arith.addf %114, %121 : vector<384x64xf32>
      %cst_87 = arith.constant 0.000000e+00 : f32
      %123 = vector.broadcast %cst_87 : f32 to vector<384x64xf32>
      %124 = arith.maximumf %122, %123 : vector<384x64xf32>
      %cst_88 = arith.constant 0.000000e+00 : f32
      %125 = vector.shape_cast %18 : vector<384x1xi1> to vector<384x1xi1>
      %126 = vector.broadcast %125 : vector<384x1xi1> to vector<384x64xi1>
      %127 = vector.broadcast %cst_88 : f32 to vector<384x64xf32>
      %128 = arith.select %126, %124, %127 : vector<384x64xi1>, vector<384x64xf32>
      %c25_89 = arith.constant 25 : index
      %c0_90 = arith.constant 0 : index
      %129 = vector.load %arg6[%c25_89, %c0_90] : memref<440x64xf32, #tpu.memory_space<vmem>>, vector<384x64xf32>
      tpu.vector_store %arg6[%c25_89, %c0_90], %128 {strides = array<i32>} : memref<440x64xf32, #tpu.memory_space<vmem>>, vector<384x64xf32>,
    }
    %c9_i32_18 = arith.constant 9 : i32
    %c0_19 = arith.constant 0 : index
    %c0_20 = arith.constant 0 : index
    %35 = vector.load %arg6[%c0_19, %c0_20] : memref<440x64xf32, #tpu.memory_space<vmem>>, vector<432x64xf32>
    %c1 = arith.constant 1 : index
    %c0_21 = arith.constant 0 : index
    %36 = vector.load %arg6[%c1, %c0_21] : memref<440x64xf32, #tpu.memory_space<vmem>>, vector<432x64xf32>
    %c2 = arith.constant 2 : index
    %c0_22 = arith.constant 0 : index
    %37 = vector.load %arg6[%c2, %c0_22] : memref<440x64xf32, #tpu.memory_space<vmem>>, vector<432x64xf32>
    %38 = tpu.concatenate %35, %36, %37 in 1 : vector<432x64xf32>, vector<432x64xf32>, vector<432x64xf32> -> vector<432x192xf32>
    %39 = vector.extract_strided_slice %38 {offsets = [0, 0], sizes = [384, 192], strides = [1, 1]} : vector<432x192xf32> to vector<384x192xf32>
    %c0_23 = arith.constant 0 : index
    %c0_24 = arith.constant 0 : index
    %c0_25 = arith.constant 0 : index
    %40 = vector.load %arg4[%c0_23, %c0_24, %c0_25] : memref<3x192x4xf32, #tpu.memory_space<vmem>>, vector<1x192x4xf32>
    %41 = vector.shape_cast %40 : vector<1x192x4xf32> to vector<192x4xf32>
    %cst_26 = arith.constant dense<0.000000e+00> : vector<384x4xf32>
    %42 = tpu.matmul %39, %41, %cst_26 {dimension_numbers = #tpu.dot_dimension_numbers<[1], [0], [0], [1], [0, 0, 1, 1], [], []>} : vector<384x192xf32>, vector<192x4xf32>, vector<384x4xf32> -> vector<384x4xf32>
    %43 = vector.extract_strided_slice %38 {offsets = [24, 0], sizes = [384, 192], strides = [1, 1]} : vector<432x192xf32> to vector<384x192xf32>
    %c1_27 = arith.constant 1 : index
    %c0_28 = arith.constant 0 : index
    %c0_29 = arith.constant 0 : index
    %44 = vector.load %arg4[%c1_27, %c0_28, %c0_29] : memref<3x192x4xf32, #tpu.memory_space<vmem>>, vector<1x192x4xf32>
    %45 = vector.shape_cast %44 : vector<1x192x4xf32> to vector<192x4xf32>
    %cst_30 = arith.constant dense<0.000000e+00> : vector<384x4xf32>
    %46 = tpu.matmul %43, %45, %cst_30 {dimension_numbers = #tpu.dot_dimension_numbers<[1], [0], [0], [1], [0, 0, 1, 1], [], []>} : vector<384x192xf32>, vector<192x4xf32>, vector<384x4xf32> -> vector<384x4xf32>
    %47 = arith.addf %42, %46 : vector<384x4xf32>
    %48 = vector.extract_strided_slice %38 {offsets = [48, 0], sizes = [384, 192], strides = [1, 1]} : vector<432x192xf32> to vector<384x192xf32>
    %c2_31 = arith.constant 2 : index
    %c0_32 = arith.constant 0 : index
    %c0_33 = arith.constant 0 : index
    %49 = vector.load %arg4[%c2_31, %c0_32, %c0_33] : memref<3x192x4xf32, #tpu.memory_space<vmem>>, vector<1x192x4xf32>
    %50 = vector.shape_cast %49 : vector<1x192x4xf32> to vector<192x4xf32>
    %cst_34 = arith.constant dense<0.000000e+00> : vector<384x4xf32>
    %51 = tpu.matmul %48, %50, %cst_34 {dimension_numbers = #tpu.dot_dimension_numbers<[1], [0], [0], [1], [0, 0, 1, 1], [], []>} : vector<384x192xf32>, vector<192x4xf32>, vector<384x4xf32> -> vector<384x4xf32>
    %52 = arith.addf %47, %51 : vector<384x4xf32>
    %c0_35 = arith.constant 0 : index
    %c0_36 = arith.constant 0 : index
    %c16 = arith.constant 16 : index
    %53 = vector.load %arg1[%c0_35, %c0_36, %c16] : memref<1x384x36xf32, #tpu.memory_space<vmem>>, vector<1x384x4xf32>
    %54 = vector.shape_cast %53 : vector<1x384x4xf32> to vector<384x4xf32>
    %55 = arith.addf %52, %54 : vector<384x4xf32>
    %c0_37 = arith.constant 0 : index
    %c0_38 = arith.constant 0 : index
    %c0_39 = arith.constant 0 : index
    %56 = vector.load %arg5[%c0_37, %c0_38, %c0_39] : memref<1x384x4xf32, #tpu.memory_space<vmem>>, vector<1x384x4xf32>
    %57 = vector.shape_cast %56 : vector<1x384x4xf32> to vector<384x4xf32>
    %58 = vector.shape_cast %55 : vector<384x4xf32> to vector<1x384x4xf32>
    tpu.vector_store %arg5[%c0_37, %c0_38, %c0_39], %58 {strides = array<i32>} : memref<1x384x4xf32, #tpu.memory_space<vmem>>, vector<1x384x4xf32>,
    return
  }
  func.func @transform_0(%arg0: i32) -> (i32, i32, i32) {
    %c0_i32 = arith.constant 0 : i32
    %c0_i32_0 = arith.constant 0 : i32
    %c0_i32_1 = arith.constant 0 : i32
    return %arg0, %c0_i32, %c0_i32_0 : i32, i32, i32
  }
  func.func @transform_1(%arg0: i32) -> (i32, i32) {
    %c0_i32 = arith.constant 0 : i32
    %c0_i32_0 = arith.constant 0 : i32
    %c0_i32_1 = arith.constant 0 : i32
    return %c0_i32, %c0_i32_0 : i32, i32
  }
  func.func @transform_2(%arg0: i32) -> (i32, i32, i32) {
    %c0_i32 = arith.constant 0 : i32
    %c0_i32_0 = arith.constant 0 : i32
    %c0_i32_1 = arith.constant 0 : i32
    %c0_i32_2 = arith.constant 0 : i32
    return %c0_i32, %c0_i32_0, %c0_i32_1 : i32, i32, i32
  }
  func.func @transform_3(%arg0: i32) -> (i32, i32, i32) {
    %c0_i32 = arith.constant 0 : i32
    %c0_i32_0 = arith.constant 0 : i32
    %c0_i32_1 = arith.constant 0 : i32
    %c0_i32_2 = arith.constant 0 : i32
    return %c0_i32, %c0_i32_0, %c0_i32_1 : i32, i32, i32
  }
  func.func @transform_4(%arg0: i32) -> (i32, i32, i32) {
    %c0_i32 = arith.constant 0 : i32
    %c0_i32_0 = arith.constant 0 : i32
    %c0_i32_1 = arith.constant 0 : i32
    return %arg0, %c0_i32, %c0_i32_0 : i32, i32, i32
  }
}

</mosaic_0001>

<bundles_post_ra>
// kernel: vdsr_forward.1
= control target key start
LH: loop header
LB: loop body
LE: loop exit
PB: predicated region body
PF: predicated region fallthrough
CT: control target
= control target key end

     0   :  { %s8592_s15 = smov 0   ;;  %s14657_s0 = inlined_call_operand.vmem [shape: f32[2,384,36], index: 0, kind: input, shape index: {}]   ;;  %s14658_s1 = inlined_call_operand.vmem [shape: f32[36,64], index: 1, kind: input, shape index: {}]   ;;  %s14659_s2 = inlined_call_operand.vmem [shape: f32[54,192,64], index: 2, kind: input, shape index: {}]   ;;  %s14660_s3 = inlined_call_operand.vmem [shape: f32[3,192,4], index: 3, kind: input, shape index: {}]   ;;  %s14661_s4 = inlined_call_operand.vmem [shape: f32[2,384,4], index: 4, kind: output, shape index: {}]  }
   0x1 LB: > { %s7545_s16 = sadd.s32 4294967295, %s8556_s15   ;;  %p7549_p0 = scmp.ge.s32.totalorder %s8556_s15, 1  ;;  %s8556_s15 = sphi %s8592_s15, %s14_s15  }
   0x2   : > { %p162_p1 = scmp.lt.s32.totalorder %s8556_s15, 3 }
   0x4   : > { %p163_p2 = pnand %p7549_p0, %p162_p1 }
   0x6   : > { %166 = sbr.rel (%p163_p2) target bundleno = 2092 (0x82c), region = 36 }
   0xb   : > { %v1226_v0 = vld [vmem:[%s14658_s1 + $0x20] sm:$0xf]  ;;  %vm1372_vm0 = vcmask 1043456   ;;  %v8606_v1 = vld [vmem:[%s14658_s1 + $0x18] sm:$0xff]  ;;  %p188_p3 = scmp.lt.s32.totalorder %s7545_s16, 1  ;;  %vm14662_vm1 = vcmask 523264   ;;  %v198_v54 = vlaneseq }
   0xc   : > { %8267 = vmatprep.subr.msk.mxu0 %vm1372_vm0, %v1226_v0  ;;  %8349 = vmatprep.subr.msk.mxu1 %vm1372_vm0, %v1226_v0  ;;  %v8611_v2 = vld [vmem:[%s14658_s1 + $0x10] sm:$0xff]  ;;  %v14663_v3 = vmov 0.0   ;;  %v1223_v4 = vld [vmem:[%s14658_s1 + $0x8] sm:$0xff]  ;;  %v1222_v5 = vld [vmem:[%s14658_s1] sm:$0xff]  ;;  %vm1227_vm2 = vcmask 293888   ;;  %s10785_s8 = smov 0  }
   0xd   : > { %8268 = vmatpush3.msk.msra.mxu0 %vm1372_vm0, %v1226_v0  ;;  %8354 = vmatpush3.msk.msra.mxu1 %vm1372_vm0, %v1226_v0  ;;  %s16782_s16 = smov (!%p188_p3, %s7545_s16), 1  ;;  %1064 = vst.msk [vmem:[#allocation2] sm:$0xff] %vm14662_vm1, %v14663_v3  ;;  %1065 = vst.msk [vmem:[#allocation2 + $0x8] sm:$0xff] %vm14662_vm1, %v14663_v3  ;;  %v8956_v55 = vshrl.u32 %v198_v54, 7 }
   0xe   : > { %1066 = vst.msk [vmem:[#allocation2 + $0x10] sm:$0xff] %vm14662_vm1, %v14663_v3  ;;  %1068 = vst.msk [vmem:[#allocation2 + $0x20] sm:$0xff] %vm14662_vm1, %v14663_v3  ;;  %8269 = vmatprep.subr.mxu0 %v8606_v1  ;;  %8350 = vmatprep.subr.mxu1 %v8606_v1  ;;  %s8407_s25 = smul.u32 384, %s16782_s16 }
   0xf   : > { %1069 = vst.msk [vmem:[#allocation2 + $0x28] sm:$0xff] %vm14662_vm1, %v14663_v3  ;;  %1116 = vst.msk [vmem:[#allocation2 + $0x1a0] sm:$0xff] %vm14662_vm1, %v14663_v3  ;;  %8270 = vmatpush3.msra.mxu0 %v8606_v1  ;;  %8355 = vmatpush3.msra.mxu1 %v8606_v1  ;;  %v200_v56 = vadd.s32 8, %v8956_v55  ;;  %v224_v59 = vadd.s32 200, %v8956_v55  ;;  %v223_v60 = vadd.s32 192, %v8956_v55  ;;  %v202_v0 = vadd.s32 24, %v8956_v55 }
  0x10   : > { %1117 = vst.msk [vmem:[#allocation2 + $0x1a8] sm:$0xff] %vm14662_vm1, %v14663_v3  ;;  %1118 = vst.msk [vmem:[#allocation2 + $0x1b0] sm:$0xff] %vm14662_vm1, %v14663_v3  ;;  %8271 = vmatprep.subr.mxu0 %v8611_v2  ;;  %8351 = vmatprep.subr.mxu1 %v8611_v2  ;;  %s8853_s30 = scalar_lea.vmem %s14657_s0, %s8407_s25  ;;  %s8858_s7 = scalar_lea.vmem %s14661_s4, %s8407_s25  ;;  %v9060_v54 = vadd.s32 56, %v8956_v55 }
  0x11   : > { %1119 = vst.msk [vmem:[#allocation3] sm:$0xff] %vm14662_vm1, %v14663_v3  ;;  %1120 = vst.msk [vmem:[#allocation3 + $0x8] sm:$0xff] %vm14662_vm1, %v14663_v3  ;;  %8272 = vmatpush3.msra.mxu0 %v8611_v2  ;;  %8356 = vmatpush3.msra.mxu1 %v8611_v2  ;;  %v1174_v6 = vld [vmem:[%s8853_s30] sm:$0xff]  ;;  %v1175_v8 = vld [vmem:[%s8853_s30 + $0x8] sm:$0xff]  ;;  %v8959_v57 = vmul.u32.u64.low 2863311531, %v200_v56  ;;  %v8960_v58 = vmul.u32.u64.high 2863311531, %v200_v56, %v8959_v57 }
  0x12   : > { %1121 = vst.msk [vmem:[#allocation3 + $0x10] sm:$0xff] %vm14662_vm1, %v14663_v3  ;;  %1122 = vst.msk [vmem:[#allocation3 + $0x18] sm:$0xff] %vm14662_vm1, %v14663_v3  ;;  %8273 = vmatprep.subr.mxu0 %v1223_v4  ;;  %8352 = vmatprep.subr.mxu1 %v1223_v4  ;;  %v1198_v7 = vld [vmem:[%s8853_s30 + $0xc0] sm:$0xff]  ;;  %v1199_v9 = vld [vmem:[%s8853_s30 + $0xc8] sm:$0xff]  ;;  %v8964_v61 = vmul.u32.u64.low 2863311531, %v224_v59  ;;  %v8965_v62 = vmul.u32.u64.high 2863311531, %v224_v59, %v8964_v61 }
  0x13   : > { %1123 = vst.msk [vmem:[#allocation3 + $0x20] sm:$0xff] %vm14662_vm1, %v14663_v3  ;;  %1124 = vst.msk [vmem:[#allocation3 + $0x28] sm:$0xff] %vm14662_vm1, %v14663_v3  ;;  %8274 = vmatpush3.msra.mxu0 %v1223_v4  ;;  %8357 = vmatpush3.msra.mxu1 %v1223_v4  ;;  %v1176_v10 = vld [vmem:[%s8853_s30 + $0x10] sm:$0xff]  ;;  %v1177_v12 = vld [vmem:[%s8853_s30 + $0x18] sm:$0xff]  ;;  %v264_v63 = vshrl.u32 %v8960_v58, 4 }
  0x14   : > { %1125 = vst.msk [vmem:[#allocation3 + $0x30] sm:$0xff] %vm14662_vm1, %v14663_v3  ;;  %1126 = vst.msk [vmem:[#allocation3 + $0x38] sm:$0xff] %vm14662_vm1, %v14663_v3  ;;  %8275 = vmatprep.subr.mxu0 %v1222_v5  ;;  %8353 = vmatprep.subr.mxu1 %v1222_v5  ;;  %v1200_v11 = vld [vmem:[%s8853_s30 + $0xd0] sm:$0xff]  ;;  %v1201_v13 = vld [vmem:[%s8853_s30 + $0xd8] sm:$0xff]  ;;  %v8970_v1 = vmul.u32.u64.low 2863311531, %v8956_v55  ;;  %v8971_v2 = vmul.u32.u64.high 2863311531, %v8956_v55, %v8970_v1 }
  0x15   : > { %1127 = vst.msk [vmem:[#allocation3 + $0x40] sm:$0xff] %vm14662_vm1, %v14663_v3  ;;  %1128 = vst.msk [vmem:[#allocation3 + $0x48] sm:$0xff] %vm14662_vm1, %v14663_v3  ;;  %8276 = vmatpush3.msra.mxu0 %v1222_v5  ;;  %8358 = vmatpush3.msra.mxu1 %v1222_v5  ;;  %v1178_v14 = vld [vmem:[%s8853_s30 + $0x20] sm:$0xff]  ;;  %v1179_v16 = vld [vmem:[%s8853_s30 + $0x28] sm:$0xff]  ;;  %v8973_v4 = vmul.u32.u64.low 2863311531, %v223_v60  ;;  %v8974_v5 = vmul.u32.u64.high 2863311531, %v223_v60, %v8973_v4 }
  0x16   : > { %1129 = vst.msk [vmem:[#allocation3 + $0x50] sm:$0xff] %vm14662_vm1, %v14663_v3  ;;  %1130 = vst.msk [vmem:[#allocation3 + $0x58] sm:$0xff] %vm14662_vm1, %v14663_v3  ;;  %8277 = vmatprep.mubr.msk.f32.mxu0 %vm1227_vm2, %v1174_v6  ;;  %8313 = vmatprep.mubr.msk.f32.mxu1 %vm1227_vm2, %v1198_v7  ;;  %v1202_v15 = vld [vmem:[%s8853_s30 + $0xe0] sm:$0xff]  ;;  %v1203_v17 = vld [vmem:[%s8853_s30 + $0xe8] sm:$0xff]  ;;  %v226_v6 = vadd.s32 216, %v8956_v55  ;;  %v265_v7 = vmul.u32 24, %v264_v63 }
  0x17   : > { %1131 = vst.msk [vmem:[#allocation3 + $0x60] sm:$0xff] %vm14662_vm1, %v14663_v3  ;;  %1132 = vst.msk [vmem:[#allocation3 + $0x68] sm:$0xff] %vm14662_vm1, %v14663_v3  ;;  %8278 = vmatmul.mubr.msk.f32.vlgmr.msra.gmra.mxu0 %vm1227_vm2, %v1175_v8  ;;  %8314 = vmatmul.mubr.msk.f32.vlgmr.msra.gmra.mxu1 %vm1227_vm2, %v1199_v9  ;;  %v1180_v18 = vld [vmem:[%s8853_s30 + $0x30] sm:$0xff]  ;;  %v1181_v20 = vld [vmem:[%s8853_s30 + $0x38] sm:$0xff]  ;;  %v8977_v8 = vmul.u32.u64.low 2863311531, %v202_v0  ;;  %v8978_v9 = vmul.u32.u64.high 2863311531, %v202_v0, %v8977_v8 }
  0x18   : > { %1133 = vst.msk [vmem:[#allocation3 + $0x70] sm:$0xff] %vm14662_vm1, %v14663_v3  ;;  %1134 = vst.msk [vmem:[#allocation3 + $0x78] sm:$0xff] %vm14662_vm1, %v14663_v3  ;;  %8280 = vmatprep.mubr.msk.f32.mxu0 %vm1227_vm2, %v1176_v10  ;;  %8316 = vmatprep.mubr.msk.f32.mxu1 %vm1227_vm2, %v1200_v11  ;;  %v1204_v19 = vld [vmem:[%s8853_s30 + $0xf0] sm:$0xff]  ;;  %v1205_v21 = vld [vmem:[%s8853_s30 + $0xf8] sm:$0xff]  ;;  %v201_v10 = vadd.s32 16, %v8956_v55  ;;  %v225_v11 = vadd.s32 208, %v8956_v55 }
  0x19   : > { %1135 = vst.msk [vmem:[#allocation3 + $0x80] sm:$0xff] %vm14662_vm1, %v14663_v3  ;;  %1136 = vst.msk [vmem:[#allocation3 + $0x88] sm:$0xff] %vm14662_vm1, %v14663_v3  ;;  %v1182_v22 = vld [vmem:[%s8853_s30 + $0x40] sm:$0xff]  ;;  %v1183_v24 = vld [vmem:[%s8853_s30 + $0x48] sm:$0xff] }
  0x1a   : > { %1137 = vst.msk [vmem:[#allocation3 + $0x90] sm:$0xff] %vm14662_vm1, %v14663_v3  ;;  %1138 = vst.msk [vmem:[#allocation3 + $0x98] sm:$0xff] %vm14662_vm1, %v14663_v3  ;;  %v1206_v23 = vld [vmem:[%s8853_s30 + $0x100] sm:$0xff]  ;;  %v1207_v25 = vld [vmem:[%s8853_s30 + $0x108] sm:$0xff] }
  0x1b   : > { %1139 = vst.msk [vmem:[#allocation3 + $0xa0] sm:$0xff] %vm14662_vm1, %v14663_v3  ;;  %1140 = vst.msk [vmem:[#allocation3 + $0xa8] sm:$0xff] %vm14662_vm1, %v14663_v3  ;;  %8281 = vmatmul.mubr.msk.f32.gmra.mxu0 %vm1227_vm2, %v1177_v12  ;;  %8317 = vmatmul.mubr.msk.f32.gmra.mxu1 %vm1227_vm2, %v1201_v13  ;;  %v1184_v26 = vld [vmem:[%s8853_s30 + $0x50] sm:$0xff]  ;;  %v1185_v28 = vld [vmem:[%s8853_s30 + $0x58] sm:$0xff]  ;;  %v528_v12 = vshrl.u32 %v8965_v62, 4 }
  0x1c   : > { %1141 = vst.msk [vmem:[#allocation3 + $0xb0] sm:$0xff] %vm14662_vm1, %v14663_v3  ;;  %1142 = vst.msk [vmem:[#allocation3 + $0xb8] sm:$0xff] %vm14662_vm1, %v14663_v3  ;;  %8283 = vmatprep.mubr.msk.f32.mxu0 %vm1227_vm2, %v1178_v14  ;;  %8319 = vmatprep.mubr.msk.f32.mxu1 %vm1227_vm2, %v1202_v15  ;;  %v1208_v27 = vld [vmem:[%s8853_s30 + $0x110] sm:$0xff]  ;;  %v1209_v29 = vld [vmem:[%s8853_s30 + $0x118] sm:$0xff]  ;;  %v8983_v13 = vmul.u32.u64.low 2863311531, %v226_v6  ;;  %v8984_v14 = vmul.u32.u64.high 2863311531, %v226_v6, %v8983_v13  ;;  %v8986_v15 = vsub.s32 %v200_v56, %v265_v7 }
  0x1d   : > { %1143 = vst.msk [vmem:[#allocation3 + $0xc0] sm:$0xff] %vm14662_vm1, %v14663_v3  ;;  %1144 = vst.msk [vmem:[#allocation3 + $0xc8] sm:$0xff] %vm14662_vm1, %v14663_v3  ;;  %v1186_v30 = vld [vmem:[%s8853_s30 + $0x60] sm:$0xff]  ;;  %v1187_v32 = vld [vmem:[%s8853_s30 + $0x68] sm:$0xff] }
  0x1e   : > { %1145 = vst.msk [vmem:[#allocation3 + $0xd0] sm:$0xff] %vm14662_vm1, %v14663_v3  ;;  %1146 = vst.msk [vmem:[#allocation3 + $0xd8] sm:$0xff] %vm14662_vm1, %v14663_v3  ;;  %v1210_v31 = vld [vmem:[%s8853_s30 + $0x120] sm:$0xff]  ;;  %v1211_v33 = vld [vmem:[%s8853_s30 + $0x128] sm:$0xff]  ;;  %vm776_vm3 = vcmp.ne.s32.totalorder %v8986_v15, 0  ;;  %vm824_vm4 = vcmp.lt.s32.totalorder %v8986_v15, 0 }
  0x1f   : > { %1147 = vst.msk [vmem:[#allocation3 + $0xe0] sm:$0xff] %vm14662_vm1, %v14663_v3  ;;  %1148 = vst.msk [vmem:[#allocation3 + $0xe8] sm:$0xff] %vm14662_vm1, %v14663_v3  ;;  %8284 = vmatmul.mubr.msk.f32.gmra.mxu0 %vm1227_vm2, %v1179_v16  ;;  %8320 = vmatmul.mubr.msk.f32.gmra.mxu1 %vm1227_vm2, %v1203_v17  ;;  %v1188_v34 = vld [vmem:[%s8853_s30 + $0x70] sm:$0xff]  ;;  %v1189_v36 = vld [vmem:[%s8853_s30 + $0x78] sm:$0xff]  ;;  %v8988_v16 = vmul.u32.u64.low 2863311531, %v201_v10  ;;  %v8989_v17 = vmul.u32.u64.high 2863311531, %v201_v10, %v8988_v16 }
  0x20   : > { %1149 = vst.msk [vmem:[#allocation3 + $0xf0] sm:$0xff] %vm14662_vm1, %v14663_v3  ;;  %1150 = vst.msk [vmem:[#allocation3 + $0xf8] sm:$0xff] %vm14662_vm1, %v14663_v3  ;;  %8286 = vmatprep.mubr.msk.f32.mxu0 %vm1227_vm2, %v1180_v18  ;;  %8322 = vmatprep.mubr.msk.f32.mxu1 %vm1227_vm2, %v1204_v19  ;;  %v1212_v35 = vld [vmem:[%s8853_s30 + $0x130] sm:$0xff]  ;;  %v1213_v37 = vld [vmem:[%s8853_s30 + $0x138] sm:$0xff]  ;;  %v253_v18 = vshrl.u32 %v8971_v2, 4 }
  0x21   : > { %1151 = vst.msk [vmem:[#allocation3 + $0x100] sm:$0xff] %vm14662_vm1, %v14663_v3  ;;  %1152 = vst.msk [vmem:[#allocation3 + $0x108] sm:$0xff] %vm14662_vm1, %v14663_v3  ;;  %v1190_v38 = vld [vmem:[%s8853_s30 + $0x80] sm:$0xff]  ;;  %v1191_v40 = vld [vmem:[%s8853_s30 + $0x88] sm:$0xff]  ;;  %v9083_v2 = vmul.u32.u64.low 2863311531, %v9060_v54  ;;  %v9084_v4 = vmul.u32.u64.high 2863311531, %v9060_v54, %v9083_v2 }
  0x22   : > { %1153 = vst.msk [vmem:[#allocation3 + $0x110] sm:$0xff] %vm14662_vm1, %v14663_v3  ;;  %1154 = vst.msk [vmem:[#allocation3 + $0x118] sm:$0xff] %vm14662_vm1, %v14663_v3  ;;  %v1214_v39 = vld [vmem:[%s8853_s30 + $0x140] sm:$0xff]  ;;  %v1215_v41 = vld [vmem:[%s8853_s30 + $0x148] sm:$0xff] }
  0x23   : > { %1155 = vst.msk [vmem:[#allocation3 + $0x120] sm:$0xff] %vm14662_vm1, %v14663_v3  ;;  %1156 = vst.msk [vmem:[#allocation3 + $0x128] sm:$0xff] %vm14662_vm1, %v14663_v3  ;;  %8287 = vmatmul.mubr.msk.f32.gmra.mxu0 %vm1227_vm2, %v1181_v20  ;;  %8323 = vmatmul.mubr.msk.f32.gmra.mxu1 %vm1227_vm2, %v1205_v21  ;;  %v1192_v42 = vld [vmem:[%s8853_s30 + $0x90] sm:$0xff]  ;;  %v1193_v44 = vld [vmem:[%s8853_s30 + $0x98] sm:$0xff]  ;;  %v8992_v19 = vmul.u32.u64.low 2863311531, %v225_v11  ;;  %v8993_v20 = vmul.u32.u64.high 2863311531, %v225_v11, %v8992_v19 }
  0x24   : > { %1157 = vst.msk [vmem:[#allocation3 + $0x130] sm:$0xff] %vm14662_vm1, %v14663_v3  ;;  %1158 = vst.msk [vmem:[#allocation3 + $0x138] sm:$0xff] %vm14662_vm1, %v14663_v3  ;;  %8289 = vmatprep.mubr.msk.f32.mxu0 %vm1227_vm2, %v1182_v22  ;;  %8325 = vmatprep.mubr.msk.f32.mxu1 %vm1227_vm2, %v1206_v23  ;;  %v1216_v43 = vld [vmem:[%s8853_s30 + $0x150] sm:$0xff]  ;;  %v1217_v45 = vld [vmem:[%s8853_s30 + $0x158] sm:$0xff]  ;;  %v8996_v21 = vadd.s32 40, %v8956_v55  ;;  %v517_v22 = vshrl.u32 %v8974_v5, 4 }
  0x25   : > { %1159 = vst.msk [vmem:[#allocation3 + $0x140] sm:$0xff] %vm14662_vm1, %v14663_v3  ;;  %1160 = vst.msk [vmem:[#allocation3 + $0x148] sm:$0xff] %vm14662_vm1, %v14663_v3  ;;  %v1194_v46 = vld [vmem:[%s8853_s30 + $0xa0] sm:$0xff]  ;;  %v1195_v48 = vld [vmem:[%s8853_s30 + $0xa8] sm:$0xff]  ;;  %v9000_v23 = vadd.s32 232, %v8956_v55  ;;  %v9087_v5 = vadd.s32 48, %v8956_v55 }
  0x26   : > { %1161 = vst.msk [vmem:[#allocation3 + $0x150] sm:$0xff] %vm14662_vm1, %v14663_v3  ;;  %1162 = vst.msk [vmem:[#allocation3 + $0x158] sm:$0xff] %vm14662_vm1, %v14663_v3  ;;  %v1218_v47 = vld [vmem:[%s8853_s30 + $0x160] sm:$0xff]  ;;  %v1219_v49 = vld [vmem:[%s8853_s30 + $0x168] sm:$0xff]  ;;  %v15166_v19 = vmov 0 }
  0x27   : > { %1163 = vst.msk [vmem:[#allocation3 + $0x160] sm:$0xff] %vm14662_vm1, %v14663_v3  ;;  %1164 = vst.msk [vmem:[#allocation3 + $0x168] sm:$0xff] %vm14662_vm1, %v14663_v3  ;;  %8290 = vmatmul.mubr.msk.f32.gmra.mxu0 %vm1227_vm2, %v1183_v24  ;;  %8326 = vmatmul.mubr.msk.f32.gmra.mxu1 %vm1227_vm2, %v1207_v25  ;;  %v1196_v50 = vld [vmem:[%s8853_s30 + $0xb0] sm:$0xff]  ;;  %v1197_v52 = vld [vmem:[%s8853_s30 + $0xb8] sm:$0xff]  ;;  %v529_v24 = vmul.u32 24, %v528_v12  ;;  %v286_v25 = vshrl.u32 %v8978_v9, 4 }
  0x28   : > { %1165 = vst.msk [vmem:[#allocation3 + $0x170] sm:$0xff] %vm14662_vm1, %v14663_v3  ;;  %1166 = vst.msk [vmem:[#allocation3 + $0x178] sm:$0xff] %vm14662_vm1, %v14663_v3  ;;  %8292 = vmatprep.mubr.msk.f32.mxu0 %vm1227_vm2, %v1184_v26  ;;  %8328 = vmatprep.mubr.msk.f32.mxu1 %vm1227_vm2, %v1208_v27  ;;  %v1220_v51 = vld [vmem:[%s8853_s30 + $0x170] sm:$0xff]  ;;  %v1221_v53 = vld [vmem:[%s8853_s30 + $0x178] sm:$0xff]  ;;  %v9005_v26 = vadd.s32 32, %v8956_v55  ;;  %v254_v27 = vmul.u32 24, %v253_v18 }
  0x29   : > { %1167 = vst.msk [vmem:[#allocation3 + $0x180] sm:$0xff] %vm14662_vm1, %v14663_v3  ;;  %1168 = vst.msk [vmem:[#allocation3 + $0x188] sm:$0xff] %vm14662_vm1, %v14663_v3  ;;  %v9100_v9 = vadd.s32 240, %v8956_v55 }
  0x2a   : > { %1169 = vst.msk [vmem:[#allocation3 + $0x190] sm:$0xff] %vm14662_vm1, %v14663_v3  ;;  %1170 = vst.msk [vmem:[#allocation3 + $0x198] sm:$0xff] %vm14662_vm1, %v14663_v3 }
  0x2b   : > { %1171 = vst.msk [vmem:[#allocation3 + $0x1a0] sm:$0xff] %vm14662_vm1, %v14663_v3  ;;  %1172 = vst.msk [vmem:[#allocation3 + $0x1a8] sm:$0xff] %vm14662_vm1, %v14663_v3  ;;  %8293 = vmatmul.mubr.msk.f32.gmra.mxu0 %vm1227_vm2, %v1185_v28  ;;  %8329 = vmatmul.mubr.msk.f32.gmra.mxu1 %vm1227_vm2, %v1209_v29  ;;  %v9009_v28 = vmul.u32.u64.low 2863311531, %v8996_v21  ;;  %v9010_v29 = vmul.u32.u64.high 2863311531, %v8996_v21, %v9009_v28 }
  0x2c   : > { %1173 = vst.msk [vmem:[#allocation3 + $0x1b0] sm:$0xff] %vm14662_vm1, %v14663_v3  ;;  %1067 = vst.msk [vmem:[#allocation2 + $0x18] sm:$0xff] %vm14662_vm1, %v14663_v3  ;;  %8295 = vmatprep.mubr.msk.f32.mxu0 %vm1227_vm2, %v1186_v30  ;;  %8331 = vmatprep.mubr.msk.f32.mxu1 %vm1227_vm2, %v1210_v31  ;;  %v518_v30 = vmul.u32 24, %v517_v22  ;;  %v9142_v22 = vadd.s32 72, %v8956_v55  ;;  %v9160_v28 = vadd.s32 264, %v8956_v55 }
  0x2d   : > { %1070 = vst.msk [vmem:[#allocation2 + $0x30] sm:$0xff] %vm14662_vm1, %v14663_v3  ;;  %1071 = vst.msk [vmem:[#allocation2 + $0x38] sm:$0xff] %vm14662_vm1, %v14663_v3 }
  0x2e   : > { %1072 = vst.msk [vmem:[#allocation2 + $0x40] sm:$0xff] %vm14662_vm1, %v14663_v3  ;;  %1073 = vst.msk [vmem:[#allocation2 + $0x48] sm:$0xff] %vm14662_vm1, %v14663_v3 }
  0x2f   : > { %1074 = vst.msk [vmem:[#allocation2 + $0x50] sm:$0xff] %vm14662_vm1, %v14663_v3  ;;  %1075 = vst.msk [vmem:[#allocation2 + $0x58] sm:$0xff] %vm14662_vm1, %v14663_v3  ;;  %8296 = vmatmul.mubr.msk.f32.gmra.mxu0 %vm1227_vm2, %v1187_v32  ;;  %8332 = vmatmul.mubr.msk.f32.gmra.mxu1 %vm1227_vm2, %v1211_v33  ;;  %v9013_v31 = vmul.u32.u64.low 2863311531, %v9000_v23  ;;  %v9014_v32 = vmul.u32.u64.high 2863311531, %v9000_v23, %v9013_v31  ;;  %v9017_v33 = vadd.s32 24, %v8986_v15 }
  0x30   : > { %1076 = vst.msk [vmem:[#allocation2 + $0x60] sm:$0xff] %vm14662_vm1, %v14663_v3  ;;  %1077 = vst.msk [vmem:[#allocation2 + $0x68] sm:$0xff] %vm14662_vm1, %v14663_v3  ;;  %8298 = vmatprep.mubr.msk.f32.mxu0 %vm1227_vm2, %v1188_v34  ;;  %8334 = vmatprep.mubr.msk.f32.mxu1 %vm1227_vm2, %v1212_v35  ;;  %v9019_v34 = vsub.s32 %v224_v59, %v529_v24  ;;  %v550_v35 = vshrl.u32 %v8984_v14, 4  ;;  %v15163_v14 = vmov 0  ;;  %v15175_v31 = vmov 0 }
  0x31   : > { %1078 = vst.msk [vmem:[#allocation2 + $0x70] sm:$0xff] %vm14662_vm1, %v14663_v3  ;;  %1079 = vst.msk [vmem:[#allocation2 + $0x78] sm:$0xff] %vm14662_vm1, %v14663_v3 }
  0x32   : > { %1080 = vst.msk [vmem:[#allocation2 + $0x80] sm:$0xff] %vm14662_vm1, %v14663_v3  ;;  %1081 = vst.msk [vmem:[#allocation2 + $0x88] sm:$0xff] %vm14662_vm1, %v14663_v3  ;;  %vm800_vm6 = vcmp.ne.s32.totalorder %v9019_v34, 0  ;;  %vm848_vm7 = vcmp.lt.s32.totalorder %v9019_v34, 0 }
  0x33   : > { %1082 = vst.msk [vmem:[#allocation2 + $0x90] sm:$0xff] %vm14662_vm1, %v14663_v3  ;;  %1083 = vst.msk [vmem:[#allocation2 + $0x98] sm:$0xff] %vm14662_vm1, %v14663_v3  ;;  %8299 = vmatmul.mubr.msk.f32.gmra.mxu0 %vm1227_vm2, %v1189_v36  ;;  %8335 = vmatmul.mubr.msk.f32.gmra.mxu1 %vm1227_vm2, %v1213_v37  ;;  %v287_v37 = vmul.u32 24, %v286_v25  ;;  %v15317_v36 = vmov 0 }
  0x34   : > { %1084 = vst.msk [vmem:[#allocation2 + $0xa0] sm:$0xff] %vm14662_vm1, %v14663_v3  ;;  %1085 = vst.msk [vmem:[#allocation2 + $0xa8] sm:$0xff] %vm14662_vm1, %v14663_v3  ;;  %8301 = vmatprep.mubr.msk.f32.mxu0 %vm1227_vm2, %v1190_v38  ;;  %8337 = vmatprep.mubr.msk.f32.mxu1 %vm1227_vm2, %v1214_v39  ;;  %v275_v38 = vshrl.u32 %v8989_v17, 4  ;;  %v9125_v17 = vmul.u32.u64.low 2863311531, %v9087_v5  ;;  %v9126_v18 = vmul.u32.u64.high 2863311531, %v9087_v5, %v9125_v17 }
  0x35   : > { %1086 = vst.msk [vmem:[#allocation2 + $0xb0] sm:$0xff] %vm14662_vm1, %v14663_v3  ;;  %1087 = vst.msk [vmem:[#allocation2 + $0xb8] sm:$0xff] %vm14662_vm1, %v14663_v3 }
  0x36   : > { %1088 = vst.msk [vmem:[#allocation2 + $0xc0] sm:$0xff] %vm14662_vm1, %v14663_v3  ;;  %1089 = vst.msk [vmem:[#allocation2 + $0xc8] sm:$0xff] %vm14662_vm1, %v14663_v3  ;;  %v319_v2 = vshrl.u32 %v9126_v18, 4  ;;  %v15193_v18 = vmov 0 }
  0x37   : > { %1090 = vst.msk [vmem:[#allocation2 + $0xd0] sm:$0xff] %vm14662_vm1, %v14663_v3  ;;  %1091 = vst.msk [vmem:[#allocation2 + $0xd8] sm:$0xff] %vm14662_vm1, %v14663_v3  ;;  %8302 = vmatmul.mubr.msk.f32.gmra.mxu0 %vm1227_vm2, %v1191_v40  ;;  %8338 = vmatmul.mubr.msk.f32.gmra.mxu1 %vm1227_vm2, %v1215_v41  ;;  %v9028_v39 = vmul.u32.u64.low 2863311531, %v9005_v26  ;;  %v9029_v40 = vmul.u32.u64.high 2863311531, %v9005_v26, %v9028_v39  ;;  %v9032_v41 = vsub.s32 %v8956_v55, %v254_v27 }
  0x38   : > { %1092 = vst.msk [vmem:[#allocation2 + $0xe0] sm:$0xff] %vm14662_vm1, %v14663_v3  ;;  %1093 = vst.msk [vmem:[#allocation2 + $0xe8] sm:$0xff] %vm14662_vm1, %v14663_v3  ;;  %8304 = vmatprep.mubr.msk.f32.mxu0 %vm1227_vm2, %v1192_v42  ;;  %8340 = vmatprep.mubr.msk.f32.mxu1 %vm1227_vm2, %v1216_v43  ;;  %v539_v42 = vshrl.u32 %v8993_v20, 4  ;;  %v9035_v43 = vsub.s32 %v223_v60, %v518_v30  ;;  %v9156_v25 = vmul.u32.u64.low 2863311531, %v9100_v9  ;;  %v9157_v27 = vmul.u32.u64.high 2863311531, %v9100_v9, %v9156_v25 }
  0x39   : > { %1094 = vst.msk [vmem:[#allocation2 + $0xf0] sm:$0xff] %vm14662_vm1, %v14663_v3  ;;  %1095 = vst.msk [vmem:[#allocation2 + $0xf8] sm:$0xff] %vm14662_vm1, %v14663_v3  ;;  %vm775_vm8 = vcmp.ne.s32.totalorder %v9032_v41, 0  ;;  %vm823_vm9 = vcmp.lt.s32.totalorder %v9032_v41, 0  ;;  %v297_v61 = vshrl.u32 %v9029_v40, 4  ;;  %v9176_v30 = vadd.s32 64, %v8956_v55 }
  0x3a   : > { %1096 = vst.msk [vmem:[#allocation2 + $0x100] sm:$0xff] %vm14662_vm1, %v14663_v3  ;;  %1097 = vst.msk [vmem:[#allocation2 + $0x108] sm:$0xff] %vm14662_vm1, %v14663_v3  ;;  %vm799_vm10 = vcmp.ne.s32.totalorder %v9035_v43, 0  ;;  %vm847_vm11 = vcmp.lt.s32.totalorder %v9035_v43, 0  ;;  %v9070_v59 = vadd.s32 24, %v9035_v43 }
  0x3b   : > { %1098 = vst.msk [vmem:[#allocation2 + $0x110] sm:$0xff] %vm14662_vm1, %v14663_v3  ;;  %1099 = vst.msk [vmem:[#allocation2 + $0x118] sm:$0xff] %vm14662_vm1, %v14663_v3  ;;  %8305 = vmatmul.mubr.msk.f32.gmra.mxu0 %vm1227_vm2, %v1193_v44  ;;  %8341 = vmatmul.mubr.msk.f32.gmra.mxu1 %vm1227_vm2, %v1217_v45  ;;  %v551_v45 = vmul.u32 24, %v550_v35  ;;  %v298_v8 = vmul.u32 24, %v297_v61  ;;  %v9190_v35 = vadd.s32 256, %v8956_v55 }
  0x3c   : > { %1100 = vst.msk [vmem:[#allocation2 + $0x120] sm:$0xff] %vm14662_vm1, %v14663_v3  ;;  %1101 = vst.msk [vmem:[#allocation2 + $0x128] sm:$0xff] %vm14662_vm1, %v14663_v3  ;;  %8307 = vmatprep.mubr.msk.f32.mxu0 %vm1227_vm2, %v1194_v46  ;;  %8343 = vmatprep.mubr.msk.f32.mxu1 %vm1227_vm2, %v1218_v47  ;;  %v9043_v46 = vadd.s32 224, %v8956_v55  ;;  %v9047_v47 = vadd.s32 24, %v9019_v34 }
  0x3d   : > { %1102 = vst.msk [vmem:[#allocation2 + $0x130] sm:$0xff] %vm14662_vm1, %v14663_v3  ;;  %1103 = vst.msk [vmem:[#allocation2 + $0x138] sm:$0xff] %vm14662_vm1, %v14663_v3  ;;  %v9063_v56 = vsub.s32 %v226_v6, %v551_v45  ;;  %v9153_v24 = vsub.s32 %v9005_v26, %v298_v8  ;;  %v15181_v45 = vmov 0 }
  0x3e   : > { %1104 = vst.msk [vmem:[#allocation2 + $0x140] sm:$0xff] %vm14662_vm1, %v14663_v3  ;;  %1105 = vst.msk [vmem:[#allocation2 + $0x148] sm:$0xff] %vm14662_vm1, %v14663_v3  ;;  %v9066_v57 = vmul.u32.u64.low 2863311531, %v9043_v46  ;;  %v9067_v58 = vmul.u32.u64.high 2863311531, %v9043_v46, %v9066_v57 }
  0x3f   : > { %1106 = vst.msk [vmem:[#allocation2 + $0x150] sm:$0xff] %vm14662_vm1, %v14663_v3  ;;  %1107 = vst.msk [vmem:[#allocation2 + $0x158] sm:$0xff] %vm14662_vm1, %v14663_v3  ;;  %8308 = vmatmul.mubr.msk.f32.gmra.mxu0 %vm1227_vm2, %v1195_v48  ;;  %8344 = vmatmul.mubr.msk.f32.gmra.mxu1 %vm1227_vm2, %v1219_v49  ;;  %v9049_v48 = vsub.s32 %v202_v0, %v287_v37  ;;  %v276_v49 = vmul.u32 24, %v275_v38  ;;  %v9080_v0 = vadd.s32 248, %v8956_v55  ;;  %vm802_vm14 = vcmp.ne.s32.totalorder %v9063_v56, 0 }
  0x40   : > { %1108 = vst.msk [vmem:[#allocation2 + $0x160] sm:$0xff] %vm14662_vm1, %v14663_v3  ;;  %1109 = vst.msk [vmem:[#allocation2 + $0x168] sm:$0xff] %vm14662_vm1, %v14663_v3  ;;  %8310 = vmatprep.mubr.msk.f32.mxu0 %vm1227_vm2, %v1196_v50  ;;  %8346 = vmatprep.mubr.msk.f32.mxu1 %vm1227_vm2, %v1220_v51  ;;  %v540_v50 = vmul.u32 24, %v539_v42  ;;  %v308_v51 = vshrl.u32 %v9010_v29, 4  ;;  %vm850_vm15 = vcmp.lt.s32.totalorder %v9063_v56, 0  ;;  %v9095_v7 = vadd.s32 24, %v9063_v56 }
  0x41   : > { %1110 = vst.msk [vmem:[#allocation2 + $0x170] sm:$0xff] %vm14662_vm1, %v14663_v3  ;;  %1111 = vst.msk [vmem:[#allocation2 + $0x178] sm:$0xff] %vm14662_vm1, %v14663_v3  ;;  %vm778_vm12 = vcmp.ne.s32.totalorder %v9049_v48, 0  ;;  %v9073_v60 = vsub.s32 %v201_v10, %v276_v49  ;;  %vm826_vm13 = vcmp.lt.s32.totalorder %v9049_v48, 0  ;;  %v9090_v6 = vadd.s32 24, %v9049_v48 }
  0x42   : > { %1112 = vst.msk [vmem:[#allocation2 + $0x180] sm:$0xff] %vm14662_vm1, %v14663_v3  ;;  %1113 = vst.msk [vmem:[#allocation2 + $0x188] sm:$0xff] %vm14662_vm1, %v14663_v3  ;;  %v9077_v62 = vsub.s32 %v225_v11, %v540_v50  ;;  %v309_v63 = vmul.u32 24, %v308_v51  ;;  %v9109_v12 = vmul.u32.u64.low 2863311531, %v9080_v0  ;;  %v9110_v13 = vmul.u32.u64.high 2863311531, %v9080_v0, %v9109_v12 }
  0x43   : > { %1114 = vst.msk [vmem:[#allocation2 + $0x190] sm:$0xff] %vm14662_vm1, %v14663_v3  ;;  %1115 = vst.msk [vmem:[#allocation2 + $0x198] sm:$0xff] %vm14662_vm1, %v14663_v3  ;;  %8311 = vmatmul.mubr.msk.f32.gmra.mxu0 %vm1227_vm2, %v1197_v52  ;;  %8347 = vmatmul.mubr.msk.f32.gmra.mxu1 %vm1227_vm2, %v1221_v53  ;;  %v9055_v52 = vadd.s32 24, %v9032_v41  ;;  %v572_v53 = vshrl.u32 %v9014_v32, 4  ;;  %vm777_vm0 = vcmp.ne.s32.totalorder %v9073_v60, 0  ;;  %vm825_vm2 = vcmp.lt.s32.totalorder %v9073_v60, 0 }
  0x44   : > { %vm9022_vm5 = vmand %vm824_vm4, %vm776_vm3  ;;  %15158 = vst [vmem:[#allocation4_spill] sm:$0xff] %v9063_v56  ;;  %v9103_v10 = vadd.s32 24, %v9073_v60  ;;  %v9106_v11 = vsub.s32 %v8996_v21, %v309_v63  ;;  %vm801_vm4 = vcmp.ne.s32.totalorder %v9077_v62, 0  ;;  %v9138_v20 = vadd.s32 24, %v9077_v62 }
  0x45   : > { %15159 = vst [vmem:[#allocation5_spill] sm:$0xff] %v9073_v60  ;;  %15160 = vst [vmem:[#allocation6_spill] sm:$0xff] %v9077_v62  ;;  %v573_v1 = vmul.u32 24, %v572_v53  ;;  %v561_v21 = vshrl.u32 %v9067_v58, 4  ;;  %v15172_v29 = vmov 0  ;;  %v330_v32 = vshrl.u32 %v9084_v4, 4 }
  0x46   : > { %15161 = vst [vmem:[#allocation7_spill] sm:$0xff] %v9103_v10  ;;  %15162 = vst [vmem:[#allocation8_spill] sm:$0xff] %v9106_v11  ;;  %v9173_v26 = vadd.s32 24, %v9106_v11  ;;  %v15177_v37 = vmov 0  ;;  %v9204_v40 = vmul.u32.u64.low 2863311531, %v9142_v22  ;;  %v9205_v42 = vmul.u32.u64.high 2863311531, %v9142_v22, %v9204_v40 }
  0x47   : > { %vm9116_vm3 = vmand %vm848_vm7, %vm800_vm6  ;;  %v9122_v16 = vsub.s32 %v9000_v23, %v573_v1  ;;  %vm849_vm6 = vcmp.lt.s32.totalorder %v9077_v62, 0  ;;  %15168 = vst [vmem:[#allocation10_spill] sm:$0xff] %v9138_v20  ;;  %v15169_v23 = vmov 0  ;;  %v562_v39 = vmul.u32 24, %v561_v21 }
  0x48   : > { %v15164_v14 = vsel %vm9116_vm3, 4294967295, %v15163_v14  ;;  %vm9132_vm1 = vmand %vm823_vm9, %vm775_vm8  ;;  %15171 = vst [vmem:[#allocation11_spill] sm:$0xff] %v9153_v24  ;;  %vm780_vm9 = vcmp.ne.s32.totalorder %v9106_v11, 0  ;;  %v9218_v49 = vmul.u32.u64.low 2863311531, %v9160_v28  ;;  %v9219_v50 = vmul.u32.u64.high 2863311531, %v9160_v28, %v9218_v49 }
  0x49   : > { %15165 = vst [vmem:[#allocation9_spill] sm:$0xff] %v9122_v16  ;;  %v15167_v19 = vsel %vm9132_vm1, 4294967295, %v15166_v19  ;;  %vm9148_vm7 = vmand %vm847_vm11, %vm799_vm10  ;;  %v9201_v38 = vadd.s32 24, %v9122_v16  ;;  %v15185_v51 = vmov 0  ;;  %v9230_v53 = vadd.s32 24, %v9153_v24 }
  0x4a   : > { %v15170_v23 = vsel %vm9148_vm7, 4294967295, %v15169_v23  ;;  %vm9166_vm8 = vmand %vm826_vm13, %vm778_vm12  ;;  %15174 = vst [vmem:[#allocation12_spill] sm:$0xff] %v9173_v26  ;;  %vm804_vm12 = vcmp.ne.s32.totalorder %v9122_v16, 0  ;;  %v594_v57 = vshrl.u32 %v9110_v13, 4  ;;  %v15190_v63 = vmov 0 }
  0x4b   : > { %v15173_v29 = vsel %vm9166_vm8, 4294967295, %v15172_v29  ;;  %vm9182_vm11 = vmand %vm850_vm15, %vm802_vm14  ;;  %15180 = vst [vmem:[#allocation14_spill] sm:$0xff] %v9201_v38  ;;  %vm779_vm15 = vcmp.ne.s32.totalorder %v9153_v24, 0  ;;  %v9234_v58 = vmul.u32.u64.low 2863311531, %v9176_v30  ;;  %v9235_v61 = vmul.u32.u64.high 2863311531, %v9176_v30, %v9234_v58 }
  0x4c   : > { %v15176_v31 = vsel %vm9182_vm11, 4294967295, %v15175_v31  ;;  %vm9196_vm10 = vmand %vm825_vm2, %vm777_vm0  ;;  %vm827_vm0 = vcmp.lt.s32.totalorder %v9153_v24, 0  ;;  %vm15184_vm2 = vcmp.lt.s32.totalorder %v9106_v11, 0  ;;  %15188 = vst [vmem:[#allocation17_spill] sm:$0xff] %v9230_v53  ;;  %v331_v1 = vmul.u32 24, %v330_v32 }
  0x4d   : > { %v15178_v37 = vsel %vm9196_vm10, 4294967295, %v15177_v37  ;;  %vm9211_vm14 = vmand %vm849_vm6, %vm801_vm4  ;;  %vm15189_vm4 = vcmp.lt.s32.totalorder %v9122_v16, 0  ;;  %v9247_v4 = vmul.u32.u64.low 2863311531, %v9190_v35  ;;  %v9248_v8 = vmul.u32.u64.high 2863311531, %v9190_v35, %v9247_v4 }
  0x4e   : > { %15179 = vst [vmem:[#allocation13_spill] sm:$0xff] %v15178_v37  ;;  %v15182_v45 = vsel %vm9211_vm14, 4294967295, %v15181_v45  ;;  %vm9225_vm13 = vmand %vm15184_vm2, %vm780_vm9  ;;  %v9269_v21 = vsub.s32 %v9043_v46, %v562_v39  ;;  %v583_v49 = vshrl.u32 %v9157_v27, 4  ;;  %v9297_v4 = vadd.s32 88, %v8956_v55 }
  0x4f   : > { %15183 = vst [vmem:[#allocation15_spill] sm:$0xff] %v15182_v45  ;;  %v15186_v51 = vsel %vm9225_vm13, 4294967295, %v15185_v51  ;;  %vm9241_vm6 = vmand %vm15189_vm4, %vm804_vm12  ;;  %v9304_v3 = vsub.s32 %v9060_v54, %v331_v1  ;;  %v595_v46 = vmul.u32 24, %v594_v57  ;;  %v320_v40 = vmul.u32 24, %v319_v2 }
  0x50   : > { %15187 = vst [vmem:[#allocation16_spill] sm:$0xff] %v15186_v51  ;;  %v15191_v63 = vsel %vm9241_vm6, 4294967295, %v15190_v63  ;;  %vm9264_vm9 = vmand %vm827_vm0, %vm779_vm15  ;;  %vm803_vm12 = vcmp.ne.s32.totalorder %v9269_v21, 0  ;;  %vm851_vm15 = vcmp.lt.s32.totalorder %v9269_v21, 0  ;;  %v352_v39 = vshrl.u32 %v9205_v42, 4 }
  0x51   : > { %15192 = vst [vmem:[#allocation18_spill] sm:$0xff] %v15191_v63  ;;  %v15194_v18 = vsel %vm9264_vm9, 4294967295, %v15193_v18  ;;  %15196 = vst [vmem:[#allocation20_spill] sm:$0xff] %v9269_v21  ;;  %v9310_v58 = vadd.s32 280, %v8956_v55  ;;  %v9313_v32 = vadd.s32 24, %v9269_v21  ;;  %v584_v25 = vmul.u32 24, %v583_v49 }
  0x52   : > { %15195 = vst [vmem:[#allocation19_spill] sm:$0xff] %v15194_v18  ;;  %15197 = vst [vmem:[#allocation21_spill] sm:$0xff] %v9304_v3  ;;  %v616_v27 = vshrl.u32 %v9219_v50, 4  ;;  %v9317_v54 = vadd.s32 80, %v8956_v55  ;;  %v341_v57 = vshrl.u32 %v9235_v61, 4  ;;  %v9325_v42 = vadd.s32 272, %v8956_v55 }
  0x53   : > { %15198 = vst [vmem:[#allocation22_spill] sm:$0xff] %v9313_v32  ;;  %v9321_v1 = vmul.u32.u64.low 2863311531, %v9297_v4  ;;  %v9322_v2 = vmul.u32.u64.high 2863311531, %v9297_v4, %v9321_v1  ;;  %v9329_v17 = vsub.s32 %v9080_v0, %v595_v46  ;;  %v9332_v49 = vsub.s32 %v9087_v5, %v320_v40  ;;  %vm9381_vm2 = vmand %vm851_vm15, %vm803_vm12 }
  0x54   : > { %v605_v50 = vshrl.u32 %v9248_v8, 4  ;;  %v353_v13 = vmul.u32 24, %v352_v39  ;;  %v9336_v61 = vmul.u32.u64.low 2863311531, %v9310_v58  ;;  %v9337_v12 = vmul.u32.u64.high 2863311531, %v9310_v58, %v9336_v61 }
  0x55   : > { %15199 = vst [vmem:[#allocation23_spill] sm:$0xff] %v9329_v17  ;;  %15200 = vst [vmem:[#allocation24_spill] sm:$0xff] %v9332_v49  ;;  %v9340_v1 = vadd.s32 104, %v8956_v55  ;;  %v617_v44 = vmul.u32 24, %v616_v27  ;;  %v9344_v24 = vmul.u32.u64.low 2863311531, %v9317_v54  ;;  %v9345_v0 = vmul.u32.u64.high 2863311531, %v9317_v54, %v9344_v24 }
  0x56   : > { %v9348_v5 = vsub.s32 %v9100_v9, %v584_v25  ;;  %v342_v40 = vmul.u32 24, %v341_v57  ;;  %v9351_v8 = vmul.u32.u64.low 2863311531, %v9325_v42  ;;  %v9352_v46 = vmul.u32.u64.high 2863311531, %v9325_v42, %v9351_v8 }
  0x57   : > { %v9355_v39 = vadd.s32 24, %v9304_v3  ;;  %v606_v61 = vmul.u32 24, %v605_v50  ;;  %v9359_v27 = vadd.s32 296, %v8956_v55  ;;  %v9363_v24 = vsub.s32 %v9142_v22, %v353_v13 }
  0x58   : > { %15201 = vst [vmem:[#allocation25_spill] sm:$0xff] %v9348_v5  ;;  %v9366_v9 = vmul.u32.u64.low 2863311531, %v9340_v1  ;;  %v9367_v25 = vmul.u32.u64.high 2863311531, %v9340_v1, %v9366_v9  ;;  %v9370_v57 = vadd.s32 24, %v9329_v17  ;;  %v9375_v50 = vsub.s32 %v9160_v28, %v617_v44 }
  0x59   : > { %15202 = vst [vmem:[#allocation26_spill] sm:$0xff] %v9355_v39  ;;  %15203 = vst [vmem:[#allocation27_spill] sm:$0xff] %v9363_v24  ;;  %v15206_v22 = vmov 0  ;;  %v9388_v13 = vsub.s32 %v9176_v30, %v342_v40  ;;  %v374_v8 = vshrl.u32 %v9322_v2, 4  ;;  %vm15210_vm4 = vcmp.ne.s32.totalorder %v9304_v3, 0 }
  0x5a   : > { %15204 = vst [vmem:[#allocation28_spill] sm:$0xff] %v9370_v57  ;;  %15205 = vst [vmem:[#allocation29_spill] sm:$0xff] %v9375_v50  ;;  %v15207_v22 = vsel %vm9381_vm2, 4294967295, %v15206_v22  ;;  %vm15211_vm0 = vcmp.lt.s32.totalorder %v9304_v3, 0  ;;  %v15212_v44 = vmov 0  ;;  %v9400_v28 = vsub.s32 %v9190_v35, %v606_v61 }
  0x5b   : > { %15208 = vst [vmem:[#allocation30_spill] sm:$0xff] %v15207_v22  ;;  %15209 = vst [vmem:[#allocation31_spill] sm:$0xff] %v9388_v13  ;;  %v9403_v9 = vmul.u32.u64.low 2863311531, %v9359_v27  ;;  %v9404_v53 = vmul.u32.u64.high 2863311531, %v9359_v27, %v9403_v9  ;;  %v9407_v30 = vadd.s32 96, %v8956_v55  ;;  %vm15216_vm12 = vcmp.ne.s32.totalorder %v9329_v17, 0 }
  0x5c   : > { %vm9395_vm13 = vmand %vm15211_vm0, %vm15210_vm4  ;;  %15215 = vst [vmem:[#allocation33_spill] sm:$0xff] %v9400_v28  ;;  %vm15217_vm15 = vcmp.lt.s32.totalorder %v9329_v17, 0  ;;  %v15218_v2 = vmov 0  ;;  %v9418_v40 = vadd.s32 24, %v9332_v49  ;;  %vm784_vm0 = vcmp.ne.s32.totalorder %v9363_v24, 0 }
  0x5d   : > { %v15213_v44 = vsel %vm9395_vm13, 4294967295, %v15212_v44  ;;  %vm9413_vm6 = vmand %vm15217_vm15, %vm15216_vm12  ;;  %vm832_vm4 = vcmp.lt.s32.totalorder %v9363_v24, 0  ;;  %v638_v35 = vshrl.u32 %v9337_v12, 4  ;;  %vm15222_vm9 = vcmp.ne.s32.totalorder %v9332_v49, 0 }
  0x5e   : > { %15214 = vst [vmem:[#allocation32_spill] sm:$0xff] %v15213_v44  ;;  %v15219_v2 = vsel %vm9413_vm6, 4294967295, %v15218_v2  ;;  %15221 = vst [vmem:[#allocation35_spill] sm:$0xff] %v9418_v40  ;;  %vm15223_vm14 = vcmp.lt.s32.totalorder %v9332_v49, 0  ;;  %v15224_v61 = vmov 0  ;;  %v9432_v9 = vadd.s32 24, %v9348_v5 }
  0x5f   : > { %15220 = vst [vmem:[#allocation34_spill] sm:$0xff] %v15219_v2  ;;  %vm9427_vm10 = vmand %vm15223_vm14, %vm15222_vm9  ;;  %vm856_vm15 = vcmp.lt.s32.totalorder %v9375_v50, 0  ;;  %v363_v18 = vshrl.u32 %v9345_v0, 4  ;;  %vm15228_vm11 = vcmp.ne.s32.totalorder %v9348_v5, 0  ;;  %vm15229_vm8 = vcmp.lt.s32.totalorder %v9348_v5, 0 }
  0x60   : > { %v15225_v61 = vsel %vm9427_vm10, 4294967295, %v15224_v61  ;;  %15227 = vst [vmem:[#allocation37_spill] sm:$0xff] %v9432_v9  ;;  %vm9441_vm7 = vmand %vm15229_vm8, %vm15228_vm11  ;;  %v15230_v12 = vmov 0  ;;  %vm783_vm14 = vcmp.ne.s32.totalorder %v9388_v13, 0  ;;  %vm831_vm9 = vcmp.lt.s32.totalorder %v9388_v13, 0 }
  0x61   : > { %15226 = vst [vmem:[#allocation36_spill] sm:$0xff] %v15225_v61  ;;  %v15231_v12 = vsel %vm9441_vm7, 4294967295, %v15230_v12  ;;  %v375_v16 = vmul.u32 24, %v374_v8  ;;  %v627_v38 = vshrl.u32 %v9352_v46, 4  ;;  %vm9448_vm12 = vmand %vm832_vm4, %vm784_vm0  ;;  %v15233_v63 = vmov 0 }
  0x62   : > { %15232 = vst [vmem:[#allocation38_spill] sm:$0xff] %v15231_v12  ;;  %v15234_v63 = vsel %vm9448_vm12, 4294967295, %v15233_v63  ;;  %vm807_vm1 = vcmp.ne.s32.totalorder %v9400_v28, 0  ;;  %vm855_vm3 = vcmp.lt.s32.totalorder %v9400_v28, 0  ;;  %v9463_v8 = vadd.s32 24, %v9363_v24  ;;  %vm9477_vm0 = vmand %vm831_vm9, %vm783_vm14 }
  0x63   : > { %15235 = vst [vmem:[#allocation39_spill] sm:$0xff] %v15234_v63  ;;  %v9455_v0 = vmul.u32.u64.low 2863311531, %v9407_v30  ;;  %v9456_v11 = vmul.u32.u64.high 2863311531, %v9407_v30, %v9455_v0  ;;  %vm15237_vm8 = vcmp.ne.s32.totalorder %v9375_v50, 0  ;;  %v15238_v46 = vmov 0  ;;  %vm9493_vm4 = vmand %vm855_vm3, %vm807_vm1 }
  0x64   : > { %15236 = vst [vmem:[#allocation40_spill] sm:$0xff] %v9463_v8  ;;  %vm9467_vm11 = vmand %vm856_vm15, %vm15237_vm8  ;;  %v639_v51 = vmul.u32 24, %v638_v35  ;;  %v396_v62 = vshrl.u32 %v9367_v25, 4  ;;  %v9473_v20 = vadd.s32 24, %v9375_v50  ;;  %v15242_v0 = vmov 0 }
  0x65   : > { %v15239_v46 = vsel %vm9467_vm11, 4294967295, %v15238_v46  ;;  %v15243_v0 = vsel %vm9477_vm0, 4294967295, %v15242_v0  ;;  %v9482_v26 = vadd.s32 24, %v9388_v13  ;;  %v9485_v21 = vadd.s32 24, %v9400_v28 }
  0x66   : > { %15240 = vst [vmem:[#allocation41_spill] sm:$0xff] %v15239_v46  ;;  %15241 = vst [vmem:[#allocation42_spill] sm:$0xff] %v9473_v20  ;;  %v364_v32 = vmul.u32 24, %v363_v18  ;;  %v15247_v35 = vmov 0  ;;  %v9498_v22 = vsub.s32 %v9297_v4, %v375_v16  ;;  %v628_v45 = vmul.u32 24, %v627_v38 }
  0x67   : > { %15244 = vst [vmem:[#allocation43_spill] sm:$0xff] %v15243_v0  ;;  %15245 = vst [vmem:[#allocation44_spill] sm:$0xff] %v9482_v26  ;;  %v15248_v35 = vsel %vm9493_vm4, 4294967295, %v15247_v35  ;;  %v9501_v60 = vadd.s32 288, %v8956_v55  ;;  %v660_v38 = vshrl.u32 %v9404_v53, 4  ;;  %v9521_v2 = vsub.s32 %v9310_v58, %v639_v51 }
  0x68   : > { %15246 = vst [vmem:[#allocation45_spill] sm:$0xff] %v9485_v21  ;;  %15249 = vst [vmem:[#allocation46_spill] sm:$0xff] %v15248_v35  ;;  %v397_v18 = vmul.u32 24, %v396_v62  ;;  %v9524_v17 = vadd.s32 120, %v8956_v55  ;;  %v9539_v62 = vsub.s32 %v9317_v54, %v364_v32  ;;  %vm786_vm1 = vcmp.ne.s32.totalorder %v9498_v22, 0 }
  0x69   : > { %15250 = vst [vmem:[#allocation47_spill] sm:$0xff] %v9498_v22  ;;  %15251 = vst [vmem:[#allocation48_spill] sm:$0xff] %v9521_v2  ;;  %vm834_vm3 = vcmp.lt.s32.totalorder %v9498_v22, 0  ;;  %v9544_v58 = vsub.s32 %v9325_v42, %v628_v45  ;;  %v9547_v25 = vmul.u32.u64.low 2863311531, %v9501_v60  ;;  %v9548_v4 = vmul.u32.u64.high 2863311531, %v9501_v60, %v9547_v25 }
  0x6a   : > { %v9551_v53 = vadd.s32 24, %v9498_v22  ;;  %v661_v16 = vmul.u32 24, %v660_v38  ;;  %v385_v51 = vshrl.u32 %v9456_v11, 4  ;;  %v9555_v32 = vadd.s32 312, %v8956_v55  ;;  %vm9634_vm8 = vmand %vm834_vm3, %vm786_vm1 }
  0x6b   : > { %v9559_v54 = vsub.s32 %v9340_v1, %v397_v18  ;;  %v9562_v45 = vmul.u32.u64.low 2863311531, %v9524_v17  ;;  %v9563_v42 = vmul.u32.u64.high 2863311531, %v9524_v17, %v9562_v45  ;;  %vm858_vm14 = vcmp.lt.s32.totalorder %v9521_v2, 0 }
  0x6c   : > { %15252 = vst [vmem:[#allocation49_spill] sm:$0xff] %v9551_v53  ;;  %v9567_v25 = vadd.s32 24, %v9521_v2  ;;  %v9571_v11 = vadd.s32 112, %v8956_v55  ;;  %v9575_v38 = vadd.s32 24, %v9539_v62  ;;  %v9579_v1 = vadd.s32 304, %v8956_v55 }
  0x6d   : > { %v9582_v18 = vsub.s32 %v9359_v27, %v661_v16  ;;  %v386_v45 = vmul.u32 24, %v385_v51  ;;  %v9585_v28 = vmul.u32.u64.low 2863311531, %v9555_v32  ;;  %v9586_v21 = vmul.u32.u64.high 2863311531, %v9555_v32, %v9585_v28 }
  0x6e   : > { %15253 = vst [vmem:[#allocation50_spill] sm:$0xff] %v9567_v25  ;;  %v9590_v35 = vadd.s32 24, %v9544_v58  ;;  %v9594_v13 = vadd.s32 136, %v8956_v55  ;;  %v9598_v27 = vmul.u32.u64.low 2863311531, %v9571_v11  ;;  %v9599_v16 = vmul.u32.u64.high 2863311531, %v9571_v11, %v9598_v27 }
  0x6f   : > { %v9602_v51 = vadd.s32 328, %v8956_v55  ;;  %v9605_v28 = vmul.u32.u64.low 2863311531, %v9579_v1  ;;  %v9606_v26 = vmul.u32.u64.high 2863311531, %v9579_v1, %v9605_v28  ;;  %v9609_v0 = vadd.s32 128, %v8956_v55 }
  0x70   : > { %v9612_v50 = vadd.s32 320, %v8956_v55  ;;  %v9615_v20 = vadd.s32 24, %v9559_v54  ;;  %v9619_v27 = vsub.s32 %v9407_v30, %v386_v45  ;;  %v649_v46 = vshrl.u32 %v9548_v4, 4 }
  0x71   : > { %v418_v24 = vshrl.u32 %v9563_v42, 4  ;;  %v9624_v28 = vmul.u32.u64.low 2863311531, %v9594_v13  ;;  %v9625_v8 = vmul.u32.u64.high 2863311531, %v9594_v13, %v9624_v28  ;;  %v9628_v63 = vadd.s32 152, %v8956_v55 }
  0x72   : > { %15254 = vst [vmem:[#allocation51_spill] sm:$0xff] %v9619_v27  ;;  %v15255_v5 = vmov 0  ;;  %v9640_v30 = vmul.u32.u64.low 2863311531, %v9602_v51  ;;  %v9641_v4 = vmul.u32.u64.high 2863311531, %v9602_v51, %v9640_v30  ;;  %v9644_v42 = vadd.s32 344, %v8956_v55 }
  0x73   : > { %v15256_v5 = vsel %vm9634_vm8, 4294967295, %v15255_v5  ;;  %vm15257_vm9 = vcmp.ne.s32.totalorder %v9521_v2, 0  ;;  %v15258_v45 = vmov 0  ;;  %vm15261_vm1 = vcmp.ne.s32.totalorder %v9539_v62, 0 }
  0x74   : > { %vm9650_vm4 = vmand %vm858_vm14, %vm15257_vm9  ;;  %v9655_v28 = vmul.u32.u64.low 2863311531, %v9609_v0  ;;  %v9656_v9 = vmul.u32.u64.high 2863311531, %v9609_v0, %v9655_v28  ;;  %v9659_v12 = vmul.u32.u64.low 2863311531, %v9612_v50  ;;  %v9660_v49 = vmul.u32.u64.high 2863311531, %v9612_v50, %v9659_v12 }
  0x75   : > { %v15259_v45 = vsel %vm9650_vm4, 4294967295, %v15258_v45  ;;  %vm15262_vm3 = vcmp.lt.s32.totalorder %v9539_v62, 0  ;;  %v15263_v30 = vmov 0  ;;  %v650_v40 = vmul.u32 24, %v649_v46 }
  0x76   : > { %15260 = vst [vmem:[#allocation52_spill] sm:$0xff] %v15259_v45  ;;  %vm9666_vm15 = vmand %vm15262_vm3, %vm15261_vm1  ;;  %v682_v61 = vshrl.u32 %v9586_v21, 4  ;;  %v9673_v57 = vadd.s32 144, %v8956_v55  ;;  %vm15265_vm9 = vcmp.ne.s32.totalorder %v9544_v58, 0  ;;  %vm15266_vm0 = vcmp.lt.s32.totalorder %v9544_v58, 0 }
  0x77   : > { %v15264_v30 = vsel %vm9666_vm15, 4294967295, %v15263_v30  ;;  %vm9679_vm11 = vmand %vm15266_vm0, %vm15265_vm9  ;;  %v15267_v12 = vmov 0  ;;  %vm835_vm1 = vcmp.lt.s32.totalorder %v9619_v27, 0  ;;  %v419_v28 = vmul.u32 24, %v418_v24 }
  0x78   : > { %v15268_v12 = vsel %vm9679_vm11, 4294967295, %v15267_v12  ;;  %v9685_v3 = vmul.u32.u64.low 2863311531, %v9628_v63  ;;  %v9686_v39 = vmul.u32.u64.high 2863311531, %v9628_v63, %v9685_v3  ;;  %vm15269_vm3 = vcmp.ne.s32.totalorder %v9559_v54, 0 }
  0x79   : > { %vm15270_vm14 = vcmp.lt.s32.totalorder %v9559_v54, 0  ;;  %v15271_v21 = vmov 0  ;;  %v9697_v46 = vadd.s32 24, %v9582_v18  ;;  %v407_v44 = vshrl.u32 %v9599_v16, 4 }
  0x7a   : > { %vm9692_vm12 = vmand %vm15270_vm14, %vm15269_vm3  ;;  %v9701_v10 = vmul.u32.u64.low 2863311531, %v9644_v42  ;;  %v9702_v24 = vmul.u32.u64.high 2863311531, %v9644_v42, %v9701_v10  ;;  %vm15273_vm0 = vcmp.ne.s32.totalorder %v9582_v18, 0  ;;  %vm15274_vm14 = vcmp.lt.s32.totalorder %v9582_v18, 0 }
  0x7b   : > { %v15272_v21 = vsel %vm9692_vm12, 4294967295, %v15271_v21  ;;  %vm9716_vm9 = vmand %vm15274_vm14, %vm15273_vm0  ;;  %v15275_v16 = vmov 0  ;;  %v9721_v10 = vadd.s32 24, %v9619_v27  ;;  %v671_v56 = vshrl.u32 %v9606_v26, 4 }
  0x7c   : > { %v15276_v16 = vsel %vm9716_vm9, 4294967295, %v15275_v16  ;;  %vm15278_vm3 = vcmp.ne.s32.totalorder %v9619_v27, 0  ;;  %v15279_v3 = vmov 0  ;;  %v9733_v37 = vsub.s32 %v9501_v60, %v650_v40 }
  0x7d   : > { %15277 = vst [vmem:[#allocation53_spill] sm:$0xff] %v9721_v10  ;;  %vm9728_vm8 = vmand %vm835_vm1, %vm15278_vm3  ;;  %v683_v2 = vmul.u32 24, %v682_v61  ;;  %v9736_v25 = vmul.u32.u64.low 2863311531, %v9673_v57  ;;  %v9737_v45 = vmul.u32.u64.high 2863311531, %v9673_v57, %v9736_v25  ;;  %v9748_v53 = vsub.s32 %v9524_v17, %v419_v28 }
  0x7e   : > { %v15280_v3 = vsel %vm9728_vm8, 4294967295, %v15279_v3  ;;  %v440_v60 = vshrl.u32 %v9625_v8, 4  ;;  %v408_v25 = vmul.u32 24, %v407_v44  ;;  %v704_v26 = vshrl.u32 %v9641_v4, 4 }
  0x7f   : > { %15281 = vst [vmem:[#allocation54_spill] sm:$0xff] %v15280_v3  ;;  %15282 = vst [vmem:[#allocation55_spill] sm:$0xff] %v9748_v53  ;;  %v672_v28 = vmul.u32 24, %v671_v56  ;;  %v429_v8 = vshrl.u32 %v9656_v9, 4  ;;  %v693_v22 = vshrl.u32 %v9660_v49, 4  ;;  %v9769_v40 = vsub.s32 %v9555_v32, %v683_v2 }
  0x80   : > { %v9772_v44 = vadd.s32 336, %v8956_v55  ;;  %v9775_v4 = vadd.s32 24, %v9733_v37  ;;  %v441_v56 = vmul.u32 24, %v440_v60  ;;  %v462_v9 = vshrl.u32 %v9686_v39, 4 }
  0x81   : > { %v9781_v49 = vsub.s32 %v9571_v11, %v408_v25  ;;  %v705_v17 = vmul.u32 24, %v704_v26  ;;  %v726_v2 = vshrl.u32 %v9702_v24, 4  ;;  %v9785_v32 = vadd.s32 24, %v9748_v53 }
  0x82   : > { %v9788_v61 = vsub.s32 %v9579_v1, %v672_v28  ;;  %v430_v27 = vmul.u32 24, %v429_v8  ;;  %v694_v10 = vmul.u32 24, %v693_v22  ;;  %v451_v39 = vshrl.u32 %v9737_v45, 4 }
  0x83   : > { %15283 = vst [vmem:[#allocation56_spill] sm:$0xff] %v9781_v49  ;;  %15284 = vst [vmem:[#allocation57_spill] sm:$0xff] %v9785_v32  ;;  %v9793_v60 = vmul.u32.u64.low 2863311531, %v9772_v44  ;;  %v9794_v3 = vmul.u32.u64.high 2863311531, %v9772_v44, %v9793_v60  ;;  %v9798_v11 = vadd.s32 24, %v9769_v40  ;;  %v9801_v24 = vsub.s32 %v9594_v13, %v441_v56 }
  0x84   : > { %15285 = vst [vmem:[#allocation58_spill] sm:$0xff] %v9788_v61  ;;  %v463_v1 = vmul.u32 24, %v462_v9  ;;  %v9806_v22 = vsub.s32 %v9602_v51, %v705_v17  ;;  %v727_v45 = vmul.u32 24, %v726_v2  ;;  %vm15288_vm14 = vcmp.ne.s32.totalorder %v9733_v37, 0 }
  0x85   : > { %15286 = vst [vmem:[#allocation59_spill] sm:$0xff] %v9801_v24  ;;  %vm15289_vm8 = vcmp.lt.s32.totalorder %v9733_v37, 0  ;;  %v15290_v26 = vmov 0  ;;  %v9817_v13 = vadd.s32 24, %v9781_v49  ;;  %v9821_v25 = vsub.s32 %v9609_v0, %v430_v27 }
  0x86   : > { %15287 = vst [vmem:[#allocation60_spill] sm:$0xff] %v9806_v22  ;;  %vm9812_vm3 = vmand %vm15289_vm8, %vm15288_vm14  ;;  %v9824_v51 = vsub.s32 %v9612_v50, %v694_v10  ;;  %vm15294_vm1 = vcmp.ne.s32.totalorder %v9748_v53, 0  ;;  %vm15295_vm0 = vcmp.lt.s32.totalorder %v9748_v53, 0  ;;  %v15296_v17 = vmov 0  ;;  %v15379_v53 = vld [vmem:[#allocation6_spill] sm:$0xff] }
  0x87   : > { %v15291_v26 = vsel %vm9812_vm3, 4294967295, %v15290_v26  ;;  %15292 = vst [vmem:[#allocation61_spill] sm:$0xff] %v9821_v25  ;;  %vm9830_vm12 = vmand %vm15295_vm0, %vm15294_vm1  ;;  %v9836_v28 = vadd.s32 24, %v9788_v61  ;;  %v452_v8 = vmul.u32 24, %v451_v39  ;;  %v9839_v0 = vadd.s32 168, %v8956_v55 }
  0x88   : > { %15293 = vst [vmem:[#allocation62_spill] sm:$0xff] %v9824_v51  ;;  %v15297_v17 = vsel %vm9830_vm12, 4294967295, %v15296_v17  ;;  %vm15300_vm14 = vcmp.ne.s32.totalorder %v9769_v40, 0  ;;  %vm15301_vm9 = vcmp.lt.s32.totalorder %v9769_v40, 0  ;;  %v15302_v50 = vmov 0 }
  0x89   : > { %15298 = vst [vmem:[#allocation63_spill] sm:$0xff] %v15297_v17  ;;  %15299 = vst [vmem:[#allocation64_spill] sm:$0xff] %v9836_v28  ;;  %v9852_v27 = vadd.s32 24, %v9801_v24  ;;  %v9855_v10 = vsub.s32 %v9628_v63, %v463_v1  ;;  %v15306_v56 = vsel %vm9022_vm5, %v9017_v33, %v8986_v15  ;;  %v15307_v9 = vmov 0 }
  0x8a   : > { %vm9845_vm11 = vmand %vm15301_vm9, %vm15300_vm14  ;;  %vm9862_vm8 = vcmp.lt.s32.totalorder %v15306_v56, 16  ;;  %vm15310_vm9 = vnez %v15164_v14  ;;  %v15312_v39 = vmov 0  ;;  %vm15315_vm0 = vcmp.ne.s32.totalorder %v9781_v49, 0 }
  0x8b   : > { %v15303_v50 = vsel %vm9845_vm11, 4294967295, %v15302_v50  ;;  %15304 = vst [vmem:[#allocation65_spill] sm:$0xff] %v9852_v27  ;;  %15305 = vst [vmem:[#allocation66_spill] sm:$0xff] %v9855_v10  ;;  %v15308_v9 = vsel %vm9862_vm8, 4294967295, %v15307_v9  ;;  %v15311_v2 = vsel %vm15310_vm9, %v9047_v47, %v9019_v34  ;;  %vm15316_vm1 = vcmp.lt.s32.totalorder %v9781_v49, 0  ;;  %v15395_v49 = vld [vmem:[#allocation12_spill] sm:$0xff] }
  0x8c   : > { %15309 = vst [vmem:[#allocation67_spill] sm:$0xff] %v15308_v9  ;;  %vm9871_vm14 = vcmp.lt.s32.totalorder %v15311_v2, 16  ;;  %vm9879_vm15 = vmand %vm15316_vm1, %vm15315_vm0  ;;  %vm864_vm4 = vcmp.lt.s32.totalorder %v9806_v22, 0  ;;  %v9886_v15 = vsub.s32 %v9644_v42, %v727_v45  ;;  %v9889_v33 = vadd.s32 360, %v8956_v55  ;;  %v15352_v45 = vld [vmem:[#allocation4_spill] sm:$0xff]  ;;  %v15404_v27 = vld [vmem:[#allocation9_spill] sm:$0xff] }
  0x8d   : > { %v15313_v39 = vsel %vm9871_vm14, 4294967295, %v15312_v39  ;;  %v15318_v36 = vsel %vm9879_vm15, 4294967295, %v15317_v36  ;;  %vm15320_vm9 = vcmp.ne.s32.totalorder %v9788_v61, 0  ;;  %vm15321_vm7 = vcmp.lt.s32.totalorder %v9788_v61, 0 }
  0x8e   : > { %15314 = vst [vmem:[#allocation68_spill] sm:$0xff] %v15313_v39  ;;  %15319 = vst [vmem:[#allocation69_spill] sm:$0xff] %v9886_v15  ;;  %v15322_v34 = vmov 0  ;;  %vm15325_vm13 = vnez %v15167_v19  ;;  %v15327_v14 = vmov 0  ;;  %v15332_v42 = vmov 0 }
  0x8f   : > { %vm9895_vm10 = vmand %vm15321_vm7, %vm15320_vm9  ;;  %v15326_v47 = vsel %vm15325_vm13, %v9055_v52, %v9032_v41  ;;  %vm15330_vm7 = vnez %v15170_v23  ;;  %vm15335_vm6 = vcmp.ne.s32.totalorder %v9801_v24, 0  ;;  %vm15336_vm5 = vcmp.lt.s32.totalorder %v9801_v24, 0  ;;  %v15403_v24 = vld [vmem:[#allocation14_spill] sm:$0xff] }
  0x90   : > { %v15323_v34 = vsel %vm9895_vm10, 4294967295, %v15322_v34  ;;  %vm9908_vm14 = vcmp.lt.s32.totalorder %v15326_v47, 16  ;;  %v15331_v63 = vsel %vm15330_vm7, %v9070_v59, %v9035_v43  ;;  %vm9925_vm0 = vmand %vm15336_vm5, %vm15335_vm6  ;;  %v15337_v19 = vmov 0 }
  0x91   : > { %15324 = vst [vmem:[#allocation70_spill] sm:$0xff] %v15323_v34  ;;  %v15328_v14 = vsel %vm9908_vm14, 4294967295, %v15327_v14  ;;  %vm9917_vm9 = vcmp.lt.s32.totalorder %v15331_v63, 16  ;;  %v15338_v19 = vsel %vm9925_vm0, 4294967295, %v15337_v19  ;;  %v9930_v41 = vsub.s32 %v9673_v57, %v452_v8  ;;  %v15396_v34 = vld [vmem:[#allocation8_spill] sm:$0xff] }
  0x92   : > { %15329 = vst [vmem:[#allocation71_spill] sm:$0xff] %v15328_v14  ;;  %v15333_v42 = vsel %vm9917_vm9, 4294967295, %v15332_v42  ;;  %15339 = vst [vmem:[#allocation73_spill] sm:$0xff] %v15338_v19  ;;  %v715_v52 = vshrl.u32 %v9794_v3, 4  ;;  %v9934_v23 = vmul.u32.u64.low 2863311531, %v9839_v0  ;;  %v9935_v43 = vmul.u32.u64.high 2863311531, %v9839_v0, %v9934_v23 }
  0x93   : > { %15334 = vst [vmem:[#allocation72_spill] sm:$0xff] %v15333_v42  ;;  %15340 = vst [vmem:[#allocation74_spill] sm:$0xff] %v9930_v41  ;;  %vm15341_vm13 = vcmp.ne.s32.totalorder %v9806_v22, 0  ;;  %v15342_v59 = vmov 0  ;;  %v9944_v60 = vadd.s32 24, %v9806_v22  ;;  %v9947_v1 = vadd.s32 24, %v9821_v25 }
  0x94   : > { %vm9939_vm7 = vmand %vm864_vm4, %vm15341_vm13  ;;  %vm842_vm5 = vcmp.lt.s32.totalorder %v9855_v10, 0  ;;  %vm15346_vm1 = vnez %v15173_v29  ;;  %v15348_v3 = vmov 0  ;;  %vm15351_vm4 = vnez %v15176_v31  ;;  %v15368_v23 = vld [vmem:[#allocation13_spill] sm:$0xff]  ;;  %v15376_v31 = vld [vmem:[#allocation15_spill] sm:$0xff] }
  0x95   : > { %v15343_v59 = vsel %vm9939_vm7, 4294967295, %v15342_v59  ;;  %15344 = vst [vmem:[#allocation75_spill] sm:$0xff] %v9944_v60  ;;  %15345 = vst [vmem:[#allocation76_spill] sm:$0xff] %v9947_v1  ;;  %v15347_v57 = vsel %vm15346_vm1, %v9090_v6, %v9049_v48  ;;  %v15353_v8 = vsel %vm15351_vm4, %v9095_v7, %v15352_v45  ;;  %v15354_v56 = vmov 0  ;;  %v15371_v45 = vld [vmem:[#allocation5_spill] sm:$0xff]  ;;  %v15378_v7 = vld [vmem:[#allocation10_spill] sm:$0xff] }
  0x96   : > { %vm9956_vm9 = vcmp.lt.s32.totalorder %v15347_v57, 16  ;;  %vm9965_vm13 = vcmp.lt.s32.totalorder %v15353_v8, 16  ;;  %vm15357_vm6 = vcmp.ne.s32.totalorder %v9821_v25, 0  ;;  %vm15358_vm14 = vcmp.lt.s32.totalorder %v9821_v25, 0  ;;  %v15370_v57 = vld [vmem:[#allocation7_spill] sm:$0xff] }
  0x97   : > { %v15349_v3 = vsel %vm9956_vm9, 4294967295, %v15348_v3  ;;  %v15355_v56 = vsel %vm9965_vm13, 4294967295, %v15354_v56  ;;  %vm9973_vm8 = vmand %vm15358_vm14, %vm15357_vm6  ;;  %v15359_v29 = vmov 0  ;;  %vm15362_vm14 = vcmp.ne.s32.totalorder %v9824_v51, 0  ;;  %v15418_v1 = vld [vmem:[#allocation11_spill] sm:$0xff] }
  0x98   : > { %15350 = vst [vmem:[#allocation77_spill] sm:$0xff] %v15349_v3  ;;  %15356 = vst [vmem:[#allocation4_spill] sm:$0xff] %v15355_v56  ;;  %v15360_v29 = vsel %vm9973_vm8, 4294967295, %v15359_v29  ;;  %v9980_v48 = vmul.u32.u64.low 2863311531, %v9889_v33  ;;  %v9981_v6 = vmul.u32.u64.high 2863311531, %v9889_v33, %v9980_v48  ;;  %vm15363_vm6 = vcmp.lt.s32.totalorder %v9824_v51, 0 }
  0x99   : > { %15361 = vst [vmem:[#allocation78_spill] sm:$0xff] %v15360_v29  ;;  %vm9995_vm4 = vmand %vm15363_vm6, %vm15362_vm14  ;;  %v15364_v2 = vmov 0  ;;  %v10000_v47 = vadd.s32 24, %v9824_v51  ;;  %v10003_v63 = vadd.s32 24, %v9855_v10  ;;  %vm15369_vm9 = vnez %v15368_v23 }
  0x9a   : > { %v15365_v2 = vsel %vm9995_vm4, 4294967295, %v15364_v2  ;;  %v15372_v8 = vsel %vm15369_vm9, %v15370_v57, %v15371_v45  ;;  %v15373_v48 = vmov 0  ;;  %vm15377_vm14 = vnez %v15376_v31 }
  0x9b   : > { %15366 = vst [vmem:[#allocation79_spill] sm:$0xff] %v15365_v2  ;;  %15367 = vst [vmem:[#allocation80_spill] sm:$0xff] %v10000_v47  ;;  %vm10010_vm1 = vcmp.lt.s32.totalorder %v15372_v8, 16  ;;  %v15380_v32 = vsel %vm15377_vm14, %v15378_v7, %v15379_v53  ;;  %v15381_v17 = vmov 0  ;;  %vm15384_vm12 = vcmp.ne.s32.totalorder %v9855_v10, 0  ;;  %v15393_v53 = vld [vmem:[#allocation16_spill] sm:$0xff] }
  0x9c   : > { %v15374_v48 = vsel %vm10010_vm1, 4294967295, %v15373_v48  ;;  %vm10019_vm6 = vcmp.lt.s32.totalorder %v15380_v32, 16  ;;  %vm10025_vm3 = vmand %vm842_vm5, %vm15384_vm12  ;;  %v15385_v23 = vmov 0  ;;  %v10030_v57 = vadd.s32 24, %v9886_v15  ;;  %v15424_v47 = vld [vmem:[#allocation22_spill] sm:$0xff]  ;;  %v15425_v2 = vld [vmem:[#allocation20_spill] sm:$0xff] }
  0x9d   : > { %15375 = vst [vmem:[#allocation13_spill] sm:$0xff] %v15374_v48  ;;  %v15382_v17 = vsel %vm10019_vm6, 4294967295, %v15381_v17  ;;  %v15386_v23 = vsel %vm10025_vm3, 4294967295, %v15385_v23  ;;  %v716_v31 = vmul.u32 24, %v715_v52  ;;  %vm15388_vm12 = vcmp.ne.s32.totalorder %v9886_v15, 0  ;;  %v15401_v52 = vld [vmem:[#allocation18_spill] sm:$0xff] }
  0x9e   : > { %15383 = vst [vmem:[#allocation7_spill] sm:$0xff] %v15382_v17  ;;  %15387 = vst [vmem:[#allocation5_spill] sm:$0xff] %v10030_v57  ;;  %vm15389_vm5 = vcmp.lt.s32.totalorder %v9886_v15, 0  ;;  %v15390_v45 = vmov 0  ;;  %vm15394_vm1 = vnez %v15393_v53  ;;  %v15398_v61 = vmov 0 }
  0x9f   : > { %vm10054_vm14 = vmand %vm15389_vm5, %vm15388_vm12  ;;  %v15397_v7 = vsel %vm15394_vm1, %v15395_v49, %v15396_v34  ;;  %vm15402_vm0 = vnez %v15401_v52  ;;  %v15406_v28 = vmov 0  ;;  %v10085_v34 = vadd.s32 24, %v9930_v41 }
  0xa0   : > { %v15391_v45 = vsel %vm10054_vm14, 4294967295, %v15390_v45  ;;  %vm10063_vm9 = vcmp.lt.s32.totalorder %v15397_v7, 16  ;;  %v15405_v19 = vsel %vm15402_vm0, %v15403_v24, %v15404_v27  ;;  %v10088_v7 = vadd.s32 160, %v8956_v55 }
  0xa1   : > { %15392 = vst [vmem:[#allocation15_spill] sm:$0xff] %v15391_v45  ;;  %v15399_v61 = vsel %vm10063_vm9, 4294967295, %v15398_v61  ;;  %vm10072_vm12 = vcmp.lt.s32.totalorder %v15405_v19, 16  ;;  %15409 = vst [vmem:[#allocation16_spill] sm:$0xff] %v10085_v34  ;;  %vm15410_vm0 = vcmp.ne.s32.totalorder %v9930_v41, 0  ;;  %vm15411_vm1 = vcmp.lt.s32.totalorder %v9930_v41, 0 }
  0xa2   : > { %15400 = vst [vmem:[#allocation10_spill] sm:$0xff] %v15399_v61  ;;  %v15407_v28 = vsel %vm10072_vm12, 4294967295, %v15406_v28  ;;  %vm10098_vm5 = vmand %vm15411_vm1, %vm15410_vm0  ;;  %v15412_v52 = vmov 0  ;;  %v10103_v49 = vadd.s32 352, %v8956_v55  ;;  %v15420_v19 = vmov 0 }
  0xa3   : > { %15408 = vst [vmem:[#allocation6_spill] sm:$0xff] %v15407_v28  ;;  %v15413_v52 = vsel %vm10098_vm5, 4294967295, %v15412_v52  ;;  %v15426_v22 = vsel %vm9381_vm2, %v15424_v47, %v15425_v2  ;;  %v15427_v60 = vmov 0  ;;  %v484_v51 = vshrl.u32 %v9935_v43, 4 }
  0xa4   : > { %15414 = vst [vmem:[#allocation12_spill] sm:$0xff] %v15413_v52  ;;  %vm10119_vm0 = vcmp.lt.s32.totalorder %v15426_v22, 16  ;;  %vm15430_vm2 = vnez %v15308_v9  ;;  %vm15432_vm1 = vcmask 523264   ;;  %v15439_v43 = vmov 0  ;;  %v15456_v9 = vld [vmem:[#allocation24_spill] sm:$0xff]  ;;  %v15494_v52 = vld [vmem:[#allocation31_spill] sm:$0xff] }
  0xa5   : > { %v15428_v60 = vsel %vm10119_vm0, 4294967295, %v15427_v60  ;;  %vm15433_vm3 = vmmov %vm15432_vm1  ;;  %v15477_v34 = vmov 0  ;;  %v10225_v56 = vadd.s32 376, %v8956_v55  ;;  %v15496_v10 = vmov 0 }
  0xa6   : > { %15429 = vst [vmem:[#allocation18_spill] sm:$0xff] %v15428_v60  ;;  %vm15471_vm15 = vmmov %vm15432_vm1 }
  0xd7   : > { %v8279_v8 = vpop.f32.mrf.mxu0  ;;  %v8315_v32 = vpop.f32.mrf.mxu1 }
  0xd8   : > { %v1682_v24 = vmax.f32 %v8279_v8, 0.0  ;;  %v1706_v27 = vmax.f32 %v8315_v32, 0.0  ;;  %v15415_v8 = vld [vmem:[#allocation19_spill] sm:$0xff]  ;;  %v15417_v32 = vld [vmem:[#allocation17_spill] sm:$0xff] }
  0xd9   : > { %v1442_v53 = vpop.f32.mrf.mxu0  ;;  %v1562_v25 = vpop.f32.mrf.mxu1  ;;  %vm15416_vm8 = vnez %v15415_v8 }
  0xda   : > { %v15419_v29 = vsel %vm15416_vm8, %v15417_v32, %v15418_v1  ;;  %v1826_v22 = vsel %vm15430_vm2, %v1682_v24, 0.0  ;;  %vm15431_vm8 = vnez %v15313_v39  ;;  %v1681_v47 = vmax.f32 %v1442_v53, 0.0  ;;  %v15434_v1 = vld [vmem:[#allocation32_spill] sm:$0xff]  ;;  %v15442_v24 = vld [vmem:[#allocation34_spill] sm:$0xff]  ;;  %v15445_v53 = vld [vmem:[#allocation23_spill] sm:$0xff] }
  0xdb   : > { %vm10110_vm7 = vcmp.lt.s32.totalorder %v15419_v29, 16  ;;  %v10132_v29 = vsub.s32 %v9772_v44, %v716_v31  ;;  %v1850_v2 = vsel %vm15431_vm8, %v1706_v27, 0.0  ;;  %v1705_v32 = vmax.f32 %v1562_v25, 0.0  ;;  %1874 = vst.msk [vmem:[#allocation2 + $0x21] sm:$0xff] %vm15432_vm1, %v1826_v22  ;;  %v8282_v8 = vpop.f32.mrf.mxu0  ;;  %v8318_v45 = vpop.f32.mrf.mxu1  ;;  %v15436_v44 = vld [vmem:[#allocation26_spill] sm:$0xff]  ;;  %v15437_v31 = vld [vmem:[#allocation21_spill] sm:$0xff] }
  0xdc   : > { %v15421_v19 = vsel %vm10110_vm7, 4294967295, %v15420_v19  ;;  %1898 = vst.msk [vmem:[#allocation2 + $0xe1] sm:$0xff] %vm15433_vm3, %v1850_v2  ;;  %vm15435_vm14 = vnez %v15434_v1  ;;  %vm15443_vm2 = vnez %v15442_v24  ;;  %v15444_v27 = vld [vmem:[#allocation28_spill] sm:$0xff]  ;;  %v15447_v22 = vmov 0 }
  0xdd   : > { %15422 = vst [vmem:[#allocation8_spill] sm:$0xff] %v15421_v19  ;;  %v15438_v15 = vsel %vm15435_vm14, %v15436_v44, %v15437_v31  ;;  %v15446_v25 = vsel %vm15443_vm2, %v15444_v27, %v15445_v53  ;;  %v748_v2 = vshrl.u32 %v9981_v6, 4  ;;  %vm15450_vm3 = vnez %v15328_v14  ;;  %vm15452_vm2 = vmmov %vm15432_vm1  ;;  %v1572_v1 = vpop.f32.mrf.mxu1  ;;  %v15453_v39 = vld [vmem:[#allocation36_spill] sm:$0xff]  ;;  %v15455_v6 = vld [vmem:[#allocation35_spill] sm:$0xff] }
  0xde   : > { %vm10146_vm4 = vcmp.lt.s32.totalorder %v15438_v15, 16  ;;  %vm10155_vm8 = vcmp.lt.s32.totalorder %v15446_v25, 16  ;;  %v10165_v15 = vmul.u32.u64.low 2863311531, %v10088_v7  ;;  %v10166_v44 = vmul.u32.u64.high 2863311531, %v10088_v7, %v10165_v15  ;;  %v1452_v25 = vpop.f32.mrf.mxu0 }
  0xdf   : > { %v15440_v43 = vsel %vm10146_vm4, 4294967295, %v15439_v43  ;;  %v15448_v22 = vsel %vm10155_vm8, 4294967295, %v15447_v22  ;;  %v1825_v31 = vsel %vm15450_vm3, %v1681_v47, 0.0  ;;  %vm15451_vm14 = vnez %v15333_v42  ;;  %v15461_v47 = vld [vmem:[#allocation38_spill] sm:$0xff]  ;;  %v15475_v42 = vld [vmem:[#allocation27_spill] sm:$0xff] }
  0xe0   : > { %15441 = vst [vmem:[#allocation14_spill] sm:$0xff] %v15440_v43  ;;  %15449 = vst [vmem:[#allocation9_spill] sm:$0xff] %v15448_v22  ;;  %v1849_v24 = vsel %vm15451_vm14, %v1705_v32, 0.0  ;;  %v1684_v27 = vmax.f32 %v8282_v8, 0.0  ;;  %v1708_v53 = vmax.f32 %v8318_v45, 0.0  ;;  %vm15454_vm5 = vnez %v15453_v39  ;;  %v15463_v32 = vld [vmem:[#allocation37_spill] sm:$0xff] }
  0xe1   : > { %1873 = vst.msk [vmem:[#allocation2 + $0x19] sm:$0xff] %vm15432_vm1, %v1825_v31  ;;  %v15457_v41 = vsel %vm15454_vm5, %v15455_v6, %v15456_v9  ;;  %v15458_v15 = vmov 0  ;;  %vm15462_vm3 = vnez %v15461_v47  ;;  %v15464_v8 = vld [vmem:[#allocation25_spill] sm:$0xff]  ;;  %v15466_v31 = vmov 0 }
  0xe2   : > { %1897 = vst.msk [vmem:[#allocation2 + $0xd9] sm:$0xff] %vm15452_vm2, %v1849_v24  ;;  %vm10179_vm10 = vcmp.lt.s32.totalorder %v15457_v41, 16  ;;  %v15465_v45 = vsel %vm15462_vm3, %v15463_v32, %v15464_v8  ;;  %v485_v39 = vmul.u32 24, %v484_v51  ;;  %v10195_v9 = vadd.s32 184, %v8956_v55  ;;  %vm15470_vm3 = vmmov %vm15432_vm1  ;;  %v8285_v32 = vpop.f32.mrf.mxu0  ;;  %v8321_v8 = vpop.f32.mrf.mxu1  ;;  %v15474_v51 = vld [vmem:[#allocation40_spill] sm:$0xff] }
  0xe3   : > { %v15459_v15 = vsel %vm10179_vm10, 4294967295, %v15458_v15  ;;  %vm10188_vm14 = vcmp.lt.s32.totalorder %v15465_v45, 16  ;;  %vm15469_vm5 = vnez %v15349_v3  ;;  %v1852_v24 = vsel %vm9965_vm13, %v1708_v53, 0.0  ;;  %v15472_v45 = vld [vmem:[#allocation39_spill] sm:$0xff]  ;;  %v15482_v53 = vld [vmem:[#allocation42_spill] sm:$0xff]  ;;  %v15493_v3 = vld [vmem:[#allocation44_spill] sm:$0xff] }
  0xe4   : > { %15460 = vst [vmem:[#allocation19_spill] sm:$0xff] %v15459_v15  ;;  %v15467_v31 = vsel %vm10188_vm14, 4294967295, %v15466_v31  ;;  %v1828_v41 = vsel %vm15469_vm5, %v1684_v27, 0.0  ;;  %v1683_v6 = vmax.f32 %v1452_v25, 0.0  ;;  %v1707_v47 = vmax.f32 %v1572_v1, 0.0  ;;  %1900 = vst.msk [vmem:[#allocation2 + $0xf1] sm:$0xff] %vm15471_vm15, %v1852_v24 }
  0xe5   : > { %15468 = vst [vmem:[#allocation17_spill] sm:$0xff] %v15467_v31  ;;  %1876 = vst.msk [vmem:[#allocation2 + $0x31] sm:$0xff] %vm15470_vm3, %v1828_v41  ;;  %vm15473_vm2 = vnez %v15472_v45  ;;  %v15480_v27 = vld [vmem:[#allocation41_spill] sm:$0xff]  ;;  %v15485_v41 = vmov 0  ;;  %v10222_v24 = vadd.s32 24, %v10132_v29  ;;  %v749_v45 = vmul.u32 24, %v748_v2  ;;  %v1582_v2 = vpop.f32.mrf.mxu1 }
  0xe6   : > { %v15476_v14 = vsel %vm15473_vm2, %v15474_v51, %v15475_v42  ;;  %vm15481_vm5 = vnez %v15480_v27  ;;  %v15483_v25 = vld [vmem:[#allocation29_spill] sm:$0xff]  ;;  %vm15488_vm15 = vnez %v15374_v48  ;;  %v1851_v51 = vsel %vm10019_vm6, %v1707_v47, 0.0  ;;  %vm15489_vm2 = vmmov %vm15470_vm3 }
  0xe7   : > { %vm10208_vm1 = vcmp.lt.s32.totalorder %v15476_v14, 16  ;;  %v15484_v1 = vsel %vm15481_vm5, %v15482_v53, %v15483_v25  ;;  %v10228_v14 = vadd.s32 176, %v8956_v55  ;;  %v1827_v42 = vsel %vm15488_vm15, %v1683_v6, 0.0  ;;  %vm15490_vm3 = vmmov %vm15489_vm2  ;;  %v1462_v25 = vpop.f32.mrf.mxu0  ;;  %v15499_v6 = vld [vmem:[#allocation46_spill] sm:$0xff]  ;;  %v15501_v47 = vld [vmem:[#allocation45_spill] sm:$0xff] }
  0xe8   : > { %v15478_v34 = vsel %vm10208_vm1, 4294967295, %v15477_v34  ;;  %vm10217_vm13 = vcmp.lt.s32.totalorder %v15484_v1, 16  ;;  %v1686_v27 = vmax.f32 %v8285_v32, 0.0  ;;  %v1710_v53 = vmax.f32 %v8321_v8, 0.0  ;;  %1875 = vst.msk [vmem:[#allocation2 + $0x29] sm:$0xff] %vm15489_vm2, %v1827_v42  ;;  %v15491_v1 = vld [vmem:[#allocation43_spill] sm:$0xff] }
  0xe9   : > { %15479 = vst [vmem:[#allocation11_spill] sm:$0xff] %v15478_v34  ;;  %v15486_v41 = vsel %vm10217_vm13, 4294967295, %v15485_v41  ;;  %1899 = vst.msk [vmem:[#allocation2 + $0xe9] sm:$0xff] %vm15490_vm3, %v1851_v51  ;;  %vm15492_vm5 = vnez %v15491_v1  ;;  %vm15500_vm15 = vnez %v15499_v6  ;;  %v15502_v32 = vld [vmem:[#allocation33_spill] sm:$0xff]  ;;  %v15504_v42 = vmov 0 }
  0xea   : > { %15487 = vst [vmem:[#allocation30_spill] sm:$0xff] %v15486_v41  ;;  %v15495_v57 = vsel %vm15492_vm5, %v15493_v3, %v15494_v52  ;;  %v15503_v8 = vsel %vm15500_vm15, %v15501_v47, %v15502_v32  ;;  %v10255_v51 = vsub.s32 %v9839_v0, %v485_v39  ;;  %v10262_v3 = vadd.s32 368, %v8956_v55  ;;  %vm15507_vm3 = vmmov %vm15489_vm2  ;;  %v8288_v0 = vpop.f32.mrf.mxu0  ;;  %v8324_v39 = vpop.f32.mrf.mxu1  ;;  %v15509_v32 = vld [vmem:[#allocation49_spill] sm:$0xff] }
  0xeb   : > { %vm10241_vm11 = vcmp.lt.s32.totalorder %v15495_v57, 16  ;;  %vm10250_vm6 = vcmp.lt.s32.totalorder %v15503_v8, 16  ;;  %v10258_v1 = vmul.u32.u64.low 2863311531, %v10103_v49  ;;  %v10259_v17 = vmul.u32.u64.high 2863311531, %v10103_v49, %v10258_v1  ;;  %v15510_v8 = vld [vmem:[#allocation47_spill] sm:$0xff] }
  0xec   : > { %v15497_v10 = vsel %vm10241_vm11, 4294967295, %v15496_v10  ;;  %v15505_v42 = vsel %vm10250_vm6, 4294967295, %v15504_v42  ;;  %v1830_v57 = vsel %vm10063_vm9, %v1686_v27, 0.0  ;;  %v1854_v52 = vsel %vm10072_vm12, %v1710_v53, 0.0  ;;  %v15515_v27 = vld [vmem:[#allocation52_spill] sm:$0xff]  ;;  %v15517_v53 = vld [vmem:[#allocation50_spill] sm:$0xff] }
  0xed   : > { %15498 = vst [vmem:[#allocation22_spill] sm:$0xff] %v15497_v10  ;;  %15506 = vst [vmem:[#allocation20_spill] sm:$0xff] %v15505_v42  ;;  %v1685_v6 = vmax.f32 %v1462_v25, 0.0  ;;  %v1709_v47 = vmax.f32 %v1582_v2, 0.0  ;;  %vm15508_vm5 = vnez %v15256_v5  ;;  %v15512_v1 = vmov 0  ;;  %v15518_v25 = vld [vmem:[#allocation48_spill] sm:$0xff] }
  0xee   : > { %1878 = vst.msk [vmem:[#allocation2 + $0x41] sm:$0xff] %vm15489_vm2, %v1830_v57  ;;  %v15511_v55 = vsel %vm15508_vm5, %v15509_v32, %v15510_v8  ;;  %vm15516_vm9 = vnez %v15515_v27  ;;  %v15520_v57 = vmov 0  ;;  %v473_v5 = vshrl.u32 %v10166_v44, 4 }
  0xef   : > { %1902 = vst.msk [vmem:[#allocation2 + $0x101] sm:$0xff] %vm15507_vm3, %v1854_v52  ;;  %vm10275_vm15 = vcmp.lt.s32.totalorder %v15511_v55, 16  ;;  %v15519_v2 = vsel %vm15516_vm9, %v15517_v53, %v15518_v25  ;;  %v10289_v52 = vsub.s32 %v9889_v33, %v749_v45  ;;  %v1829_v55 = vsel %vm10110_vm7, %v1685_v6, 0.0  ;;  %vm15523_vm9 = vmmov %vm15489_vm2  ;;  %v1472_v33 = vpop.f32.mrf.mxu0  ;;  %v1592_v45 = vpop.f32.mrf.mxu1 }
  0xf0   : > { %v15513_v1 = vsel %vm10275_vm15, 4294967295, %v15512_v1  ;;  %vm10284_vm12 = vcmp.lt.s32.totalorder %v15519_v2, 16  ;;  %v10293_v32 = vmul.u32.u64.low 2863311531, %v10195_v9  ;;  %v10294_v8 = vmul.u32.u64.high 2863311531, %v10195_v9, %v10293_v32  ;;  %1877 = vst.msk [vmem:[#allocation2 + $0x39] sm:$0xff] %vm15523_vm9, %v1829_v55  ;;  %vm15535_vm9 = vmmov %vm15489_vm2 }
  0xf1   : > { %15514 = vst [vmem:[#allocation32_spill] sm:$0xff] %v15513_v1  ;;  %v15521_v57 = vsel %vm10284_vm12, 4294967295, %v15520_v57  ;;  %v1853_v27 = vsel %vm10119_vm0, %v1709_v47, 0.0  ;;  %v1688_v53 = vmax.f32 %v8288_v0, 0.0  ;;  %v1712_v25 = vmax.f32 %v8324_v39, 0.0  ;;  %v8327_v55 = vpop.f32.mrf.mxu1 }
  0xf2   : > { %15522 = vst [vmem:[#allocation26_spill] sm:$0xff] %v15521_v57  ;;  %1901 = vst.msk [vmem:[#allocation2 + $0xf9] sm:$0xff] %vm15489_vm2, %v1853_v27  ;;  %vm15524_vm3 = vnez %v15264_v30  ;;  %v15526_v2 = vmov 0  ;;  %vm15529_vm7 = vnez %v15268_v12  ;;  %v15531_v47 = vmov 0 }
  0xf3   : > { %v15525_v44 = vsel %vm15524_vm3, %v9575_v38, %v9539_v62  ;;  %v15530_v6 = vsel %vm15529_vm7, %v9590_v35, %v9544_v58  ;;  %v10321_v0 = vmul.u32.u64.low 2863311531, %v10225_v56  ;;  %v10322_v39 = vmul.u32.u64.high 2863311531, %v10225_v56, %v10321_v0  ;;  %vm15534_vm7 = vmmov %vm15489_vm2  ;;  %v8291_v58 = vpop.f32.mrf.mxu0 }
  0xf4   : > { %vm10307_vm5 = vcmp.lt.s32.totalorder %v15525_v44, 16  ;;  %vm10316_vm0 = vcmp.lt.s32.totalorder %v15530_v6, 16  ;;  %v10325_v30 = vmul.u32.u64.low 2863311531, %v10228_v14  ;;  %v10326_v62 = vmul.u32.u64.high 2863311531, %v10228_v14, %v10325_v30  ;;  %v1602_v6 = vpop.f32.mrf.mxu1  ;;  %v15551_v0 = vld [vmem:[#allocation54_spill] sm:$0xff] }
  0xf5   : > { %v15527_v2 = vsel %vm10307_vm5, 4294967295, %v15526_v2  ;;  %v15532_v47 = vsel %vm10316_vm0, 4294967295, %v15531_v47  ;;  %v1832_v38 = vsel %vm10146_vm4, %v1688_v53, 0.0  ;;  %v1856_v12 = vsel %vm10155_vm8, %v1712_v25, 0.0  ;;  %v15553_v30 = vld [vmem:[#allocation53_spill] sm:$0xff] }
  0xf6   : > { %15528 = vst [vmem:[#allocation21_spill] sm:$0xff] %v15527_v2  ;;  %15533 = vst [vmem:[#allocation34_spill] sm:$0xff] %v15532_v47  ;;  %v1687_v32 = vmax.f32 %v1472_v33, 0.0  ;;  %v1711_v35 = vmax.f32 %v1592_v45, 0.0  ;;  %vm15536_vm2 = vnez %v15272_v21  ;;  %v15538_v44 = vmov 0  ;;  %v1482_v45 = vpop.f32.mrf.mxu0 }
  0xf7   : > { %1880 = vst.msk [vmem:[#allocation2 + $0x51] sm:$0xff] %vm15534_vm7, %v1832_v38  ;;  %v15537_v27 = vsel %vm15536_vm2, %v9615_v20, %v9559_v54  ;;  %vm15541_vm4 = vnez %v15276_v16  ;;  %v15543_v25 = vmov 0  ;;  %v1690_v33 = vmax.f32 %v8291_v58, 0.0  ;;  %v15554_v38 = vld [vmem:[#allocation51_spill] sm:$0xff] }
  0xf8   : > { %1904 = vst.msk [vmem:[#allocation2 + $0x111] sm:$0xff] %vm15535_vm9, %v1856_v12  ;;  %vm10339_vm3 = vcmp.lt.s32.totalorder %v15537_v27, 16  ;;  %v15542_v53 = vsel %vm15541_vm4, %v9697_v46, %v9582_v18  ;;  %v10355_v21 = vmul.u32.u64.low 2863311531, %v10262_v3  ;;  %v10356_v20 = vmul.u32.u64.high 2863311531, %v10262_v3, %v10355_v21  ;;  %vm15550_vm9 = vmmov %vm15534_vm7 }
  0xf9   : > { %v15539_v44 = vsel %vm10339_vm3, 4294967295, %v15538_v44  ;;  %vm10348_vm8 = vcmp.lt.s32.totalorder %v15542_v53, 16  ;;  %v1831_v54 = vsel %vm10179_vm10, %v1687_v32, 0.0  ;;  %v1855_v16 = vsel %vm10188_vm14, %v1711_v35, 0.0 }
  0xfa   : > { %15540 = vst [vmem:[#allocation28_spill] sm:$0xff] %v15539_v44  ;;  %v15544_v25 = vsel %vm10348_vm8, 4294967295, %v15543_v25  ;;  %v1714_v18 = vmax.f32 %v8327_v55, 0.0  ;;  %vm15546_vm4 = vcmp.ne.s32.totalorder %v10132_v29, 0  ;;  %vm15547_vm2 = vcmp.lt.s32.totalorder %v10132_v29, 0  ;;  %1879 = vst.msk [vmem:[#allocation2 + $0x49] sm:$0xff] %vm15550_vm9, %v1831_v54 }
  0xfb   : > { %15545 = vst [vmem:[#allocation23_spill] sm:$0xff] %v15544_v25  ;;  %vm10366_vm8 = vmand %vm15547_vm2, %vm15546_vm4  ;;  %vm15552_vm10 = vnez %v15551_v0  ;;  %v15556_v32 = vmov 0  ;;  %vm15559_vm4 = vnez %v15291_v26  ;;  %v15561_v58 = vmov 0  ;;  %v15568_v0 = vld [vmem:[#allocation57_spill] sm:$0xff] }
  0xfc   : > { %1903 = vst.msk [vmem:[#allocation2 + $0x109] sm:$0xff] %vm15534_vm7, %v1855_v16  ;;  %v15555_v12 = vsel %vm15552_vm10, %v15553_v30, %v15554_v38  ;;  %v15560_v35 = vsel %vm15559_vm4, %v9775_v4, %v9733_v37  ;;  %v474_v55 = vmul.u32 24, %v473_v5  ;;  %v737_v27 = vshrl.u32 %v10259_v17, 4  ;;  %vm15564_vm10 = vmmov %vm15534_vm7  ;;  %v8294_v37 = vpop.f32.mrf.mxu0  ;;  %v8330_v4 = vpop.f32.mrf.mxu1  ;;  %v15566_v16 = vld [vmem:[#allocation63_spill] sm:$0xff] }
  0xfd   : > { %vm10377_vm14 = vcmp.lt.s32.totalorder %v15555_v12, 16  ;;  %vm10386_vm2 = vcmp.lt.s32.totalorder %v15560_v35, 16  ;;  %v1834_v53 = vsel %vm10208_vm1, %v1690_v33, 0.0  ;;  %v1858_v26 = vsel %vm10217_vm13, %v1714_v18, 0.0  ;;  %vm15565_vm4 = vmmov %vm15534_vm7  ;;  %v15569_v5 = vld [vmem:[#allocation55_spill] sm:$0xff] }
  0xfe   : > { %v15557_v32 = vsel %vm10377_vm14, 4294967295, %v15556_v32  ;;  %v15562_v58 = vsel %vm10386_vm2, 4294967295, %v15561_v58  ;;  %v1689_v21 = vmax.f32 %v1482_v45, 0.0  ;;  %v1713_v54 = vmax.f32 %v1602_v6, 0.0  ;;  %1882 = vst.msk [vmem:[#allocation2 + $0x61] sm:$0xff] %vm15564_vm10, %v1834_v53 }
  0xff   : > { %15558 = vst [vmem:[#allocation36_spill] sm:$0xff] %v15557_v32  ;;  %15563 = vst [vmem:[#allocation35_spill] sm:$0xff] %v15562_v58  ;;  %vm15567_vm7 = vnez %v15566_v16  ;;  %v15571_v17 = vmov 0  ;;  %vm15574_vm1 = vnez %v15303_v50  ;;  %v15576_v18 = vmov 0  ;;  %v1612_v16 = vpop.f32.mrf.mxu1 }
 0x100   : > { %1906 = vst.msk [vmem:[#allocation2 + $0x121] sm:$0xff] %vm15565_vm4, %v1858_v26  ;;  %v15570_v30 = vsel %vm15567_vm7, %v15568_v0, %v15569_v5  ;;  %v15575_v33 = vsel %vm15574_vm1, %v9798_v11, %v9769_v40  ;;  %vm15579_vm7 = vcmp.ne.s32.totalorder %v10255_v51, 0  ;;  %vm15580_vm10 = vcmp.lt.s32.totalorder %v10255_v51, 0  ;;  %v15597_v0 = vld [vmem:[#allocation64_spill] sm:$0xff]  ;;  %v15598_v5 = vld [vmem:[#allocation58_spill] sm:$0xff] }
 0x101   : > { %vm10404_vm9 = vcmp.lt.s32.totalorder %v15570_v30, 16  ;;  %vm10413_vm13 = vcmp.lt.s32.totalorder %v15575_v33, 16  ;;  %vm10425_vm4 = vmand %vm15580_vm10, %vm15579_vm7  ;;  %v10430_v50 = vadd.s32 24, %v10255_v51  ;;  %v10433_v40 = vadd.s32 24, %v10289_v52 }
 0x102   : > { %v15572_v17 = vsel %vm10404_vm9, 4294967295, %v15571_v17  ;;  %v15577_v18 = vsel %vm10413_vm13, 4294967295, %v15576_v18  ;;  %v506_v11 = vshrl.u32 %v10294_v8, 4  ;;  %v1833_v38 = vsel %vm10241_vm11, %v1689_v21, 0.0  ;;  %v1492_v8 = vpop.f32.mrf.mxu0  ;;  %v15590_v21 = vld [vmem:[#allocation56_spill] sm:$0xff] }
 0x103   : > { %15573 = vst [vmem:[#allocation24_spill] sm:$0xff] %v15572_v17  ;;  %15578 = vst [vmem:[#allocation38_spill] sm:$0xff] %v15577_v18  ;;  %v1857_v12 = vsel %vm10250_vm6, %v1713_v54, 0.0  ;;  %v1692_v35 = vmax.f32 %v8294_v37, 0.0  ;;  %v1716_v53 = vmax.f32 %v8330_v4, 0.0  ;;  %vm15583_vm1 = vcmp.ne.s32.totalorder %v10289_v52, 0 }
 0x104   : > { %vm15584_vm7 = vcmp.lt.s32.totalorder %v10289_v52, 0  ;;  %v15585_v26 = vmov 0  ;;  %vm15587_vm13 = vcmask 523264   ;;  %vm15589_vm11 = vnez %v15318_v36  ;;  %v15595_v4 = vld [vmem:[#allocation70_spill] sm:$0xff] }
 0x105   : > { %vm10444_vm10 = vmand %vm15584_vm7, %vm15583_vm1  ;;  %1881 = vst.msk [vmem:[#allocation2 + $0x59] sm:$0xff] %vm15587_vm13, %v1833_v38  ;;  %v15591_v54 = vsel %vm15589_vm11, %v9817_v13, %v15590_v21  ;;  %v15592_v37 = vmov 0  ;;  %vm15596_vm1 = vnez %v15595_v4  ;;  %v15600_v33 = vmov 0 }
 0x106   : > { %v15586_v26 = vsel %vm10444_vm10, 4294967295, %v15585_v26  ;;  %vm15588_vm9 = vmmov %vm15587_vm13  ;;  %vm10455_vm6 = vcmp.lt.s32.totalorder %v15591_v54, 16  ;;  %v15599_v30 = vsel %vm15596_vm1, %v15597_v0, %v15598_v5  ;;  %v10469_v38 = vsub.s32 %v10088_v7, %v474_v55  ;;  %v8297_v5 = vpop.f32.mrf.mxu0  ;;  %v8333_v7 = vpop.f32.mrf.mxu1  ;;  %v15605_v55 = vld [vmem:[#allocation73_spill] sm:$0xff] }
 0x107   : > { %1905 = vst.msk [vmem:[#allocation2 + $0x119] sm:$0xff] %vm15588_vm9, %v1857_v12  ;;  %v15593_v37 = vsel %vm10455_vm6, 4294967295, %v15592_v37  ;;  %vm10464_vm7 = vcmp.lt.s32.totalorder %v15599_v30, 16  ;;  %v738_v36 = vmul.u32 24, %v737_v27  ;;  %v770_v12 = vshrl.u32 %v10322_v39, 4  ;;  %vm15603_vm11 = vmmov %vm15588_vm9  ;;  %v15607_v27 = vld [vmem:[#allocation65_spill] sm:$0xff] }
 0x108   : > { %15594 = vst [vmem:[#allocation37_spill] sm:$0xff] %v15593_v37  ;;  %v15601_v33 = vsel %vm10464_vm7, 4294967295, %v15600_v33  ;;  %v495_v13 = vshrl.u32 %v10326_v62, 4  ;;  %v1836_v21 = vsel %vm10275_vm15, %v1692_v35, 0.0  ;;  %v1860_v54 = vsel %vm10284_vm12, %v1716_v53, 0.0  ;;  %vm15604_vm13 = vmmov %vm15588_vm9  ;;  %v15608_v39 = vld [vmem:[#allocation59_spill] sm:$0xff] }
 0x109   : > { %15602 = vst [vmem:[#allocation25_spill] sm:$0xff] %v15601_v33  ;;  %v1691_v4 = vmax.f32 %v1492_v8, 0.0  ;;  %v1715_v0 = vmax.f32 %v1612_v16, 0.0  ;;  %1884 = vst.msk [vmem:[#allocation2 + $0x71] sm:$0xff] %vm15603_vm11, %v1836_v21  ;;  %vm15606_vm9 = vnez %v15605_v55  ;;  %v15610_v62 = vmov 0  ;;  %v15614_v35 = vld [vmem:[#allocation75_spill] sm:$0xff] }
 0x10a   : > { %1908 = vst.msk [vmem:[#allocation2 + $0x131] sm:$0xff] %vm15604_vm13, %v1860_v54  ;;  %v15609_v30 = vsel %vm15606_vm9, %v15607_v27, %v15608_v39  ;;  %vm15613_vm15 = vnez %v15343_v59  ;;  %v15615_v53 = vld [vmem:[#allocation60_spill] sm:$0xff]  ;;  %v15617_v16 = vmov 0  ;;  %v507_v55 = vmul.u32 24, %v506_v11  ;;  %v15621_v21 = vld [vmem:[#allocation78_spill] sm:$0xff]  ;;  %v15624_v11 = vld [vmem:[#allocation61_spill] sm:$0xff] }
 0x10b   : > { %vm10484_vm1 = vcmp.lt.s32.totalorder %v15609_v30, 16  ;;  %v15616_v8 = vsel %vm15613_vm15, %v15614_v35, %v15615_v53  ;;  %v759_v59 = vshrl.u32 %v10356_v20, 4  ;;  %v1835_v27 = vsel %vm10307_vm5, %v1691_v4, 0.0  ;;  %vm15620_vm15 = vmmov %vm15603_vm11  ;;  %v1502_v53 = vpop.f32.mrf.mxu0  ;;  %v15623_v54 = vld [vmem:[#allocation76_spill] sm:$0xff]  ;;  %v15629_v4 = vld [vmem:[#allocation79_spill] sm:$0xff] }
 0x10c   : > { %v15611_v62 = vsel %vm10484_vm1, 4294967295, %v15610_v62  ;;  %vm10493_vm12 = vcmp.lt.s32.totalorder %v15616_v8, 16  ;;  %v1859_v39 = vsel %vm10316_vm0, %v1715_v0, 0.0  ;;  %v1694_v30 = vmax.f32 %v8297_v5, 0.0  ;;  %1883 = vst.msk [vmem:[#allocation2 + $0x69] sm:$0xff] %vm15620_vm15, %v1835_v27  ;;  %v1622_v8 = vpop.f32.mrf.mxu1  ;;  %v15631_v0 = vld [vmem:[#allocation80_spill] sm:$0xff] }
 0x10d   : > { %15612 = vst [vmem:[#allocation39_spill] sm:$0xff] %v15611_v62  ;;  %v15618_v16 = vsel %vm10493_vm12, 4294967295, %v15617_v16  ;;  %v1718_v35 = vmax.f32 %v8333_v7, 0.0  ;;  %1907 = vst.msk [vmem:[#allocation2 + $0x129] sm:$0xff] %vm15603_vm11, %v1859_v39  ;;  %vm15622_vm13 = vnez %v15621_v21  ;;  %v15626_v20 = vmov 0  ;;  %v15632_v5 = vld [vmem:[#allocation62_spill] sm:$0xff] }
 0x10e   : > { %15619 = vst [vmem:[#allocation40_spill] sm:$0xff] %v15618_v16  ;;  %v15625_v45 = vsel %vm15622_vm13, %v15623_v54, %v15624_v11  ;;  %vm15630_vm5 = vnez %v15629_v4  ;;  %v15634_v27 = vmov 0  ;;  %v10532_v21 = vsub.s32 %v10103_v49, %v738_v36  ;;  %v15641_v49 = vld [vmem:[#allocation66_spill] sm:$0xff] }
 0x10f   : > { %vm10517_vm9 = vcmp.lt.s32.totalorder %v15625_v45, 16  ;;  %v15633_v7 = vsel %vm15630_vm5, %v15631_v0, %v15632_v5  ;;  %v771_v39 = vmul.u32 24, %v770_v12  ;;  %v496_v54 = vmul.u32 24, %v495_v13  ;;  %vm15638_vm5 = vmmov %vm15620_vm15  ;;  %v8300_v0 = vpop.f32.mrf.mxu0  ;;  %v8336_v5 = vpop.f32.mrf.mxu1  ;;  %v15646_v13 = vld [vmem:[#allocation15_spill] sm:$0xff] }
 0x110   : > { %v15627_v20 = vsel %vm10517_vm9, 4294967295, %v15626_v20  ;;  %vm10526_vm0 = vcmp.lt.s32.totalorder %v15633_v7, 16  ;;  %v1838_v45 = vsel %vm10339_vm3, %v1694_v30, 0.0  ;;  %vm15637_vm11 = vnez %v15544_v25  ;;  %vm15639_vm13 = vmmov %vm15638_vm5  ;;  %v15648_v30 = vld [vmem:[#allocation5_spill] sm:$0xff] }
 0x111   : > { %15628 = vst [vmem:[#allocation27_spill] sm:$0xff] %v15627_v20  ;;  %v15635_v27 = vsel %vm10526_vm0, 4294967295, %v15634_v27  ;;  %v1862_v11 = vsel %vm15637_vm11, %v1718_v35, 0.0  ;;  %v1693_v4 = vmax.f32 %v1502_v53, 0.0  ;;  %v1717_v57 = vmax.f32 %v1622_v8, 0.0  ;;  %1886 = vst.msk [vmem:[#allocation2 + $0x81] sm:$0xff] %vm15638_vm5, %v1838_v45 }
 0x112   : > { %15636 = vst [vmem:[#allocation41_spill] sm:$0xff] %v15635_v27  ;;  %1910 = vst.msk [vmem:[#allocation2 + $0x141] sm:$0xff] %vm15639_vm13, %v1862_v11  ;;  %vm15640_vm15 = vnez %v15386_v23  ;;  %v15643_v12 = vmov 0  ;;  %vm15647_vm3 = vnez %v15646_v13  ;;  %v15649_v35 = vld [vmem:[#allocation69_spill] sm:$0xff]  ;;  %v15651_v8 = vmov 0  ;;  %v1512_v13 = vpop.f32.mrf.mxu0 }
 0x113   : > { %v15642_v36 = vsel %vm15640_vm15, %v10003_v63, %v15641_v49  ;;  %v15650_v53 = vsel %vm15647_vm3, %v15648_v30, %v15649_v35  ;;  %v10560_v23 = vadd.s32 24, %v10469_v38  ;;  %v10563_v63 = vsub.s32 %v10195_v9, %v507_v55  ;;  %vm15654_vm3 = vmmov %vm15638_vm5  ;;  %v1632_v30 = vpop.f32.mrf.mxu1  ;;  %v15656_v35 = vld [vmem:[#allocation12_spill] sm:$0xff]  ;;  %v15659_v9 = vld [vmem:[#allocation74_spill] sm:$0xff] }
 0x114   : > { %vm10545_vm10 = vcmp.lt.s32.totalorder %v15642_v36, 16  ;;  %vm10554_vm11 = vcmp.lt.s32.totalorder %v15650_v53, 16  ;;  %v760_v7 = vmul.u32 24, %v759_v59  ;;  %v1837_v45 = vsel %vm10377_vm14, %v1693_v4, 0.0  ;;  %vm15655_vm15 = vmmov %vm15654_vm3  ;;  %v15658_v53 = vld [vmem:[#allocation16_spill] sm:$0xff] }
 0x115   : > { %v15644_v12 = vsel %vm10545_vm10, 4294967295, %v15643_v12  ;;  %v15652_v8 = vsel %vm10554_vm11, 4294967295, %v15651_v8  ;;  %v1861_v11 = vsel %vm10386_vm2, %v1717_v57, 0.0  ;;  %v1696_v49 = vmax.f32 %v8300_v0, 0.0  ;;  %1885 = vst.msk [vmem:[#allocation2 + $0x79] sm:$0xff] %vm15654_vm3, %v1837_v45 }
 0x116   : > { %15645 = vst [vmem:[#allocation42_spill] sm:$0xff] %v15644_v12  ;;  %15653 = vst [vmem:[#allocation29_spill] sm:$0xff] %v15652_v8  ;;  %v1720_v36 = vmax.f32 %v8336_v5, 0.0  ;;  %vm15657_vm13 = vnez %v15656_v35  ;;  %v15661_v59 = vmov 0  ;;  %v15664_v57 = vsel %vm10366_vm8, %v10222_v24, %v10132_v29  ;;  %v8339_v35 = vpop.f32.mrf.mxu1 }
 0x117   : > { %1909 = vst.msk [vmem:[#allocation2 + $0x139] sm:$0xff] %vm15655_vm15, %v1861_v11  ;;  %v15660_v55 = vsel %vm15657_vm13, %v15658_v53, %v15659_v9  ;;  %vm10585_vm2 = vcmp.lt.s32.totalorder %v15664_v57, 16  ;;  %v15665_v4 = vmov 0  ;;  %v10592_v0 = vsub.s32 %v10225_v56, %v771_v39  ;;  %vm15670_vm8 = vmmov %vm15654_vm3  ;;  %v8303_v11 = vpop.f32.mrf.mxu0 }
 0x118   : > { %vm10576_vm5 = vcmp.lt.s32.totalorder %v15660_v55, 16  ;;  %v15666_v4 = vsel %vm10585_vm2, 4294967295, %v15665_v4  ;;  %v10595_v5 = vsub.s32 %v10228_v14, %v496_v54  ;;  %vm15668_vm13 = vnez %v15572_v17  ;;  %vm15671_vm2 = vmmov %vm15654_vm3 }
 0x119   : > { %v15662_v59 = vsel %vm10576_vm5, 4294967295, %v15661_v59  ;;  %15667 = vst [vmem:[#allocation44_spill] sm:$0xff] %v15666_v4  ;;  %v1840_v46 = vsel %vm15668_vm13, %v1696_v49, 0.0  ;;  %vm15669_vm14 = vnez %v15577_v18  ;;  %v1695_v24 = vmax.f32 %v1512_v13, 0.0  ;;  %v1522_v13 = vpop.f32.mrf.mxu0 }
 0x11a   : > { %15663 = vst [vmem:[#allocation43_spill] sm:$0xff] %v15662_v59  ;;  %v1864_v29 = vsel %vm15669_vm14, %v1720_v36, 0.0  ;;  %v1719_v45 = vmax.f32 %v1632_v30, 0.0  ;;  %1888 = vst.msk [vmem:[#allocation2 + $0x91] sm:$0xff] %vm15670_vm8, %v1840_v46  ;;  %v10604_v56 = vadd.s32 24, %v10532_v21  ;;  %v10609_v14 = vsub.s32 %v10262_v3, %v760_v7  ;;  %v1642_v30 = vpop.f32.mrf.mxu1 }
 0x11b   : > { %1912 = vst.msk [vmem:[#allocation2 + $0x151] sm:$0xff] %vm15671_vm2, %v1864_v29  ;;  %v1839_v39 = vsel %vm10455_vm6, %v1695_v24, 0.0  ;;  %v1698_v49 = vmax.f32 %v8303_v11, 0.0  ;;  %v1722_v36 = vmax.f32 %v8339_v35, 0.0  ;;  %vm15672_vm14 = vmmov %vm15671_vm2  ;;  %vm15673_vm13 = vcmp.ne.s32.totalorder %v10469_v38, 0  ;;  %v8306_v46 = vpop.f32.mrf.mxu0 }
 0x11c   : > { %v1863_v54 = vsel %vm10464_vm7, %v1719_v45, 0.0  ;;  %1887 = vst.msk [vmem:[#allocation2 + $0x89] sm:$0xff] %vm15672_vm14, %v1839_v39  ;;  %vm15674_vm8 = vcmp.lt.s32.totalorder %v10469_v38, 0  ;;  %v1697_v9 = vmax.f32 %v1522_v13, 0.0  ;;  %v1721_v55 = vmax.f32 %v1642_v30, 0.0  ;;  %vm15681_vm7 = vmmov %vm15672_vm14  ;;  %v8342_v29 = vpop.f32.mrf.mxu1 }
 0x11d   : > { %1911 = vst.msk [vmem:[#allocation2 + $0x149] sm:$0xff] %vm15671_vm2, %v1863_v54  ;;  %vm10621_vm3 = vmand %vm15674_vm8, %vm15673_vm13  ;;  %v1842_v7 = vsel %vm10484_vm1, %v1698_v49, 0.0  ;;  %v1866_v53 = vsel %vm10493_vm12, %v1722_v36, 0.0  ;;  %vm15677_vm2 = vcmp.ne.s32.totalorder %v10532_v21, 0  ;;  %vm15678_vm13 = vcmp.lt.s32.totalorder %v10532_v21, 0  ;;  %v1532_v13 = vpop.f32.mrf.mxu0 }
 0x11e   : > { %vm10637_vm8 = vmand %vm15678_vm13, %vm15677_vm2  ;;  %1890 = vst.msk [vmem:[#allocation2 + $0xa1] sm:$0xff] %vm15681_vm7, %v1842_v7  ;;  %vm15683_vm14 = vcmp.ne.s32.totalorder %v10563_v63, 0  ;;  %vm15684_vm15 = vcmp.lt.s32.totalorder %v10563_v63, 0  ;;  %v942_v45 = vadd.s32 24, %v10563_v63  ;;  %v966_v11 = vadd.s32 24, %v10592_v0  ;;  %v1652_v30 = vpop.f32.mrf.mxu1 }
 0x11f   : > { %vm15682_vm6 = vmmov %vm15681_vm7  ;;  %v1841_v35 = vsel %vm10517_vm9, %v1697_v9, 0.0  ;;  %v1865_v39 = vsel %vm10526_vm0, %v1721_v55, 0.0  ;;  %v1700_v54 = vmax.f32 %v8306_v46, 0.0  ;;  %v1724_v49 = vmax.f32 %v8342_v29, 0.0 }
 0x120   : > { %1914 = vst.msk [vmem:[#allocation2 + $0x161] sm:$0xff] %vm15682_vm6, %v1866_v53  ;;  %vm10647_vm12 = vmand %vm15684_vm15, %vm15683_vm14  ;;  %vm15687_vm6 = vcmp.ne.s32.totalorder %v10592_v0, 0  ;;  %vm15688_vm15 = vcmp.lt.s32.totalorder %v10592_v0, 0  ;;  %v987_v7 = vsel %vm10621_vm3, %v10560_v23, %v10469_v38  ;;  %v1011_v53 = vsel %vm10637_vm8, %v10604_v56, %v10532_v21 }
 0x121   : > { %vm10663_vm14 = vmand %vm15688_vm15, %vm15687_vm6  ;;  %vm15693_vm6 = vcmp.ne.s32.totalorder %v10595_v5, 0  ;;  %vm15694_vm15 = vcmp.lt.s32.totalorder %v10595_v5, 0  ;;  %v941_v55 = vadd.s32 24, %v10595_v5  ;;  %v965_v46 = vadd.s32 24, %v10609_v14 }
 0x122   : > { %vm15691_vm13 = vmmov %vm15681_vm7  ;;  %v1844_v38 = vsel %vm10545_vm10, %v1700_v54, 0.0  ;;  %v1868_v23 = vsel %vm10554_vm11, %v1724_v49, 0.0  ;;  %v1699_v3 = vmax.f32 %v1532_v13, 0.0  ;;  %v1723_v21 = vmax.f32 %v1652_v30, 0.0  ;;  %v8345_v49 = vpop.f32.mrf.mxu1 }
 0x123   : > { %1889 = vst.msk [vmem:[#allocation2 + $0x99] sm:$0xff] %vm15691_vm13, %v1841_v35  ;;  %vm15692_vm2 = vmmov %vm15681_vm7  ;;  %vm15697_vm3 = vcmp.ne.s32.totalorder %v10609_v14, 0  ;;  %vm15698_vm8 = vcmp.lt.s32.totalorder %v10609_v14, 0  ;;  %v15702_v57 = vsel %vm10425_vm4, %v10430_v50, %v10255_v51  ;;  %v15703_v29 = vmov 0  ;;  %v8309_v35 = vpop.f32.mrf.mxu0 }
 0x124   : > { %1913 = vst.msk [vmem:[#allocation2 + $0x159] sm:$0xff] %vm15692_vm2, %v1865_v39  ;;  %vm10681_vm7 = vmand %vm15694_vm15, %vm15693_vm6  ;;  %vm10706_vm15 = vcmp.lt.s32.totalorder %v15702_v57, 16  ;;  %vm15706_vm11 = vnez %v15586_v26  ;;  %v15708_v54 = vmov 0  ;;  %v990_v6 = vsel %vm10647_vm12, %v942_v45, %v10563_v63 }
 0x125   : > { %vm10695_vm2 = vmand %vm15698_vm8, %vm15697_vm3  ;;  %1892 = vst.msk [vmem:[#allocation2 + $0xb1] sm:$0xff] %vm15691_vm13, %v1844_v38  ;;  %v15704_v29 = vsel %vm10706_vm15, 4294967295, %v15703_v29  ;;  %v15707_v39 = vsel %vm15706_vm11, %v10433_v40, %v10289_v52  ;;  %v1014_v51 = vsel %vm10663_vm14, %v966_v11, %v10592_v0  ;;  %v1843_v50 = vsel %vm10576_vm5, %v1699_v3, 0.0  ;;  %v1542_v63 = vpop.f32.mrf.mxu0  ;;  %v1662_v0 = vpop.f32.mrf.mxu1 }
 0x126   : > { %vm15701_vm6 = vmmov %vm15691_vm13  ;;  %15705 = vst [vmem:[#allocation31_spill] sm:$0xff] %v15704_v29  ;;  %vm10715_vm3 = vcmp.lt.s32.totalorder %v15707_v39, 16  ;;  %vm15711_vm4 = vnez %v15666_v4  ;;  %v1702_v52 = vmax.f32 %v8309_v35, 0.0  ;;  %v1726_v40 = vmax.f32 %v8345_v49, 0.0 }
 0x127   : > { %1916 = vst.msk [vmem:[#allocation2 + $0x171] sm:$0xff] %vm15701_vm6, %v1868_v23  ;;  %v15709_v54 = vsel %vm10715_vm3, 4294967295, %v15708_v54  ;;  %v1867_v26 = vsel %vm15711_vm4, %v1723_v21, 0.0  ;;  %vm15712_vm11 = vmmov %vm15701_vm6  ;;  %vm10731_vm13 = vcmp.lt.s32.totalorder %v987_v7, 16  ;;  %v15714_v13 = vmov 0 }
 0x128   : > { %15710 = vst [vmem:[#allocation46_spill] sm:$0xff] %v15709_v54  ;;  %1891 = vst.msk [vmem:[#allocation2 + $0xa9] sm:$0xff] %vm15712_vm11, %v1843_v50  ;;  %v15715_v13 = vsel %vm10731_vm13, 4294967295, %v15714_v13  ;;  %vm10735_vm12 = vcmp.lt.s32.totalorder %v1011_v53, 16  ;;  %v15717_v24 = vmov 0  ;;  %v989_v45 = vsel %vm10681_vm7, %v941_v55, %v10595_v5  ;;  %v8312_v5 = vpop.f32.mrf.mxu0 }
 0x129   : > { %vm15713_vm8 = vmmov %vm15701_vm6  ;;  %15716 = vst [vmem:[#allocation45_spill] sm:$0xff] %v15715_v13  ;;  %v15718_v24 = vsel %vm10735_vm12, 4294967295, %v15717_v24  ;;  %v1013_v11 = vsel %vm10695_vm2, %v965_v46, %v10609_v14  ;;  %v1846_v36 = vsel %vm10706_vm15, %v1702_v52, 0.0  ;;  %v1870_v30 = vsel %vm10715_vm3, %v1726_v40, 0.0  ;;  %v8348_v14 = vpop.f32.mrf.mxu1 }
 0x12a   : > { %1915 = vst.msk [vmem:[#allocation2 + $0x169] sm:$0xff] %vm15713_vm8, %v1867_v26  ;;  %15719 = vst [vmem:[#allocation33_spill] sm:$0xff] %v15718_v24  ;;  %v1701_v7 = vmax.f32 %v1542_v63, 0.0  ;;  %v1725_v53 = vmax.f32 %v1662_v0, 0.0  ;;  %vm10751_vm4 = vcmp.lt.s32.totalorder %v990_v6, 16  ;;  %v15721_v38 = vmov 0  ;;  %v1552_v56 = vpop.f32.mrf.mxu0 }
 0x12b   : > { %vm15720_vm14 = vmmov %vm15701_vm6  ;;  %1918 = vst.msk [vmem:[#allocation2 + $0x181] sm:$0xff] %vm15701_vm6, %v1870_v30  ;;  %v15722_v38 = vsel %vm10751_vm4, 4294967295, %v15721_v38  ;;  %vm10755_vm7 = vcmp.lt.s32.totalorder %v1014_v51, 16  ;;  %v15724_v9 = vmov 0  ;;  %v1704_v23 = vmax.f32 %v8312_v5, 0.0  ;;  %v1672_v35 = vpop.f32.mrf.mxu1 }
 0x12c   : > { %1894 = vst.msk [vmem:[#allocation2 + $0xc1] sm:$0xff] %vm15720_vm14, %v1846_v36  ;;  %15723 = vst [vmem:[#allocation49_spill] sm:$0xff] %v15722_v38  ;;  %v15725_v9 = vsel %vm10755_vm7, 4294967295, %v15724_v9  ;;  %v1845_v55 = vsel %vm10731_vm13, %v1701_v7, 0.0  ;;  %v1869_v46 = vsel %vm10735_vm12, %v1725_v53, 0.0  ;;  %v1728_v3 = vmax.f32 %v8348_v14, 0.0 }
 0x12d   : > { %15726 = vst [vmem:[#allocation47_spill] sm:$0xff] %v15725_v9  ;;  %vm15727_vm2 = vmmov %vm15701_vm6  ;;  %vm10765_vm8 = vcmp.lt.s32.totalorder %v989_v45, 16  ;;  %v15729_v21 = vmov 0  ;;  %vm10769_vm14 = vcmp.lt.s32.totalorder %v1013_v11, 16  ;;  %v15732_v57 = vmov 0 }
 0x12e   : > { %1893 = vst.msk [vmem:[#allocation2 + $0xb9] sm:$0xff] %vm15727_vm2, %v1845_v55  ;;  %vm15728_vm11 = vmmov %vm15727_vm2  ;;  %v15730_v21 = vsel %vm10765_vm8, 4294967295, %v15729_v21  ;;  %v15733_v57 = vsel %vm10769_vm14, 4294967295, %v15732_v57  ;;  %v1848_v39 = vsel %vm10751_vm4, %v1704_v23, 0.0  ;;  %v1872_v49 = vsel %vm10755_vm7, %v1728_v3, 0.0 }
 0x12f   : > { %1917 = vst.msk [vmem:[#allocation2 + $0x179] sm:$0xff] %vm15728_vm11, %v1869_v46  ;;  %15731 = vst [vmem:[#allocation52_spill] sm:$0xff] %v15730_v21  ;;  %v1703_v6 = vmax.f32 %v1552_v56, 0.0  ;;  %v1727_v51 = vmax.f32 %v1672_v35, 0.0 }
 0x130   : > { %15734 = vst [vmem:[#allocation50_spill] sm:$0xff] %v15733_v57  ;;  %vm15735_vm6 = vmmov %vm15727_vm2 }
 0x131   : > { %1896 = vst.msk [vmem:[#allocation2 + $0xd1] sm:$0xff] %vm15735_vm6, %v1848_v39  ;;  %v1847_v50 = vsel %vm10765_vm8, %v1703_v6, 0.0  ;;  %v1871_v26 = vsel %vm10769_vm14, %v1727_v51, 0.0  ;;  %vm15736_vm11 = vmmov %vm15727_vm2 }
 0x132   : > { %1920 = vst.msk [vmem:[#allocation2 + $0x191] sm:$0xff] %vm15727_vm2, %v1872_v49  ;;  %vm15737_vm3 = vmmov %vm15727_vm2 }
 0x133   : > { %1895 = vst.msk [vmem:[#allocation2 + $0xc9] sm:$0xff] %vm15736_vm11, %v1847_v50 }
 0x134   : > { %1919 = vst.msk [vmem:[#allocation2 + $0x189] sm:$0xff] %vm15737_vm3, %v1871_v26 }
 0x135 LB: >> { %v1984_v52 = vld [vmem:[#allocation2 + $0x19] sm:$0xff]  ;;  %v1986_v40 = vld [vmem:[#allocation2 + $0x29] sm:$0xff]  ;;  %s8563_s9 = smov 64   ;;  %v1985_v63 = vld [vmem:[#allocation2 + $0x21] sm:$0xff]  ;;  %v14899_v45 = vmov 0.0   ;;  %s7601_s10 = smul.u32 1152, %s8560_s8  ;;  %s8560_s8 = sphi %s10785_s8, %s1926_s8  }
 0x136   : >> { %2149 = vrot.lane.b32.xlu0 %v1984_v52, %s8563_s9  ;;  %2153 = vrot.lane.b32.xlu1 %v1986_v40, %s8563_s9  ;;  %v1987_v0 = vld [vmem:[#allocation2 + $0x31] sm:$0xff]  ;;  %v1988_v11 = vld [vmem:[#allocation2 + $0x39] sm:$0xff]  ;;  %v1989_v36 = vld [vmem:[#allocation2 + $0x41] sm:$0xff]  ;;  %vm15738_vm3 = vcmask 523264   ;;  %v15761_v12 = vmov 0.0   ;;  %s1926_s8 = sadd.s32 1, %s8560_s8  }
 0x137   : >> { %2557 = vmatprep.subr.mxu0 %v14899_v45  ;;  %2871 = vmatprep.subr.mxu1 %v14899_v45  ;;  %s10800_s13 = scalar_lea.vmem %s14659_s2, %s7601_s10  ;;  %v1990_v30 = vld [vmem:[#allocation2 + $0x49] sm:$0xff]  ;;  %v1991_v7 = vld [vmem:[#allocation2 + $0x51] sm:$0xff]  ;;  %v1992_v14 = vld [vmem:[#allocation2 + $0x59] sm:$0xff]  ;;  %p1923_p4 = scmp.ge.s32.totalorder %s1926_s8, 9  }
 0x138   : >> { %v7618_v53 = vld [vmem:[%s10800_s13 + $0x138] sm:$0xff]  ;;  %v7617_v5 = vld [vmem:[%s10800_s13 + $0x130] sm:$0xff]  ;;  %v1993_v55 = vld [vmem:[#allocation2 + $0x61] sm:$0xff]  ;;  %s8565_s14 = smov (%p1923_p4), 64   ;;  %s8566_s28 = smov (%p1923_p4), 112  }
 0x139   : >> { %2558 = vmatpush1.msra.mxu0 %v7618_v53  ;;  %v7616_v46 = vld [vmem:[%s10800_s13 + $0x128] sm:$0xff]  ;;  %v7615_v23 = vld [vmem:[%s10800_s13 + $0x120] sm:$0xff]  ;;  %v1995_v56 = vld [vmem:[#allocation2 + $0x71] sm:$0xff] }
 0x13a   : >> { %2151 = vrot.lane.b32.xlu0 %v1985_v63, %s8563_s9  ;;  %2155 = vrot.lane.b32.xlu1 %v1987_v0, %s8563_s9  ;;  %v1994_v3 = vld [vmem:[#allocation2 + $0x69] sm:$0xff]  ;;  %v7614_v35 = vld [vmem:[%s10800_s13 + $0x118] sm:$0xff]  ;;  %v1997_v49 = vld [vmem:[#allocation2 + $0x81] sm:$0xff] }
 0x13b   : >> { %2559 = vmatprep.subr.mxu0 %v14899_v45  ;;  %v1996_v39 = vld [vmem:[#allocation2 + $0x79] sm:$0xff]  ;;  %v7613_v6 = vld [vmem:[%s10800_s13 + $0x110] sm:$0xff]  ;;  %v7612_v51 = vld [vmem:[%s10800_s13 + $0x108] sm:$0xff] }
 0x13c   : >> { %2560 = vmatpush1.msra.mxu0 %v7617_v5  ;;  %v10824_v50 = vld [vmem:[#allocation2 + $0x1a] sm:$0xff]  ;;  %v1998_v26 = vld [vmem:[#allocation2 + $0x89] sm:$0xff]  ;;  %v1999_v52 = vld [vmem:[#allocation2 + $0x91] sm:$0xff] }
 0x13d   : >> { %2561 = vmatprep.subr.mxu0 %v14899_v45  ;;  %7627 = vmatprep.mubr.msk.f32.mxu0 %vm15738_vm3, %v10824_v50  ;;  %v7611_v40 = vld [vmem:[%s10800_s13 + $0x100] sm:$0xff]  ;;  %v7608_v53 = vld [vmem:[%s10800_s13 + $0xe8] sm:$0xff]  ;;  %vm15739_vm6 = vmmov %vm15738_vm3 }
 0x13e   : >> { %2157 = vrot.lane.b32.xlu0 %v1988_v11, %s8563_s9  ;;  %2159 = vrot.lane.b32.xlu1 %v1989_v36, %s8563_s9  ;;  %v2000_v63 = vld [vmem:[#allocation2 + $0x99] sm:$0xff]  ;;  %v2001_v0 = vld [vmem:[#allocation2 + $0xa1] sm:$0xff]  ;;  %v7609_v36 = vld [vmem:[%s10800_s13 + $0xf0] sm:$0xff] }
 0x13f   : >> { %2562 = vmatpush1.msra.mxu0 %v7616_v46  ;;  %v7610_v11 = vld [vmem:[%s10800_s13 + $0xf8] sm:$0xff]  ;;  %vm15740_vm2 = vmmov %vm15738_vm3  ;;  %v11017_v9 = vld [vmem:[#allocation2 + $0x4a] sm:$0xff] }
 0x140   : >> { %2563 = vmatprep.subr.mxu0 %v14899_v45  ;;  %v2004_v5 = vld [vmem:[#allocation2 + $0xb9] sm:$0xff]  ;;  %vm15741_vm11 = vmmov %vm15740_vm2  ;;  %v7729_v57 = vld [vmem:[%s10800_s13 + $0x1a8] sm:$0xff] }
 0x141   : >> { %2564 = vmatpush1.msra.mxu0 %v7615_v23  ;;  %v2377_v46 = vld [vmem:[%s10800_s13 + $0x78] sm:$0xff]  ;;  %vm15742_vm3 = vmmov %vm15740_vm2  ;;  %v7725_v27 = vld [vmem:[%s10800_s13 + $0x188] sm:$0xff] }
 0x142   : >> { %2161 = vrot.lane.b32.xlu0 %v1990_v30, %s8563_s9  ;;  %2163 = vrot.lane.b32.xlu1 %v1991_v7, %s8563_s9  ;;  %v2002_v30 = vld [vmem:[#allocation2 + $0xa9] sm:$0xff]  ;;  %v2003_v7 = vld [vmem:[#allocation2 + $0xb1] sm:$0xff]  ;;  %v11049_v16 = vld [vmem:[#allocation2 + $0x5a] sm:$0xff] }
 0x143   : >> { %2565 = vmatprep.subr.mxu0 %v14899_v45  ;;  %v7606_v23 = vld [vmem:[%s10800_s13 + $0xd8] sm:$0xff]  ;;  %2872 = vmatpush1.msra.mxu1 %v2377_v46  ;;  %v2370_v46 = vld [vmem:[%s10800_s13 + $0x40] sm:$0xff]  ;;  %v7745_v41 = vld [vmem:[%s10800_s13 + $0x228] sm:$0xff] }
 0x144   : >> { %2566 = vmatpush1.msra.mxu0 %v7614_v35  ;;  %v2007_v35 = vld [vmem:[#allocation2 + $0xd1] sm:$0xff]  ;;  %2873 = vmatprep.subr.mxu1 %v14899_v45  ;;  %v11065_v33 = vld [vmem:[#allocation2 + $0x62] sm:$0xff]  ;;  %v11173_v44 = vld [vmem:[#allocation2 + $0x9a] sm:$0xff] }
 0x145   : >> { %2567 = vmatprep.subr.mxu0 %v14899_v45  ;;  %v11033_v24 = vld [vmem:[#allocation2 + $0x52] sm:$0xff]  ;;  %v11131_v21 = vld [vmem:[#allocation2 + $0x82] sm:$0xff]  ;;  %v11145_v13 = vld [vmem:[#allocation2 + $0x8a] sm:$0xff]  ;;  %15766 = vst [vmem:[#allocation82_spill] sm:$0xff] %v11173_v44 }
 0x146   : >> { %2165 = vrot.lane.b32.xlu0 %v1992_v14, %s8563_s9  ;;  %2167 = vrot.lane.b32.xlu1 %v1993_v55, %s8563_s9  ;;  %v2005_v14 = vld [vmem:[#allocation2 + $0xc1] sm:$0xff]  ;;  %v7727_v8 = vld [vmem:[%s10800_s13 + $0x198] sm:$0xff]  ;;  %v11200_v10 = vld [vmem:[#allocation2 + $0xaa] sm:$0xff] }
 0x147   : >> { %2568 = vmatpush1.msra.mxu0 %v7613_v6  ;;  %v7607_v55 = vld [vmem:[%s10800_s13 + $0xe0] sm:$0xff]  ;;  %v7747_v25 = vld [vmem:[%s10800_s13 + $0x238] sm:$0xff]  ;;  %15773 = vst [vmem:[#allocation86_spill] sm:$0xff] %v11200_v10  ;;  %vm15804_vm7 = vmmov %vm15740_vm2 }
 0x148   : >> { %2569 = vmatprep.subr.mxu0 %v14899_v45  ;;  %v2008_v6 = vld [vmem:[#allocation2 + $0xd9] sm:$0xff]  ;;  %v11187_v1 = vld [vmem:[#allocation2 + $0xa2] sm:$0xff] }
 0x149   : >> { %2570 = vmatpush1.msra.mxu0 %v7612_v51  ;;  %v2009_v51 = vld [vmem:[#allocation2 + $0xe1] sm:$0xff]  ;;  %v7743_v31 = vld [vmem:[%s10800_s13 + $0x218] sm:$0xff]  ;;  %15769 = vst [vmem:[#allocation84_spill] sm:$0xff] %v11187_v1 }
 0x14a   : >> { %2169 = vrot.lane.b32.xlu0 %v1994_v3, %s8563_s9  ;;  %2171 = vrot.lane.b32.xlu1 %v1995_v56, %s8563_s9  ;;  %v2376_v3 = vld [vmem:[%s10800_s13 + $0x70] sm:$0xff]  ;;  %v7740_v20 = vld [vmem:[%s10800_s13 + $0x200] sm:$0xff] }
 0x14b   : >> { %2571 = vmatprep.subr.mxu0 %v14899_v45  ;;  %v2006_v56 = vld [vmem:[#allocation2 + $0xc9] sm:$0xff]  ;;  %2874 = vmatpush1.msra.mxu1 %v2376_v3  ;;  %v2015_v3 = vld [vmem:[#allocation2 + $0x111] sm:$0xff] }
 0x14c   : >> { %2572 = vmatpush1.msra.mxu0 %v7611_v40  ;;  %2875 = vmatprep.subr.mxu1 %v14899_v45  ;;  %v7603_v40 = vld [vmem:[%s10800_s13 + $0xc0] sm:$0xff]  ;;  %v11159_v62 = vld [vmem:[#allocation2 + $0x92] sm:$0xff] }
 0x14d   : >> { %2573 = vmatprep.subr.mxu0 %v14899_v45  ;;  %v11213_v61 = vld [vmem:[#allocation2 + $0xb2] sm:$0xff] }
 0x14e   : >> { %2173 = vrot.lane.b32.xlu0 %v1996_v39, %s8563_s9  ;;  %2175 = vrot.lane.b32.xlu1 %v1997_v49, %s8563_s9  ;;  %v7605_v39 = vld [vmem:[%s10800_s13 + $0xd0] sm:$0xff]  ;;  %v2375_v49 = vld [vmem:[%s10800_s13 + $0x68] sm:$0xff]  ;;  %15776 = vst [vmem:[#allocation88_spill] sm:$0xff] %v11213_v61 }
 0x14f   : >> { %2574 = vmatpush1.msra.mxu0 %v7610_v11  ;;  %2876 = vmatpush1.msra.mxu1 %v2375_v49  ;;  %v2011_v11 = vld [vmem:[#allocation2 + $0xf1] sm:$0xff]  ;;  %v2017_v49 = vld [vmem:[#allocation2 + $0x121] sm:$0xff] }
 0x150   : >> { %2575 = vmatprep.subr.mxu0 %v14899_v45  ;;  %2877 = vmatprep.subr.mxu1 %v14899_v45 }
 0x151   : >> { %2576 = vmatpush1.msra.mxu0 %v7609_v36  ;;  %v7626_v36 = vld [vmem:[%s10800_s13 + $0x178] sm:$0xff] }
 0x152   : >> { %2177 = vrot.lane.b32.xlu0 %v1998_v26, %s8563_s9  ;;  %2179 = vrot.lane.b32.xlu1 %v1999_v52, %s8563_s9  ;;  %v7604_v26 = vld [vmem:[%s10800_s13 + $0xc8] sm:$0xff]  ;;  %v2374_v52 = vld [vmem:[%s10800_s13 + $0x60] sm:$0xff] }
 0x153   : >> { %2577 = vmatprep.subr.mxu0 %v14899_v45  ;;  %2878 = vmatpush1.msra.mxu1 %v2374_v52  ;;  %v2367_v52 = vld [vmem:[%s10800_s13 + $0x28] sm:$0xff] }
 0x154   : >> { %2578 = vmatpush1.msra.mxu0 %v7608_v53  ;;  %2879 = vmatprep.subr.mxu1 %v14899_v45  ;;  %v2013_v53 = vld [vmem:[#allocation2 + $0x101] sm:$0xff] }
 0x155   : >> { %2579 = vmatprep.subr.mxu0 %v14899_v45 }
 0x156   : >> { %2181 = vrot.lane.b32.xlu0 %v2000_v63, %s8563_s9  ;;  %2183 = vrot.lane.b32.xlu1 %v2001_v0, %s8563_s9  ;;  %v2373_v63 = vld [vmem:[%s10800_s13 + $0x58] sm:$0xff]  ;;  %v2010_v0 = vld [vmem:[#allocation2 + $0xe9] sm:$0xff] }
 0x157   : >> { %2580 = vmatpush1.msra.mxu0 %v7607_v55  ;;  %2880 = vmatpush1.msra.mxu1 %v2373_v63  ;;  %v7624_v55 = vld [vmem:[%s10800_s13 + $0x168] sm:$0xff]  ;;  %v2019_v63 = vld [vmem:[#allocation2 + $0x131] sm:$0xff] }
 0x158   : >> { %2581 = vmatprep.subr.mxu0 %v14899_v45  ;;  %2881 = vmatprep.subr.mxu1 %v14899_v45 }
 0x159   : >> { %2582 = vmatpush1.msra.mxu0 %v7606_v23  ;;  %v2014_v23 = vld [vmem:[#allocation2 + $0x109] sm:$0xff] }
 0x15a   : >> { %2185 = vrot.lane.b32.xlu0 %v2002_v30, %s8563_s9  ;;  %2187 = vrot.lane.b32.xlu1 %v2003_v7, %s8563_s9  ;;  %v2372_v30 = vld [vmem:[%s10800_s13 + $0x50] sm:$0xff]  ;;  %v2012_v7 = vld [vmem:[#allocation2 + $0xf9] sm:$0xff] }
 0x15b   : >> { %2583 = vmatprep.subr.mxu0 %v14899_v45  ;;  %2882 = vmatpush1.msra.mxu1 %v2372_v30  ;;  %v2021_v30 = vld [vmem:[#allocation2 + $0x141] sm:$0xff] }
 0x15c   : >> { %2584 = vmatpush1.msra.mxu0 %v7605_v39  ;;  %2883 = vmatprep.subr.mxu1 %v14899_v45  ;;  %v2016_v39 = vld [vmem:[#allocation2 + $0x119] sm:$0xff] }
 0x15d   : >> { %2585 = vmatprep.subr.mxu0 %v14899_v45 }
 0x15e   : >> { %2189 = vrot.lane.b32.xlu0 %v2004_v5, %s8563_s9  ;;  %2191 = vrot.lane.b32.xlu1 %v2005_v14, %s8563_s9  ;;  %v7625_v5 = vld [vmem:[%s10800_s13 + $0x170] sm:$0xff]  ;;  %v2371_v14 = vld [vmem:[%s10800_s13 + $0x48] sm:$0xff] }
 0x15f   : >> { %2586 = vmatpush1.msra.mxu0 %v7604_v26  ;;  %2884 = vmatpush1.msra.mxu1 %v2371_v14  ;;  %v7621_v26 = vld [vmem:[%s10800_s13 + $0x150] sm:$0xff] }
 0x160   : >> { %2587 = vmatprep.subr.mxu0 %v14899_v45  ;;  %2885 = vmatprep.subr.mxu1 %v14899_v45  ;;  %v2022_v14 = vld [vmem:[#allocation2 + $0x149] sm:$0xff] }
 0x161   : >> { %2588 = vmatpush1.msra.mxu0 %v7603_v40  ;;  %2886 = vmatpush1.msra.mxu1 %v2370_v46  ;;  %v2018_v40 = vld [vmem:[#allocation2 + $0x129] sm:$0xff] }
 0x162   : >> { %2193 = vrot.lane.b32.xlu0 %v2006_v56, %s8563_s9  ;;  %2195 = vrot.lane.b32.xlu1 %v2007_v35, %s8563_s9  ;;  %v7623_v56 = vld [vmem:[%s10800_s13 + $0x160] sm:$0xff]  ;;  %v2369_v35 = vld [vmem:[%s10800_s13 + $0x38] sm:$0xff] }
 0x163   : >> { %2605 = vmatprep.subr.mxu0 %v14899_v45  ;;  %2887 = vmatprep.subr.mxu1 %v14899_v45  ;;  %v2363_v46 = vld [vmem:[%s10800_s13 + $0x8] sm:$0xff] }
 0x164   : >> { %2606 = vmatpush2.msra.mxu0 %v7626_v36  ;;  %2888 = vmatpush1.msra.mxu1 %v2369_v35  ;;  %v2020_v36 = vld [vmem:[#allocation2 + $0x139] sm:$0xff] }
 0x165   : >> { %2607 = vmatprep.subr.mxu0 %v14899_v45  ;;  %2889 = vmatprep.subr.mxu1 %v14899_v45  ;;  %v2385_v35 = vld [vmem:[%s10800_s13 + $0xb8] sm:$0xff] }
 0x166   : >> { %2197 = vrot.lane.b32.xlu0 %v2008_v6, %s8563_s9  ;;  %2199 = vrot.lane.b32.xlu1 %v2009_v51, %s8563_s9  ;;  %v7622_v6 = vld [vmem:[%s10800_s13 + $0x158] sm:$0xff]  ;;  %v2368_v51 = vld [vmem:[%s10800_s13 + $0x30] sm:$0xff] }
 0x167   : >> { %2608 = vmatpush2.msra.mxu0 %v7625_v5  ;;  %2890 = vmatpush1.msra.mxu1 %v2368_v51  ;;  %v2364_v5 = vld [vmem:[%s10800_s13 + $0x10] sm:$0xff]  ;;  %v2035_v51 = vld [vmem:[#allocation2 + $0x2] sm:$0xff] }
 0x168   : >> { %2609 = vmatprep.subr.mxu0 %v14899_v45  ;;  %2891 = vmatprep.subr.mxu1 %v14899_v45 }
 0x169   : >> { %2610 = vmatpush2.msra.mxu0 %v7624_v55  ;;  %2892 = vmatpush1.msra.mxu1 %v2367_v52  ;;  %v2023_v55 = vld [vmem:[#allocation2 + $0x151] sm:$0xff]  ;;  %v2029_v52 = vld [vmem:[#allocation2 + $0x181] sm:$0xff] }
 0x16a   : >> { %2201 = vrot.lane.b32.xlu0 %v2010_v0, %s8563_s9  ;;  %2203 = vrot.lane.b32.xlu1 %v2011_v11, %s8563_s9  ;;  %v7620_v0 = vld [vmem:[%s10800_s13 + $0x148] sm:$0xff]  ;;  %v2366_v11 = vld [vmem:[%s10800_s13 + $0x20] sm:$0xff] }
 0x16b   : >> { %2611 = vmatprep.subr.mxu0 %v14899_v45  ;;  %2893 = vmatprep.subr.mxu1 %v14899_v45 }
 0x16c   : >> { %2612 = vmatpush2.msra.mxu0 %v7623_v56  ;;  %2894 = vmatpush1.msra.mxu1 %v2366_v11  ;;  %v2362_v56 = vld [vmem:[%s10800_s13] sm:$0xff]  ;;  %v2031_v11 = vld [vmem:[#allocation2 + $0x191] sm:$0xff] }
 0x16d   : >> { %2613 = vmatprep.subr.mxu0 %v14899_v45  ;;  %2895 = vmatprep.subr.mxu1 %v14899_v45 }
 0x16e   : >> { %2205 = vrot.lane.b32.xlu0 %v2012_v7, %s8563_s9  ;;  %2207 = vrot.lane.b32.xlu1 %v2013_v53, %s8563_s9  ;;  %v7619_v7 = vld [vmem:[%s10800_s13 + $0x140] sm:$0xff]  ;;  %v2365_v53 = vld [vmem:[%s10800_s13 + $0x18] sm:$0xff] }
 0x16f   : >> { %2614 = vmatpush2.msra.mxu0 %v7622_v6  ;;  %2896 = vmatpush1.msra.mxu1 %v2365_v53  ;;  %v2384_v6 = vld [vmem:[%s10800_s13 + $0xb0] sm:$0xff] }
 0x170   : >> { %2615 = vmatprep.subr.mxu0 %v14899_v45  ;;  %2897 = vmatprep.subr.mxu1 %v14899_v45  ;;  %v2380_v53 = vld [vmem:[%s10800_s13 + $0x90] sm:$0xff] }
 0x171   : >> { %2616 = vmatpush2.msra.mxu0 %v7621_v26  ;;  %2898 = vmatpush1.msra.mxu1 %v2364_v5  ;;  %v2028_v26 = vld [vmem:[#allocation2 + $0x179] sm:$0xff]  ;;  %v2379_v5 = vld [vmem:[%s10800_s13 + $0x88] sm:$0xff] }
 0x172   : >> { %2209 = vrot.lane.b32.xlu0 %v2014_v23, %s8563_s9  ;;  %2211 = vrot.lane.b32.xlu1 %v2015_v3, %s8563_s9  ;;  %v2024_v23 = vld [vmem:[#allocation2 + $0x159] sm:$0xff]  ;;  %v2025_v3 = vld [vmem:[#allocation2 + $0x161] sm:$0xff] }
 0x173   : >> { %2617 = vmatprep.subr.mxu0 %v14899_v45  ;;  %2899 = vmatprep.subr.mxu1 %v14899_v45 }
 0x174   : >> { %2618 = vmatpush2.msra.mxu0 %v7620_v0  ;;  %2900 = vmatpush1.msra.mxu1 %v2363_v46  ;;  %v2030_v0 = vld [vmem:[#allocation2 + $0x189] sm:$0xff]  ;;  %v1930_v46 = vld [vmem:[#allocation2 + $0x18] sm:$0xff] }
 0x175   : >> { %2619 = vmatprep.subr.mxu0 %v14899_v45  ;;  %2901 = vmatprep.subr.mxu1 %v14899_v45 }
 0x176   : >> { %2213 = vrot.lane.b32.xlu0 %v2016_v39, %s8563_s9  ;;  %2215 = vrot.lane.b32.xlu1 %v2017_v49, %s8563_s9  ;;  %v2026_v39 = vld [vmem:[#allocation2 + $0x169] sm:$0xff]  ;;  %v2027_v49 = vld [vmem:[#allocation2 + $0x171] sm:$0xff] }
 0x177   : >> { %2620 = vmatpush2.msra.mxu0 %v7619_v7  ;;  %2902 = vmatpush1.msra.mxu1 %v2362_v56  ;;  %v1982_v7 = vld [vmem:[#allocation2 + $0x9] sm:$0xff] }
 0x178   : >> { %3212 = vmatprep.subr.mxu0 %v14899_v45  ;;  %2919 = vmatprep.subr.mxu1 %v14899_v45 }
 0x179   : >> { %2920 = vmatpush2.msra.mxu1 %v2385_v35  ;;  %7675 = vmatprep.mubr.msk.f32.mxu1 %vm15739_vm6, %v2035_v51  ;;  %v10951_v35 = vld [vmem:[#allocation2 + $0x22] sm:$0xff]  ;;  %vm15743_vm6 = vmmov %vm15740_vm2 }
 0x17a   : >> { %2217 = vrot.lane.b32.xlu0 %v2018_v40, %s8563_s9  ;;  %2219 = vrot.lane.b32.xlu1 %v2019_v63, %s8563_s9  ;;  %v2383_v40 = vld [vmem:[%s10800_s13 + $0xa8] sm:$0xff]  ;;  %v2382_v63 = vld [vmem:[%s10800_s13 + $0xa0] sm:$0xff] }
 0x17b   : >> { %2921 = vmatprep.subr.mxu1 %v14899_v45 }
 0x17c   : >> { %2922 = vmatpush2.msra.mxu1 %v2384_v6  ;;  %v7738_v6 = vld [vmem:[%s10800_s13 + $0x1f0] sm:$0xff] }
 0x17d   : >> { %2923 = vmatprep.subr.mxu1 %v14899_v45 }
 0x17e   : >> { %2221 = vrot.lane.b32.xlu0 %v2020_v36, %s8563_s9  ;;  %2223 = vrot.lane.b32.xlu1 %v2021_v30, %s8563_s9  ;;  %v2381_v36 = vld [vmem:[%s10800_s13 + $0x98] sm:$0xff]  ;;  %v1981_v30 = vld [vmem:[#allocation2 + $0x1] sm:$0xff] }
 0x17f   : >> { %2924 = vmatpush2.msra.mxu1 %v2383_v40  ;;  %v1932_v40 = vld [vmem:[#allocation2 + $0x28] sm:$0xff] }
 0x180   : >> { %2925 = vmatprep.subr.mxu1 %v14899_v45 }
 0x181   : >> { %2926 = vmatpush2.msra.mxu1 %v2382_v63  ;;  %v7737_v63 = vld [vmem:[%s10800_s13 + $0x1e8] sm:$0xff] }
 0x182   : >> { %2225 = vrot.lane.b32.xlu0 %v2022_v14, %s8563_s9  ;;  %2227 = vrot.lane.b32.xlu1 %v2023_v55, %s8563_s9  ;;  %v1983_v14 = vld [vmem:[#allocation2 + $0x11] sm:$0xff]  ;;  %v2378_v55 = vld [vmem:[%s10800_s13 + $0x80] sm:$0xff] }
 0x183   : >> { %2927 = vmatprep.subr.mxu1 %v14899_v45 }
 0x184   : >> { %2928 = vmatpush2.msra.mxu1 %v2381_v36 }
 0x185   : >> { %2929 = vmatprep.subr.mxu1 %v14899_v45 }
 0x186   : >> { %2229 = vrot.lane.b32.xlu0 %v2024_v23, %s8563_s9  ;;  %2231 = vrot.lane.b32.xlu1 %v2025_v3, %s8563_s9  ;;  %v7739_v3 = vld [vmem:[%s10800_s13 + $0x1f8] sm:$0xff] }
 0x187   : >> { %2930 = vmatpush2.msra.mxu1 %v2380_v53  ;;  %v10975_v53 = vld [vmem:[#allocation2 + $0x32] sm:$0xff] }
 0x188   : >> { %2931 = vmatprep.subr.mxu1 %v14899_v45 }
 0x189   : >> { %2932 = vmatpush2.msra.mxu1 %v2379_v5  ;;  %v1933_v5 = vld [vmem:[#allocation2 + $0x30] sm:$0xff] }
 0x18a   : >> { %2233 = vrot.lane.b32.xlu0 %v2026_v39, %s8563_s9  ;;  %2235 = vrot.lane.b32.xlu1 %v2027_v49, %s8563_s9  ;;  %v1931_v49 = vld [vmem:[#allocation2 + $0x20] sm:$0xff] }
 0x18b   : >> { %2933 = vmatprep.subr.mxu1 %v14899_v45 }
 0x18c   : >> { %2934 = vmatpush2.msra.mxu1 %v2378_v55  ;;  %v7734_v55 = vld [vmem:[%s10800_s13 + $0x1d0] sm:$0xff] }
 0x18d   : >> { %4341 = vmatprep.subr.mxu1 %v14899_v45 }
 0x18e   : >> { %2237 = vrot.lane.b32.xlu0 %v2028_v26, %s8563_s9  ;;  %2239 = vrot.lane.b32.xlu1 %v2029_v52, %s8563_s9  ;;  %v10960_v52 = vld [vmem:[#allocation2 + $0x2a] sm:$0xff] }
 0x192   : >> { %2241 = vrot.lane.b32.xlu0 %v2030_v0, %s8563_s9  ;;  %2243 = vrot.lane.b32.xlu1 %v2031_v11, %s8563_s9  ;;  %v7736_v11 = vld [vmem:[%s10800_s13 + $0x1e0] sm:$0xff] }
 0x196   : >> { %2143 = vrot.lane.b32.xlu0 %v1981_v30, %s8563_s9  ;;  %2145 = vrot.lane.b32.xlu1 %v1982_v7, %s8563_s9 }
 0x19a   : >> { %2147 = vrot.lane.b32.xlu0 %v1983_v14, %s8563_s9  ;;  %v7735_v14 = vld [vmem:[%s10800_s13 + $0x1d8] sm:$0xff] }
 0x1a8   : >> { %v2150_v23 = vpop.permute.xlu0 %2149  ;;  %v2154_v56 = vpop.permute.xlu1 %2153 }
 0x1a9   : >> { %v10954_v39 = vsel %vm15740_vm2, %v1930_v46, %v2150_v23  ;;  %v10973_v36 = vsel %vm15740_vm2, %v1932_v40, %v2154_v56  ;;  %v10987_v56 = vld [vmem:[#allocation2 + $0x3a] sm:$0xff] }
 0x1aa   : >> { %2622 = vmatmul.mubr.f32.vlgmr.msra.gmra.mxu0 %v10954_v39 }
 0x1ab   : >> { %3213 = vmatpush1.msra.mxu0 %v7739_v3  ;;  %7628 = vmatprep.mubr.msk.f32.mxu0 %vm15741_vm11, %v10951_v35  ;;  %vm15744_vm11 = vmmov %vm15740_vm2 }
 0x1ac   : >> { %v2152_v51 = vpop.permute.xlu0 %2151  ;;  %v2156_v26 = vpop.permute.xlu1 %2155  ;;  %3214 = vmatprep.subr.mxu0 %v14899_v45 }
 0x1ad   : >> { %v10965_v0 = vsel %vm15742_vm3, %v1931_v49, %v2152_v51  ;;  %3215 = vmatpush1.msra.mxu0 %v7738_v6  ;;  %vm15745_vm3 = vmmov %vm15740_vm2  ;;  %v1934_v49 = vld [vmem:[#allocation2 + $0x38] sm:$0xff]  ;;  %v7733_v6 = vld [vmem:[%s10800_s13 + $0x1c8] sm:$0xff] }
 0x1ae   : >> { %2627 = vmatmul.mubr.f32.gmra.mxu0 %v10965_v0  ;;  %3216 = vmatprep.subr.mxu0 %v14899_v45  ;;  %v10985_v46 = vsel %vm15745_vm3, %v1933_v5, %v2156_v26  ;;  %v7732_v51 = vld [vmem:[%s10800_s13 + $0x1c0] sm:$0xff]  ;;  %vm15748_vm3 = vmmov %vm15740_vm2 }
 0x1af   : >> { %7629 = vmatprep.mubr.msk.f32.mxu0 %vm15743_vm6, %v10960_v52  ;;  %3217 = vmatpush1.msra.mxu0 %v7737_v63  ;;  %vm15746_vm6 = vmmov %vm15740_vm2  ;;  %v1935_v5 = vld [vmem:[#allocation2 + $0x40] sm:$0xff] }
 0x1b0   : >> { %v2158_v30 = vpop.permute.xlu0 %2157  ;;  %v2160_v7 = vpop.permute.xlu1 %2159  ;;  %3218 = vmatprep.subr.mxu0 %v14899_v45 }
 0x1b1   : >> { %3219 = vmatpush1.msra.mxu0 %v7736_v11  ;;  %v10997_v26 = vsel %vm15740_vm2, %v1934_v49, %v2158_v30  ;;  %v11001_v11 = vld [vmem:[#allocation2 + $0x42] sm:$0xff]  ;;  %v11011_v30 = vsel %vm15748_vm3, %v1935_v5, %v2160_v7  ;;  %vm15751_vm3 = vmmov %vm15740_vm2 }
 0x1b2   : >> { %2632 = vmatmul.mubr.f32.gmra.mxu0 %v10973_v36  ;;  %3220 = vmatprep.subr.mxu0 %v14899_v45  ;;  %v7728_v7 = vld [vmem:[%s10800_s13 + $0x1a0] sm:$0xff] }
 0x1b3   : >> { %7630 = vmatprep.mubr.msk.f32.mxu0 %vm15744_vm11, %v10975_v53  ;;  %3221 = vmatpush1.msra.mxu0 %v7735_v14  ;;  %v7731_v14 = vld [vmem:[%s10800_s13 + $0x1b8] sm:$0xff]  ;;  %vm15747_vm11 = vmmov %vm15740_vm2 }
 0x1b4   : >> { %v2162_v23 = vpop.permute.xlu0 %2161  ;;  %v2164_v3 = vpop.permute.xlu1 %2163  ;;  %3222 = vmatprep.subr.mxu0 %v14899_v45 }
 0x1b5   : >> { %3223 = vmatpush1.msra.mxu0 %v7734_v55  ;;  %v7730_v55 = vld [vmem:[%s10800_s13 + $0x1b0] sm:$0xff] }
 0x1b6   : >> { %2637 = vmatmul.mubr.f32.gmra.mxu0 %v10985_v46  ;;  %3224 = vmatprep.subr.mxu0 %v14899_v45 }
 0x1b7   : >> { %7631 = vmatprep.mubr.msk.f32.mxu0 %vm15746_vm6, %v10987_v56  ;;  %3225 = vmatpush1.msra.mxu0 %v7733_v6  ;;  %vm15749_vm6 = vmmov %vm15740_vm2 }
 0x1b8   : >> { %v2166_v40 = vpop.permute.xlu0 %2165  ;;  %v10999_v63 = vpop.permute.xlu1 %2167  ;;  %3226 = vmatprep.subr.mxu0 %v14899_v45 }
 0x1b9   : >> { %3227 = vmatpush1.msra.mxu0 %v7732_v51  ;;  %v1936_v51 = vld [vmem:[#allocation2 + $0x48] sm:$0xff] }
 0x1ba   : >> { %2642 = vmatmul.mubr.f32.gmra.mxu0 %v10997_v26  ;;  %3228 = vmatprep.subr.mxu0 %v14899_v45  ;;  %v11027_v5 = vsel %vm15740_vm2, %v1936_v51, %v2162_v23  ;;  %v7726_v23 = vld [vmem:[%s10800_s13 + $0x190] sm:$0xff] }
 0x1bb   : >> { %7632 = vmatprep.mubr.msk.f32.mxu0 %vm15747_vm11, %v11001_v11  ;;  %3229 = vmatpush1.msra.mxu0 %v7731_v14  ;;  %vm15750_vm11 = vmmov %vm15740_vm2 }
 0x1bc   : >> { %v11013_v49 = vpop.permute.xlu0 %2169  ;;  %v11015_v6 = vpop.permute.xlu1 %2171  ;;  %3230 = vmatprep.subr.mxu0 %v14899_v45 }
 0x1bd   : >> { %3231 = vmatpush1.msra.mxu0 %v7730_v55  ;;  %v1937_v55 = vld [vmem:[#allocation2 + $0x50] sm:$0xff] }
 0x1be   : >> { %2647 = vmatmul.mubr.f32.gmra.mxu0 %v11011_v30  ;;  %3232 = vmatprep.subr.mxu0 %v14899_v45 }
 0x1bf   : >> { %7633 = vmatprep.mubr.msk.f32.mxu0 %vm15749_vm6, %v11017_v9  ;;  %3233 = vmatpush1.msra.mxu0 %v7729_v57  ;;  %v11043_v57 = vsel %vm15751_vm3, %v1937_v55, %v2164_v3  ;;  %v7724_v3 = vld [vmem:[%s10800_s13 + $0x180] sm:$0xff]  ;;  %vm15752_vm6 = vmmov %vm15740_vm2 }
 0x1c0   : >> { %v11029_v14 = vpop.permute.xlu0 %2173  ;;  %v11031_v54 = vpop.permute.xlu1 %2175  ;;  %3234 = vmatprep.subr.mxu0 %v14899_v45  ;;  %vm15754_vm3 = vmmov %vm15740_vm2 }
 0x1c1   : >> { %3235 = vmatpush1.msra.mxu0 %v7728_v7  ;;  %v1938_v7 = vld [vmem:[#allocation2 + $0x58] sm:$0xff] }
 0x1c2   : >> { %2652 = vmatmul.mubr.f32.gmra.mxu0 %v11027_v5  ;;  %3236 = vmatprep.subr.mxu0 %v14899_v45 }
 0x1c3   : >> { %7634 = vmatprep.mubr.msk.f32.mxu0 %vm15750_vm11, %v11033_v24  ;;  %3237 = vmatpush1.msra.mxu0 %v7727_v8  ;;  %v11059_v8 = vsel %vm15740_vm2, %v1938_v7, %v2166_v40  ;;  %v7746_v40 = vld [vmem:[%s10800_s13 + $0x230] sm:$0xff]  ;;  %vm15753_vm11 = vmmov %vm15740_vm2  ;;  %v1940_v7 = vld [vmem:[#allocation2 + $0x68] sm:$0xff] }
 0x1c4   : >> { %v11045_v51 = vpop.permute.xlu0 %2177  ;;  %v11047_v4 = vpop.permute.xlu1 %2179  ;;  %3238 = vmatprep.subr.mxu0 %v14899_v45 }
 0x1c5   : >> { %3239 = vmatpush1.msra.mxu0 %v7726_v23  ;;  %v1939_v23 = vld [vmem:[#allocation2 + $0x60] sm:$0xff] }
 0x1c6   : >> { %2657 = vmatmul.mubr.f32.gmra.mxu0 %v11043_v57  ;;  %3240 = vmatprep.subr.mxu0 %v14899_v45 }
 0x1c7   : >> { %7635 = vmatprep.mubr.msk.f32.mxu0 %vm15752_vm6, %v11049_v16  ;;  %3241 = vmatpush1.msra.mxu0 %v7725_v27  ;;  %v11076_v27 = vsel %vm15754_vm3, %v1939_v23, %v10999_v63  ;;  %v7744_v63 = vld [vmem:[%s10800_s13 + $0x220] sm:$0xff]  ;;  %vm15755_vm6 = vmmov %vm15740_vm2  ;;  %v1941_v23 = vld [vmem:[#allocation2 + $0x70] sm:$0xff] }
 0x1c8   : >> { %v11061_v55 = vpop.permute.xlu0 %2181  ;;  %v11063_v18 = vpop.permute.xlu1 %2183  ;;  %3242 = vmatprep.subr.mxu0 %v14899_v45  ;;  %vm15757_vm3 = vmmov %vm15740_vm2 }
 0x1c9   : >> { %3243 = vmatpush1.msra.mxu0 %v7724_v3  ;;  %v11082_v3 = vld [vmem:[#allocation2 + $0x6a] sm:$0xff] }
 0x1ca   : >> { %2662 = vmatmul.mubr.f32.gmra.mxu0 %v11059_v8  ;;  %3260 = vmatprep.subr.mxu0 %v14899_v45 }
 0x1cb   : >> { %7636 = vmatprep.mubr.msk.f32.mxu0 %vm15753_vm11, %v11065_v33  ;;  %3261 = vmatpush2.msra.mxu0 %v7747_v25  ;;  %v11091_v25 = vsel %vm15755_vm6, %v1940_v7, %v11013_v49  ;;  %v7742_v49 = vld [vmem:[%s10800_s13 + $0x210] sm:$0xff]  ;;  %vm15756_vm11 = vmmov %vm15740_vm2 }
 0x1cc   : >> { %v11078_v58 = vpop.permute.xlu0 %2185  ;;  %v11080_v47 = vpop.permute.xlu1 %2187  ;;  %3262 = vmatprep.subr.mxu0 %v14899_v45  ;;  %v11108_v7 = vsel %vm15756_vm11, %v1941_v23, %v11015_v6  ;;  %vm15758_vm6 = vmmov %vm15740_vm2 }
 0x1cd   : >> { %3263 = vmatpush2.msra.mxu0 %v7746_v40  ;;  %v11099_v40 = vld [vmem:[#allocation2 + $0x72] sm:$0xff]  ;;  %vm15759_vm11 = vmmov %vm15740_vm2 }
 0x1ce   : >> { %2667 = vmatmul.mubr.f32.gmra.mxu0 %v11076_v27  ;;  %3264 = vmatprep.subr.mxu0 %v14899_v45 }
 0x1cf   : >> { %7637 = vmatprep.mubr.msk.f32.mxu0 %vm15740_vm2, %v11082_v3  ;;  %3265 = vmatpush2.msra.mxu0 %v7745_v41  ;;  %v1942_v41 = vld [vmem:[#allocation2 + $0x78] sm:$0xff] }
 0x1d0   : >> { %v11095_v42 = vpop.permute.xlu0 %2189  ;;  %v11097_v22 = vpop.permute.xlu1 %2191  ;;  %3266 = vmatprep.subr.mxu0 %v14899_v45  ;;  %v11123_v6 = vsel %vm15758_vm6, %v1942_v41, %v11029_v14  ;;  %v1944_v14 = vld [vmem:[#allocation2 + $0x88] sm:$0xff]  ;;  %vm15762_vm6 = vmmov %vm15740_vm2 }
 0x1d1   : >> { %3267 = vmatpush2.msra.mxu0 %v7744_v63  ;;  %v11116_v63 = vld [vmem:[#allocation2 + $0x7a] sm:$0xff] }
 0x1d2   : >> { %2672 = vmatmul.mubr.f32.gmra.mxu0 %v11091_v25  ;;  %3268 = vmatprep.subr.mxu0 %v14899_v45 }
 0x1d3   : >> { %7638 = vmatprep.mubr.msk.f32.mxu0 %vm15757_vm3, %v11099_v40  ;;  %3269 = vmatpush2.msra.mxu0 %v7743_v31  ;;  %v1943_v31 = vld [vmem:[#allocation2 + $0x80] sm:$0xff]  ;;  %vm15760_vm3 = vmmov %vm15740_vm2 }
 0x1d4   : >> { %v11112_v28 = vpop.permute.xlu0 %2193  ;;  %v11114_v60 = vpop.permute.xlu1 %2195  ;;  %3270 = vmatprep.subr.mxu0 %v14899_v45 }
 0x1d5   : >> { %3271 = vmatpush2.msra.mxu0 %v7742_v49  ;;  %v7741_v49 = vld [vmem:[%s10800_s13 + $0x208] sm:$0xff] }
 0x1d6   : >> { %2677 = vmatmul.mubr.f32.gmra.mxu0 %v11108_v7  ;;  %3272 = vmatprep.subr.mxu0 %v14899_v45  ;;  %v11137_v45 = vsel %vm15759_vm11, %v1943_v31, %v11031_v54  ;;  %v11151_v54 = vsel %vm15762_vm6, %v1944_v14, %v11045_v51  ;;  %v1945_v31 = vld [vmem:[#allocation2 + $0x90] sm:$0xff]  ;;  %vm15763_vm11 = vmmov %vm15740_vm2  ;;  %v1946_v51 = vld [vmem:[#allocation2 + $0x98] sm:$0xff] }
 0x1d7   : >> { %7639 = vmatprep.mubr.msk.f32.mxu0 %vm15740_vm2, %v11116_v63  ;;  %3273 = vmatpush2.msra.mxu0 %v7741_v49  ;;  %v11165_v17 = vsel %vm15763_vm11, %v1945_v31, %v11047_v4  ;;  %vm15767_vm6 = vmmov %vm15740_vm2  ;;  %v1947_v4 = vld [vmem:[#allocation2 + $0xa0] sm:$0xff] }
 0x1d8   : >> { %v11127_v23 = vpop.permute.xlu0 %2197  ;;  %v11129_v38 = vpop.permute.xlu1 %2199  ;;  %3274 = vmatprep.subr.mxu0 %v15761_v12  ;;  %15764 = vst [vmem:[#allocation81_spill] sm:$0xff] %v11165_v17  ;;  %v11179_v32 = vsel %vm15767_vm6, %v1946_v51, %v11061_v55  ;;  %vm15770_vm11 = vmmov %vm15740_vm2  ;;  %v1948_v55 = vld [vmem:[#allocation2 + $0xa8] sm:$0xff] }
 0x1d9   : >> { %3275 = vmatpush2.msra.mxu0 %v7740_v20  ;;  %15768 = vst [vmem:[#allocation83_spill] sm:$0xff] %v11179_v32  ;;  %v11192_v2 = vsel %vm15770_vm11, %v1947_v4, %v11063_v18  ;;  %vm15774_vm6 = vmmov %vm15740_vm2  ;;  %v1949_v18 = vld [vmem:[#allocation2 + $0xb0] sm:$0xff] }
 0x1da   : >> { %2682 = vmatmul.mubr.f32.gmra.mxu0 %v11123_v6  ;;  %4655 = vmatprep.subr.mxu0 %v15761_v12  ;;  %15771 = vst [vmem:[#allocation85_spill] sm:$0xff] %v11192_v2  ;;  %v11205_v43 = vsel %vm15774_vm6, %v1948_v55, %v11078_v58  ;;  %vm15777_vm11 = vmmov %vm15740_vm2  ;;  %v1950_v58 = vld [vmem:[#allocation2 + $0xb8] sm:$0xff] }
 0x1db   : >> { %7640 = vmatprep.mubr.msk.f32.mxu0 %vm15760_vm3, %v11131_v21  ;;  %vm15765_vm3 = vmmov %vm15740_vm2  ;;  %15775 = vst [vmem:[#allocation87_spill] sm:$0xff] %v11205_v43  ;;  %v11218_v19 = vsel %vm15777_vm11, %v1949_v18, %v11080_v47  ;;  %v11226_v12 = vld [vmem:[#allocation2 + $0xba] sm:$0xff] }
 0x1dc   : >> { %v11141_v41 = vpop.permute.xlu0 %2201  ;;  %v11143_v29 = vpop.permute.xlu1 %2203  ;;  %15778 = vst [vmem:[#allocation89_spill] sm:$0xff] %v11218_v19  ;;  %15780 = vst [vmem:[#allocation90_spill] sm:$0xff] %v11226_v12  ;;  %v1951_v47 = vld [vmem:[#allocation2 + $0xc0] sm:$0xff] }
 0x1dd   : >> { %vm15781_vm6 = vmmov %vm15740_vm2 }
 0x1de   : >> { %2687 = vmatmul.mubr.f32.gmra.mxu0 %v11137_v45  ;;  %vm15784_vm11 = vmmov %vm15740_vm2 }
 0x1df   : >> { %7641 = vmatprep.mubr.msk.f32.mxu0 %vm15740_vm2, %v11145_v13 }
 0x1e0   : >> { %v11155_v49 = vpop.permute.xlu0 %2205  ;;  %v11157_v59 = vpop.permute.xlu1 %2207 }
 0x1e2   : >> { %2692 = vmatmul.mubr.f32.gmra.mxu0 %v11151_v54 }
 0x1e3   : >> { %7642 = vmatprep.mubr.msk.f32.mxu0 %vm15765_vm3, %v11159_v62  ;;  %vm15772_vm3 = vmmov %vm15740_vm2 }
 0x1e4   : >> { %v11169_v14 = vpop.permute.xlu0 %2209  ;;  %v11171_v37 = vpop.permute.xlu1 %2211 }
 0x1e6   : >> { %2697 = vmatmul.mubr.f32.gmra.mxu0 %v11165_v17  ;;  %v11299_v17 = vld [vmem:[#allocation2 + $0xea] sm:$0xff] }
 0x1e7   : >> { %7643 = vmatprep.mubr.msk.f32.mxu0 %vm15740_vm2, %v11173_v44  ;;  %v11287_v44 = vld [vmem:[#allocation2 + $0xe2] sm:$0xff] }
 0x1e8   : >> { %v11183_v20 = vpop.permute.xlu0 %2213  ;;  %v11185_v31 = vpop.permute.xlu1 %2215 }
 0x1ea   : >> { %2702 = vmatmul.mubr.f32.gmra.mxu0 %v11179_v32 }
 0x1eb   : >> { %7644 = vmatprep.mubr.msk.f32.mxu0 %vm15772_vm3, %v11187_v1  ;;  %vm15779_vm3 = vmmov %vm15740_vm2 }
 0x1ec   : >> { %v11196_v51 = vpop.permute.xlu0 %2217  ;;  %v11198_v34 = vpop.permute.xlu1 %2219 }
 0x1ee   : >> { %2707 = vmatmul.mubr.f32.gmra.mxu0 %v11192_v2  ;;  %v11244_v2 = vsel %vm15784_vm11, %v1951_v47, %v11097_v22  ;;  %v1953_v22 = vld [vmem:[#allocation2 + $0xd0] sm:$0xff]  ;;  %vm15794_vm11 = vmmov %vm15740_vm2 }
 0x1ef   : >> { %7645 = vmatprep.mubr.msk.f32.mxu0 %vm15740_vm2, %v11200_v10  ;;  %v11231_v10 = vsel %vm15781_vm6, %v1950_v58, %v11095_v42  ;;  %15785 = vst [vmem:[#allocation93_spill] sm:$0xff] %v11244_v2  ;;  %v1952_v42 = vld [vmem:[#allocation2 + $0xc8] sm:$0xff]  ;;  %vm15789_vm6 = vmmov %vm15740_vm2  ;;  %v11270_v32 = vsel %vm15794_vm11, %v1953_v22, %v11114_v60 }
 0x1f0   : >> { %v11209_v4 = vpop.permute.xlu0 %2221  ;;  %v11211_v15 = vpop.permute.xlu1 %2223  ;;  %15782 = vst [vmem:[#allocation91_spill] sm:$0xff] %v11231_v10  ;;  %v11257_v1 = vsel %vm15789_vm6, %v1952_v42, %v11112_v28  ;;  %15795 = vst [vmem:[#allocation100_spill] sm:$0xff] %v11270_v32  ;;  %v1954_v28 = vld [vmem:[#allocation2 + $0xd8] sm:$0xff] }
 0x1f1   : >> { %15790 = vst [vmem:[#allocation96_spill] sm:$0xff] %v11257_v1  ;;  %vm15800_vm6 = vmmov %vm15740_vm2 }
 0x1f2   : >> { %2712 = vmatmul.mubr.f32.gmra.mxu0 %v11205_v43  ;;  %v11239_v43 = vld [vmem:[#allocation2 + $0xc2] sm:$0xff]  ;;  %vm15801_vm11 = vmmov %vm15740_vm2 }
 0x1f3   : >> { %7646 = vmatprep.mubr.msk.f32.mxu0 %vm15779_vm3, %v11213_v61  ;;  %15783 = vst [vmem:[#allocation92_spill] sm:$0xff] %v11239_v43  ;;  %vm15786_vm3 = vmmov %vm15740_vm2 }
 0x1f4   : >> { %v11222_v55 = vpop.permute.xlu0 %2225  ;;  %v11224_v48 = vpop.permute.xlu1 %2227 }
 0x1f6   : >> { %2717 = vmatmul.mubr.f32.gmra.mxu0 %v11218_v19  ;;  %v11252_v19 = vld [vmem:[#allocation2 + $0xca] sm:$0xff] }
 0x1f7   : >> { %7647 = vmatprep.mubr.msk.f32.mxu0 %vm15740_vm2, %v11226_v12  ;;  %15788 = vst [vmem:[#allocation95_spill] sm:$0xff] %v11252_v19 }
 0x1f8   : >> { %v11235_v18 = vpop.permute.xlu0 %2229  ;;  %v11237_v61 = vpop.permute.xlu1 %2231 }
 0x1fa   : >> { %2722 = vmatmul.mubr.f32.gmra.mxu0 %v11231_v10  ;;  %v11265_v10 = vld [vmem:[#allocation2 + $0xd2] sm:$0xff] }
 0x1fb   : >> { %7648 = vmatprep.mubr.msk.f32.mxu0 %vm15786_vm3, %v11239_v43  ;;  %15793 = vst [vmem:[#allocation99_spill] sm:$0xff] %v11265_v10  ;;  %vm15796_vm3 = vmmov %vm15740_vm2 }
 0x1fc   : >> { %v11248_v58 = vpop.permute.xlu0 %2233  ;;  %v11250_v12 = vpop.permute.xlu1 %2235 }
 0x1fd   : >> { %15787 = vst [vmem:[#allocation94_spill] sm:$0xff] %v11250_v12  ;;  %v1929_v12 = vld [vmem:[#allocation2 + $0x10] sm:$0xff] }
 0x1fe   : >> { %2727 = vmatmul.mubr.f32.gmra.mxu0 %v11244_v2  ;;  %v11278_v2 = vld [vmem:[#allocation2 + $0xda] sm:$0xff] }
 0x1ff   : >> { %7649 = vmatprep.mubr.msk.f32.mxu0 %vm15740_vm2, %v11252_v19  ;;  %15799 = vst [vmem:[#allocation103_spill] sm:$0xff] %v11278_v2 }
 0x200   : >> { %v11261_v47 = vpop.permute.xlu0 %2237  ;;  %v11263_v43 = vpop.permute.xlu1 %2239 }
 0x201   : >> { %15791 = vst [vmem:[#allocation97_spill] sm:$0xff] %v11261_v47  ;;  %15792 = vst [vmem:[#allocation98_spill] sm:$0xff] %v11263_v43  ;;  %v1927_v43 = vld [vmem:[#allocation2] sm:$0xff] }
 0x202   : >> { %2732 = vmatmul.mubr.f32.gmra.mxu0 %v11257_v1  ;;  %v11283_v1 = vsel %vm15800_vm6, %v1954_v28, %v11127_v23  ;;  %v1955_v47 = vld [vmem:[#allocation2 + $0xe0] sm:$0xff]  ;;  %v1956_v23 = vld [vmem:[#allocation2 + $0xe8] sm:$0xff]  ;;  %vm15803_vm6 = vmmov %vm15740_vm2 }
 0x203   : >> { %7650 = vmatprep.mubr.msk.f32.mxu0 %vm15796_vm3, %v11265_v10  ;;  %v1928_v10 = vld [vmem:[#allocation2 + $0x8] sm:$0xff]  ;;  %vm15802_vm3 = vmmov %vm15740_vm2 }
 0x204   : >> { %v11274_v42 = vpop.permute.xlu0 %2241  ;;  %v11276_v19 = vpop.permute.xlu1 %2243 }
 0x205   : >> { %15797 = vst [vmem:[#allocation101_spill] sm:$0xff] %v11274_v42  ;;  %15798 = vst [vmem:[#allocation102_spill] sm:$0xff] %v11276_v19  ;;  %v2036_v42 = vld [vmem:[#allocation2 + $0xa] sm:$0xff] }
 0x206   : >> { %2737 = vmatmul.mubr.f32.gmra.mxu0 %v11270_v32  ;;  %v11293_v32 = vsel %vm15802_vm3, %v1955_v47, %v11129_v38  ;;  %vm15806_vm3 = vmmov %vm15740_vm2  ;;  %v11310_v47 = vld [vmem:[#allocation2 + $0xf2] sm:$0xff] }
 0x207   : >> { %7651 = vmatprep.mubr.msk.f32.mxu0 %vm15740_vm2, %v11278_v2 }
 0x208   : >> { %v2144_v60 = vpop.permute.xlu0 %2143  ;;  %v2146_v22 = vpop.permute.xlu1 %2145 }
 0x209   : >> { %v2305_v19 = vsel %vm15801_vm11, %v1927_v43, %v2144_v60  ;;  %v2306_v28 = vsel %vm15803_vm6, %v1928_v10, %v2146_v22  ;;  %v2037_v43 = vld [vmem:[#allocation2 + $0x12] sm:$0xff]  ;;  %vm15805_vm11 = vmmov %vm15740_vm2  ;;  %v11333_v60 = vld [vmem:[#allocation2 + $0x102] sm:$0xff] }
 0x20a   : >> { %2742 = vmatmul.mubr.f32.gmra.mxu0 %v11283_v1  ;;  %2936 = vmatmul.mubr.f32.vlgmr.msra.gmra.mxu1 %v2305_v19  ;;  %v11304_v19 = vsel %vm15805_vm11, %v1956_v23, %v11141_v41  ;;  %vm15807_vm6 = vmmov %vm15740_vm2  ;;  %v1957_v10 = vld [vmem:[#allocation2 + $0xf0] sm:$0xff]  ;;  %v11381_v23 = vld [vmem:[#allocation2 + $0x122] sm:$0xff] }
 0x20b   : >> { %7652 = vmatprep.mubr.msk.f32.mxu0 %vm15740_vm2, %v11287_v44  ;;  %7676 = vmatprep.mubr.msk.f32.mxu1 %vm15804_vm7, %v2036_v42  ;;  %vm15808_vm7 = vmmov %vm15740_vm2 }
 0x20c   : >> { %v2148_v2 = vpop.permute.xlu0 %2147  ;;  %v11315_v42 = vsel %vm15808_vm7, %v1957_v10, %v11143_v29  ;;  %vm15809_vm11 = vmmov %vm15740_vm2  ;;  %v1959_v29 = vld [vmem:[#allocation2 + $0x100] sm:$0xff] }
 0x20d   : >> { %v2307_v38 = vsel %vm15806_vm3, %v1929_v12, %v2148_v2  ;;  %vm15810_vm3 = vmmov %vm15740_vm2  ;;  %v1958_v2 = vld [vmem:[#allocation2 + $0xf8] sm:$0xff]  ;;  %v2033_v10 = vld [vmem:[#allocation2 + $0x1a1] sm:$0xff] }
 0x20e   : >> { %2747 = vmatmul.mubr.f32.gmra.mxu0 %v11293_v32  ;;  %2941 = vmatmul.mubr.f32.gmra.mxu1 %v2306_v28  ;;  %v11321_v12 = vld [vmem:[#allocation2 + $0xfa] sm:$0xff]  ;;  %vm15812_vm7 = vmmov %vm15740_vm2 }
 0x20f   : >> { %7653 = vmatprep.mubr.msk.f32.mxu0 %vm15807_vm6, %v11299_v17  ;;  %7677 = vmatprep.mubr.msk.f32.mxu1 %vm15740_vm2, %v2037_v43  ;;  %vm15811_vm6 = vmmov %vm15740_vm2  ;;  %v2032_v28 = vld [vmem:[#allocation2 + $0x199] sm:$0xff]  ;;  %v1964_v43 = vld [vmem:[#allocation2 + $0x128] sm:$0xff] }
 0x210   : >> { %v11327_v41 = vsel %vm15811_vm6, %v1958_v2, %v11155_v49  ;;  %vm15815_vm6 = vmmov %vm15740_vm2  ;;  %v11345_v49 = vld [vmem:[#allocation2 + $0x10a] sm:$0xff]  ;;  %2245 = vrot.lane.b32.xlu1 %v2032_v28, %s8563_s9  ;;  %2247 = vrot.lane.b32.xlu0 %v2033_v10, %s8563_s9  ;;  %v11432_v28 = vld [vmem:[#allocation2 + $0x142] sm:$0xff] }
 0x211   : >> { %v1965_v2 = vld [vmem:[#allocation2 + $0x130] sm:$0xff]  ;;  %15833 = vst [vmem:[#allocation105_spill] sm:$0xff] %v11432_v28 }
 0x212   : >> { %2752 = vmatmul.mubr.f32.gmra.mxu0 %v11304_v19  ;;  %2946 = vmatmul.mubr.f32.gmra.mxu1 %v2307_v38  ;;  %v11394_v38 = vld [vmem:[#allocation2 + $0x12a] sm:$0xff] }
 0x213   : >> { %7654 = vmatprep.mubr.msk.f32.mxu0 %vm15809_vm11, %v11310_v47  ;;  %7678 = vmatprep.mubr.msk.f32.mxu1 %vm15810_vm3, %v10824_v50  ;;  %vm15813_vm11 = vmmov %vm15740_vm2  ;;  %v11444_v10 = vld [vmem:[#allocation2 + $0x14a] sm:$0xff] }
 0x214   : >> { %v11339_v50 = vsel %vm15813_vm11, %v1959_v29, %v11157_v59  ;;  %vm15814_vm3 = vmmov %vm15740_vm2  ;;  %v1961_v59 = vld [vmem:[#allocation2 + $0x110] sm:$0xff]  ;;  %15838 = vst [vmem:[#allocation107_spill] sm:$0xff] %v11444_v10 }
 0x215   : >> { %vm15817_vm11 = vmmov %vm15740_vm2  ;;  %v11407_v29 = vld [vmem:[#allocation2 + $0x132] sm:$0xff] }
 0x216   : >> { %2757 = vmatmul.mubr.f32.gmra.mxu0 %v11315_v42  ;;  %2951 = vmatmul.mubr.f32.gmra.mxu1 %v10954_v39  ;;  %v1960_v39 = vld [vmem:[#allocation2 + $0x108] sm:$0xff] }
 0x217   : >> { %7655 = vmatprep.mubr.msk.f32.mxu0 %vm15740_vm2, %v11321_v12  ;;  %7679 = vmatprep.mubr.msk.f32.mxu1 %vm15812_vm7, %v10951_v35  ;;  %v11351_v35 = vsel %vm15740_vm2, %v1960_v39, %v11169_v14  ;;  %vm15816_vm7 = vmmov %vm15740_vm2  ;;  %v11369_v14 = vld [vmem:[#allocation2 + $0x11a] sm:$0xff]  ;;  %v2034_v39 = vld [vmem:[#allocation2 + $0x1a9] sm:$0xff] }
 0x218   : >> { %2249 = vrot.lane.b32.xlu1 %v2034_v39, %s8563_s9  ;;  %v11456_v39 = vld [vmem:[#allocation2 + $0x152] sm:$0xff] }
 0x219   : >> { %15842 = vst [vmem:[#allocation109_spill] sm:$0xff] %v11456_v39 }
 0x21a   : >> { %2762 = vmatmul.mubr.f32.gmra.mxu0 %v11327_v41  ;;  %2956 = vmatmul.mubr.f32.gmra.mxu1 %v10965_v0  ;;  %v11357_v0 = vld [vmem:[#allocation2 + $0x112] sm:$0xff] }
 0x21b   : >> { %7656 = vmatprep.mubr.msk.f32.mxu0 %vm15814_vm3, %v11333_v60  ;;  %7680 = vmatprep.mubr.msk.f32.mxu1 %vm15815_vm6, %v10960_v52  ;;  %vm15818_vm3 = vmmov %vm15740_vm2 }
 0x21c   : >> { %v11363_v52 = vsel %vm15818_vm3, %v1961_v59, %v11171_v37  ;;  %vm15819_vm6 = vmmov %vm15740_vm2  ;;  %v1963_v37 = vld [vmem:[#allocation2 + $0x120] sm:$0xff]  ;;  %v1966_v59 = vld [vmem:[#allocation2 + $0x138] sm:$0xff] }
 0x21d   : >> { %vm15822_vm3 = vmmov %vm15740_vm2 }
 0x21e   : >> { %2767 = vmatmul.mubr.f32.gmra.mxu0 %v11339_v50  ;;  %2961 = vmatmul.mubr.f32.gmra.mxu1 %v10973_v36  ;;  %v1962_v36 = vld [vmem:[#allocation2 + $0x118] sm:$0xff] }
 0x21f   : >> { %7657 = vmatprep.mubr.msk.f32.mxu0 %vm15816_vm7, %v11345_v49  ;;  %7681 = vmatprep.mubr.msk.f32.mxu1 %vm15817_vm11, %v10975_v53  ;;  %vm15820_vm7 = vmmov %vm15740_vm2 }
 0x220   : >> { %v11375_v22 = vsel %vm15820_vm7, %v1962_v36, %v11183_v20  ;;  %vm15821_vm11 = vmmov %vm15740_vm2  ;;  %v11420_v36 = vld [vmem:[#allocation2 + $0x13a] sm:$0xff] }
 0x221   : >> { %vm15824_vm7 = vmmov %vm15740_vm2 }
 0x222   : >> { %2772 = vmatmul.mubr.f32.gmra.mxu0 %v11351_v35  ;;  %2966 = vmatmul.mubr.f32.gmra.mxu1 %v10985_v46 }
 0x223   : >> { %7658 = vmatprep.mubr.msk.f32.mxu0 %vm15819_vm6, %v11357_v0  ;;  %7682 = vmatprep.mubr.msk.f32.mxu1 %vm15740_vm2, %v10987_v56  ;;  %vm15823_vm6 = vmmov %vm15740_vm2 }
 0x224   : >> { %v11388_v20 = vsel %vm15823_vm6, %v1963_v37, %v11185_v31  ;;  %vm15827_vm6 = vmmov %vm15740_vm2 }
 0x226   : >> { %2777 = vmatmul.mubr.f32.gmra.mxu0 %v11363_v52  ;;  %2971 = vmatmul.mubr.f32.gmra.mxu1 %v10997_v26 }
 0x227   : >> { %7659 = vmatprep.mubr.msk.f32.mxu0 %vm15821_vm11, %v11369_v14  ;;  %7683 = vmatprep.mubr.msk.f32.mxu1 %vm15822_vm3, %v11001_v11  ;;  %vm15825_vm11 = vmmov %vm15740_vm2 }
 0x228   : >> { %v11401_v31 = vsel %vm15825_vm11, %v1964_v43, %v11196_v51  ;;  %vm15826_vm3 = vmmov %vm15740_vm2  ;;  %v11414_v51 = vsel %vm15740_vm2, %v1965_v2, %v11198_v34  ;;  %v1967_v34 = vld [vmem:[#allocation2 + $0x140] sm:$0xff] }
 0x229   : >> { %vm15829_vm11 = vmmov %vm15740_vm2 }
 0x22a   : >> { %2782 = vmatmul.mubr.f32.gmra.mxu0 %v11375_v22  ;;  %2976 = vmatmul.mubr.f32.gmra.mxu1 %v11011_v30 }
 0x22b   : >> { %7660 = vmatprep.mubr.msk.f32.mxu0 %vm15740_vm2, %v11381_v23  ;;  %7684 = vmatprep.mubr.msk.f32.mxu1 %vm15824_vm7, %v11017_v9  ;;  %vm15828_vm7 = vmmov %vm15740_vm2 }
 0x22e   : >> { %2787 = vmatmul.mubr.f32.gmra.mxu0 %v11388_v20  ;;  %2981 = vmatmul.mubr.f32.gmra.mxu1 %v11027_v5 }
 0x22f   : >> { %7661 = vmatprep.mubr.msk.f32.mxu0 %vm15826_vm3, %v11394_v38  ;;  %7685 = vmatprep.mubr.msk.f32.mxu1 %vm15827_vm6, %v11033_v24  ;;  %vm15830_vm3 = vmmov %vm15740_vm2 }
 0x230   : >> { %v11426_v37 = vsel %vm15830_vm3, %v1966_v59, %v11209_v4  ;;  %vm15832_vm6 = vmmov %vm15740_vm2  ;;  %v1968_v4 = vld [vmem:[#allocation2 + $0x148] sm:$0xff] }
 0x231   : >> { %15831 = vst [vmem:[#allocation104_spill] sm:$0xff] %v11426_v37  ;;  %vm15837_vm3 = vmmov %vm15740_vm2 }
 0x232   : >> { %2792 = vmatmul.mubr.f32.gmra.mxu0 %v11401_v31  ;;  %2986 = vmatmul.mubr.f32.gmra.mxu1 %v11043_v57 }
 0x233   : >> { %7662 = vmatprep.mubr.msk.f32.mxu0 %vm15828_vm7, %v11407_v29  ;;  %7686 = vmatprep.mubr.msk.f32.mxu1 %vm15829_vm11, %v11049_v16  ;;  %vm15834_vm7 = vmmov %vm15740_vm2 }
 0x234   : >> { %v11438_v43 = vsel %vm15834_vm7, %v1967_v34, %v11211_v15  ;;  %vm15836_vm11 = vmmov %vm15740_vm2  ;;  %v1969_v15 = vld [vmem:[#allocation2 + $0x150] sm:$0xff]  ;;  %v11468_v34 = vld [vmem:[#allocation2 + $0x15a] sm:$0xff] }
 0x235   : >> { %15835 = vst [vmem:[#allocation106_spill] sm:$0xff] %v11438_v43  ;;  %vm15841_vm7 = vmmov %vm15740_vm2 }
 0x236   : >> { %2797 = vmatmul.mubr.f32.gmra.mxu0 %v11414_v51  ;;  %2991 = vmatmul.mubr.f32.gmra.mxu1 %v11059_v8  ;;  %15847 = vst [vmem:[#allocation111_spill] sm:$0xff] %v11468_v34 }
 0x237   : >> { %7663 = vmatprep.mubr.msk.f32.mxu0 %vm15832_vm6, %v11420_v36  ;;  %7687 = vmatprep.mubr.msk.f32.mxu1 %vm15740_vm2, %v11065_v33  ;;  %vm15839_vm6 = vmmov %vm15740_vm2 }
 0x238   : >> { %v11450_v2 = vsel %vm15839_vm6, %v1968_v4, %v11222_v55  ;;  %vm15846_vm6 = vmmov %vm15740_vm2  ;;  %v1970_v55 = vld [vmem:[#allocation2 + $0x158] sm:$0xff] }
 0x239   : >> { %15840 = vst [vmem:[#allocation108_spill] sm:$0xff] %v11450_v2  ;;  %v11474_v4 = vsel %vm15740_vm2, %v1970_v55, %v11235_v18  ;;  %v1972_v18 = vld [vmem:[#allocation2 + $0x168] sm:$0xff] }
 0x23a   : >> { %2802 = vmatmul.mubr.f32.gmra.mxu0 %v11426_v37  ;;  %2996 = vmatmul.mubr.f32.gmra.mxu1 %v11076_v27  ;;  %15848 = vst [vmem:[#allocation112_spill] sm:$0xff] %v11474_v4  ;;  %v11492_v55 = vld [vmem:[#allocation2 + $0x16a] sm:$0xff] }
 0x23b   : >> { %7664 = vmatprep.mubr.msk.f32.mxu0 %vm15836_vm11, %v11432_v28  ;;  %7688 = vmatprep.mubr.msk.f32.mxu1 %vm15837_vm3, %v11082_v3  ;;  %vm15843_vm11 = vmmov %vm15740_vm2  ;;  %15855 = vst [vmem:[#allocation115_spill] sm:$0xff] %v11492_v55  ;;  %v15883_v28 = vld [vmem:[#allocation87_spill] sm:$0xff] }
 0x23c   : >> { %v11462_v59 = vsel %vm15843_vm11, %v1969_v15, %v11224_v48  ;;  %vm15845_vm3 = vmmov %vm15740_vm2  ;;  %v1971_v48 = vld [vmem:[#allocation2 + $0x160] sm:$0xff] }
 0x23d   : >> { %15844 = vst [vmem:[#allocation110_spill] sm:$0xff] %v11462_v59  ;;  %vm15850_vm11 = vmmov %vm15740_vm2  ;;  %v11480_v15 = vld [vmem:[#allocation2 + $0x162] sm:$0xff] }
 0x23e   : >> { %2807 = vmatmul.mubr.f32.gmra.mxu0 %v11438_v43  ;;  %3001 = vmatmul.mubr.f32.gmra.mxu1 %v11091_v25  ;;  %15851 = vst [vmem:[#allocation113_spill] sm:$0xff] %v11480_v15 }
 0x23f   : >> { %7665 = vmatprep.mubr.msk.f32.mxu0 %vm15740_vm2, %v11444_v10  ;;  %7689 = vmatprep.mubr.msk.f32.mxu1 %vm15841_vm7, %v11099_v40  ;;  %vm15849_vm7 = vmmov %vm15740_vm2  ;;  %v15876_v10 = vld [vmem:[#allocation85_spill] sm:$0xff] }
 0x242   : >> { %2812 = vmatmul.mubr.f32.gmra.mxu0 %v11450_v2  ;;  %3006 = vmatmul.mubr.f32.gmra.mxu1 %v11108_v7 }
 0x243   : >> { %7666 = vmatprep.mubr.msk.f32.mxu0 %vm15845_vm3, %v11456_v39  ;;  %7690 = vmatprep.mubr.msk.f32.mxu1 %vm15846_vm6, %v11116_v63  ;;  %vm15852_vm3 = vmmov %vm15740_vm2  ;;  %v15868_v39 = vld [vmem:[#allocation83_spill] sm:$0xff] }
 0x244   : >> { %vm15854_vm6 = vmmov %vm15740_vm2 }
 0x246   : >> { %2817 = vmatmul.mubr.f32.gmra.mxu0 %v11462_v59  ;;  %3011 = vmatmul.mubr.f32.gmra.mxu1 %v11123_v6  ;;  %v11486_v59 = vsel %vm15852_vm3, %v1971_v48, %v11237_v61  ;;  %vm15859_vm3 = vmmov %vm15740_vm2  ;;  %v1973_v61 = vld [vmem:[#allocation2 + $0x170] sm:$0xff] }
 0x247   : >> { %7667 = vmatprep.mubr.msk.f32.mxu0 %vm15849_vm7, %v11468_v34  ;;  %7691 = vmatprep.mubr.msk.f32.mxu1 %vm15850_vm11, %v11131_v21  ;;  %15853 = vst [vmem:[#allocation114_spill] sm:$0xff] %v11486_v59  ;;  %vm15856_vm7 = vmmov %vm15740_vm2  ;;  %v11504_v48 = vld [vmem:[#allocation2 + $0x172] sm:$0xff] }
 0x248   : >> { %vm15858_vm11 = vmmov %vm15740_vm2  ;;  %15860 = vst [vmem:[#allocation117_spill] sm:$0xff] %v11504_v48 }
 0x24a   : >> { %2822 = vmatmul.mubr.f32.gmra.mxu0 %v11474_v4  ;;  %3016 = vmatmul.mubr.f32.gmra.mxu1 %v11137_v45  ;;  %v11498_v4 = vsel %vm15856_vm7, %v1972_v18, %v11248_v58  ;;  %v15865_v58 = vld [vmem:[#allocation82_spill] sm:$0xff]  ;;  %vm15866_vm7 = vmmov %vm15740_vm2  ;;  %v1974_v18 = vld [vmem:[#allocation2 + $0x178] sm:$0xff] }
 0x24b   : >> { %7668 = vmatprep.mubr.msk.f32.mxu0 %vm15854_vm6, %v11480_v15  ;;  %7692 = vmatprep.mubr.msk.f32.mxu1 %vm15740_vm2, %v11145_v13  ;;  %15857 = vst [vmem:[#allocation116_spill] sm:$0xff] %v11498_v4  ;;  %v15861_v15 = vld [vmem:[#allocation81_spill] sm:$0xff]  ;;  %vm15863_vm6 = vmmov %vm15740_vm2 }
 0x24e   : >> { %2827 = vmatmul.mubr.f32.gmra.mxu0 %v11486_v59  ;;  %3021 = vmatmul.mubr.f32.gmra.mxu1 %v11151_v54  ;;  %v15862_v59 = vld [vmem:[#allocation94_spill] sm:$0xff] }
 0x24f   : >> { %7669 = vmatprep.mubr.msk.f32.mxu0 %vm15858_vm11, %v11492_v55  ;;  %7693 = vmatprep.mubr.msk.f32.mxu1 %vm15859_vm3, %v11159_v62  ;;  %v11510_v34 = vsel %vm15863_vm6, %v1973_v61, %v15862_v59  ;;  %v11516_v55 = vld [vmem:[#allocation2 + $0x17a] sm:$0xff]  ;;  %vm15870_vm11 = vmmov %vm15740_vm2  ;;  %v15873_v59 = vld [vmem:[#allocation84_spill] sm:$0xff] }
 0x250   : >> { %15864 = vst [vmem:[#allocation81_spill] sm:$0xff] %v11510_v34  ;;  %15867 = vst [vmem:[#allocation94_spill] sm:$0xff] %v11516_v55  ;;  %v1975_v61 = vld [vmem:[#allocation2 + $0x180] sm:$0xff] }
 0x251   : >> { %vm15872_vm3 = vmmov %vm15740_vm2 }
 0x252   : >> { %2832 = vmatmul.mubr.f32.gmra.mxu0 %v11498_v4  ;;  %3026 = vmatmul.mubr.f32.gmra.mxu1 %v15861_v15  ;;  %v15869_v4 = vld [vmem:[#allocation97_spill] sm:$0xff]  ;;  %vm15874_vm6 = vmmov %vm15740_vm2 }
 0x253   : >> { %7670 = vmatprep.mubr.msk.f32.mxu0 %vm15740_vm2, %v11504_v48  ;;  %7694 = vmatprep.mubr.msk.f32.mxu1 %vm15866_vm7, %v15865_v58  ;;  %v11522_v2 = vsel %vm15870_vm11, %v1974_v18, %v15869_v4  ;;  %v11528_v48 = vld [vmem:[#allocation2 + $0x182] sm:$0xff]  ;;  %vm15879_vm7 = vmmov %vm15740_vm2 }
 0x254   : >> { %15871 = vst [vmem:[#allocation82_spill] sm:$0xff] %v11522_v2  ;;  %15875 = vst [vmem:[#allocation83_spill] sm:$0xff] %v11528_v48  ;;  %v15880_v4 = vld [vmem:[#allocation86_spill] sm:$0xff]  ;;  %v1976_v18 = vld [vmem:[#allocation2 + $0x188] sm:$0xff] }
 0x255   : >> { %vm15881_vm11 = vmmov %vm15740_vm2 }
 0x256   : >> { %2837 = vmatmul.mubr.f32.gmra.mxu0 %v11510_v34  ;;  %3031 = vmatmul.mubr.f32.gmra.mxu1 %v15868_v39  ;;  %v15877_v34 = vld [vmem:[#allocation98_spill] sm:$0xff] }
 0x257   : >> { %7671 = vmatprep.mubr.msk.f32.mxu0 %vm15872_vm3, %v11516_v55  ;;  %7695 = vmatprep.mubr.msk.f32.mxu1 %vm15874_vm6, %v15873_v59  ;;  %v11534_v43 = vsel %vm15740_vm2, %v1975_v61, %v15877_v34  ;;  %v11540_v55 = vld [vmem:[#allocation2 + $0x18a] sm:$0xff]  ;;  %vm15885_vm3 = vmmov %vm15740_vm2 }
 0x258   : >> { %15878 = vst [vmem:[#allocation97_spill] sm:$0xff] %v11534_v43  ;;  %15882 = vst [vmem:[#allocation84_spill] sm:$0xff] %v11540_v55  ;;  %v15888_v34 = vld [vmem:[#allocation88_spill] sm:$0xff] }
 0x259   : >> { %vm15887_vm6 = vmmov %vm15740_vm2  ;;  %v1977_v61 = vld [vmem:[#allocation2 + $0x190] sm:$0xff] }
 0x25a   : >> { %2842 = vmatmul.mubr.f32.gmra.mxu0 %v11522_v2  ;;  %3036 = vmatmul.mubr.f32.gmra.mxu1 %v15876_v10  ;;  %v15884_v2 = vld [vmem:[#allocation101_spill] sm:$0xff] }
 0x25b   : >> { %7672 = vmatprep.mubr.msk.f32.mxu0 %vm15879_vm7, %v11528_v48  ;;  %7696 = vmatprep.mubr.msk.f32.mxu1 %vm15881_vm11, %v15880_v4  ;;  %v11546_v37 = vsel %vm15885_vm3, %v1976_v18, %v15884_v2  ;;  %v11552_v48 = vld [vmem:[#allocation2 + $0x192] sm:$0xff]  ;;  %vm15892_vm7 = vmmov %vm15740_vm2  ;;  %v15895_v2 = vld [vmem:[#allocation90_spill] sm:$0xff] }
 0x25c   : >> { %15886 = vst [vmem:[#allocation85_spill] sm:$0xff] %v11546_v37  ;;  %15889 = vst [vmem:[#allocation98_spill] sm:$0xff] %v11552_v48  ;;  %v15890_v4 = vld [vmem:[#allocation89_spill] sm:$0xff]  ;;  %v15897_v18 = vld [vmem:[#allocation91_spill] sm:$0xff] }
 0x25d   : >> { %vm15894_vm11 = vmmov %vm15740_vm2 }
 0x25e   : >> { %2847 = vmatmul.mubr.f32.gmra.mxu0 %v11534_v43  ;;  %3041 = vmatmul.mubr.f32.gmra.mxu1 %v15883_v28  ;;  %v15891_v43 = vld [vmem:[#allocation102_spill] sm:$0xff]  ;;  %vm15896_vm3 = vmmov %vm15740_vm2 }
 0x25f   : >> { %7673 = vmatprep.mubr.msk.f32.mxu0 %vm15887_vm6, %v11540_v55  ;;  %7697 = vmatprep.mubr.msk.f32.mxu1 %vm15740_vm2, %v15888_v34  ;;  %v11558_v28 = vsel %vm15892_vm7, %v1977_v61, %v15891_v43  ;;  %v15898_v55 = vld [vmem:[#allocation92_spill] sm:$0xff]  ;;  %vm15899_vm6 = vmmov %vm15740_vm2  ;;  %v15901_v43 = vld [vmem:[#allocation93_spill] sm:$0xff] }
 0x260   : >> { %15893 = vst [vmem:[#allocation101_spill] sm:$0xff] %v11558_v28  ;;  %v15902_v61 = vld [vmem:[#allocation95_spill] sm:$0xff]  ;;  %vm15903_vm7 = vmmov %vm15740_vm2 }
 0x262   : >> { %2852 = vmatmul.mubr.f32.gmra.mxu0 %v11546_v37  ;;  %3046 = vmatmul.mubr.f32.gmra.mxu1 %v15890_v4 }
 0x263   : >> { %7674 = vmatprep.mubr.msk.f32.mxu0 %vm15894_vm11, %v11552_v48  ;;  %7698 = vmatprep.mubr.msk.f32.mxu1 %vm15896_vm3, %v15895_v2  ;;  %vm15904_vm11 = vmmov %vm15740_vm2  ;;  %v7840_v48 = vld [vmem:[%s10800_s13 + $0x378] sm:$0xff] }
 0x264   : >> { %4342 = vmatpush1.msra.mxu1 %v7840_v48  ;;  %vm15908_vm3 = vmmov %vm15740_vm2  ;;  %v15912_v48 = vld [vmem:[#allocation103_spill] sm:$0xff] }
 0x266   : >> { %2857 = vmatmul.mubr.f32.gmra.mxu0 %v11558_v28  ;;  %3051 = vmatmul.mubr.f32.gmra.mxu1 %v15897_v18  ;;  %v15906_v18 = vld [vmem:[#allocation96_spill] sm:$0xff] }
 0x267   : >> { %7699 = vmatprep.mubr.msk.f32.mxu1 %vm15899_vm6, %v15898_v55  ;;  %7748 = vmatprep.mubr.msk.f32.mxu0 %vm15740_vm2, %v10975_v53  ;;  %v15907_v53 = vld [vmem:[#allocation99_spill] sm:$0xff]  ;;  %vm15909_vm6 = vmmov %vm15740_vm2 }
 0x26a   : >> { %v11570_v37 = vpop.f32.mrf.mxu0  ;;  %3056 = vmatmul.mubr.f32.gmra.mxu1 %v15901_v43  ;;  %3277 = vmatmul.mubr.f32.vlgmr.msra.gmra.mxu0 %v10985_v46 }
 0x26b   : >> { %15900 = vst [vmem:[#allocation88_spill] sm:$0xff] %v11570_v37  ;;  %7700 = vmatprep.mubr.msk.f32.mxu1 %vm15903_vm7, %v15902_v61  ;;  %7749 = vmatprep.mubr.msk.f32.mxu0 %vm15904_vm11, %v10987_v56  ;;  %v15910_v37 = vmov 0.0   ;;  %vm15913_vm7 = vmmov %vm15740_vm2 }
 0x26c   : >> { %v2625_v28 = vpop.f32.mrf.mxu0  ;;  %4343 = vmatprep.subr.mxu1 %v15910_v37  ;;  %vm15914_vm11 = vmmov %vm15740_vm2 }
 0x26d   : >> { %v15911_v28 = vld [vmem:[#allocation100_spill] sm:$0xff] }
 0x26e   : >> { %v11579_v55 = vpop.f32.mrf.mxu0  ;;  %3061 = vmatmul.mubr.f32.gmra.mxu1 %v15906_v18  ;;  %3282 = vmatmul.mubr.f32.gmra.mxu0 %v10997_v26 }
 0x26f   : >> { %15905 = vst [vmem:[#allocation89_spill] sm:$0xff] %v11579_v55  ;;  %7701 = vmatprep.mubr.msk.f32.mxu1 %vm15908_vm3, %v15907_v53  ;;  %7750 = vmatprep.mubr.msk.f32.mxu0 %vm15909_vm6, %v11001_v11  ;;  %v7839_v55 = vld [vmem:[%s10800_s13 + $0x370] sm:$0xff]  ;;  %vm15915_vm3 = vmmov %vm15740_vm2 }
 0x270   : >> { %v2630_v46 = vpop.f32.mrf.mxu0  ;;  %4344 = vmatpush1.msra.mxu1 %v7839_v55  ;;  %vm15916_vm6 = vmmov %vm15740_vm2  ;;  %v7838_v55 = vld [vmem:[%s10800_s13 + $0x368] sm:$0xff] }
 0x271   : >> { %4345 = vmatprep.subr.mxu1 %v15910_v37  ;;  %v7837_v46 = vld [vmem:[%s10800_s13 + $0x360] sm:$0xff] }
 0x272   : >> { %v11588_v56 = vpop.f32.mrf.mxu0  ;;  %3066 = vmatmul.mubr.f32.gmra.mxu1 %v15911_v28  ;;  %3287 = vmatmul.mubr.f32.gmra.mxu0 %v11011_v30 }
 0x273   : >> { %7702 = vmatprep.mubr.msk.f32.mxu1 %vm15740_vm2, %v15912_v48  ;;  %7751 = vmatprep.mubr.msk.f32.mxu0 %vm15913_vm7, %v11017_v9  ;;  %vm15917_vm7 = vmmov %vm15740_vm2 }
 0x274   : >> { %v2635_v26 = vpop.f32.mrf.mxu0  ;;  %4346 = vmatpush1.msra.mxu1 %v7838_v55  ;;  %v15933_v55 = vld [vmem:[#allocation86_spill] sm:$0xff] }
 0x275   : >> { %4347 = vmatprep.subr.mxu1 %v15910_v37  ;;  %v7836_v26 = vld [vmem:[%s10800_s13 + $0x358] sm:$0xff] }
 0x276   : >> { %v11597_v11 = vpop.f32.mrf.mxu0  ;;  %3071 = vmatmul.mubr.f32.gmra.mxu1 %v11283_v1  ;;  %3292 = vmatmul.mubr.f32.gmra.mxu0 %v11027_v5 }
 0x277   : >> { %7703 = vmatprep.mubr.msk.f32.mxu1 %vm15914_vm11, %v11287_v44  ;;  %7752 = vmatprep.mubr.msk.f32.mxu0 %vm15915_vm3, %v11033_v24  ;;  %vm15918_vm11 = vmmov %vm15740_vm2 }
 0x278   : >> { %v2640_v30 = vpop.f32.mrf.mxu0  ;;  %vm15919_vm3 = vmmov %vm15740_vm2  ;;  %4348 = vmatpush1.msra.mxu1 %v7837_v46  ;;  %v15935_v46 = vld [vmem:[#allocation87_spill] sm:$0xff] }
 0x279   : >> { %4349 = vmatprep.subr.mxu1 %v15910_v37  ;;  %v7835_v30 = vld [vmem:[%s10800_s13 + $0x350] sm:$0xff] }
 0x27a   : >> { %v11606_v9 = vpop.f32.mrf.mxu0  ;;  %3076 = vmatmul.mubr.f32.gmra.mxu1 %v11293_v32  ;;  %3297 = vmatmul.mubr.f32.gmra.mxu0 %v11043_v57 }
 0x27b   : >> { %7704 = vmatprep.mubr.msk.f32.mxu1 %vm15916_vm6, %v11299_v17  ;;  %7753 = vmatprep.mubr.msk.f32.mxu0 %vm15740_vm2, %v11049_v16  ;;  %vm15920_vm6 = vmmov %vm15740_vm2 }
 0x27c   : >> { %v2645_v5 = vpop.f32.mrf.mxu0  ;;  %4350 = vmatpush1.msra.mxu1 %v7836_v26  ;;  %v15939_v26 = vld [vmem:[#allocation106_spill] sm:$0xff] }
 0x27d   : >> { %4351 = vmatprep.subr.mxu1 %v15910_v37  ;;  %v7834_v5 = vld [vmem:[%s10800_s13 + $0x348] sm:$0xff] }
 0x27e   : >> { %v11615_v24 = vpop.f32.mrf.mxu0  ;;  %3081 = vmatmul.mubr.f32.gmra.mxu1 %v11304_v19  ;;  %3302 = vmatmul.mubr.f32.gmra.mxu0 %v11059_v8 }
 0x27f   : >> { %7705 = vmatprep.mubr.msk.f32.mxu1 %vm15917_vm7, %v11310_v47  ;;  %7754 = vmatprep.mubr.msk.f32.mxu0 %vm15918_vm11, %v11065_v33  ;;  %vm15921_vm7 = vmmov %vm15740_vm2 }
 0x280   : >> { %v2650_v57 = vpop.f32.mrf.mxu0  ;;  %vm15922_vm11 = vmmov %vm15740_vm2  ;;  %4352 = vmatpush1.msra.mxu1 %v7835_v30 }
 0x281   : >> { %4353 = vmatprep.subr.mxu1 %v15910_v37  ;;  %v7833_v57 = vld [vmem:[%s10800_s13 + $0x340] sm:$0xff] }
 0x282   : >> { %v11624_v16 = vpop.f32.mrf.mxu0  ;;  %3086 = vmatmul.mubr.f32.gmra.mxu1 %v11315_v42  ;;  %3307 = vmatmul.mubr.f32.gmra.mxu0 %v11076_v27 }
 0x283   : >> { %7706 = vmatprep.mubr.msk.f32.mxu1 %vm15919_vm3, %v11321_v12  ;;  %7755 = vmatprep.mubr.msk.f32.mxu0 %vm15920_vm6, %v11082_v3  ;;  %vm15923_vm3 = vmmov %vm15740_vm2 }
 0x284   : >> { %v2655_v8 = vpop.f32.mrf.mxu0  ;;  %vm15924_vm6 = vmmov %vm15740_vm2  ;;  %4354 = vmatpush1.msra.mxu1 %v7834_v5  ;;  %v15946_v5 = vld [vmem:[#allocation92_spill] sm:$0xff] }
 0x285   : >> { %4355 = vmatprep.subr.mxu1 %v15910_v37 }
 0x286   : >> { %v11633_v33 = vpop.f32.mrf.mxu0  ;;  %3091 = vmatmul.mubr.f32.gmra.mxu1 %v11327_v41  ;;  %3312 = vmatmul.mubr.f32.gmra.mxu0 %v11091_v25 }
 0x287   : >> { %7707 = vmatprep.mubr.msk.f32.mxu1 %vm15740_vm2, %v11333_v60  ;;  %7756 = vmatprep.mubr.msk.f32.mxu0 %vm15921_vm7, %v11099_v40  ;;  %vm15925_vm7 = vmmov %vm15740_vm2 }
 0x288   : >> { %v2660_v27 = vpop.f32.mrf.mxu0  ;;  %4356 = vmatpush1.msra.mxu1 %v7833_v57 }
 0x289   : >> { %v15936_v27 = vld [vmem:[#allocation105_spill] sm:$0xff]  ;;  %4357 = vmatprep.subr.mxu1 %v15910_v37 }
 0x28a   : >> { %v11642_v3 = vpop.f32.mrf.mxu0  ;;  %3096 = vmatmul.mubr.f32.gmra.mxu1 %v11339_v50  ;;  %3317 = vmatmul.mubr.f32.gmra.mxu0 %v11108_v7 }
 0x28b   : >> { %7708 = vmatprep.mubr.msk.f32.mxu1 %vm15922_vm11, %v11345_v49  ;;  %7757 = vmatprep.mubr.msk.f32.mxu0 %vm15923_vm3, %v11116_v63  ;;  %vm15926_vm11 = vmmov %vm15740_vm2 }
 0x28c   : >> { %v2665_v25 = vpop.f32.mrf.mxu0  ;;  %vm15927_vm3 = vmmov %vm15740_vm2 }
 0x28e   : >> { %v11651_v40 = vpop.f32.mrf.mxu0  ;;  %3101 = vmatmul.mubr.f32.gmra.mxu1 %v11351_v35  ;;  %3322 = vmatmul.mubr.f32.gmra.mxu0 %v11123_v6 }
 0x28f   : >> { %7709 = vmatprep.mubr.msk.f32.mxu1 %vm15924_vm6, %v11357_v0  ;;  %7758 = vmatprep.mubr.msk.f32.mxu0 %vm15740_vm2, %v11131_v21  ;;  %vm15928_vm6 = vmmov %vm15740_vm2 }
 0x290   : >> { %v2670_v7 = vpop.f32.mrf.mxu0 }
 0x291   : >> { %v15940_v7 = vld [vmem:[#allocation107_spill] sm:$0xff] }
 0x292   : >> { %v11660_v63 = vpop.f32.mrf.mxu0  ;;  %3106 = vmatmul.mubr.f32.gmra.mxu1 %v11363_v52  ;;  %3327 = vmatmul.mubr.f32.gmra.mxu0 %v11137_v45 }
 0x293   : >> { %7710 = vmatprep.mubr.msk.f32.mxu1 %vm15925_vm7, %v11369_v14  ;;  %7759 = vmatprep.mubr.msk.f32.mxu0 %vm15926_vm11, %v11145_v13  ;;  %vm15929_vm7 = vmmov %vm15740_vm2 }
 0x294   : >> { %v2675_v6 = vpop.f32.mrf.mxu0  ;;  %vm15930_vm11 = vmmov %vm15740_vm2 }
 0x296   : >> { %v11669_v21 = vpop.f32.mrf.mxu0  ;;  %3111 = vmatmul.mubr.f32.gmra.mxu1 %v11375_v22  ;;  %3332 = vmatmul.mubr.f32.gmra.mxu0 %v11151_v54 }
 0x297   : >> { %7711 = vmatprep.mubr.msk.f32.mxu1 %vm15927_vm3, %v11381_v23  ;;  %7760 = vmatprep.mubr.msk.f32.mxu0 %vm15928_vm6, %v11159_v62  ;;  %vm15931_vm3 = vmmov %vm15740_vm2 }
 0x298   : >> { %v2680_v45 = vpop.f32.mrf.mxu0  ;;  %vm15932_vm6 = vmmov %vm15740_vm2 }
 0x299   : >> { %v15943_v45 = vld [vmem:[#allocation108_spill] sm:$0xff] }
 0x29a   : >> { %v11678_v13 = vpop.f32.mrf.mxu0  ;;  %3116 = vmatmul.mubr.f32.gmra.mxu1 %v11388_v20  ;;  %3337 = vmatmul.mubr.f32.gmra.mxu0 %v15861_v15 }
 0x29b   : >> { %7712 = vmatprep.mubr.msk.f32.mxu1 %vm15740_vm2, %v11394_v38  ;;  %7761 = vmatprep.mubr.msk.f32.mxu0 %vm15929_vm7, %v15865_v58  ;;  %vm15937_vm7 = vmmov %vm15740_vm2 }
 0x29c   : >> { %v2685_v54 = vpop.f32.mrf.mxu0 }
 0x29d   : >> { %v15945_v54 = vld [vmem:[#allocation109_spill] sm:$0xff] }
 0x29e   : >> { %v11687_v62 = vpop.f32.mrf.mxu0  ;;  %3121 = vmatmul.mubr.f32.gmra.mxu1 %v11401_v31  ;;  %3342 = vmatmul.mubr.f32.gmra.mxu0 %v15868_v39 }
 0x29f   : >> { %7713 = vmatprep.mubr.msk.f32.mxu1 %vm15930_vm11, %v11407_v29  ;;  %7762 = vmatprep.mubr.msk.f32.mxu0 %vm15931_vm3, %v15873_v59  ;;  %v15934_v59 = vld [vmem:[#allocation104_spill] sm:$0xff]  ;;  %vm15938_vm11 = vmmov %vm15740_vm2 }
 0x2a0   : >> { %v2690_v15 = vpop.f32.mrf.mxu0  ;;  %vm15941_vm3 = vmmov %vm15740_vm2 }
 0x2a1   : >> { %v7832_v15 = vld [vmem:[%s10800_s13 + $0x338] sm:$0xff] }
 0x2a2   : >> { %v11696_v58 = vpop.f32.mrf.mxu0  ;;  %3126 = vmatmul.mubr.f32.gmra.mxu1 %v11414_v51  ;;  %3347 = vmatmul.mubr.f32.gmra.mxu0 %v15876_v10 }
 0x2a3   : >> { %7714 = vmatprep.mubr.msk.f32.mxu1 %vm15932_vm6, %v11420_v36  ;;  %7763 = vmatprep.mubr.msk.f32.mxu0 %vm15740_vm2, %v15933_v55  ;;  %vm15942_vm6 = vmmov %vm15740_vm2 }
 0x2a4   : >> { %v2695_v39 = vpop.f32.mrf.mxu0  ;;  %4358 = vmatpush1.msra.mxu1 %v7832_v15  ;;  %v15960_v15 = vld [vmem:[#allocation116_spill] sm:$0xff] }
 0x2a5   : >> { %v15949_v39 = vld [vmem:[#allocation111_spill] sm:$0xff]  ;;  %4359 = vmatprep.subr.mxu1 %v15910_v37 }
 0x2a6   : >> { %v11705_v8 = vpop.f32.mrf.mxu0  ;;  %3131 = vmatmul.mubr.f32.gmra.mxu1 %v15934_v59  ;;  %3352 = vmatmul.mubr.f32.gmra.mxu0 %v15935_v46 }
 0x2a7   : >> { %7715 = vmatprep.mubr.msk.f32.mxu1 %vm15937_vm7, %v15936_v27  ;;  %7764 = vmatprep.mubr.msk.f32.mxu0 %vm15938_vm11, %v15888_v34  ;;  %v15944_v34 = vld [vmem:[#allocation91_spill] sm:$0xff]  ;;  %vm15947_vm7 = vmmov %vm15740_vm2 }
 0x2a8   : >> { %v2700_v10 = vpop.f32.mrf.mxu0  ;;  %vm15950_vm11 = vmmov %vm15740_vm2 }
 0x2a9   : >> { %v15952_v10 = vld [vmem:[#allocation112_spill] sm:$0xff] }
 0x2aa   : >> { %v11714_v25 = vpop.f32.mrf.mxu0  ;;  %3136 = vmatmul.mubr.f32.gmra.mxu1 %v15939_v26  ;;  %3357 = vmatmul.mubr.f32.gmra.mxu0 %v15890_v4 }
 0x2ab   : >> { %7716 = vmatprep.mubr.msk.f32.mxu1 %vm15941_vm3, %v15940_v7  ;;  %7765 = vmatprep.mubr.msk.f32.mxu0 %vm15942_vm6, %v15895_v2  ;;  %v15948_v2 = vld [vmem:[#allocation110_spill] sm:$0xff]  ;;  %vm15951_vm3 = vmmov %vm15740_vm2 }
 0x2ac   : >> { %v2705_v6 = vpop.f32.mrf.mxu0  ;;  %vm15954_vm6 = vmmov %vm15740_vm2 }
 0x2ad   : >> { %v15953_v6 = vld [vmem:[#allocation113_spill] sm:$0xff] }
 0x2ae   : >> { %v11722_v30 = vpop.f32.mrf.mxu0  ;;  %3141 = vmatmul.mubr.f32.gmra.mxu1 %v15943_v45  ;;  %3362 = vmatmul.mubr.f32.gmra.mxu0 %v15944_v34  ;;  %v7831_v34 = vld [vmem:[%s10800_s13 + $0x330] sm:$0xff] }
 0x2af   : >> { %7717 = vmatprep.mubr.msk.f32.mxu1 %vm15740_vm2, %v15945_v54  ;;  %7766 = vmatprep.mubr.msk.f32.mxu0 %vm15947_vm7, %v15946_v5  ;;  %v15955_v5 = vld [vmem:[#allocation114_spill] sm:$0xff]  ;;  %vm15957_vm7 = vmmov %vm15740_vm2 }
 0x2b0   : >> { %v2710_v4 = vpop.f32.mrf.mxu0  ;;  %4360 = vmatpush1.msra.mxu1 %v7831_v34  ;;  %v15965_v34 = vld [vmem:[#allocation81_spill] sm:$0xff] }
 0x2b1   : >> { %v15956_v4 = vld [vmem:[#allocation115_spill] sm:$0xff]  ;;  %4361 = vmatprep.subr.mxu1 %v15910_v37 }
 0x2b2   : >> { %v11731_v55 = vpop.f32.mrf.mxu0  ;;  %3146 = vmatmul.mubr.f32.gmra.mxu1 %v15948_v2  ;;  %3367 = vmatmul.mubr.f32.gmra.mxu0 %v15901_v43 }
 0x2b3   : >> { %7718 = vmatprep.mubr.msk.f32.mxu1 %vm15950_vm11, %v15949_v39  ;;  %7767 = vmatprep.mubr.msk.f32.mxu0 %vm15951_vm3, %v15902_v61  ;;  %vm15958_vm11 = vmmov %vm15740_vm2 }
 0x2b4   : >> { %v2715_v57 = vpop.f32.mrf.mxu0  ;;  %vm15962_vm3 = vmmov %vm15740_vm2 }
 0x2b5   : >> { %v15961_v57 = vld [vmem:[#allocation117_spill] sm:$0xff] }
 0x2b6   : >> { %v11740_v46 = vpop.f32.mrf.mxu0  ;;  %3151 = vmatmul.mubr.f32.gmra.mxu1 %v15952_v10  ;;  %3372 = vmatmul.mubr.f32.gmra.mxu0 %v15906_v18 }
 0x2b7   : >> { %7719 = vmatprep.mubr.msk.f32.mxu1 %vm15954_vm6, %v15953_v6  ;;  %7768 = vmatprep.mubr.msk.f32.mxu0 %vm15740_vm2, %v15907_v53  ;;  %vm15963_vm6 = vmmov %vm15740_vm2 }
 0x2b8   : >> { %v2720_v43 = vpop.f32.mrf.mxu0 }
 0x2b9   : >> { %v7830_v43 = vld [vmem:[%s10800_s13 + $0x328] sm:$0xff] }
 0x2ba   : >> { %v11749_v61 = vpop.f32.mrf.mxu0  ;;  %3156 = vmatmul.mubr.f32.gmra.mxu1 %v15955_v5  ;;  %3377 = vmatmul.mubr.f32.gmra.mxu0 %v15911_v28 }
 0x2bb   : >> { %7720 = vmatprep.mubr.msk.f32.mxu1 %vm15957_vm7, %v15956_v4  ;;  %7769 = vmatprep.mubr.msk.f32.mxu0 %vm15958_vm11, %v15912_v48  ;;  %vm15967_vm7 = vmmov %vm15740_vm2 }
 0x2bc   : >> { %v2725_v18 = vpop.f32.mrf.mxu0  ;;  %4362 = vmatpush1.msra.mxu1 %v7830_v43  ;;  %vm15970_vm11 = vmmov %vm15740_vm2 }
 0x2bd   : >> { %v15966_v18 = vld [vmem:[#allocation94_spill] sm:$0xff]  ;;  %4363 = vmatprep.subr.mxu1 %v15910_v37 }
 0x2be   : >> { %v11758_v53 = vpop.f32.mrf.mxu0  ;;  %3161 = vmatmul.mubr.f32.gmra.mxu1 %v15960_v15  ;;  %3382 = vmatmul.mubr.f32.gmra.mxu0 %v11283_v1 }
 0x2bf   : >> { %15959 = vst [vmem:[#allocation102_spill] sm:$0xff] %v11758_v53  ;;  %7721 = vmatprep.mubr.msk.f32.mxu1 %vm15962_vm3, %v15961_v57  ;;  %7770 = vmatprep.mubr.msk.f32.mxu0 %vm15963_vm6, %v11287_v44  ;;  %vm15972_vm3 = vmmov %vm15740_vm2 }
 0x2c0   : >> { %v2730_v28 = vpop.f32.mrf.mxu0  ;;  %vm15973_vm6 = vmmov %vm15740_vm2 }
 0x2c1   : >> { %v15969_v28 = vld [vmem:[#allocation82_spill] sm:$0xff] }
 0x2c2   : >> { %v11767_v48 = vpop.f32.mrf.mxu0  ;;  %3166 = vmatmul.mubr.f32.gmra.mxu1 %v15965_v34  ;;  %3387 = vmatmul.mubr.f32.gmra.mxu0 %v11293_v32  ;;  %v7829_v32 = vld [vmem:[%s10800_s13 + $0x320] sm:$0xff] }
 0x2c3   : >> { %15964 = vst [vmem:[#allocation90_spill] sm:$0xff] %v11767_v48  ;;  %7722 = vmatprep.mubr.msk.f32.mxu1 %vm15740_vm2, %v15966_v18  ;;  %7771 = vmatprep.mubr.msk.f32.mxu0 %vm15967_vm7, %v11299_v17  ;;  %vm15974_vm7 = vmmov %vm15740_vm2 }
 0x2c4   : >> { %v2735_v1 = vpop.f32.mrf.mxu0  ;;  %4364 = vmatpush1.msra.mxu1 %v7829_v32 }
 0x2c5   : >> { %4365 = vmatprep.subr.mxu1 %v15910_v37 }
 0x2c6   : >> { %v11776_v44 = vpop.f32.mrf.mxu0  ;;  %3171 = vmatmul.mubr.f32.gmra.mxu1 %v15969_v28  ;;  %3392 = vmatmul.mubr.f32.gmra.mxu0 %v11304_v19 }
 0x2c7   : >> { %15968 = vst [vmem:[#allocation93_spill] sm:$0xff] %v11776_v44  ;;  %7772 = vmatprep.mubr.msk.f32.mxu0 %vm15970_vm11, %v11310_v47  ;;  %vm15975_vm11 = vmmov %vm15740_vm2 }
 0x2c8   : >> { %v2740_v43 = vpop.f32.mrf.mxu0 }
 0x2ca   : >> { %v11783_v48 = vpop.f32.mrf.mxu0  ;;  %v11785_v53 = vpop.f32.mrf.mxu1  ;;  %3397 = vmatmul.mubr.f32.gmra.mxu0 %v11315_v42  ;;  %v7828_v42 = vld [vmem:[%s10800_s13 + $0x318] sm:$0xff] }
 0x2cb   : >> { %15971 = vst [vmem:[#allocation95_spill] sm:$0xff] %v11783_v48  ;;  %7773 = vmatprep.mubr.msk.f32.mxu0 %vm15972_vm3, %v11321_v12  ;;  %4366 = vmatpush1.msra.mxu1 %v7828_v42  ;;  %vm15977_vm3 = vmmov %vm15740_vm2 }
 0x2cc   : >> { %v2745_v17 = vpop.f32.mrf.mxu0  ;;  %v2939_v19 = vpop.f32.mrf.mxu1  ;;  %4367 = vmatprep.subr.mxu1 %v15910_v37 }
 0x2ce   : >> { %v11791_v1 = vpop.f32.mrf.mxu0  ;;  %v11793_v47 = vpop.f32.mrf.mxu1  ;;  %3402 = vmatmul.mubr.f32.gmra.mxu0 %v11327_v41 }
 0x2cf   : >> { %7774 = vmatprep.mubr.msk.f32.mxu0 %vm15973_vm6, %v11333_v60  ;;  %vm15979_vm6 = vmmov %vm15740_vm2 }
 0x2d0   : >> { %v2750_v43 = vpop.f32.mrf.mxu0  ;;  %v2944_v32 = vpop.f32.mrf.mxu1 }
 0x2d2   : >> { %v11799_v48 = vpop.f32.mrf.mxu0  ;;  %v11801_v44 = vpop.f32.mrf.mxu1  ;;  %3407 = vmatmul.mubr.f32.gmra.mxu0 %v11339_v50  ;;  %v7827_v50 = vld [vmem:[%s10800_s13 + $0x310] sm:$0xff] }
 0x2d3   : >> { %7775 = vmatprep.mubr.msk.f32.mxu0 %vm15740_vm2, %v11345_v49  ;;  %4368 = vmatpush1.msra.mxu1 %v7827_v50 }
 0x2d4   : >> { %v2755_v12 = vpop.f32.mrf.mxu0  ;;  %v2949_v41 = vpop.f32.mrf.mxu1  ;;  %4369 = vmatprep.subr.mxu1 %v15910_v37 }
 0x2d6   : >> { %v11807_v17 = vpop.f32.mrf.mxu0  ;;  %v11809_v60 = vpop.f32.mrf.mxu1  ;;  %3412 = vmatmul.mubr.f32.gmra.mxu0 %v11351_v35 }
 0x2d7   : >> { %7776 = vmatprep.mubr.msk.f32.mxu0 %vm15974_vm7, %v11357_v0  ;;  %vm15982_vm7 = vmmov %vm15740_vm2 }
 0x2d8   : >> { %v2760_v19 = vpop.f32.mrf.mxu0  ;;  %v2954_v43 = vpop.f32.mrf.mxu1 }
 0x2da   : >> { %v11815_v32 = vpop.f32.mrf.mxu0  ;;  %v11817_v42 = vpop.f32.mrf.mxu1  ;;  %3417 = vmatmul.mubr.f32.gmra.mxu0 %v11363_v52  ;;  %v7826_v52 = vld [vmem:[%s10800_s13 + $0x308] sm:$0xff] }
 0x2db   : >> { %7777 = vmatprep.mubr.msk.f32.mxu0 %vm15975_vm11, %v11369_v14  ;;  %4370 = vmatpush1.msra.mxu1 %v7826_v52  ;;  %vm15984_vm11 = vmmov %vm15740_vm2 }
 0x2dc   : >> { %v2765_v49 = vpop.f32.mrf.mxu0  ;;  %v2959_v35 = vpop.f32.mrf.mxu1  ;;  %4371 = vmatprep.subr.mxu1 %v15910_v37 }
 0x2de   : >> { %v11823_v12 = vpop.f32.mrf.mxu0  ;;  %v11825_v0 = vpop.f32.mrf.mxu1  ;;  %3422 = vmatmul.mubr.f32.gmra.mxu0 %v11375_v22 }
 0x2df   : >> { %15976 = vst [vmem:[#allocation96_spill] sm:$0xff] %v11823_v12  ;;  %7778 = vmatprep.mubr.msk.f32.mxu0 %vm15977_vm3, %v11381_v23  ;;  %vm15986_vm3 = vmmov %vm15740_vm2  ;;  %v7813_v12 = vld [vmem:[%s10800_s13 + $0x2b8] sm:$0xff] }
 0x2e0   : >> { %v2770_v41 = vpop.f32.mrf.mxu0  ;;  %v2964_v19 = vpop.f32.mrf.mxu1  ;;  %4656 = vmatpush1.msra.mxu0 %v7813_v12 }
 0x2e1   : >> { %4657 = vmatprep.subr.mxu0 %v15910_v37 }
 0x2e2   : >> { %v11831_v43 = vpop.f32.mrf.mxu0  ;;  %v11833_v50 = vpop.f32.mrf.mxu1  ;;  %3427 = vmatmul.mubr.f32.gmra.mxu0 %v11388_v20  ;;  %v7825_v20 = vld [vmem:[%s10800_s13 + $0x300] sm:$0xff] }
 0x2e3   : >> { %15978 = vst [vmem:[#allocation99_spill] sm:$0xff] %v11831_v43  ;;  %7779 = vmatprep.mubr.msk.f32.mxu0 %vm15979_vm6, %v11394_v38  ;;  %4372 = vmatpush1.msra.mxu1 %v7825_v20  ;;  %vm15988_vm6 = vmmov %vm15740_vm2 }
 0x2e4   : >> { %v2775_v14 = vpop.f32.mrf.mxu0  ;;  %v2969_v22 = vpop.f32.mrf.mxu1  ;;  %4389 = vmatprep.subr.mxu1 %v15910_v37 }
 0x2e6   : >> { %v11839_v49 = vpop.f32.mrf.mxu0  ;;  %v11841_v23 = vpop.f32.mrf.mxu1  ;;  %3432 = vmatmul.mubr.f32.gmra.mxu0 %v11401_v31 }
 0x2e7   : >> { %15980 = vst [vmem:[#allocation100_spill] sm:$0xff] %v11839_v49  ;;  %7780 = vmatprep.mubr.msk.f32.mxu0 %vm15740_vm2, %v11407_v29  ;;  %v16020_v49 = vld [vmem:[#allocation71_spill] sm:$0xff] }
 0x2e8   : >> { %v2780_v35 = vpop.f32.mrf.mxu0  ;;  %v2974_v41 = vpop.f32.mrf.mxu1 }
 0x2ea   : >> { %v11847_v19 = vpop.f32.mrf.mxu0  ;;  %v11849_v52 = vpop.f32.mrf.mxu1  ;;  %3437 = vmatmul.mubr.f32.gmra.mxu0 %v11414_v51  ;;  %v7848_v51 = vld [vmem:[%s10800_s13 + $0x3b8] sm:$0xff] }
 0x2eb   : >> { %15981 = vst [vmem:[#allocation103_spill] sm:$0xff] %v11847_v19  ;;  %7781 = vmatprep.mubr.msk.f32.mxu0 %vm15982_vm7, %v11420_v36  ;;  %4390 = vmatpush2.msra.mxu1 %v7848_v51  ;;  %vm15991_vm7 = vmmov %vm15740_vm2 }
 0x2ec   : >> { %v2785_v38 = vpop.f32.mrf.mxu0  ;;  %v2979_v31 = vpop.f32.mrf.mxu1  ;;  %4391 = vmatprep.subr.mxu1 %v15910_v37 }
 0x2ee   : >> { %v11855_v14 = vpop.f32.mrf.mxu0  ;;  %v11857_v29 = vpop.f32.mrf.mxu1  ;;  %3442 = vmatmul.mubr.f32.gmra.mxu0 %v15934_v59 }
 0x2ef   : >> { %15983 = vst [vmem:[#allocation86_spill] sm:$0xff] %v11855_v14  ;;  %7782 = vmatprep.mubr.msk.f32.mxu0 %vm15984_vm11, %v15936_v27  ;;  %vm15993_vm11 = vmmov %vm15740_vm2  ;;  %v7842_v14 = vld [vmem:[%s10800_s13 + $0x388] sm:$0xff] }
 0x2f0   : >> { %v2790_v22 = vpop.f32.mrf.mxu0  ;;  %v2984_v35 = vpop.f32.mrf.mxu1 }
 0x2f2   : >> { %v11863_v41 = vpop.f32.mrf.mxu0  ;;  %v11865_v20 = vpop.f32.mrf.mxu1  ;;  %3447 = vmatmul.mubr.f32.gmra.mxu0 %v15939_v26  ;;  %v7847_v26 = vld [vmem:[%s10800_s13 + $0x3b0] sm:$0xff] }
 0x2f3   : >> { %15985 = vst [vmem:[#allocation104_spill] sm:$0xff] %v11863_v41  ;;  %7783 = vmatprep.mubr.msk.f32.mxu0 %vm15986_vm3, %v15940_v7  ;;  %4392 = vmatpush2.msra.mxu1 %v7847_v26  ;;  %vm15995_vm3 = vmmov %vm15740_vm2 }
 0x2f4   : >> { %v2795_v36 = vpop.f32.mrf.mxu0  ;;  %v2989_v59 = vpop.f32.mrf.mxu1  ;;  %4393 = vmatprep.subr.mxu1 %v15910_v37 }
 0x2f6   : >> { %v11871_v38 = vpop.f32.mrf.mxu0  ;;  %v11873_v27 = vpop.f32.mrf.mxu1  ;;  %3452 = vmatmul.mubr.f32.gmra.mxu0 %v15943_v45 }
 0x2f7   : >> { %15987 = vst [vmem:[#allocation87_spill] sm:$0xff] %v11871_v38  ;;  %7784 = vmatprep.mubr.msk.f32.mxu0 %vm15988_vm6, %v15945_v54  ;;  %vm15997_vm6 = vmmov %vm15740_vm2 }
 0x2f8   : >> { %v2800_v31 = vpop.f32.mrf.mxu0  ;;  %v2994_v22 = vpop.f32.mrf.mxu1 }
 0x2fa   : >> { %v11879_v35 = vpop.f32.mrf.mxu0  ;;  %v11881_v51 = vpop.f32.mrf.mxu1  ;;  %3457 = vmatmul.mubr.f32.gmra.mxu0 %v15948_v2  ;;  %v7846_v2 = vld [vmem:[%s10800_s13 + $0x3a8] sm:$0xff] }
 0x2fb   : >> { %15989 = vst [vmem:[#allocation105_spill] sm:$0xff] %v11879_v35  ;;  %7785 = vmatprep.mubr.msk.f32.mxu0 %vm15740_vm2, %v15949_v39  ;;  %4394 = vmatpush2.msra.mxu1 %v7846_v2 }
 0x2fc   : >> { %v2805_v7 = vpop.f32.mrf.mxu0  ;;  %v2999_v45 = vpop.f32.mrf.mxu1  ;;  %4395 = vmatprep.subr.mxu1 %v15910_v37 }
 0x2fe   : >> { %v11887_v36 = vpop.f32.mrf.mxu0  ;;  %v11889_v54 = vpop.f32.mrf.mxu1  ;;  %3462 = vmatmul.mubr.f32.gmra.mxu0 %v15952_v10 }
 0x2ff   : >> { %15990 = vst [vmem:[#allocation106_spill] sm:$0xff] %v11887_v36  ;;  %7786 = vmatprep.mubr.msk.f32.mxu0 %vm15991_vm7, %v15953_v6  ;;  %vm16003_vm7 = vmmov %vm15740_vm2  ;;  %v7843_v36 = vld [vmem:[%s10800_s13 + $0x390] sm:$0xff] }
 0x300   : >> { %v2810_v59 = vpop.f32.mrf.mxu0  ;;  %v3004_v31 = vpop.f32.mrf.mxu1 }
 0x302   : >> { %v11895_v22 = vpop.f32.mrf.mxu0  ;;  %v11897_v26 = vpop.f32.mrf.mxu1  ;;  %3467 = vmatmul.mubr.f32.gmra.mxu0 %v15955_v5  ;;  %v7845_v5 = vld [vmem:[%s10800_s13 + $0x3a0] sm:$0xff] }
 0x303   : >> { %15992 = vst [vmem:[#allocation107_spill] sm:$0xff] %v11895_v22  ;;  %7787 = vmatprep.mubr.msk.f32.mxu0 %vm15993_vm11, %v15956_v4  ;;  %4396 = vmatpush2.msra.mxu1 %v7845_v5  ;;  %v7844_v5 = vld [vmem:[%s10800_s13 + $0x398] sm:$0xff]  ;;  %vm16007_vm11 = vmmov %vm15740_vm2 }
 0x304   : >> { %v2815_v39 = vpop.f32.mrf.mxu0  ;;  %v3009_v10 = vpop.f32.mrf.mxu1  ;;  %4397 = vmatprep.subr.mxu1 %v15910_v37  ;;  %v2086_v22 = vld [vmem:[#allocation2 + $0x19a] sm:$0xff] }
 0x305   : >> { %v15999_v10 = vld [vmem:[#allocation83_spill] sm:$0xff]  ;;  %4398 = vmatpush2.msra.mxu1 %v7844_v5  ;;  %v2246_v5 = vpop.permute.xlu1 %2245 }
 0x306   : >> { %v11903_v7 = vpop.f32.mrf.mxu0  ;;  %v11905_v6 = vpop.f32.mrf.mxu1  ;;  %3472 = vmatmul.mubr.f32.gmra.mxu0 %v15960_v15  ;;  %4399 = vmatprep.subr.mxu1 %v15910_v37 }
 0x307   : >> { %15994 = vst [vmem:[#allocation108_spill] sm:$0xff] %v11903_v7  ;;  %7788 = vmatprep.mubr.msk.f32.mxu0 %vm15995_vm3, %v15961_v57  ;;  %4400 = vmatpush2.msra.mxu1 %v7843_v36  ;;  %vm16010_vm3 = vmmov %vm15740_vm2 }
 0x308   : >> { %v2820_v45 = vpop.f32.mrf.mxu0  ;;  %v3014_v59 = vpop.f32.mrf.mxu1  ;;  %4401 = vmatprep.subr.mxu1 %v15910_v37 }
 0x309   : >> { %4402 = vmatpush2.msra.mxu1 %v7842_v14 }
 0x30a   : >> { %v11911_v31 = vpop.f32.mrf.mxu0  ;;  %v11913_v2 = vpop.f32.mrf.mxu1  ;;  %3477 = vmatmul.mubr.f32.gmra.mxu0 %v15965_v34  ;;  %4403 = vmatprep.subr.mxu1 %v15910_v37 }
 0x30b   : >> { %15996 = vst [vmem:[#allocation91_spill] sm:$0xff] %v11911_v31  ;;  %7789 = vmatprep.mubr.msk.f32.mxu0 %vm15997_vm6, %v15966_v18  ;;  %v16001_v18 = vld [vmem:[#allocation97_spill] sm:$0xff]  ;;  %vm16011_vm6 = vmmov %vm15740_vm2 }
 0x30c   : >> { %v2825_v4 = vpop.f32.mrf.mxu0  ;;  %v3019_v15 = vpop.f32.mrf.mxu1 }
 0x30d   : >> { %v16002_v4 = vld [vmem:[#allocation84_spill] sm:$0xff] }
 0x30e   : >> { %v11919_v39 = vpop.f32.mrf.mxu0  ;;  %v11921_v57 = vpop.f32.mrf.mxu1  ;;  %3482 = vmatmul.mubr.f32.gmra.mxu0 %v15969_v28 }
 0x30f   : >> { %15998 = vst [vmem:[#allocation109_spill] sm:$0xff] %v11919_v39  ;;  %7790 = vmatprep.mubr.msk.f32.mxu0 %vm15740_vm2, %v15999_v10 }
 0x310   : >> { %v2830_v45 = vpop.f32.mrf.mxu0  ;;  %v3024_v59 = vpop.f32.mrf.mxu1 }
 0x311   : >> { %v16005_v45 = vld [vmem:[#allocation85_spill] sm:$0xff]  ;;  %v16006_v59 = vld [vmem:[#allocation98_spill] sm:$0xff] }
 0x312   : >> { %v11927_v34 = vpop.f32.mrf.mxu0  ;;  %v11929_v31 = vpop.f32.mrf.mxu1  ;;  %3487 = vmatmul.mubr.f32.gmra.mxu0 %v16001_v18  ;;  %v1978_v18 = vld [vmem:[#allocation2 + $0x198] sm:$0xff] }
 0x313   : >> { %16000 = vst [vmem:[#allocation92_spill] sm:$0xff] %v11927_v34  ;;  %7791 = vmatprep.mubr.msk.f32.mxu0 %vm16003_vm7, %v16002_v4  ;;  %vm16013_vm7 = vmmov %vm15740_vm2 }
 0x314   : >> { %v2835_v28 = vpop.f32.mrf.mxu0  ;;  %v3029_v15 = vpop.f32.mrf.mxu1 }
 0x315   : >> { %v16009_v28 = vld [vmem:[#allocation101_spill] sm:$0xff]  ;;  %v2356_v15 = vsel %vm16010_vm3, %v1978_v18, %v2246_v5  ;;  %v1980_v18 = vld [vmem:[#allocation2 + $0x1a8] sm:$0xff]  ;;  %vm16016_vm3 = vmmov %vm15740_vm2 }
 0x316   : >> { %v11935_v39 = vpop.f32.mrf.mxu0  ;;  %v11937_v10 = vpop.f32.mrf.mxu1  ;;  %3492 = vmatmul.mubr.f32.gmra.mxu0 %v16005_v45 }
 0x317   : >> { %16004 = vst [vmem:[#allocation110_spill] sm:$0xff] %v11935_v39  ;;  %7792 = vmatprep.mubr.msk.f32.mxu0 %vm16007_vm11, %v16006_v59  ;;  %v2248_v45 = vpop.permute.xlu0 %2247  ;;  %v1979_v59 = vld [vmem:[#allocation2 + $0x1a0] sm:$0xff]  ;;  %vm16015_vm11 = vmmov %vm15740_vm2 }
 0x318   : >> { %v2840_v34 = vpop.f32.mrf.mxu0  ;;  %v3034_v7 = vpop.f32.mrf.mxu1  ;;  %v2087_v39 = vld [vmem:[#allocation2 + $0x1a2] sm:$0xff] }
 0x31a   : >> { %v11943_v35 = vpop.f32.mrf.mxu0  ;;  %v11945_v4 = vpop.f32.mrf.mxu1  ;;  %3497 = vmatmul.mubr.f32.gmra.mxu0 %v16009_v28 }
 0x31b   : >> { %16008 = vst [vmem:[#allocation111_spill] sm:$0xff] %v11943_v35  ;;  %7793 = vmatprep.mubr.msk.f32.mxu0 %vm16011_vm6, %v2086_v22  ;;  %v2357_v35 = vsel %vm15740_vm2, %v1979_v59, %v2248_v45  ;;  %v2250_v28 = vpop.permute.xlu1 %2249  ;;  %v2088_v22 = vld [vmem:[#allocation2 + $0x1aa] sm:$0xff]  ;;  %vm16021_vm6 = vnez %v16020_v49 }
 0x31c   : >> { %v2845_v34 = vpop.f32.mrf.mxu0  ;;  %v3039_v7 = vpop.f32.mrf.mxu1 }
 0x31e   : >> { %v11951_v38 = vpop.f32.mrf.mxu0  ;;  %v11953_v36 = vpop.f32.mrf.mxu1  ;;  %3502 = vmatmul.mubr.f32.gmra.mxu0 %v2356_v15  ;;  %v2358_v15 = vsel %vm16015_vm11, %v1980_v18, %v2250_v28  ;;  %vm16024_vm11 = vmmov %vm15740_vm2 }
 0x31f   : >> { %16012 = vst [vmem:[#allocation112_spill] sm:$0xff] %v11951_v38  ;;  %7794 = vmatprep.mubr.msk.f32.mxu0 %vm16013_vm7, %v2087_v39  ;;  %v7841_v38 = vld [vmem:[%s10800_s13 + $0x380] sm:$0xff] }
 0x320   : >> { %v2850_v41 = vpop.f32.mrf.mxu0  ;;  %v3044_v5 = vpop.f32.mrf.mxu1  ;;  %4404 = vmatpush2.msra.mxu1 %v7841_v38 }
 0x321   : >> { %4996 = vmatprep.subr.mxu1 %v15910_v37 }
 0x322   : >> { %v11958_v34 = vpop.f32.mrf.mxu0  ;;  %v11960_v7 = vpop.f32.mrf.mxu1  ;;  %3507 = vmatmul.mubr.f32.gmra.mxu0 %v2357_v35 }
 0x323   : >> { %16014 = vst [vmem:[#allocation113_spill] sm:$0xff] %v11958_v34  ;;  %7795 = vmatprep.mubr.msk.f32.mxu0 %vm16016_vm3, %v2088_v22  ;;  %v16018_v34 = vld [vmem:[#allocation88_spill] sm:$0xff] }
 0x324   : >> { %v2855_v39 = vpop.f32.mrf.mxu0  ;;  %v3049_v45 = vpop.f32.mrf.mxu1  ;;  %v2938_v19 = vadd.f32 %v11785_v53, %v16018_v34 }
 0x325   : >> { %v16019_v45 = vld [vmem:[#allocation89_spill] sm:$0xff] }
 0x326   : >> { %v11965_v41 = vpop.f32.mrf.mxu0  ;;  %v11967_v59 = vpop.f32.mrf.mxu1  ;;  %3512 = vmatmul.mubr.f32.gmra.mxu0 %v2358_v15 }
 0x327   : >> { %16017 = vst [vmem:[#allocation114_spill] sm:$0xff] %v11965_v41  ;;  %v2943_v41 = vadd.f32 %v11793_v47, %v16019_v45 }
 0x328   : >> { %v2860_v5 = vpop.f32.mrf.mxu0  ;;  %v3054_v14 = vpop.f32.mrf.mxu1 }
 0x32a   : >> { %v11972_v35 = vpop.f32.mrf.mxu1  ;;  %v3278_v28 = vpop.f32.mrf.mxu0 }
 0x32b   : >> { %v3517_v18 = vadd.f32 %v3278_v28, %v2938_v19  ;;  %v2948_v19 = vadd.f32 %v11801_v44, %v11588_v56 }
 0x32c   : >> { %v3059_v22 = vpop.f32.mrf.mxu1  ;;  %v3280_v39 = vpop.f32.mrf.mxu0 }
 0x32d   : >> { %v3565_v15 = vmax.f32 %v3517_v18, 0.0  ;;  %v16022_v18 = vld [vmem:[#allocation67_spill] sm:$0xff] }
 0x32e   : >> { %v11977_v5 = vpop.f32.mrf.mxu1  ;;  %v3283_v14 = vpop.f32.mrf.mxu0  ;;  %vm16023_vm7 = vnez %v16022_v18 }
 0x32f   : >> { %v3613_v53 = vsel %vm16021_vm6, %v3565_v15, 0.0  ;;  %v3518_v38 = vadd.f32 %v3283_v14, %v2943_v41  ;;  %v2953_v15 = vadd.f32 %v11809_v60, %v11597_v11  ;;  %v16025_v14 = vld [vmem:[#allocation13_spill] sm:$0xff] }
 0x330   : >> { %3661 = vst.msk [vmem:[#allocation3 + $0x19] sm:$0xff] %vm15740_vm2, %v3613_v53  ;;  %v3064_v34 = vpop.f32.mrf.mxu1  ;;  %v3285_v43 = vpop.f32.mrf.mxu0  ;;  %vm16026_vm3 = vnez %v16025_v14 }
 0x331   : >> { %v3566_v28 = vmax.f32 %v3518_v38, 0.0 }
 0x332   : >> { %v11985_v22 = vpop.f32.mrf.mxu1  ;;  %v3288_v47 = vpop.f32.mrf.mxu0 }
 0x333   : >> { %v3614_v39 = vsel %vm16023_vm7, %v3566_v28, 0.0  ;;  %v3519_v41 = vadd.f32 %v3288_v47, %v2948_v19  ;;  %v7812_v47 = vld [vmem:[%s10800_s13 + $0x2b0] sm:$0xff] }
 0x334   : >> { %3662 = vst.msk [vmem:[#allocation3 + $0x21] sm:$0xff] %vm16024_vm11, %v3614_v39  ;;  %v3069_v45 = vpop.f32.mrf.mxu1  ;;  %v3290_v43 = vpop.f32.mrf.mxu0  ;;  %v2958_v39 = vadd.f32 %v11817_v42, %v11606_v9  ;;  %4658 = vmatpush1.msra.mxu0 %v7812_v47  ;;  %v2963_v9 = vadd.f32 %v11825_v0, %v11615_v24 }
 0x335   : >> { %v3567_v56 = vmax.f32 %v3519_v41, 0.0  ;;  %4659 = vmatprep.subr.mxu0 %v15910_v37  ;;  %v16027_v45 = vld [vmem:[#allocation77_spill] sm:$0xff] }
 0x336   : >> { %v11993_v44 = vpop.f32.mrf.mxu1  ;;  %v3293_v12 = vpop.f32.mrf.mxu0  ;;  %vm16028_vm11 = vnez %v16027_v45 }
 0x337   : >> { %v3615_v53 = vsel %vm16026_vm3, %v3567_v56, 0.0  ;;  %v3520_v38 = vadd.f32 %v3293_v12, %v2953_v15  ;;  %v3768_v34 = vld [vmem:[#allocation3 + $0x19] sm:$0xff]  ;;  %vm16029_vm3 = vmmov %vm15740_vm2 }
 0x338   : >> { %3663 = vst.msk [vmem:[#allocation3 + $0x29] sm:$0xff] %vm15740_vm2, %v3615_v53  ;;  %v3074_v28 = vpop.f32.mrf.mxu1  ;;  %v3295_v19 = vpop.f32.mrf.mxu0  ;;  %3933 = vrot.lane.b32.xlu0 %v3768_v34, %s8563_s9 }
 0x339   : >> { %v3568_v11 = vmax.f32 %v3520_v38, 0.0  ;;  %v16030_v19 = vld [vmem:[#allocation8_spill] sm:$0xff] }
 0x33a   : >> { %v12002_v60 = vpop.f32.mrf.mxu1  ;;  %v3298_v41 = vpop.f32.mrf.mxu0 }
 0x33b   : >> { %v3616_v43 = vsel %vm16028_vm11, %v3568_v11, 0.0  ;;  %v3521_v15 = vadd.f32 %v3298_v41, %v2958_v39  ;;  %v3769_v56 = vld [vmem:[#allocation3 + $0x21] sm:$0xff]  ;;  %vm16031_vm11 = vnez %v16030_v19 }
 0x33c   : >> { %v3822_v12 = vld [vmem:[#allocation3 + $0x1a] sm:$0xff]  ;;  %3664 = vst.msk [vmem:[#allocation3 + $0x31] sm:$0xff] %vm15740_vm2, %v3616_v43  ;;  %v3079_v53 = vpop.f32.mrf.mxu1  ;;  %v3300_v34 = vpop.f32.mrf.mxu0  ;;  %3935 = vrot.lane.b32.xlu1 %v3769_v56, %s8563_s9  ;;  %v7811_v56 = vld [vmem:[%s10800_s13 + $0x2a8] sm:$0xff] }
 0x33d   : >> { %7849 = vmatprep.mubr.msk.f32.mxu1 %vm16029_vm3, %v3822_v12  ;;  %v3569_v42 = vmax.f32 %v3521_v15, 0.0  ;;  %v2968_v12 = vadd.f32 %v11833_v50, %v11624_v16  ;;  %4660 = vmatpush1.msra.mxu0 %v7811_v56  ;;  %v16032_v53 = vld [vmem:[#allocation10_spill] sm:$0xff]  ;;  %v2973_v16 = vadd.f32 %v11841_v23, %v11633_v33 }
 0x33e   : >> { %v12012_v38 = vpop.f32.mrf.mxu1  ;;  %v3303_v28 = vpop.f32.mrf.mxu0  ;;  %4661 = vmatprep.subr.mxu0 %v15910_v37  ;;  %vm16033_vm3 = vnez %v16032_v53 }
 0x33f   : >> { %v3617_v47 = vsel %vm16031_vm11, %v3569_v42, 0.0  ;;  %v3522_v39 = vadd.f32 %v3303_v28, %v2963_v9  ;;  %v3770_v11 = vld [vmem:[#allocation3 + $0x29] sm:$0xff] }
 0x340   : >> { %3665 = vst.msk [vmem:[#allocation3 + $0x39] sm:$0xff] %vm15740_vm2, %v3617_v47  ;;  %v3084_v41 = vpop.f32.mrf.mxu1  ;;  %v3305_v43 = vpop.f32.mrf.mxu0  ;;  %3937 = vrot.lane.b32.xlu0 %v3770_v11, %s8563_s9 }
 0x341   : >> { %v3570_v24 = vmax.f32 %v3522_v39, 0.0  ;;  %v16034_v41 = vld [vmem:[#allocation19_spill] sm:$0xff] }
 0x342   : >> { %v12021_v0 = vpop.f32.mrf.mxu1  ;;  %v3308_v15 = vpop.f32.mrf.mxu0  ;;  %vm16035_vm11 = vnez %v16034_v41 }
 0x343   : >> { %v3618_v34 = vsel %vm16033_vm3, %v3570_v24, 0.0  ;;  %v3523_v9 = vadd.f32 %v3308_v15, %v2968_v12  ;;  %v3771_v42 = vld [vmem:[#allocation3 + $0x31] sm:$0xff]  ;;  %vm16036_vm3 = vmmov %vm15740_vm2 }
 0x344   : >> { %3666 = vst.msk [vmem:[#allocation3 + $0x41] sm:$0xff] %vm15740_vm2, %v3618_v34  ;;  %v3089_v28 = vpop.f32.mrf.mxu1  ;;  %v3310_v47 = vpop.f32.mrf.mxu0  ;;  %3939 = vrot.lane.b32.xlu1 %v3771_v42, %s8563_s9  ;;  %v7810_v34 = vld [vmem:[%s10800_s13 + $0x2a0] sm:$0xff]  ;;  %v2978_v42 = vadd.f32 %v11849_v52, %v11642_v3  ;;  %v2983_v3 = vadd.f32 %v11857_v29, %v11651_v40 }
 0x345   : >> { %v3571_v50 = vmax.f32 %v3523_v9, 0.0  ;;  %4662 = vmatpush1.msra.mxu0 %v7810_v34  ;;  %v16037_v28 = vld [vmem:[#allocation14_spill] sm:$0xff] }
 0x346   : >> { %v12030_v39 = vpop.f32.mrf.mxu1  ;;  %v3313_v11 = vpop.f32.mrf.mxu0  ;;  %4663 = vmatprep.subr.mxu0 %v15910_v37  ;;  %vm16038_vm2 = vnez %v16037_v28 }
 0x347   : >> { %v3619_v43 = vsel %vm16035_vm11, %v3571_v50, 0.0  ;;  %v3524_v56 = vadd.f32 %v3313_v11, %v2973_v16  ;;  %v3772_v12 = vld [vmem:[#allocation3 + $0x39] sm:$0xff] }
 0x348   : >> { %3667 = vst.msk [vmem:[#allocation3 + $0x49] sm:$0xff] %vm16036_vm3, %v3619_v43  ;;  %v3094_v24 = vpop.f32.mrf.mxu1  ;;  %v3315_v15 = vpop.f32.mrf.mxu0  ;;  %3941 = vrot.lane.b32.xlu0 %v3772_v12, %s8563_s9 }
 0x349   : >> { %v3572_v33 = vmax.f32 %v3524_v56, 0.0  ;;  %v16039_v24 = vld [vmem:[#allocation22_spill] sm:$0xff] }
 0x34a   : >> { %v12039_v23 = vpop.f32.mrf.mxu1  ;;  %v3318_v9 = vpop.f32.mrf.mxu0  ;;  %vm16040_vm11 = vnez %v16039_v24 }
 0x34b   : >> { %v3620_v47 = vsel %vm16038_vm2, %v3572_v33, 0.0  ;;  %v3525_v16 = vadd.f32 %v3318_v9, %v2978_v42  ;;  %v3773_v50 = vld [vmem:[#allocation3 + $0x41] sm:$0xff]  ;;  %vm16041_vm2 = vmmov %vm16036_vm3 }
 0x34c   : >> { %3668 = vst.msk [vmem:[#allocation3 + $0x51] sm:$0xff] %vm16036_vm3, %v3620_v47  ;;  %v3099_v11 = vpop.f32.mrf.mxu1  ;;  %v3320_v43 = vpop.f32.mrf.mxu0  ;;  %3943 = vrot.lane.b32.xlu1 %v3773_v50, %s8563_s9  ;;  %v7809_v47 = vld [vmem:[%s10800_s13 + $0x298] sm:$0xff]  ;;  %v2988_v50 = vadd.f32 %v11865_v20, %v11660_v63  ;;  %v2993_v63 = vadd.f32 %v11873_v27, %v11669_v21 }
 0x34d   : >> { %v3573_v52 = vmax.f32 %v3525_v16, 0.0  ;;  %4664 = vmatpush1.msra.mxu0 %v7809_v47  ;;  %v16042_v11 = vld [vmem:[#allocation11_spill] sm:$0xff] }
 0x34e   : >> { %v12048_v56 = vpop.f32.mrf.mxu1  ;;  %v3323_v12 = vpop.f32.mrf.mxu0  ;;  %4665 = vmatprep.subr.mxu0 %v15910_v37  ;;  %vm16043_vm3 = vnez %v16042_v11 }
 0x34f   : >> { %v3621_v15 = vsel %vm16040_vm11, %v3573_v52, 0.0  ;;  %v3526_v34 = vadd.f32 %v3323_v12, %v2983_v3  ;;  %v3774_v42 = vld [vmem:[#allocation3 + $0x49] sm:$0xff] }
 0x350   : >> { %3669 = vst.msk [vmem:[#allocation3 + $0x59] sm:$0xff] %vm16041_vm2, %v3621_v15  ;;  %v3104_v33 = vpop.f32.mrf.mxu1  ;;  %v3325_v9 = vpop.f32.mrf.mxu0  ;;  %3945 = vrot.lane.b32.xlu0 %v3774_v42, %s8563_s9 }
 0x351   : >> { %v3574_v40 = vmax.f32 %v3526_v34, 0.0  ;;  %v16044_v33 = vld [vmem:[#allocation21_spill] sm:$0xff] }
 0x352   : >> { %v12057_v29 = vpop.f32.mrf.mxu1  ;;  %v3328_v16 = vpop.f32.mrf.mxu0  ;;  %vm16045_vm11 = vnez %v16044_v33 }
 0x353   : >> { %v3622_v43 = vsel %vm16043_vm3, %v3574_v40, 0.0  ;;  %v3527_v3 = vadd.f32 %v3328_v16, %v2988_v50  ;;  %v3775_v52 = vld [vmem:[#allocation3 + $0x51] sm:$0xff]  ;;  %vm16046_vm3 = vmmov %vm16041_vm2 }
 0x354   : >> { %3670 = vst.msk [vmem:[#allocation3 + $0x61] sm:$0xff] %vm16041_vm2, %v3622_v43  ;;  %v3109_v12 = vpop.f32.mrf.mxu1  ;;  %v3330_v15 = vpop.f32.mrf.mxu0  ;;  %3947 = vrot.lane.b32.xlu1 %v3775_v52, %s8563_s9  ;;  %v7808_v43 = vld [vmem:[%s10800_s13 + $0x290] sm:$0xff]  ;;  %v2998_v52 = vadd.f32 %v11881_v51, %v11678_v13  ;;  %v3003_v13 = vadd.f32 %v11889_v54, %v11687_v62 }
 0x355   : >> { %v3575_v20 = vmax.f32 %v3527_v3, 0.0  ;;  %4666 = vmatpush1.msra.mxu0 %v7808_v43  ;;  %v16047_v12 = vld [vmem:[#allocation32_spill] sm:$0xff] }
 0x356   : >> { %v12066_v34 = vpop.f32.mrf.mxu1  ;;  %v3333_v42 = vpop.f32.mrf.mxu0  ;;  %4667 = vmatprep.subr.mxu0 %v15910_v37  ;;  %vm16048_vm2 = vnez %v16047_v12 }
 0x357   : >> { %v3623_v9 = vsel %vm16045_vm11, %v3575_v20, 0.0  ;;  %v3528_v47 = vadd.f32 %v3333_v42, %v2993_v63  ;;  %v3776_v50 = vld [vmem:[#allocation3 + $0x59] sm:$0xff] }
 0x358   : >> { %3671 = vst.msk [vmem:[#allocation3 + $0x69] sm:$0xff] %vm16046_vm3, %v3623_v9  ;;  %v3114_v40 = vpop.f32.mrf.mxu1  ;;  %v3335_v16 = vpop.f32.mrf.mxu0  ;;  %3949 = vrot.lane.b32.xlu0 %v3776_v50, %s8563_s9 }
 0x359   : >> { %v3576_v21 = vmax.f32 %v3528_v47, 0.0  ;;  %v16049_v40 = vld [vmem:[#allocation36_spill] sm:$0xff] }
 0x35a   : >> { %v12075_v27 = vpop.f32.mrf.mxu1  ;;  %v3338_v3 = vpop.f32.mrf.mxu0  ;;  %vm16050_vm11 = vnez %v16049_v40 }
 0x35b   : >> { %v3624_v15 = vsel %vm16048_vm2, %v3576_v21, 0.0  ;;  %v3529_v63 = vadd.f32 %v3338_v3, %v2998_v52  ;;  %v3777_v20 = vld [vmem:[#allocation3 + $0x61] sm:$0xff]  ;;  %vm16051_vm2 = vmmov %vm16046_vm3 }
 0x35c   : >> { %3672 = vst.msk [vmem:[#allocation3 + $0x71] sm:$0xff] %vm16046_vm3, %v3624_v15  ;;  %v3119_v42 = vpop.f32.mrf.mxu1  ;;  %v3340_v9 = vpop.f32.mrf.mxu0  ;;  %3951 = vrot.lane.b32.xlu1 %v3777_v20, %s8563_s9  ;;  %v7807_v15 = vld [vmem:[%s10800_s13 + $0x288] sm:$0xff]  ;;  %v3008_v20 = vadd.f32 %v11897_v26, %v11696_v58  ;;  %v3013_v58 = vadd.f32 %v11905_v6, %v11705_v8  ;;  %v3018_v8 = vadd.f32 %v11913_v2, %v11714_v25 }
 0x35d   : >> { %v3577_v51 = vmax.f32 %v3529_v63, 0.0  ;;  %4668 = vmatpush1.msra.mxu0 %v7807_v15  ;;  %v16052_v42 = vld [vmem:[#allocation28_spill] sm:$0xff]  ;;  %v3023_v25 = vadd.f32 %v11921_v57, %v11722_v30  ;;  %v3028_v30 = vadd.f32 %v11929_v31, %v11731_v55  ;;  %v3033_v55 = vadd.f32 %v11937_v10, %v11740_v46 }
 0x35e   : >> { %v12084_v47 = vpop.f32.mrf.mxu1  ;;  %v3343_v50 = vpop.f32.mrf.mxu0  ;;  %4669 = vmatprep.subr.mxu0 %v15910_v37  ;;  %vm16053_vm3 = vnez %v16052_v42 }
 0x35f   : >> { %v3625_v16 = vsel %vm16050_vm11, %v3577_v51, 0.0  ;;  %v3530_v43 = vadd.f32 %v3343_v50, %v3003_v13  ;;  %v3778_v52 = vld [vmem:[#allocation3 + $0x69] sm:$0xff] }
 0x360   : >> { %3673 = vst.msk [vmem:[#allocation3 + $0x79] sm:$0xff] %vm16051_vm2, %v3625_v16  ;;  %v3124_v21 = vpop.f32.mrf.mxu1  ;;  %v3345_v3 = vpop.f32.mrf.mxu0  ;;  %3953 = vrot.lane.b32.xlu0 %v3778_v52, %s8563_s9 }
 0x361   : >> { %v3578_v62 = vmax.f32 %v3530_v43, 0.0  ;;  %v16054_v21 = vld [vmem:[#allocation37_spill] sm:$0xff] }
 0x362   : >> { %v12093_v54 = vpop.f32.mrf.mxu1  ;;  %v3348_v63 = vpop.f32.mrf.mxu0  ;;  %vm16055_vm11 = vnez %v16054_v21 }
 0x363   : >> { %v3626_v9 = vsel %vm16053_vm3, %v3578_v62, 0.0  ;;  %v3531_v13 = vadd.f32 %v3348_v63, %v3008_v20  ;;  %v3779_v51 = vld [vmem:[#allocation3 + $0x71] sm:$0xff]  ;;  %vm16056_vm3 = vmmov %vm16051_vm2 }
 0x364   : >> { %3674 = vst.msk [vmem:[#allocation3 + $0x81] sm:$0xff] %vm16051_vm2, %v3626_v9  ;;  %v3129_v50 = vpop.f32.mrf.mxu1  ;;  %v3350_v16 = vpop.f32.mrf.mxu0  ;;  %3955 = vrot.lane.b32.xlu1 %v3779_v51, %s8563_s9  ;;  %v7806_v9 = vld [vmem:[%s10800_s13 + $0x280] sm:$0xff] }
 0x365   : >> { %v3579_v26 = vmax.f32 %v3531_v13, 0.0  ;;  %4670 = vmatpush1.msra.mxu0 %v7806_v9  ;;  %v16057_v50 = vld [vmem:[#allocation24_spill] sm:$0xff] }
 0x366   : >> { %v12102_v43 = vpop.f32.mrf.mxu1  ;;  %v3353_v52 = vpop.f32.mrf.mxu0  ;;  %4671 = vmatprep.subr.mxu0 %v15910_v37  ;;  %vm16058_vm2 = vnez %v16057_v50 }
 0x367   : >> { %v3627_v3 = vsel %vm16055_vm11, %v3579_v26, 0.0  ;;  %v3532_v15 = vadd.f32 %v3353_v52, %v3013_v58  ;;  %v3780_v20 = vld [vmem:[#allocation3 + $0x79] sm:$0xff] }
 0x368   : >> { %3675 = vst.msk [vmem:[#allocation3 + $0x89] sm:$0xff] %vm16056_vm3, %v3627_v3  ;;  %v3134_v62 = vpop.f32.mrf.mxu1  ;;  %v3355_v63 = vpop.f32.mrf.mxu0  ;;  %3957 = vrot.lane.b32.xlu0 %v3780_v20, %s8563_s9  ;;  %v7805_v20 = vld [vmem:[%s10800_s13 + $0x278] sm:$0xff] }
 0x369   : >> { %v3580_v6 = vmax.f32 %v3532_v15, 0.0  ;;  %4672 = vmatpush1.msra.mxu0 %v7805_v20 }
 0x36a   : >> { %v12111_v13 = vpop.f32.mrf.mxu1  ;;  %v3358_v51 = vpop.f32.mrf.mxu0  ;;  %4673 = vmatprep.subr.mxu0 %v15910_v37 }
 0x36b   : >> { %v3628_v16 = vsel %vm16058_vm2, %v3580_v6, 0.0  ;;  %v3533_v58 = vadd.f32 %v3358_v51, %v3018_v8  ;;  %v3781_v26 = vld [vmem:[#allocation3 + $0x81] sm:$0xff] }
 0x36c   : >> { %3676 = vst.msk [vmem:[#allocation3 + $0x91] sm:$0xff] %vm16056_vm3, %v3628_v16  ;;  %v3139_v52 = vpop.f32.mrf.mxu1  ;;  %v3360_v3 = vpop.f32.mrf.mxu0  ;;  %3959 = vrot.lane.b32.xlu1 %v3781_v26, %s8563_s9 }
 0x36d   : >> { %v3581_v2 = vmax.f32 %v3533_v58, 0.0  ;;  %v7804_v58 = vld [vmem:[%s10800_s13 + $0x270] sm:$0xff]  ;;  %v16060_v3 = vld [vmem:[#allocation39_spill] sm:$0xff] }
 0x36e   : >> { %v12121_v15 = vpop.f32.mrf.mxu1  ;;  %v3363_v62 = vpop.f32.mrf.mxu0  ;;  %4674 = vmatpush1.msra.mxu0 %v7804_v58  ;;  %vm16061_vm1 = vnez %v16060_v3 }
 0x36f   : >> { %v3629_v9 = vsel %vm10517_vm9, %v3581_v2, 0.0  ;;  %v3534_v8 = vadd.f32 %v3363_v62, %v3023_v25  ;;  %v3782_v6 = vld [vmem:[#allocation3 + $0x89] sm:$0xff]  ;;  %4675 = vmatprep.subr.mxu0 %v15910_v37 }
 0x370   : >> { %3677 = vst.msk [vmem:[#allocation3 + $0x99] sm:$0xff] %vm16056_vm3, %v3629_v9  ;;  %v3144_v51 = vpop.f32.mrf.mxu1  ;;  %v3365_v16 = vpop.f32.mrf.mxu0  ;;  %3961 = vrot.lane.b32.xlu0 %v3782_v6, %s8563_s9 }
 0x371   : >> { %v3582_v57 = vmax.f32 %v3534_v8, 0.0 }
 0x372   : >> { %v12131_v26 = vpop.f32.mrf.mxu1  ;;  %v3368_v52 = vpop.f32.mrf.mxu0 }
 0x373   : >> { %v3630_v20 = vsel %vm16061_vm1, %v3582_v57, 0.0  ;;  %v3535_v25 = vadd.f32 %v3368_v52, %v3028_v30  ;;  %v3783_v2 = vld [vmem:[#allocation3 + $0x91] sm:$0xff]  ;;  %vm16063_vm1 = vmmov %vm16056_vm3 }
 0x374   : >> { %3678 = vst.msk [vmem:[#allocation3 + $0xa1] sm:$0xff] %vm16056_vm3, %v3630_v20  ;;  %v3149_v62 = vpop.f32.mrf.mxu1  ;;  %v3370_v9 = vpop.f32.mrf.mxu0  ;;  %3963 = vrot.lane.b32.xlu1 %v3783_v2, %s8563_s9  ;;  %v3038_v20 = vadd.f32 %v11945_v4, %v11749_v61  ;;  %vm16065_vm3 = vmmov %vm16063_vm1  ;;  %v16066_v61 = vld [vmem:[#allocation102_spill] sm:$0xff] }
 0x375   : >> { %v3583_v31 = vmax.f32 %v3535_v25, 0.0  ;;  %v7803_v25 = vld [vmem:[%s10800_s13 + $0x268] sm:$0xff]  ;;  %v3043_v4 = vadd.f32 %v11953_v36, %v16066_v61  ;;  %v7802_v61 = vld [vmem:[%s10800_s13 + $0x260] sm:$0xff] }
 0x376   : >> { %v12140_v8 = vpop.f32.mrf.mxu1  ;;  %v3373_v6 = vpop.f32.mrf.mxu0  ;;  %4676 = vmatpush1.msra.mxu0 %v7803_v25 }
 0x377   : >> { %v3631_v16 = vsel %vm10576_vm5, %v3583_v31, 0.0  ;;  %v3536_v30 = vadd.f32 %v3373_v6, %v3033_v55  ;;  %v3784_v57 = vld [vmem:[#allocation3 + $0x99] sm:$0xff]  ;;  %4677 = vmatprep.subr.mxu0 %v15910_v37 }
 0x378   : >> { %3679 = vst.msk [vmem:[#allocation3 + $0xa9] sm:$0xff] %vm16063_vm1, %v3631_v16  ;;  %v3154_v58 = vpop.f32.mrf.mxu1  ;;  %v3375_v52 = vpop.f32.mrf.mxu0  ;;  %3965 = vrot.lane.b32.xlu0 %v3784_v57, %s8563_s9  ;;  %4678 = vmatpush1.msra.mxu0 %v7802_v61 }
 0x379   : >> { %v3584_v2 = vmax.f32 %v3536_v30, 0.0  ;;  %4679 = vmatprep.subr.mxu0 %v15910_v37 }
 0x37a   : >> { %v12148_v46 = vpop.f32.mrf.mxu1  ;;  %v3378_v10 = vpop.f32.mrf.mxu0 }
 0x37b   : >> { %v3632_v9 = vsel %vm10545_vm10, %v3584_v2, 0.0  ;;  %v3537_v31 = vadd.f32 %v3378_v10, %v3038_v20  ;;  %v3785_v55 = vld [vmem:[#allocation3 + $0xa1] sm:$0xff] }
 0x37c   : >> { %3680 = vst.msk [vmem:[#allocation3 + $0xb1] sm:$0xff] %vm16065_vm3, %v3632_v9  ;;  %v3159_v6 = vpop.f32.mrf.mxu1  ;;  %v3380_v16 = vpop.f32.mrf.mxu0  ;;  %3967 = vrot.lane.b32.xlu1 %v3785_v55, %s8563_s9  ;;  %v16068_v55 = vld [vmem:[#allocation90_spill] sm:$0xff]  ;;  %vm16070_vm3 = vmmov %vm16063_vm1 }
 0x37d   : >> { %v3585_v30 = vmax.f32 %v3537_v31, 0.0  ;;  %v3048_v6 = vadd.f32 %v11960_v7, %v16068_v55  ;;  %v16071_v7 = vld [vmem:[#allocation93_spill] sm:$0xff] }
 0x37e   : >> { %v12158_v57 = vpop.f32.mrf.mxu1  ;;  %v3383_v58 = vpop.f32.mrf.mxu0 }
 0x37f   : >> { %v3633_v20 = vsel %vm10731_vm13, %v3585_v30, 0.0  ;;  %v3538_v2 = vadd.f32 %v3383_v58, %v3043_v4  ;;  %v3786_v10 = vld [vmem:[#allocation3 + $0xa9] sm:$0xff] }
 0x380   : >> { %3681 = vst.msk [vmem:[#allocation3 + $0xb9] sm:$0xff] %vm16063_vm1, %v3633_v20  ;;  %v3164_v25 = vpop.f32.mrf.mxu1  ;;  %v3385_v9 = vpop.f32.mrf.mxu0  ;;  %3969 = vrot.lane.b32.xlu0 %v3786_v10, %s8563_s9 }
 0x381   : >> { %v3586_v16 = vmax.f32 %v3538_v2, 0.0  ;;  %v3053_v2 = vadd.f32 %v11967_v59, %v16071_v7  ;;  %v16074_v7 = vld [vmem:[#allocation49_spill] sm:$0xff] }
 0x382   : >> { %v12166_v36 = vpop.f32.mrf.mxu1  ;;  %v3388_v31 = vpop.f32.mrf.mxu0  ;;  %vm16075_vm4 = vnez %v16074_v7 }
 0x383   : >> { %v3634_v52 = vsel %vm10706_vm15, %v3586_v16, 0.0  ;;  %v3539_v30 = vadd.f32 %v3388_v31, %v3048_v6  ;;  %v3787_v4 = vld [vmem:[#allocation3 + $0xb1] sm:$0xff] }
 0x384   : >> { %3682 = vst.msk [vmem:[#allocation3 + $0xc1] sm:$0xff] %vm16070_vm3, %v3634_v52  ;;  %v3169_v58 = vpop.f32.mrf.mxu1  ;;  %v3390_v20 = vpop.f32.mrf.mxu0  ;;  %3971 = vrot.lane.b32.xlu1 %v3787_v4, %s8563_s9  ;;  %v16073_v4 = vld [vmem:[#allocation95_spill] sm:$0xff]  ;;  %vm16076_vm3 = vmmov %vm16063_vm1 }
 0x385   : >> { %v3587_v10 = vmax.f32 %v3539_v30, 0.0  ;;  %v3058_v58 = vadd.f32 %v11972_v35, %v16073_v4  ;;  %v7801_v30 = vld [vmem:[%s10800_s13 + $0x258] sm:$0xff]  ;;  %v3063_v35 = vadd.f32 %v11977_v5, %v11791_v1 }
 0x386   : >> { %v12176_v25 = vpop.f32.mrf.mxu1  ;;  %v3393_v9 = vpop.f32.mrf.mxu0  ;;  %4680 = vmatpush1.msra.mxu0 %v7801_v30 }
 0x387   : >> { %v3635_v6 = vsel %vm10765_vm8, %v3587_v10, 0.0  ;;  %v3540_v16 = vadd.f32 %v3393_v9, %v3053_v2  ;;  %v3788_v31 = vld [vmem:[#allocation3 + $0xb9] sm:$0xff]  ;;  %4681 = vmatprep.subr.mxu0 %v15910_v37 }
 0x388   : >> { %3683 = vst.msk [vmem:[#allocation3 + $0xc9] sm:$0xff] %vm16063_vm1, %v3635_v6  ;;  %v3174_v52 = vpop.f32.mrf.mxu1  ;;  %v3395_v61 = vpop.f32.mrf.mxu0  ;;  %3973 = vrot.lane.b32.xlu0 %v3788_v31, %s8563_s9  ;;  %v16077_v6 = vld [vmem:[#allocation72_spill] sm:$0xff] }
 0x389   : >> { %v3588_v20 = vmax.f32 %v3540_v16, 0.0  ;;  %vm16078_vm1 = vnez %v16077_v6 }
 0x38a   : >> { %v3398_v59 = vpop.f32.mrf.mxu0 }
 0x38b   : >> { %v3636_v62 = vsel %vm16075_vm4, %v3588_v20, 0.0  ;;  %v3541_v51 = vadd.f32 %v3398_v59, %v3058_v58  ;;  %v3789_v55 = vld [vmem:[#allocation3 + $0xc1] sm:$0xff]  ;;  %vm16079_vm4 = vmmov %vm16076_vm3  ;;  %v7800_v58 = vld [vmem:[%s10800_s13 + $0x250] sm:$0xff] }
 0x38c   : >> { %3684 = vst.msk [vmem:[#allocation3 + $0xd1] sm:$0xff] %vm16076_vm3, %v3636_v62  ;;  %v3400_v2 = vpop.f32.mrf.mxu0  ;;  %3975 = vrot.lane.b32.xlu1 %v3789_v55, %s8563_s9  ;;  %v3068_v62 = vadd.f32 %v11985_v22, %v11799_v48  ;;  %v16080_v20 = vld [vmem:[#allocation68_spill] sm:$0xff]  ;;  %4682 = vmatpush1.msra.mxu0 %v7800_v58  ;;  %v3073_v48 = vadd.f32 %v11993_v44, %v11807_v17 }
 0x38d   : >> { %v3589_v10 = vmax.f32 %v3541_v51, 0.0  ;;  %vm16081_vm3 = vnez %v16080_v20  ;;  %4683 = vmatprep.subr.mxu0 %v15910_v37  ;;  %v16083_v2 = vld [vmem:[#allocation7_spill] sm:$0xff] }
 0x38e   : >> { %v3403_v9 = vpop.f32.mrf.mxu0 }
 0x38f   : >> { %v3637_v16 = vsel %vm16078_vm1, %v3589_v10, 0.0  ;;  %v3542_v31 = vadd.f32 %v3403_v9, %v3063_v35  ;;  %v3790_v52 = vld [vmem:[#allocation3 + $0xc9] sm:$0xff]  ;;  %vm16082_vm1 = vmmov %vm16079_vm4 }
 0x390   : >> { %3685 = vst.msk [vmem:[#allocation3 + $0xd9] sm:$0xff] %vm16079_vm4, %v3637_v16  ;;  %v3405_v61 = vpop.f32.mrf.mxu0  ;;  %3977 = vrot.lane.b32.xlu0 %v3790_v52, %s8563_s9  ;;  %vm16084_vm4 = vnez %v16083_v2 }
 0x391   : >> { %v3590_v55 = vmax.f32 %v3542_v31, 0.0  ;;  %v3078_v31 = vadd.f32 %v12002_v60, %v11815_v32 }
 0x392   : >> { %v3408_v4 = vpop.f32.mrf.mxu0 }
 0x393   : >> { %v3638_v1 = vsel %vm16081_vm3, %v3590_v55, 0.0  ;;  %v3543_v5 = vadd.f32 %v3408_v4, %v3068_v62  ;;  %v3791_v51 = vld [vmem:[#allocation3 + $0xd1] sm:$0xff]  ;;  %vm16085_vm3 = vmmov %vm16082_vm1 }
 0x394   : >> { %3686 = vst.msk [vmem:[#allocation3 + $0xe1] sm:$0xff] %vm16082_vm1, %v3638_v1  ;;  %v3410_v59 = vpop.f32.mrf.mxu0  ;;  %3979 = vrot.lane.b32.xlu1 %v3791_v51, %s8563_s9  ;;  %v7799_v62 = vld [vmem:[%s10800_s13 + $0x248] sm:$0xff]  ;;  %v16086_v55 = vld [vmem:[#allocation4_spill] sm:$0xff]  ;;  %v16090_v51 = vld [vmem:[#allocation18_spill] sm:$0xff] }
 0x395   : >> { %v3591_v22 = vmax.f32 %v3543_v5, 0.0  ;;  %vm16087_vm1 = vnez %v16086_v55  ;;  %4684 = vmatpush1.msra.mxu0 %v7799_v62  ;;  %v16089_v1 = vld [vmem:[#allocation96_spill] sm:$0xff]  ;;  %v12573_v3 = vld [vmem:[#allocation3 + $0xca] sm:$0xff] }
 0x396   : >> { %v3413_v30 = vpop.f32.mrf.mxu0  ;;  %4685 = vmatprep.subr.mxu0 %v15910_v37  ;;  %v3083_v32 = vadd.f32 %v12012_v38, %v16089_v1  ;;  %v16098_v1 = vld [vmem:[#allocation17_spill] sm:$0xff] }
 0x397   : >> { %v3639_v35 = vsel %vm16084_vm4, %v3591_v22, 0.0  ;;  %v3544_v10 = vadd.f32 %v3413_v30, %v3073_v48  ;;  %v3792_v9 = vld [vmem:[#allocation3 + $0xd9] sm:$0xff]  ;;  %vm16088_vm4 = vmmov %vm16085_vm3 }
 0x398   : >> { %3687 = vst.msk [vmem:[#allocation3 + $0xe9] sm:$0xff] %vm16085_vm3, %v3639_v35  ;;  %v3415_v16 = vpop.f32.mrf.mxu0  ;;  %3981 = vrot.lane.b32.xlu0 %v3792_v9, %s8563_s9  ;;  %vm16091_vm3 = vnez %v16090_v51  ;;  %v16093_v35 = vld [vmem:[#allocation99_spill] sm:$0xff] }
 0x399   : >> { %v3592_v52 = vmax.f32 %v3544_v10, 0.0  ;;  %v3088_v10 = vadd.f32 %v12021_v0, %v16093_v35  ;;  %v12581_v63 = vld [vmem:[#allocation3 + $0xd2] sm:$0xff] }
 0x39a   : >> { %v3418_v61 = vpop.f32.mrf.mxu0 }
 0x39b   : >> { %v3640_v17 = vsel %vm16087_vm1, %v3592_v52, 0.0  ;;  %v3545_v44 = vadd.f32 %v3418_v61, %v3078_v31  ;;  %v3793_v4 = vld [vmem:[#allocation3 + $0xe1] sm:$0xff]  ;;  %vm16092_vm1 = vmmov %vm16088_vm4 }
 0x39c   : >> { %3688 = vst.msk [vmem:[#allocation3 + $0xf1] sm:$0xff] %vm16088_vm4, %v3640_v17  ;;  %v3420_v58 = vpop.f32.mrf.mxu0  ;;  %3983 = vrot.lane.b32.xlu1 %v3793_v4, %s8563_s9  ;;  %v7798_v31 = vld [vmem:[%s10800_s13 + $0x240] sm:$0xff]  ;;  %v12589_v21 = vld [vmem:[#allocation3 + $0xda] sm:$0xff] }
 0x39d   : >> { %v3593_v60 = vmax.f32 %v3545_v44, 0.0  ;;  %v16094_v52 = vld [vmem:[#allocation6_spill] sm:$0xff]  ;;  %4686 = vmatpush1.msra.mxu0 %v7798_v31  ;;  %v16097_v44 = vld [vmem:[#allocation100_spill] sm:$0xff]  ;;  %v16102_v31 = vld [vmem:[#allocation9_spill] sm:$0xff] }
 0x39e   : >> { %v3423_v5 = vpop.f32.mrf.mxu0  ;;  %vm16095_vm4 = vnez %v16094_v52  ;;  %4703 = vmatprep.subr.mxu0 %v15910_v37  ;;  %v3093_v0 = vadd.f32 %v12030_v39, %v16097_v44  ;;  %v3714_v39 = vld [vmem:[#allocation3 + $0x18] sm:$0xff] }
 0x39f   : >> { %v3641_v59 = vsel %vm16091_vm3, %v3593_v60, 0.0  ;;  %v3546_v48 = vadd.f32 %v3423_v5, %v3083_v32  ;;  %v3794_v22 = vld [vmem:[#allocation3 + $0xe9] sm:$0xff]  ;;  %vm16096_vm3 = vmmov %vm16092_vm1 }
 0x3a0   : >> { %3689 = vst.msk [vmem:[#allocation3 + $0xf9] sm:$0xff] %vm16092_vm1, %v3641_v59  ;;  %v3425_v30 = vpop.f32.mrf.mxu0  ;;  %3985 = vrot.lane.b32.xlu0 %v3794_v22, %s8563_s9  ;;  %vm16099_vm1 = vnez %v16098_v1  ;;  %v12597_v40 = vld [vmem:[#allocation3 + $0xe2] sm:$0xff] }
 0x3a1   : >> { %v3594_v9 = vmax.f32 %v3546_v48, 0.0  ;;  %v16101_v48 = vld [vmem:[#allocation103_spill] sm:$0xff] }
 0x3a2   : >> { %v3428_v16 = vpop.f32.mrf.mxu0  ;;  %v3098_v22 = vadd.f32 %v12039_v23, %v16101_v48  ;;  %v3823_v23 = vld [vmem:[#allocation3 + $0x22] sm:$0xff]  ;;  %v16108_v48 = vld [vmem:[#allocation20_spill] sm:$0xff] }
 0x3a3   : >> { %v3642_v38 = vsel %vm16095_vm4, %v3594_v9, 0.0  ;;  %v3547_v61 = vadd.f32 %v3428_v16, %v3088_v10  ;;  %v3795_v62 = vld [vmem:[#allocation3 + $0xf1] sm:$0xff]  ;;  %vm16100_vm4 = vmmov %vm16096_vm3  ;;  %v7963_v9 = vld [vmem:[%s10800_s13 + $0x438] sm:$0xff] }
 0x3a4   : >> { %3690 = vst.msk [vmem:[#allocation3 + $0x101] sm:$0xff] %vm16096_vm3, %v3642_v38  ;;  %v3430_v17 = vpop.f32.mrf.mxu0  ;;  %3987 = vrot.lane.b32.xlu1 %v3795_v62, %s8563_s9  ;;  %v7821_v16 = vld [vmem:[%s10800_s13 + $0x2f8] sm:$0xff]  ;;  %vm16103_vm3 = vnez %v16102_v31  ;;  %v12605_v33 = vld [vmem:[#allocation3 + $0xea] sm:$0xff] }
 0x3a5   : >> { %v3595_v4 = vmax.f32 %v3547_v61, 0.0  ;;  %4704 = vmatpush2.msra.mxu0 %v7821_v16  ;;  %v16111_v16 = vld [vmem:[#allocation104_spill] sm:$0xff] }
 0x3a6   : >> { %v3433_v58 = vpop.f32.mrf.mxu0  ;;  %4705 = vmatprep.subr.mxu0 %v15910_v37 }
 0x3a7   : >> { %v3643_v32 = vsel %vm16099_vm1, %v3595_v4, 0.0  ;;  %v3548_v60 = vadd.f32 %v3433_v58, %v3093_v0  ;;  %v3796_v5 = vld [vmem:[#allocation3 + $0xf9] sm:$0xff]  ;;  %vm16104_vm1 = vmmov %vm16100_vm4  ;;  %v16106_v4 = vld [vmem:[#allocation86_spill] sm:$0xff] }
 0x3a8   : >> { %3691 = vst.msk [vmem:[#allocation3 + $0x109] sm:$0xff] %vm16100_vm4, %v3643_v32  ;;  %v3435_v59 = vpop.f32.mrf.mxu0  ;;  %3989 = vrot.lane.b32.xlu0 %v3796_v5, %s8563_s9  ;;  %vm16105_vm4 = vmmov %vm16104_vm1  ;;  %v7962_v0 = vld [vmem:[%s10800_s13 + $0x430] sm:$0xff]  ;;  %v3103_v58 = vadd.f32 %v12048_v56, %v16106_v4  ;;  %v7961_v56 = vld [vmem:[%s10800_s13 + $0x428] sm:$0xff] }
 0x3a9   : >> { %v3596_v30 = vmax.f32 %v3548_v60, 0.0  ;;  %v3715_v59 = vld [vmem:[#allocation3 + $0x20] sm:$0xff]  ;;  %v7820_v4 = vld [vmem:[%s10800_s13 + $0x2f0] sm:$0xff] }
 0x3aa   : >> { %v3438_v35 = vpop.f32.mrf.mxu0  ;;  %v3934_v10 = vpop.permute.xlu0 %3933  ;;  %4706 = vmatpush2.msra.mxu0 %v7820_v4  ;;  %v7958_v4 = vld [vmem:[%s10800_s13 + $0x410] sm:$0xff] }
 0x3ab   : >> { %v3644_v38 = vsel %vm16103_vm3, %v3596_v30, 0.0  ;;  %v3549_v61 = vadd.f32 %v3438_v35, %v3098_v22  ;;  %v12245_v62 = vsel %vm16104_vm1, %v3714_v39, %v3934_v10  ;;  %v3797_v17 = vld [vmem:[#allocation3 + $0x101] sm:$0xff]  ;;  %vm16107_vm3 = vmmov %vm16104_vm1  ;;  %vm16109_vm1 = vnez %v16108_v48  ;;  %4707 = vmatprep.subr.mxu0 %v15910_v37  ;;  %v12613_v24 = vld [vmem:[#allocation3 + $0xf2] sm:$0xff] }
 0x3ac   : >> { %3692 = vst.msk [vmem:[#allocation3 + $0x111] sm:$0xff] %vm16105_vm4, %v3644_v38  ;;  %v3440_v44 = vpop.f32.mrf.mxu0  ;;  %3991 = vrot.lane.b32.xlu1 %v3797_v17, %s8563_s9  ;;  %4406 = vmatmul.mubr.f32.vlgmr.msra.gmra.mxu1 %v12245_v62  ;;  %vm16110_vm4 = vmmov %vm16107_vm3  ;;  %v3108_v38 = vadd.f32 %v12057_v29, %v16111_v16  ;;  %v3717_v16 = vld [vmem:[#allocation3 + $0x30] sm:$0xff]  ;;  %v12621_v41 = vld [vmem:[#allocation3 + $0xfa] sm:$0xff] }
 0x3ad   : >> { %v3597_v32 = vmax.f32 %v3549_v61, 0.0  ;;  %4997 = vmatpush1.msra.mxu1 %v7963_v9  ;;  %7850 = vmatprep.mubr.msk.f32.mxu1 %vm16107_vm3, %v3823_v23  ;;  %v3824_v9 = vld [vmem:[#allocation3 + $0x2a] sm:$0xff]  ;;  %16201 = vst [vmem:[#allocation115_spill] sm:$0xff] %v12613_v24  ;;  %16205 = vst [vmem:[#allocation117_spill] sm:$0xff] %v12621_v41 }
 0x3ae   : >> { %v3443_v60 = vpop.f32.mrf.mxu0  ;;  %v3936_v5 = vpop.permute.xlu1 %3935  ;;  %4998 = vmatprep.subr.mxu1 %v15910_v37  ;;  %v3716_v44 = vld [vmem:[#allocation3 + $0x28] sm:$0xff] }
 0x3af   : >> { %v3645_v22 = vsel %vm16109_vm1, %v3597_v32, 0.0  ;;  %v3550_v30 = vadd.f32 %v3443_v60, %v3103_v58  ;;  %v12259_v35 = vsel %vm16110_vm4, %v3715_v59, %v3936_v5  ;;  %v3798_v10 = vld [vmem:[#allocation3 + $0x109] sm:$0xff]  ;;  %4999 = vmatpush1.msra.mxu1 %v7962_v0  ;;  %vm16112_vm1 = vmmov %vm16107_vm3 }
 0x3b0   : >> { %3693 = vst.msk [vmem:[#allocation3 + $0x119] sm:$0xff] %vm16107_vm3, %v3645_v22  ;;  %v3445_v39 = vpop.f32.mrf.mxu0  ;;  %3993 = vrot.lane.b32.xlu0 %v3798_v10, %s8563_s9  ;;  %4411 = vmatmul.mubr.f32.gmra.mxu1 %v12259_v35  ;;  %v7960_v0 = vld [vmem:[%s10800_s13 + $0x420] sm:$0xff]  ;;  %vm16115_vm3 = vmmov %vm16112_vm1  ;;  %v12280_v22 = vld [vmem:[#allocation3 + $0x32] sm:$0xff] }
 0x3b1   : >> { %v3598_v61 = vmax.f32 %v3550_v30, 0.0  ;;  %7851 = vmatprep.mubr.msk.f32.mxu1 %vm16112_vm1, %v3824_v9  ;;  %5000 = vmatprep.subr.mxu1 %v15910_v37  ;;  %v16113_v58 = vld [vmem:[#allocation30_spill] sm:$0xff]  ;;  %v7959_v30 = vld [vmem:[%s10800_s13 + $0x418] sm:$0xff]  ;;  %v16116_v10 = vld [vmem:[#allocation87_spill] sm:$0xff] }
 0x3b2   : >> { %v3448_v17 = vpop.f32.mrf.mxu0  ;;  %v3938_v23 = vpop.permute.xlu0 %3937  ;;  %5001 = vmatpush1.msra.mxu1 %v7961_v56  ;;  %vm16114_vm4 = vnez %v16113_v58  ;;  %v3113_v56 = vadd.f32 %v12066_v34, %v16116_v10  ;;  %v3718_v10 = vld [vmem:[#allocation3 + $0x38] sm:$0xff]  ;;  %v12629_v19 = vld [vmem:[#allocation3 + $0x102] sm:$0xff] }
 0x3b3   : >> { %v3646_v32 = vsel %vm16114_vm4, %v3598_v61, 0.0  ;;  %v3551_v60 = vadd.f32 %v3448_v17, %v3108_v38  ;;  %v12274_v5 = vsel %vm16115_vm3, %v3716_v44, %v3938_v23  ;;  %v3799_v29 = vld [vmem:[#allocation3 + $0x111] sm:$0xff]  ;;  %5002 = vmatprep.subr.mxu1 %v15910_v37  ;;  %vm16117_vm3 = vmmov %vm16112_vm1  ;;  %v16118_v61 = vld [vmem:[#allocation34_spill] sm:$0xff]  ;;  %16208 = vst [vmem:[#allocation94_spill] sm:$0xff] %v12629_v19 }
 0x3b4   : >> { %3694 = vst.msk [vmem:[#allocation3 + $0x121] sm:$0xff] %vm16112_vm1, %v3646_v32  ;;  %v3450_v59 = vpop.f32.mrf.mxu0  ;;  %3995 = vrot.lane.b32.xlu1 %v3799_v29, %s8563_s9  ;;  %4416 = vmatmul.mubr.f32.gmra.mxu1 %v12274_v5  ;;  %vm16119_vm1 = vnez %v16118_v61  ;;  %vm16120_vm4 = vmmov %vm16117_vm3  ;;  %v12298_v32 = vld [vmem:[#allocation3 + $0x3a] sm:$0xff]  ;;  %v12637_v14 = vld [vmem:[#allocation3 + $0x10a] sm:$0xff] }
 0x3b5   : >> { %v3599_v39 = vmax.f32 %v3551_v60, 0.0  ;;  %7852 = vmatprep.mubr.msk.f32.mxu1 %vm16117_vm3, %v12280_v22  ;;  %5003 = vmatpush1.msra.mxu1 %v7960_v0  ;;  %v16121_v60 = vld [vmem:[#allocation105_spill] sm:$0xff]  ;;  %16212 = vst [vmem:[#allocation83_spill] sm:$0xff] %v12637_v14 }
 0x3b6   : >> { %v3453_v9 = vpop.f32.mrf.mxu0  ;;  %v3940_v38 = vpop.permute.xlu1 %3939  ;;  %5004 = vmatprep.subr.mxu1 %v15910_v37  ;;  %v3118_v29 = vadd.f32 %v12075_v27, %v16121_v60  ;;  %v16127_v60 = vld [vmem:[#allocation106_spill] sm:$0xff] }
 0x3b7   : >> { %v3647_v17 = vsel %vm16119_vm1, %v3599_v39, 0.0  ;;  %v3552_v44 = vadd.f32 %v3453_v9, %v3113_v56  ;;  %v12292_v23 = vsel %vm16120_vm4, %v3717_v16, %v3940_v38  ;;  %v3800_v34 = vld [vmem:[#allocation3 + $0x119] sm:$0xff]  ;;  %5005 = vmatpush1.msra.mxu1 %v7959_v30  ;;  %vm16122_vm4 = vmmov %vm16117_vm3  ;;  %v7957_v39 = vld [vmem:[%s10800_s13 + $0x408] sm:$0xff] }
 0x3b8   : >> { %3695 = vst.msk [vmem:[#allocation3 + $0x129] sm:$0xff] %vm16117_vm3, %v3647_v17  ;;  %v3455_v0 = vpop.f32.mrf.mxu0  ;;  %3997 = vrot.lane.b32.xlu0 %v3800_v34, %s8563_s9  ;;  %4421 = vmatmul.mubr.f32.gmra.mxu1 %v12292_v23  ;;  %v7819_v9 = vld [vmem:[%s10800_s13 + $0x2e8] sm:$0xff]  ;;  %v16123_v16 = vld [vmem:[#allocation26_spill] sm:$0xff]  ;;  %vm16125_vm1 = vmmov %vm16122_vm4 }
 0x3b9   : >> { %v3600_v59 = vmax.f32 %v3552_v44, 0.0  ;;  %7853 = vmatprep.mubr.msk.f32.mxu1 %vm16122_vm4, %v12298_v32  ;;  %5006 = vmatprep.subr.mxu1 %v15910_v37  ;;  %vm16124_vm3 = vnez %v16123_v16  ;;  %vm16126_vm4 = vmmov %vm16125_vm1  ;;  %v7956_v0 = vld [vmem:[%s10800_s13 + $0x400] sm:$0xff]  ;;  %v12645_v49 = vld [vmem:[#allocation3 + $0x112] sm:$0xff] }
 0x3ba   : >> { %v3458_v30 = vpop.f32.mrf.mxu0  ;;  %v3942_v56 = vpop.permute.xlu0 %3941  ;;  %5007 = vmatpush1.msra.mxu1 %v7958_v4  ;;  %4708 = vmatpush2.msra.mxu0 %v7819_v9  ;;  %v12316_v4 = vld [vmem:[#allocation3 + $0x42] sm:$0xff]  ;;  %v16128_v9 = vld [vmem:[#allocation35_spill] sm:$0xff]  ;;  %16215 = vst [vmem:[#allocation84_spill] sm:$0xff] %v12645_v49 }
 0x3bb   : >> { %v3648_v38 = vsel %vm16124_vm3, %v3600_v59, 0.0  ;;  %v3553_v17 = vadd.f32 %v3458_v30, %v3118_v29  ;;  %v12310_v34 = vsel %vm16125_vm1, %v3718_v10, %v3942_v56  ;;  %v3801_v27 = vld [vmem:[#allocation3 + $0x121] sm:$0xff]  ;;  %5008 = vmatprep.subr.mxu1 %v15910_v37  ;;  %v3123_v29 = vadd.f32 %v12084_v47, %v16127_v60  ;;  %4709 = vmatprep.subr.mxu0 %v15910_v37  ;;  %vm16130_vm3 = vmmov %vm16125_vm1  ;;  %v12334_v60 = vld [vmem:[#allocation3 + $0x4a] sm:$0xff] }
 0x3bc   : >> { %3696 = vst.msk [vmem:[#allocation3 + $0x131] sm:$0xff] %vm16126_vm4, %v3648_v38  ;;  %v3460_v44 = vpop.f32.mrf.mxu0  ;;  %3999 = vrot.lane.b32.xlu1 %v3801_v27, %s8563_s9  ;;  %4426 = vmatmul.mubr.f32.gmra.mxu1 %v12310_v34  ;;  %v3719_v10 = vld [vmem:[#allocation3 + $0x40] sm:$0xff]  ;;  %vm16129_vm4 = vnez %v16128_v9  ;;  %v16131_v9 = vld [vmem:[#allocation107_spill] sm:$0xff] }
 0x3bd   : >> { %v3601_v59 = vmax.f32 %v3553_v17, 0.0  ;;  %7854 = vmatprep.mubr.msk.f32.mxu1 %vm16125_vm1, %v12316_v4  ;;  %5009 = vmatpush1.msra.mxu1 %v7957_v39  ;;  %v7955_v17 = vld [vmem:[%s10800_s13 + $0x3f8] sm:$0xff] }
 0x3be   : >> { %v3463_v30 = vpop.f32.mrf.mxu0  ;;  %v3944_v56 = vpop.permute.xlu1 %3943  ;;  %5010 = vmatprep.subr.mxu1 %v15910_v37 }
 0x3bf   : >> { %v3649_v38 = vsel %vm16129_vm4, %v3601_v59, 0.0  ;;  %v3554_v27 = vadd.f32 %v3463_v30, %v3123_v29  ;;  %v12328_v44 = vsel %vm16130_vm3, %v3719_v10, %v3944_v56  ;;  %v3802_v47 = vld [vmem:[#allocation3 + $0x129] sm:$0xff]  ;;  %5011 = vmatpush1.msra.mxu1 %v7956_v0  ;;  %v3128_v29 = vadd.f32 %v12093_v54, %v16131_v9  ;;  %vm16132_vm3 = vmmov %vm16125_vm1  ;;  %v7954_v56 = vld [vmem:[%s10800_s13 + $0x3f0] sm:$0xff] }
 0x3c0   : >> { %3697 = vst.msk [vmem:[#allocation3 + $0x139] sm:$0xff] %vm16125_vm1, %v3649_v38  ;;  %v3465_v39 = vpop.f32.mrf.mxu0  ;;  %4001 = vrot.lane.b32.xlu0 %v3802_v47, %s8563_s9  ;;  %4431 = vmatmul.mubr.f32.gmra.mxu1 %v12328_v44  ;;  %v3720_v30 = vld [vmem:[#allocation3 + $0x48] sm:$0xff]  ;;  %v16133_v47 = vld [vmem:[#allocation23_spill] sm:$0xff]  ;;  %vm16135_vm4 = vmmov %vm16132_vm3 }
 0x3c1   : >> { %v3602_v59 = vmax.f32 %v3554_v27, 0.0  ;;  %7855 = vmatprep.mubr.msk.f32.mxu1 %vm16132_vm3, %v12334_v60  ;;  %5012 = vmatprep.subr.mxu1 %v15910_v37  ;;  %v7818_v38 = vld [vmem:[%s10800_s13 + $0x2e0] sm:$0xff]  ;;  %vm16134_vm1 = vnez %v16133_v47  ;;  %v12352_v27 = vld [vmem:[#allocation3 + $0x52] sm:$0xff] }
 0x3c2   : >> { %v3468_v0 = vpop.f32.mrf.mxu0  ;;  %v3946_v10 = vpop.permute.xlu0 %3945  ;;  %5013 = vmatpush1.msra.mxu1 %v7955_v17  ;;  %4710 = vmatpush2.msra.mxu0 %v7818_v38  ;;  %v7953_v17 = vld [vmem:[%s10800_s13 + $0x3e8] sm:$0xff] }
 0x3c3   : >> { %v3650_v39 = vsel %vm16134_vm1, %v3602_v59, 0.0  ;;  %v3555_v16 = vadd.f32 %v3468_v0, %v3128_v29  ;;  %v12346_v61 = vsel %vm16135_vm4, %v3720_v30, %v3946_v10  ;;  %v3803_v54 = vld [vmem:[#allocation3 + $0x131] sm:$0xff]  ;;  %5014 = vmatprep.subr.mxu1 %v15910_v37  ;;  %vm16137_vm4 = vmmov %vm16132_vm3  ;;  %4711 = vmatprep.subr.mxu0 %v15910_v37 }
 0x3c4   : >> { %3698 = vst.msk [vmem:[#allocation3 + $0x141] sm:$0xff] %vm16132_vm3, %v3650_v39  ;;  %v3470_v9 = vpop.f32.mrf.mxu0  ;;  %4003 = vrot.lane.b32.xlu1 %v3803_v54, %s8563_s9  ;;  %4436 = vmatmul.mubr.f32.gmra.mxu1 %v12346_v61  ;;  %v16136_v59 = vld [vmem:[#allocation108_spill] sm:$0xff]  ;;  %v3721_v10 = vld [vmem:[#allocation3 + $0x50] sm:$0xff]  ;;  %v16138_v39 = vld [vmem:[#allocation25_spill] sm:$0xff] }
 0x3c5   : >> { %v3133_v29 = vadd.f32 %v12102_v43, %v16136_v59  ;;  %v3603_v0 = vmax.f32 %v3555_v16, 0.0  ;;  %7856 = vmatprep.mubr.msk.f32.mxu1 %vm16137_vm4, %v12352_v27  ;;  %5015 = vmatpush1.msra.mxu1 %v7954_v56  ;;  %vm16139_vm3 = vnez %v16138_v39  ;;  %vm16140_vm1 = vmmov %vm16137_vm4  ;;  %v7952_v16 = vld [vmem:[%s10800_s13 + $0x3e0] sm:$0xff]  ;;  %v12370_v59 = vld [vmem:[#allocation3 + $0x5a] sm:$0xff] }
 0x3c6   : >> { %v3473_v30 = vpop.f32.mrf.mxu0  ;;  %v3948_v38 = vpop.permute.xlu1 %3947  ;;  %5016 = vmatprep.subr.mxu1 %v15910_v37  ;;  %vm16141_vm4 = vmmov %vm16140_vm1  ;;  %v16142_v39 = vld [vmem:[#allocation91_spill] sm:$0xff] }
 0x3c7   : >> { %v3651_v54 = vsel %vm16139_vm3, %v3603_v0, 0.0  ;;  %v3556_v9 = vadd.f32 %v3473_v30, %v3133_v29  ;;  %v12364_v47 = vsel %vm16140_vm1, %v3721_v10, %v3948_v38  ;;  %v3804_v43 = vld [vmem:[#allocation3 + $0x139] sm:$0xff]  ;;  %5017 = vmatpush1.msra.mxu1 %v7953_v17  ;;  %v3138_v29 = vadd.f32 %v12111_v13, %v16142_v39  ;;  %vm16145_vm3 = vmmov %vm16140_vm1 }
 0x3c8   : >> { %3699 = vst.msk [vmem:[#allocation3 + $0x149] sm:$0xff] %vm16141_vm4, %v3651_v54  ;;  %v3475_v56 = vpop.f32.mrf.mxu0  ;;  %4005 = vrot.lane.b32.xlu0 %v3804_v43, %s8563_s9  ;;  %4441 = vmatmul.mubr.f32.gmra.mxu1 %v12364_v47  ;;  %v3722_v30 = vld [vmem:[#allocation3 + $0x58] sm:$0xff]  ;;  %v7951_v38 = vld [vmem:[%s10800_s13 + $0x3d8] sm:$0xff]  ;;  %v16143_v43 = vld [vmem:[#allocation38_spill] sm:$0xff] }
 0x3c9   : >> { %v3604_v0 = vmax.f32 %v3556_v9, 0.0  ;;  %7857 = vmatprep.mubr.msk.f32.mxu1 %vm16140_vm1, %v12370_v59  ;;  %5018 = vmatprep.subr.mxu1 %v15910_v37  ;;  %v7817_v54 = vld [vmem:[%s10800_s13 + $0x2d8] sm:$0xff]  ;;  %vm16144_vm4 = vnez %v16143_v43 }
 0x3ca   : >> { %v3478_v17 = vpop.f32.mrf.mxu0  ;;  %v3950_v10 = vpop.permute.xlu0 %3949  ;;  %5019 = vmatpush1.msra.mxu1 %v7952_v16  ;;  %4712 = vmatpush2.msra.mxu0 %v7817_v54  ;;  %v12388_v9 = vld [vmem:[#allocation3 + $0x62] sm:$0xff]  ;;  %v7950_v16 = vld [vmem:[%s10800_s13 + $0x3d0] sm:$0xff] }
 0x3cb   : >> { %v3652_v56 = vsel %vm16144_vm4, %v3604_v0, 0.0  ;;  %v3557_v58 = vadd.f32 %v3478_v17, %v3138_v29  ;;  %v12382_v48 = vsel %vm16145_vm3, %v3722_v30, %v3950_v10  ;;  %v3805_v13 = vld [vmem:[#allocation3 + $0x141] sm:$0xff]  ;;  %5020 = vmatprep.subr.mxu1 %v15910_v37  ;;  %vm16147_vm3 = vmmov %vm16140_vm1  ;;  %4713 = vmatprep.subr.mxu0 %v15910_v37 }
 0x3cc   : >> { %3700 = vst.msk [vmem:[#allocation3 + $0x151] sm:$0xff] %vm16140_vm1, %v3652_v56  ;;  %v3480_v39 = vpop.f32.mrf.mxu0  ;;  %4007 = vrot.lane.b32.xlu1 %v3805_v13, %s8563_s9  ;;  %4446 = vmatmul.mubr.f32.gmra.mxu1 %v12382_v48  ;;  %v16146_v0 = vld [vmem:[#allocation109_spill] sm:$0xff] }
 0x3cd   : >> { %v3143_v29 = vadd.f32 %v12121_v15, %v16146_v0  ;;  %v3605_v17 = vmax.f32 %v3557_v58, 0.0  ;;  %7858 = vmatprep.mubr.msk.f32.mxu1 %vm16147_vm3, %v12388_v9  ;;  %5021 = vmatpush1.msra.mxu1 %v7951_v38  ;;  %v3723_v10 = vld [vmem:[#allocation3 + $0x60] sm:$0xff]  ;;  %v7949_v58 = vld [vmem:[%s10800_s13 + $0x3c8] sm:$0xff]  ;;  %vm16150_vm3 = vmmov %vm16140_vm1 }
 0x3ce   : >> { %v3483_v30 = vpop.f32.mrf.mxu0  ;;  %v3952_v54 = vpop.permute.xlu1 %3951  ;;  %5022 = vmatprep.subr.mxu1 %v15910_v37  ;;  %v16148_v56 = vld [vmem:[#allocation41_spill] sm:$0xff]  ;;  %v12406_v0 = vld [vmem:[#allocation3 + $0x6a] sm:$0xff] }
 0x3cf   : >> { %vm16149_vm0 = vnez %v16148_v56  ;;  %v3558_v39 = vadd.f32 %v3483_v30, %v3143_v29  ;;  %v12400_v43 = vsel %vm16140_vm1, %v3723_v10, %v3952_v54  ;;  %v3806_v15 = vld [vmem:[#allocation3 + $0x149] sm:$0xff]  ;;  %5023 = vmatpush1.msra.mxu1 %v7950_v16  ;;  %v16151_v56 = vld [vmem:[#allocation92_spill] sm:$0xff] }
 0x3d0   : >> { %v3653_v13 = vsel %vm16149_vm0, %v3605_v17, 0.0  ;;  %v3485_v38 = vpop.f32.mrf.mxu0  ;;  %4009 = vrot.lane.b32.xlu0 %v3806_v15, %s8563_s9  ;;  %4451 = vmatmul.mubr.f32.gmra.mxu1 %v12400_v43  ;;  %v3148_v29 = vadd.f32 %v12131_v26, %v16151_v56  ;;  %v3724_v30 = vld [vmem:[#allocation3 + $0x68] sm:$0xff]  ;;  %v16152_v15 = vld [vmem:[#allocation40_spill] sm:$0xff]  ;;  %vm16154_vm0 = vmmov %vm16140_vm1 }
 0x3d1   : >> { %3701 = vst.msk [vmem:[#allocation3 + $0x159] sm:$0xff] %vm16150_vm3, %v3653_v13  ;;  %v3606_v17 = vmax.f32 %v3558_v39, 0.0  ;;  %7859 = vmatprep.mubr.msk.f32.mxu1 %vm16140_vm1, %v12406_v0  ;;  %5024 = vmatprep.subr.mxu1 %v15910_v37  ;;  %v7948_v54 = vld [vmem:[%s10800_s13 + $0x3c0] sm:$0xff]  ;;  %v7816_v13 = vld [vmem:[%s10800_s13 + $0x2d0] sm:$0xff]  ;;  %vm16153_vm3 = vnez %v16152_v15  ;;  %vm16155_vm1 = vmmov %vm16154_vm0 }
 0x3d2   : >> { %v3488_v16 = vpop.f32.mrf.mxu0  ;;  %v3954_v10 = vpop.permute.xlu0 %3953  ;;  %5025 = vmatpush1.msra.mxu1 %v7949_v58  ;;  %4714 = vmatpush2.msra.mxu0 %v7816_v13  ;;  %v12424_v39 = vld [vmem:[#allocation3 + $0x72] sm:$0xff]  ;;  %v7971_v58 = vld [vmem:[%s10800_s13 + $0x478] sm:$0xff] }
 0x3d3   : >> { %v3654_v38 = vsel %vm16153_vm3, %v3606_v17, 0.0  ;;  %v3559_v31 = vadd.f32 %v3488_v16, %v3148_v29  ;;  %v12418_v1 = vsel %vm16154_vm0, %v3724_v30, %v3954_v10  ;;  %v3807_v26 = vld [vmem:[#allocation3 + $0x151] sm:$0xff]  ;;  %5026 = vmatprep.subr.mxu1 %v15910_v37  ;;  %v16156_v17 = vld [vmem:[#allocation110_spill] sm:$0xff]  ;;  %4715 = vmatprep.subr.mxu0 %v15910_v37  ;;  %vm16159_vm3 = vmmov %vm16154_vm0 }
 0x3d4   : >> { %3702 = vst.msk [vmem:[#allocation3 + $0x161] sm:$0xff] %vm16155_vm1, %v3654_v38  ;;  %v3490_v56 = vpop.f32.mrf.mxu0  ;;  %4011 = vrot.lane.b32.xlu1 %v3807_v26, %s8563_s9  ;;  %4456 = vmatmul.mubr.f32.gmra.mxu1 %v12418_v1  ;;  %v3153_v29 = vadd.f32 %v12140_v8, %v16156_v17  ;;  %v3725_v10 = vld [vmem:[#allocation3 + $0x70] sm:$0xff]  ;;  %v16157_v38 = vld [vmem:[#allocation44_spill] sm:$0xff] }
 0x3d5   : >> { %v3607_v16 = vmax.f32 %v3559_v31, 0.0  ;;  %7860 = vmatprep.mubr.msk.f32.mxu1 %vm16154_vm0, %v12424_v39  ;;  %5027 = vmatpush1.msra.mxu1 %v7948_v54  ;;  %vm16158_vm1 = vnez %v16157_v38  ;;  %v7970_v31 = vld [vmem:[%s10800_s13 + $0x470] sm:$0xff]  ;;  %v16160_v38 = vld [vmem:[#allocation111_spill] sm:$0xff] }
 0x3d6   : >> { %v3493_v30 = vpop.f32.mrf.mxu0  ;;  %v3956_v13 = vpop.permute.xlu1 %3955  ;;  %5044 = vmatprep.subr.mxu1 %v15910_v37  ;;  %v12442_v17 = vld [vmem:[#allocation3 + $0x7a] sm:$0xff] }
 0x3d7   : >> { %v3655_v26 = vsel %vm16158_vm1, %v3607_v16, 0.0  ;;  %v3560_v56 = vadd.f32 %v3493_v30, %v3153_v29  ;;  %v12436_v15 = vsel %vm16159_vm3, %v3725_v10, %v3956_v13  ;;  %5045 = vmatpush2.msra.mxu1 %v7971_v58  ;;  %v3158_v29 = vadd.f32 %v12148_v46, %v16160_v38  ;;  %vm16161_vm3 = vmmov %vm16154_vm0  ;;  %v3726_v30 = vld [vmem:[#allocation3 + $0x78] sm:$0xff]  ;;  %v7969_v13 = vld [vmem:[%s10800_s13 + $0x468] sm:$0xff] }
 0x3d8   : >> { %v3808_v8 = vld [vmem:[#allocation3 + $0x159] sm:$0xff]  ;;  %3703 = vst.msk [vmem:[#allocation3 + $0x169] sm:$0xff] %vm16154_vm0, %v3655_v26  ;;  %v3495_v54 = vpop.f32.mrf.mxu0  ;;  %4461 = vmatmul.mubr.f32.gmra.mxu1 %v12436_v15  ;;  %5046 = vmatprep.subr.mxu1 %v15910_v37  ;;  %v7815_v26 = vld [vmem:[%s10800_s13 + $0x2c8] sm:$0xff]  ;;  %vm16164_vm1 = vmmov %vm16161_vm3 }
 0x3d9   : >> { %4013 = vrot.lane.b32.xlu0 %v3808_v8, %s8563_s9  ;;  %v3608_v16 = vmax.f32 %v3560_v56, 0.0  ;;  %7861 = vmatprep.mubr.msk.f32.mxu1 %vm16161_vm3, %v12442_v17  ;;  %v16162_v8 = vld [vmem:[#allocation29_spill] sm:$0xff]  ;;  %vm16165_vm3 = vmmov %vm16164_vm1 }
 0x3da   : >> { %v3498_v58 = vpop.f32.mrf.mxu0  ;;  %v3958_v10 = vpop.permute.xlu0 %3957  ;;  %5047 = vmatpush2.msra.mxu1 %v7970_v31  ;;  %vm16163_vm0 = vnez %v16162_v8  ;;  %4716 = vmatpush2.msra.mxu0 %v7815_v26  ;;  %v12460_v56 = vld [vmem:[#allocation3 + $0x82] sm:$0xff] }
 0x3db   : >> { %v3656_v54 = vsel %vm16163_vm0, %v3608_v16, 0.0  ;;  %v3561_v52 = vadd.f32 %v3498_v58, %v3158_v29  ;;  %v12454_v51 = vsel %vm16164_vm1, %v3726_v30, %v3958_v10  ;;  %v3809_v46 = vld [vmem:[#allocation3 + $0x161] sm:$0xff]  ;;  %5048 = vmatprep.subr.mxu1 %v15910_v37  ;;  %v16166_v16 = vld [vmem:[#allocation112_spill] sm:$0xff]  ;;  %4717 = vmatprep.subr.mxu0 %v15910_v37 }
 0x3dc   : >> { %3704 = vst.msk [vmem:[#allocation3 + $0x171] sm:$0xff] %vm16165_vm3, %v3656_v54  ;;  %v3500_v38 = vpop.f32.mrf.mxu0  ;;  %4015 = vrot.lane.b32.xlu1 %v3809_v46, %s8563_s9  ;;  %4466 = vmatmul.mubr.f32.gmra.mxu1 %v12454_v51  ;;  %v7968_v31 = vld [vmem:[%s10800_s13 + $0x460] sm:$0xff]  ;;  %v3163_v29 = vadd.f32 %v12158_v57, %v16166_v16  ;;  %v3727_v10 = vld [vmem:[#allocation3 + $0x80] sm:$0xff]  ;;  %vm16169_vm3 = vmmov %vm16164_vm1 }
 0x3dd   : >> { %v3609_v58 = vmax.f32 %v3561_v52, 0.0  ;;  %7862 = vmatprep.mubr.msk.f32.mxu1 %vm16164_vm1, %v12460_v56  ;;  %5049 = vmatpush2.msra.mxu1 %v7969_v13  ;;  %v16167_v54 = vld [vmem:[#allocation33_spill] sm:$0xff]  ;;  %v12478_v16 = vld [vmem:[#allocation3 + $0x8a] sm:$0xff] }
 0x3de   : >> { %v3503_v30 = vpop.f32.mrf.mxu0  ;;  %v3960_v26 = vpop.permute.xlu1 %3959  ;;  %5050 = vmatprep.subr.mxu1 %v15910_v37  ;;  %vm16168_vm12 = vnez %v16167_v54  ;;  %v7967_v52 = vld [vmem:[%s10800_s13 + $0x458] sm:$0xff] }
 0x3df   : >> { %v3657_v46 = vsel %vm16168_vm12, %v3609_v58, 0.0  ;;  %v3562_v38 = vadd.f32 %v3503_v30, %v3163_v29  ;;  %v12472_v8 = vsel %vm16169_vm3, %v3727_v10, %v3960_v26  ;;  %v3810_v57 = vld [vmem:[#allocation3 + $0x169] sm:$0xff]  ;;  %5051 = vmatpush2.msra.mxu1 %v7968_v31  ;;  %v16170_v54 = vld [vmem:[#allocation113_spill] sm:$0xff]  ;;  %vm16171_vm3 = vmmov %vm16164_vm1 }
 0x3e0   : >> { %3705 = vst.msk [vmem:[#allocation3 + $0x179] sm:$0xff] %vm16164_vm1, %v3657_v46  ;;  %v3505_v13 = vpop.f32.mrf.mxu0  ;;  %4017 = vrot.lane.b32.xlu0 %v3810_v57, %s8563_s9  ;;  %4471 = vmatmul.mubr.f32.gmra.mxu1 %v12472_v8  ;;  %v3168_v29 = vadd.f32 %v12166_v36, %v16170_v54  ;;  %v3728_v30 = vld [vmem:[#allocation3 + $0x88] sm:$0xff]  ;;  %v7966_v26 = vld [vmem:[%s10800_s13 + $0x450] sm:$0xff]  ;;  %vm16174_vm12 = vmmov %vm16171_vm3 }
 0x3e1   : >> { %v3610_v58 = vmax.f32 %v3562_v38, 0.0  ;;  %7863 = vmatprep.mubr.msk.f32.mxu1 %vm16171_vm3, %v12478_v16  ;;  %5052 = vmatprep.subr.mxu1 %v15910_v37  ;;  %v7814_v46 = vld [vmem:[%s10800_s13 + $0x2c0] sm:$0xff]  ;;  %v12496_v38 = vld [vmem:[#allocation3 + $0x92] sm:$0xff] }
 0x3e2   : >> { %v3508_v31 = vpop.f32.mrf.mxu0  ;;  %v3962_v10 = vpop.permute.xlu0 %3961  ;;  %5053 = vmatpush2.msra.mxu1 %v7967_v52  ;;  %v16172_v57 = vld [vmem:[#allocation46_spill] sm:$0xff]  ;;  %4718 = vmatpush2.msra.mxu0 %v7814_v46  ;;  %v7965_v52 = vld [vmem:[%s10800_s13 + $0x448] sm:$0xff] }
 0x3e3   : >> { %vm16173_vm1 = vnez %v16172_v57  ;;  %v3563_v55 = vadd.f32 %v3508_v31, %v3168_v29  ;;  %v12490_v2 = vsel %vm16174_vm12, %v3728_v30, %v3962_v10  ;;  %v3811_v36 = vld [vmem:[#allocation3 + $0x171] sm:$0xff]  ;;  %5054 = vmatprep.subr.mxu1 %v15910_v37  ;;  %vm16176_vm12 = vmmov %vm16171_vm3 }
 0x3e4   : >> { %v3658_v13 = vsel %vm16173_vm1, %v3610_v58, 0.0  ;;  %v3510_v54 = vpop.f32.mrf.mxu0  ;;  %4019 = vrot.lane.b32.xlu1 %v3811_v36, %s8563_s9  ;;  %4476 = vmatmul.mubr.f32.gmra.mxu1 %v12490_v2  ;;  %v16175_v58 = vld [vmem:[#allocation114_spill] sm:$0xff]  ;;  %v3729_v10 = vld [vmem:[#allocation3 + $0x90] sm:$0xff]  ;;  %vm16179_vm1 = vmmov %vm16171_vm3 }
 0x3e5   : >> { %3706 = vst.msk [vmem:[#allocation3 + $0x181] sm:$0xff] %vm16171_vm3, %v3658_v13  ;;  %v3173_v29 = vadd.f32 %v12176_v25, %v16175_v58  ;;  %v3611_v31 = vmax.f32 %v3563_v55, 0.0  ;;  %7864 = vmatprep.mubr.msk.f32.mxu1 %vm16176_vm12, %v12496_v38  ;;  %5055 = vmatpush2.msra.mxu1 %v7966_v26  ;;  %v16177_v13 = vld [vmem:[#allocation50_spill] sm:$0xff]  ;;  %v12513_v26 = vld [vmem:[#allocation3 + $0x9a] sm:$0xff]  ;;  %vm16180_vm12 = vmmov %vm16179_vm1 }
 0x3e6   : >> { %v3513_v30 = vpop.f32.mrf.mxu0  ;;  %v3964_v46 = vpop.permute.xlu1 %3963  ;;  %5056 = vmatprep.subr.mxu1 %v15910_v37  ;;  %vm16178_vm14 = vnez %v16177_v13  ;;  %v7964_v25 = vld [vmem:[%s10800_s13 + $0x440] sm:$0xff] }
 0x3e7   : >> { %v3659_v36 = vsel %vm16178_vm14, %v3611_v31, 0.0  ;;  %v3564_v54 = vadd.f32 %v3513_v30, %v3173_v29  ;;  %v12507_v57 = vsel %vm16171_vm3, %v3729_v10, %v3964_v46  ;;  %v3812_v20 = vld [vmem:[#allocation3 + $0x179] sm:$0xff]  ;;  %5057 = vmatpush2.msra.mxu1 %v7965_v52  ;;  %v3819_v58 = vld [vmem:[#allocation3 + $0x2] sm:$0xff]  ;;  %vm16181_vm3 = vmmov %vm16179_vm1 }
 0x3e8   : >> { %3707 = vst.msk [vmem:[#allocation3 + $0x189] sm:$0xff] %vm16179_vm1, %v3659_v36  ;;  %v3515_v55 = vpop.f32.mrf.mxu0  ;;  %4021 = vrot.lane.b32.xlu0 %v3812_v20, %s8563_s9  ;;  %4481 = vmatmul.mubr.f32.gmra.mxu1 %v12507_v57  ;;  %v3730_v29 = vld [vmem:[#allocation3 + $0x98] sm:$0xff]  ;;  %v16182_v52 = vld [vmem:[#allocation47_spill] sm:$0xff]  ;;  %vm16184_vm14 = vmmov %vm16181_vm3 }
 0x3e9   : >> { %v3612_v6 = vmax.f32 %v3564_v54, 0.0  ;;  %7865 = vmatprep.mubr.msk.f32.mxu1 %vm16180_vm12, %v12513_v26  ;;  %5058 = vmatprep.subr.mxu1 %v15910_v37  ;;  %vm16183_vm1 = vnez %v16182_v52  ;;  %vm16185_vm0 = vmmov %vm16181_vm3  ;;  %v12527_v46 = vld [vmem:[#allocation3 + $0xa2] sm:$0xff] }
 0x3ea   : >> { %v3966_v31 = vpop.permute.xlu0 %3965  ;;  %5059 = vmatpush2.msra.mxu1 %v7964_v25  ;;  %7897 = vmatprep.mubr.msk.f32.mxu0 %vm16181_vm3, %v3819_v58  ;;  %vm16186_vm12 = vmmov %vm16185_vm0  ;;  %v3731_v37 = vld [vmem:[#allocation3 + $0xa0] sm:$0xff]  ;;  %v12536_v25 = vld [vmem:[#allocation3 + $0xaa] sm:$0xff] }
 0x3eb   : >> { %v3660_v30 = vsel %vm16183_vm1, %v3612_v6, 0.0  ;;  %v12522_v20 = vsel %vm16184_vm14, %v3730_v29, %v3966_v31  ;;  %vm16187_vm3 = vmmov %vm16185_vm0  ;;  %v3765_v55 = vld [vmem:[#allocation3 + $0x1] sm:$0xff] }
 0x3ec   : >> { %v3813_v10 = vld [vmem:[#allocation3 + $0x181] sm:$0xff]  ;;  %3708 = vst.msk [vmem:[#allocation3 + $0x191] sm:$0xff] %vm16185_vm0, %v3660_v30  ;;  %4486 = vmatmul.mubr.f32.gmra.mxu1 %v12522_v20  ;;  %vm16188_vm14 = vmmov %vm16185_vm0 }
 0x3ed   : >> { %4023 = vrot.lane.b32.xlu1 %v3813_v10, %s8563_s9  ;;  %7866 = vmatprep.mubr.msk.f32.mxu1 %vm16186_vm12, %v12527_v46  ;;  %v3732_v58 = vld [vmem:[#allocation3 + $0xa8] sm:$0xff]  ;;  %v12546_v10 = vld [vmem:[#allocation3 + $0xb2] sm:$0xff]  ;;  %vm16189_vm12 = vmmov %vm16185_vm0 }
 0x3ee   : >> { %v3968_v36 = vpop.permute.xlu1 %3967  ;;  %vm16275_vm1 = vmmov %vm16185_vm0 }
 0x3ef   : >> { %v12532_v54 = vsel %vm16187_vm3, %v3731_v37, %v3968_v36  ;;  %v3814_v6 = vld [vmem:[#allocation3 + $0x189] sm:$0xff]  ;;  %v3767_v36 = vld [vmem:[#allocation3 + $0x11] sm:$0xff]  ;;  %vm16190_vm3 = vmmov %vm16185_vm0 }
 0x3f0   : >> { %4025 = vrot.lane.b32.xlu0 %v3814_v6, %s8563_s9  ;;  %4491 = vmatmul.mubr.f32.gmra.mxu1 %v12532_v54  ;;  %v3766_v37 = vld [vmem:[#allocation3 + $0x9] sm:$0xff] }
 0x3f1   : >> { %7867 = vmatprep.mubr.msk.f32.mxu1 %vm16188_vm14, %v12536_v25  ;;  %v3733_v6 = vld [vmem:[#allocation3 + $0xb0] sm:$0xff]  ;;  %vm16191_vm14 = vmmov %vm16185_vm0 }
 0x3f2   : >> { %v3970_v29 = vpop.permute.xlu0 %3969 }
 0x3f3   : >> { %v12541_v31 = vsel %vm16185_vm0, %v3732_v58, %v3970_v29  ;;  %v3815_v30 = vld [vmem:[#allocation3 + $0x191] sm:$0xff]  ;;  %v3816_v58 = vld [vmem:[#allocation3 + $0x199] sm:$0xff] }
 0x3f4   : >> { %4027 = vrot.lane.b32.xlu1 %v3815_v30, %s8563_s9  ;;  %3927 = vrot.lane.b32.xlu0 %v3765_v55, %s8563_s9  ;;  %v12556_v55 = vld [vmem:[#allocation3 + $0xba] sm:$0xff] }
 0x3f5   : >> { %4496 = vmatmul.mubr.f32.gmra.mxu1 %v12541_v31  ;;  %v3734_v29 = vld [vmem:[#allocation3 + $0xb8] sm:$0xff] }
 0x3f6   : >> { %7868 = vmatprep.mubr.msk.f32.mxu1 %vm16189_vm12, %v12546_v10  ;;  %v3972_v52 = vpop.permute.xlu1 %3971  ;;  %vm16192_vm12 = vmmov %vm16185_vm0 }
 0x3f7   : >> { %v12551_v13 = vsel %vm16190_vm3, %v3733_v6, %v3972_v52  ;;  %v12565_v52 = vld [vmem:[#allocation3 + $0xc2] sm:$0xff]  ;;  %vm16193_vm3 = vmmov %vm16185_vm0 }
 0x3f8   : >> { %3929 = vrot.lane.b32.xlu1 %v3766_v37, %s8563_s9  ;;  %3931 = vrot.lane.b32.xlu0 %v3767_v36, %s8563_s9  ;;  %v3735_v37 = vld [vmem:[#allocation3 + $0xc0] sm:$0xff] }
 0x3f9   : >> { %4501 = vmatmul.mubr.f32.gmra.mxu1 %v12551_v13 }
 0x3fa   : >> { %7869 = vmatprep.mubr.msk.f32.mxu1 %vm16191_vm14, %v12556_v55  ;;  %v3974_v30 = vpop.permute.xlu0 %3973  ;;  %vm16194_vm14 = vmmov %vm16185_vm0 }
 0x3fb   : >> { %v12561_v7 = vsel %vm16185_vm0, %v3734_v29, %v3974_v30 }
 0x3fc   : >> { %4029 = vrot.lane.b32.xlu1 %v3816_v58, %s8563_s9  ;;  %v3736_v58 = vld [vmem:[#allocation3 + $0xc8] sm:$0xff] }
 0x3fd   : >> { %4506 = vmatmul.mubr.f32.gmra.mxu1 %v12561_v7 }
 0x3fe   : >> { %7870 = vmatprep.mubr.msk.f32.mxu1 %vm16192_vm12, %v12565_v52  ;;  %v3976_v36 = vpop.permute.xlu1 %3975  ;;  %vm16195_vm12 = vmmov %vm16185_vm0 }
 0x3ff   : >> { %v12570_v6 = vsel %vm16193_vm3, %v3735_v37, %v3976_v36  ;;  %v3737_v37 = vld [vmem:[#allocation3 + $0xd0] sm:$0xff]  ;;  %vm16196_vm3 = vmmov %vm16185_vm0 }
 0x401   : >> { %4511 = vmatmul.mubr.f32.gmra.mxu1 %v12570_v6 }
 0x402   : >> { %7871 = vmatprep.mubr.msk.f32.mxu1 %vm16194_vm14, %v12573_v3  ;;  %v3978_v29 = vpop.permute.xlu0 %3977  ;;  %vm16197_vm14 = vmmov %vm16185_vm0 }
 0x403   : >> { %v12578_v30 = vsel %vm16185_vm0, %v3736_v58, %v3978_v29  ;;  %v3738_v58 = vld [vmem:[#allocation3 + $0xd8] sm:$0xff] }
 0x405   : >> { %4516 = vmatmul.mubr.f32.gmra.mxu1 %v12578_v30 }
 0x406   : >> { %7872 = vmatprep.mubr.msk.f32.mxu1 %vm16195_vm12, %v12581_v63  ;;  %v3980_v36 = vpop.permute.xlu1 %3979  ;;  %vm16198_vm12 = vmmov %vm16185_vm0 }
 0x407   : >> { %v12586_v50 = vsel %vm16196_vm3, %v3737_v37, %v3980_v36  ;;  %v3739_v37 = vld [vmem:[#allocation3 + $0xe0] sm:$0xff]  ;;  %vm16199_vm3 = vmmov %vm16185_vm0 }
 0x409   : >> { %4521 = vmatmul.mubr.f32.gmra.mxu1 %v12586_v50 }
 0x40a   : >> { %7873 = vmatprep.mubr.msk.f32.mxu1 %vm16197_vm14, %v12589_v21  ;;  %v3982_v29 = vpop.permute.xlu0 %3981  ;;  %vm16200_vm14 = vmmov %vm16185_vm0 }
 0x40b   : >> { %v12594_v42 = vsel %vm16185_vm0, %v3738_v58, %v3982_v29  ;;  %v3740_v58 = vld [vmem:[#allocation3 + $0xe8] sm:$0xff] }
 0x40d   : >> { %4526 = vmatmul.mubr.f32.gmra.mxu1 %v12594_v42 }
 0x40e   : >> { %7874 = vmatprep.mubr.msk.f32.mxu1 %vm16198_vm12, %v12597_v40  ;;  %v3984_v36 = vpop.permute.xlu1 %3983  ;;  %vm16202_vm12 = vmmov %vm16185_vm0 }
 0x40f   : >> { %v12602_v12 = vsel %vm16199_vm3, %v3739_v37, %v3984_v36  ;;  %v3741_v37 = vld [vmem:[#allocation3 + $0xf0] sm:$0xff]  ;;  %vm16203_vm3 = vmmov %vm16185_vm0 }
 0x411   : >> { %4531 = vmatmul.mubr.f32.gmra.mxu1 %v12602_v12 }
 0x412   : >> { %7875 = vmatprep.mubr.msk.f32.mxu1 %vm16200_vm14, %v12605_v33  ;;  %v3986_v29 = vpop.permute.xlu0 %3985  ;;  %vm16206_vm14 = vmmov %vm16185_vm0 }
 0x413   : >> { %v12610_v11 = vsel %vm16185_vm0, %v3740_v58, %v3986_v29  ;;  %v3742_v58 = vld [vmem:[#allocation3 + $0xf8] sm:$0xff] }
 0x415   : >> { %4536 = vmatmul.mubr.f32.gmra.mxu1 %v12610_v11 }
 0x416   : >> { %7876 = vmatprep.mubr.msk.f32.mxu1 %vm16202_vm12, %v12613_v24  ;;  %v3988_v36 = vpop.permute.xlu1 %3987  ;;  %vm16209_vm12 = vmmov %vm16185_vm0 }
 0x417   : >> { %v12618_v28 = vsel %vm16203_vm3, %v3741_v37, %v3988_v36  ;;  %v3743_v37 = vld [vmem:[#allocation3 + $0x100] sm:$0xff]  ;;  %vm16210_vm3 = vmmov %vm16185_vm0 }
 0x418   : >> { %16204 = vst [vmem:[#allocation116_spill] sm:$0xff] %v12618_v28 }
 0x419   : >> { %4541 = vmatmul.mubr.f32.gmra.mxu1 %v12618_v28 }
 0x41a   : >> { %7877 = vmatprep.mubr.msk.f32.mxu1 %vm16206_vm14, %v12621_v41  ;;  %v3990_v29 = vpop.permute.xlu0 %3989  ;;  %vm16213_vm14 = vmmov %vm16185_vm0 }
 0x41b   : >> { %v12626_v53 = vsel %vm16185_vm0, %v3742_v58, %v3990_v29  ;;  %v3744_v58 = vld [vmem:[#allocation3 + $0x108] sm:$0xff] }
 0x41c   : >> { %16207 = vst [vmem:[#allocation81_spill] sm:$0xff] %v12626_v53 }
 0x41d   : >> { %4546 = vmatmul.mubr.f32.gmra.mxu1 %v12626_v53  ;;  %v3820_v53 = vld [vmem:[#allocation3 + $0xa] sm:$0xff] }
 0x41e   : >> { %7878 = vmatprep.mubr.msk.f32.mxu1 %vm16209_vm12, %v12629_v19  ;;  %v3992_v36 = vpop.permute.xlu1 %3991  ;;  %vm16216_vm12 = vmmov %vm16185_vm0 }
 0x41f   : >> { %v12634_v45 = vsel %vm16210_vm3, %v3743_v37, %v3992_v36  ;;  %v3745_v37 = vld [vmem:[#allocation3 + $0x110] sm:$0xff]  ;;  %vm16217_vm3 = vmmov %vm16185_vm0 }
 0x420   : >> { %16211 = vst [vmem:[#allocation82_spill] sm:$0xff] %v12634_v45 }
 0x421   : >> { %4551 = vmatmul.mubr.f32.gmra.mxu1 %v12634_v45 }
 0x422   : >> { %7879 = vmatprep.mubr.msk.f32.mxu1 %vm16213_vm14, %v12637_v14  ;;  %v3994_v29 = vpop.permute.xlu0 %3993  ;;  %v12653_v14 = vld [vmem:[#allocation3 + $0x11a] sm:$0xff]  ;;  %vm16220_vm14 = vmmov %vm16185_vm0 }
 0x423   : >> { %v12642_v18 = vsel %vm16185_vm0, %v3744_v58, %v3994_v29  ;;  %16219 = vst [vmem:[#allocation98_spill] sm:$0xff] %v12653_v14  ;;  %v3746_v58 = vld [vmem:[#allocation3 + $0x118] sm:$0xff] }
 0x424   : >> { %16214 = vst [vmem:[#allocation97_spill] sm:$0xff] %v12642_v18 }
 0x425   : >> { %4556 = vmatmul.mubr.f32.gmra.mxu1 %v12642_v18 }
 0x426   : >> { %7880 = vmatprep.mubr.msk.f32.mxu1 %vm16216_vm12, %v12645_v49  ;;  %v3996_v36 = vpop.permute.xlu1 %3995  ;;  %v12661_v49 = vld [vmem:[#allocation3 + $0x122] sm:$0xff]  ;;  %vm16223_vm12 = vmmov %vm16185_vm0 }
 0x427   : >> { %v12650_v45 = vsel %vm16217_vm3, %v3745_v37, %v3996_v36  ;;  %16222 = vst [vmem:[#allocation88_spill] sm:$0xff] %v12661_v49  ;;  %v3747_v37 = vld [vmem:[#allocation3 + $0x120] sm:$0xff]  ;;  %vm16224_vm3 = vmmov %vm16185_vm0 }
 0x428   : >> { %16218 = vst [vmem:[#allocation85_spill] sm:$0xff] %v12650_v45 }
 0x429   : >> { %4561 = vmatmul.mubr.f32.gmra.mxu1 %v12650_v45  ;;  %v3817_v45 = vld [vmem:[#allocation3 + $0x1a1] sm:$0xff] }
 0x42a   : >> { %7881 = vmatprep.mubr.msk.f32.mxu1 %vm16220_vm14, %v12653_v14  ;;  %v3998_v29 = vpop.permute.xlu0 %3997  ;;  %4031 = vrot.lane.b32.xlu0 %v3817_v45, %s8563_s9  ;;  %v12670_v14 = vld [vmem:[#allocation3 + $0x12a] sm:$0xff]  ;;  %vm16227_vm14 = vmmov %vm16185_vm0 }
 0x42b   : >> { %v12658_v18 = vsel %vm16185_vm0, %v3746_v58, %v3998_v29  ;;  %16226 = vst [vmem:[#allocation102_spill] sm:$0xff] %v12670_v14  ;;  %v3748_v58 = vld [vmem:[#allocation3 + $0x128] sm:$0xff]  ;;  %v3749_v45 = vld [vmem:[#allocation3 + $0x130] sm:$0xff] }
 0x42c   : >> { %16221 = vst [vmem:[#allocation101_spill] sm:$0xff] %v12658_v18 }
 0x42d   : >> { %4566 = vmatmul.mubr.f32.gmra.mxu1 %v12658_v18  ;;  %v3818_v18 = vld [vmem:[#allocation3 + $0x1a9] sm:$0xff] }
 0x42e   : >> { %7882 = vmatprep.mubr.msk.f32.mxu1 %vm16223_vm12, %v12661_v49  ;;  %v4000_v36 = vpop.permute.xlu1 %3999  ;;  %4033 = vrot.lane.b32.xlu1 %v3818_v18, %s8563_s9  ;;  %vm16230_vm12 = vmmov %vm16185_vm0  ;;  %v3750_v18 = vld [vmem:[#allocation3 + $0x138] sm:$0xff] }
 0x42f   : >> { %v12666_v19 = vsel %vm16224_vm3, %v3747_v37, %v4000_v36  ;;  %v12679_v37 = vld [vmem:[#allocation3 + $0x132] sm:$0xff]  ;;  %vm16231_vm3 = vmmov %vm16185_vm0 }
 0x430   : >> { %16225 = vst [vmem:[#allocation89_spill] sm:$0xff] %v12666_v19  ;;  %16229 = vst [vmem:[#allocation93_spill] sm:$0xff] %v12679_v37 }
 0x431   : >> { %4571 = vmatmul.mubr.f32.gmra.mxu1 %v12666_v19 }
 0x432   : >> { %7883 = vmatprep.mubr.msk.f32.mxu1 %vm16227_vm14, %v12670_v14  ;;  %v4002_v29 = vpop.permute.xlu0 %4001  ;;  %v12687_v14 = vld [vmem:[#allocation3 + $0x13a] sm:$0xff]  ;;  %vm16234_vm14 = vmmov %vm16185_vm0 }
 0x433   : >> { %v12675_v49 = vsel %vm16185_vm0, %v3748_v58, %v4002_v29  ;;  %16233 = vst [vmem:[#allocation96_spill] sm:$0xff] %v12687_v14 }
 0x434   : >> { %16228 = vst [vmem:[#allocation90_spill] sm:$0xff] %v12675_v49 }
 0x435   : >> { %4576 = vmatmul.mubr.f32.gmra.mxu1 %v12675_v49  ;;  %v3711_v49 = vld [vmem:[#allocation3] sm:$0xff] }
 0x436   : >> { %7884 = vmatprep.mubr.msk.f32.mxu1 %vm16230_vm12, %v12679_v37  ;;  %v4004_v36 = vpop.permute.xlu1 %4003  ;;  %v12695_v37 = vld [vmem:[#allocation3 + $0x142] sm:$0xff]  ;;  %vm16237_vm12 = vmmov %vm16185_vm0 }
 0x437   : >> { %v12684_v19 = vsel %vm16231_vm3, %v3749_v45, %v4004_v36  ;;  %16236 = vst [vmem:[#allocation100_spill] sm:$0xff] %v12695_v37  ;;  %v3751_v45 = vld [vmem:[#allocation3 + $0x140] sm:$0xff]  ;;  %vm16238_vm3 = vmmov %vm16185_vm0 }
 0x438   : >> { %16232 = vst [vmem:[#allocation95_spill] sm:$0xff] %v12684_v19 }
 0x439   : >> { %4581 = vmatmul.mubr.f32.gmra.mxu1 %v12684_v19 }
 0x43a   : >> { %7885 = vmatprep.mubr.msk.f32.mxu1 %vm16234_vm14, %v12687_v14  ;;  %v4006_v58 = vpop.permute.xlu0 %4005  ;;  %v12703_v14 = vld [vmem:[#allocation3 + $0x14a] sm:$0xff]  ;;  %vm16241_vm14 = vmmov %vm16185_vm0 }
 0x43b   : >> { %v12692_v29 = vsel %vm16185_vm0, %v3750_v18, %v4006_v58  ;;  %16240 = vst [vmem:[#allocation86_spill] sm:$0xff] %v12703_v14  ;;  %v3752_v18 = vld [vmem:[#allocation3 + $0x148] sm:$0xff] }
 0x43c   : >> { %16235 = vst [vmem:[#allocation99_spill] sm:$0xff] %v12692_v29 }
 0x43d   : >> { %4586 = vmatmul.mubr.f32.gmra.mxu1 %v12692_v29 }
 0x43e   : >> { %7886 = vmatprep.mubr.msk.f32.mxu1 %vm16237_vm12, %v12695_v37  ;;  %v4008_v36 = vpop.permute.xlu1 %4007  ;;  %v12711_v37 = vld [vmem:[#allocation3 + $0x152] sm:$0xff]  ;;  %vm16244_vm12 = vmmov %vm16185_vm0 }
 0x43f   : >> { %v12700_v19 = vsel %vm16238_vm3, %v3751_v45, %v4008_v36  ;;  %16243 = vst [vmem:[#allocation87_spill] sm:$0xff] %v12711_v37  ;;  %v3753_v45 = vld [vmem:[#allocation3 + $0x150] sm:$0xff]  ;;  %vm16245_vm3 = vmmov %vm16185_vm0 }
 0x440   : >> { %16239 = vst [vmem:[#allocation103_spill] sm:$0xff] %v12700_v19 }
 0x441   : >> { %4591 = vmatmul.mubr.f32.gmra.mxu1 %v12700_v19 }
 0x442   : >> { %7887 = vmatprep.mubr.msk.f32.mxu1 %vm16241_vm14, %v12703_v14  ;;  %v4010_v58 = vpop.permute.xlu0 %4009  ;;  %v12719_v14 = vld [vmem:[#allocation3 + $0x15a] sm:$0xff]  ;;  %vm16248_vm14 = vmmov %vm16185_vm0 }
 0x443   : >> { %v12708_v29 = vsel %vm16185_vm0, %v3752_v18, %v4010_v58  ;;  %16247 = vst [vmem:[#allocation106_spill] sm:$0xff] %v12719_v14  ;;  %v3754_v18 = vld [vmem:[#allocation3 + $0x158] sm:$0xff] }
 0x444   : >> { %16242 = vst [vmem:[#allocation104_spill] sm:$0xff] %v12708_v29 }
 0x445   : >> { %4596 = vmatmul.mubr.f32.gmra.mxu1 %v12708_v29 }
 0x446   : >> { %7888 = vmatprep.mubr.msk.f32.mxu1 %vm16244_vm12, %v12711_v37  ;;  %v4012_v36 = vpop.permute.xlu1 %4011  ;;  %v12727_v37 = vld [vmem:[#allocation3 + $0x162] sm:$0xff]  ;;  %vm16251_vm12 = vmmov %vm16185_vm0 }
 0x447   : >> { %v12716_v19 = vsel %vm16245_vm3, %v3753_v45, %v4012_v36  ;;  %16250 = vst [vmem:[#allocation108_spill] sm:$0xff] %v12727_v37  ;;  %v3755_v45 = vld [vmem:[#allocation3 + $0x160] sm:$0xff]  ;;  %vm16252_vm3 = vmmov %vm16185_vm0 }
 0x448   : >> { %16246 = vst [vmem:[#allocation105_spill] sm:$0xff] %v12716_v19 }
 0x449   : >> { %4601 = vmatmul.mubr.f32.gmra.mxu1 %v12716_v19 }
 0x44a   : >> { %7889 = vmatprep.mubr.msk.f32.mxu1 %vm16248_vm14, %v12719_v14  ;;  %v12735_v14 = vld [vmem:[#allocation3 + $0x16a] sm:$0xff]  ;;  %vm16255_vm14 = vmmov %vm16185_vm0 }
 0x44b   : >> { %v4014_v58 = vpop.permute.xlu0 %4013  ;;  %16254 = vst [vmem:[#allocation109_spill] sm:$0xff] %v12735_v14 }
 0x44c   : >> { %v12724_v29 = vsel %vm16185_vm0, %v3754_v18, %v4014_v58  ;;  %v3756_v18 = vld [vmem:[#allocation3 + $0x168] sm:$0xff] }
 0x44d   : >> { %16249 = vst [vmem:[#allocation107_spill] sm:$0xff] %v12724_v29  ;;  %4606 = vmatmul.mubr.f32.gmra.mxu1 %v12724_v29 }
 0x44e   : >> { %7890 = vmatprep.mubr.msk.f32.mxu1 %vm16251_vm12, %v12727_v37  ;;  %v4016_v36 = vpop.permute.xlu1 %4015  ;;  %v12743_v37 = vld [vmem:[#allocation3 + $0x172] sm:$0xff]  ;;  %vm16258_vm12 = vmmov %vm16185_vm0 }
 0x44f   : >> { %v12732_v19 = vsel %vm16252_vm3, %v3755_v45, %v4016_v36  ;;  %16257 = vst [vmem:[#allocation110_spill] sm:$0xff] %v12743_v37  ;;  %v3757_v45 = vld [vmem:[#allocation3 + $0x170] sm:$0xff]  ;;  %vm16259_vm3 = vmmov %vm16185_vm0 }
 0x450   : >> { %16253 = vst [vmem:[#allocation91_spill] sm:$0xff] %v12732_v19 }
 0x451   : >> { %4611 = vmatmul.mubr.f32.gmra.mxu1 %v12732_v19 }
 0x452   : >> { %7891 = vmatprep.mubr.msk.f32.mxu1 %vm16255_vm14, %v12735_v14  ;;  %v4018_v58 = vpop.permute.xlu0 %4017  ;;  %v12751_v14 = vld [vmem:[#allocation3 + $0x17a] sm:$0xff]  ;;  %vm16262_vm14 = vmmov %vm16185_vm0 }
 0x453   : >> { %v12740_v29 = vsel %vm16185_vm0, %v3756_v18, %v4018_v58  ;;  %16261 = vst [vmem:[#allocation112_spill] sm:$0xff] %v12751_v14  ;;  %v3758_v18 = vld [vmem:[#allocation3 + $0x178] sm:$0xff] }
 0x454   : >> { %16256 = vst [vmem:[#allocation92_spill] sm:$0xff] %v12740_v29 }
 0x455   : >> { %4616 = vmatmul.mubr.f32.gmra.mxu1 %v12740_v29 }
 0x456   : >> { %7892 = vmatprep.mubr.msk.f32.mxu1 %vm16258_vm12, %v12743_v37  ;;  %v4020_v36 = vpop.permute.xlu1 %4019  ;;  %v12759_v37 = vld [vmem:[#allocation3 + $0x182] sm:$0xff]  ;;  %vm16265_vm12 = vmmov %vm16185_vm0 }
 0x457   : >> { %v12748_v19 = vsel %vm16259_vm3, %v3757_v45, %v4020_v36  ;;  %16264 = vst [vmem:[#allocation114_spill] sm:$0xff] %v12759_v37  ;;  %v3759_v45 = vld [vmem:[#allocation3 + $0x180] sm:$0xff]  ;;  %vm16266_vm3 = vmmov %vm16185_vm0 }
 0x458   : >> { %16260 = vst [vmem:[#allocation111_spill] sm:$0xff] %v12748_v19 }
 0x459   : >> { %4621 = vmatmul.mubr.f32.gmra.mxu1 %v12748_v19 }
 0x45a   : >> { %7893 = vmatprep.mubr.msk.f32.mxu1 %vm16262_vm14, %v12751_v14  ;;  %v4022_v58 = vpop.permute.xlu0 %4021  ;;  %v12767_v14 = vld [vmem:[#allocation3 + $0x18a] sm:$0xff]  ;;  %vm16269_vm14 = vmmov %vm16185_vm0 }
 0x45b   : >> { %v12756_v29 = vsel %vm16185_vm0, %v3758_v18, %v4022_v58  ;;  %16268 = vst [vmem:[#allocation119_spill] sm:$0xff] %v12767_v14  ;;  %v3760_v18 = vld [vmem:[#allocation3 + $0x188] sm:$0xff] }
 0x45c   : >> { %16263 = vst [vmem:[#allocation113_spill] sm:$0xff] %v12756_v29 }
 0x45d   : >> { %4626 = vmatmul.mubr.f32.gmra.mxu1 %v12756_v29 }
 0x45e   : >> { %7894 = vmatprep.mubr.msk.f32.mxu1 %vm16265_vm12, %v12759_v37  ;;  %v12775_v37 = vld [vmem:[#allocation3 + $0x192] sm:$0xff]  ;;  %vm16272_vm12 = vmmov %vm16185_vm0 }
 0x45f   : >> { %v4024_v36 = vpop.permute.xlu1 %4023  ;;  %16271 = vst [vmem:[#allocation121_spill] sm:$0xff] %v12775_v37 }
 0x460   : >> { %v12764_v19 = vsel %vm16266_vm3, %v3759_v45, %v4024_v36  ;;  %v3761_v45 = vld [vmem:[#allocation3 + $0x190] sm:$0xff]  ;;  %vm16273_vm3 = vmmov %vm16185_vm0 }
 0x461   : >> { %16267 = vst [vmem:[#allocation118_spill] sm:$0xff] %v12764_v19  ;;  %4631 = vmatmul.mubr.f32.gmra.mxu1 %v12764_v19 }
 0x462   : >> { %7895 = vmatprep.mubr.msk.f32.mxu1 %vm16269_vm14, %v12767_v14  ;;  %v4026_v58 = vpop.permute.xlu0 %4025  ;;  %vm16274_vm14 = vmmov %vm16185_vm0 }
 0x463   : >> { %v12772_v29 = vsel %vm16185_vm0, %v3760_v18, %v4026_v58  ;;  %v3712_v18 = vld [vmem:[#allocation3 + $0x8] sm:$0xff] }
 0x464   : >> { %16270 = vst [vmem:[#allocation120_spill] sm:$0xff] %v12772_v29 }
 0x465   : >> { %4636 = vmatmul.mubr.f32.gmra.mxu1 %v12772_v29 }
 0x466   : >> { %7896 = vmatprep.mubr.msk.f32.mxu1 %vm16272_vm12, %v12775_v37  ;;  %v4028_v36 = vpop.permute.xlu1 %4027  ;;  %v3928_v19 = vpop.permute.xlu0 %3927  ;;  %v3713_v37 = vld [vmem:[#allocation3 + $0x10] sm:$0xff]  ;;  %vm16276_vm12 = vmmov %vm16185_vm0 }
 0x467   : >> { %v12780_v41 = vsel %vm16273_vm3, %v3761_v45, %v4028_v36  ;;  %v4089_v14 = vsel %vm16274_vm14, %v3711_v49, %v3928_v19  ;;  %v3821_v45 = vld [vmem:[#allocation3 + $0x12] sm:$0xff]  ;;  %vm16277_vm3 = vmmov %vm16185_vm0  ;;  %v8527_v36 = vld [vmem:[#allocation3 + $0x2a] sm:$0xff] }
 0x468   : >> { %4720 = vmatmul.mubr.f32.vlgmr.msra.gmra.mxu0 %v4089_v14  ;;  %vm16278_vm14 = vmmov %vm16185_vm0 }
 0x469   : >> { %4641 = vmatmul.mubr.f32.gmra.mxu1 %v12780_v41  ;;  %7898 = vmatprep.mubr.msk.f32.mxu0 %vm16185_vm0, %v3820_v53  ;;  %v8525_v53 = vld [vmem:[#allocation3 + $0x1a] sm:$0xff] }
 0x46a   : >> { %7972 = vmatprep.mubr.msk.f32.mxu1 %vm16275_vm1, %v12280_v22  ;;  %v3930_v58 = vpop.permute.xlu1 %3929  ;;  %v3932_v29 = vpop.permute.xlu0 %3931  ;;  %vm16279_vm1 = vmmov %vm16185_vm0 }
 0x46b   : >> { %v4090_v28 = vsel %vm16276_vm12, %v3712_v18, %v3930_v58  ;;  %v4091_v49 = vsel %vm16278_vm14, %v3713_v37, %v3932_v29  ;;  %vm16280_vm12 = vmmov %vm16185_vm0  ;;  %v8528_v58 = vld [vmem:[#allocation3 + $0x32] sm:$0xff] }
 0x46c   : >> { %v12788_v24 = vpop.f32.mrf.mxu1  ;;  %4725 = vmatmul.mubr.f32.gmra.mxu0 %v4090_v28  ;;  %vm16282_vm14 = vmmov %vm16185_vm0 }
 0x46d   : >> { %5061 = vmatmul.mubr.f32.vlgmr.msra.gmra.mxu1 %v12292_v23  ;;  %7899 = vmatprep.mubr.msk.f32.mxu0 %vm16277_vm3, %v3821_v45  ;;  %vm16281_vm3 = vmmov %vm16185_vm0 }
 0x46e   : >> { %7973 = vmatprep.mubr.msk.f32.mxu1 %vm16185_vm0, %v12298_v32  ;;  %v4409_v14 = vpop.f32.mrf.mxu1  ;;  %v8526_v32 = vld [vmem:[#allocation3 + $0x22] sm:$0xff] }
 0x470   : >> { %v12795_v19 = vpop.f32.mrf.mxu1  ;;  %4730 = vmatmul.mubr.f32.gmra.mxu0 %v4091_v49  ;;  %v8529_v49 = vld [vmem:[#allocation3 + $0x3a] sm:$0xff] }
 0x471   : >> { %5066 = vmatmul.mubr.f32.gmra.mxu1 %v12310_v34  ;;  %7900 = vmatprep.mubr.msk.f32.mxu0 %vm16279_vm1, %v8525_v53  ;;  %vm16283_vm1 = vmmov %vm16185_vm0 }
 0x472   : >> { %7974 = vmatprep.mubr.msk.f32.mxu1 %vm16280_vm12, %v12316_v4  ;;  %v4414_v28 = vpop.f32.mrf.mxu1  ;;  %vm16284_vm12 = vmmov %vm16185_vm0 }
 0x474   : >> { %v12801_v22 = vpop.f32.mrf.mxu1  ;;  %4735 = vmatmul.mubr.f32.gmra.mxu0 %v12245_v62 }
 0x475   : >> { %5071 = vmatmul.mubr.f32.gmra.mxu1 %v12328_v44  ;;  %7901 = vmatprep.mubr.msk.f32.mxu0 %vm16281_vm3, %v8526_v32  ;;  %vm16285_vm3 = vmmov %vm16185_vm0  ;;  %v16317_v32 = vld [vmem:[#allocation116_spill] sm:$0xff] }
 0x476   : >> { %7975 = vmatprep.mubr.msk.f32.mxu1 %vm16282_vm14, %v12334_v60  ;;  %v4419_v37 = vpop.f32.mrf.mxu1  ;;  %vm16286_vm14 = vmmov %vm16185_vm0 }
 0x478   : >> { %v12808_v29 = vpop.f32.mrf.mxu1  ;;  %4740 = vmatmul.mubr.f32.gmra.mxu0 %v12259_v35 }
 0x479   : >> { %5076 = vmatmul.mubr.f32.gmra.mxu1 %v12346_v61  ;;  %7902 = vmatprep.mubr.msk.f32.mxu0 %vm16185_vm0, %v8527_v36  ;;  %v16321_v36 = vld [vmem:[#allocation81_spill] sm:$0xff] }
 0x47a   : >> { %7976 = vmatprep.mubr.msk.f32.mxu1 %vm16283_vm1, %v12352_v27  ;;  %v4424_v62 = vpop.f32.mrf.mxu1  ;;  %vm16287_vm1 = vmmov %vm16185_vm0 }
 0x47c   : >> { %v12815_v18 = vpop.f32.mrf.mxu1  ;;  %4745 = vmatmul.mubr.f32.gmra.mxu0 %v12274_v5 }
 0x47d   : >> { %5081 = vmatmul.mubr.f32.gmra.mxu1 %v12364_v47  ;;  %7903 = vmatprep.mubr.msk.f32.mxu0 %vm16284_vm12, %v8528_v58  ;;  %vm16288_vm12 = vmmov %vm16185_vm0  ;;  %v16324_v58 = vld [vmem:[#allocation82_spill] sm:$0xff] }
 0x47e   : >> { %7977 = vmatprep.mubr.msk.f32.mxu1 %vm16285_vm3, %v12370_v59  ;;  %v4429_v35 = vpop.f32.mrf.mxu1  ;;  %vm16289_vm3 = vmmov %vm16185_vm0 }
 0x480   : >> { %v12822_v45 = vpop.f32.mrf.mxu1  ;;  %4750 = vmatmul.mubr.f32.gmra.mxu0 %v12292_v23 }
 0x481   : >> { %5086 = vmatmul.mubr.f32.gmra.mxu1 %v12382_v48  ;;  %7904 = vmatprep.mubr.msk.f32.mxu0 %vm16286_vm14, %v8529_v49  ;;  %vm16290_vm14 = vmmov %vm16185_vm0  ;;  %v16328_v49 = vld [vmem:[#allocation97_spill] sm:$0xff] }
 0x482   : >> { %7978 = vmatprep.mubr.msk.f32.mxu1 %vm16185_vm0, %v12388_v9  ;;  %v4434_v5 = vpop.f32.mrf.mxu1 }
 0x484   : >> { %v12829_v14 = vpop.f32.mrf.mxu1  ;;  %4755 = vmatmul.mubr.f32.gmra.mxu0 %v12310_v34 }
 0x485   : >> { %5091 = vmatmul.mubr.f32.gmra.mxu1 %v12400_v43  ;;  %7905 = vmatprep.mubr.msk.f32.mxu0 %vm16287_vm1, %v12316_v4  ;;  %vm16291_vm1 = vmmov %vm16185_vm0 }
 0x486   : >> { %7979 = vmatprep.mubr.msk.f32.mxu1 %vm16288_vm12, %v12406_v0  ;;  %v4439_v23 = vpop.f32.mrf.mxu1  ;;  %vm16292_vm12 = vmmov %vm16185_vm0 }
 0x487   : >> { %v16332_v23 = vld [vmem:[#allocation85_spill] sm:$0xff] }
 0x488   : >> { %v12837_v53 = vpop.f32.mrf.mxu1  ;;  %4760 = vmatmul.mubr.f32.gmra.mxu0 %v12328_v44 }
 0x489   : >> { %5096 = vmatmul.mubr.f32.gmra.mxu1 %v12418_v1  ;;  %7906 = vmatprep.mubr.msk.f32.mxu0 %vm16289_vm3, %v12334_v60  ;;  %vm16293_vm3 = vmmov %vm16185_vm0 }
 0x48a   : >> { %7980 = vmatprep.mubr.msk.f32.mxu1 %vm16290_vm14, %v12424_v39  ;;  %v4444_v34 = vpop.f32.mrf.mxu1  ;;  %vm16294_vm14 = vmmov %vm16185_vm0 }
 0x48c   : >> { %v12845_v28 = vpop.f32.mrf.mxu1  ;;  %4765 = vmatmul.mubr.f32.gmra.mxu0 %v12346_v61 }
 0x48d   : >> { %5101 = vmatmul.mubr.f32.gmra.mxu1 %v12436_v15  ;;  %7907 = vmatprep.mubr.msk.f32.mxu0 %vm16185_vm0, %v12352_v27 }
 0x48e   : >> { %7981 = vmatprep.mubr.msk.f32.mxu1 %vm16291_vm1, %v12442_v17  ;;  %v4449_v4 = vpop.f32.mrf.mxu1  ;;  %vm16295_vm1 = vmmov %vm16185_vm0 }
 0x48f   : >> { %v16335_v4 = vld [vmem:[#allocation101_spill] sm:$0xff] }
 0x490   : >> { %v12853_v44 = vpop.f32.mrf.mxu1  ;;  %4770 = vmatmul.mubr.f32.gmra.mxu0 %v12364_v47 }
 0x491   : >> { %5106 = vmatmul.mubr.f32.gmra.mxu1 %v12454_v51  ;;  %7908 = vmatprep.mubr.msk.f32.mxu0 %vm16292_vm12, %v12370_v59  ;;  %vm16296_vm12 = vmmov %vm16185_vm0 }
 0x492   : >> { %7982 = vmatprep.mubr.msk.f32.mxu1 %vm16293_vm3, %v12460_v56  ;;  %v4454_v61 = vpop.f32.mrf.mxu1  ;;  %vm16297_vm3 = vmmov %vm16185_vm0 }
 0x494   : >> { %v12861_v60 = vpop.f32.mrf.mxu1  ;;  %4775 = vmatmul.mubr.f32.gmra.mxu0 %v12382_v48 }
 0x495   : >> { %5111 = vmatmul.mubr.f32.gmra.mxu1 %v12472_v8  ;;  %7909 = vmatprep.mubr.msk.f32.mxu0 %vm16294_vm14, %v12388_v9  ;;  %vm16298_vm14 = vmmov %vm16185_vm0 }
 0x496   : >> { %7983 = vmatprep.mubr.msk.f32.mxu1 %vm16185_vm0, %v12478_v16  ;;  %v4459_v47 = vpop.f32.mrf.mxu1 }
 0x498   : >> { %v12869_v27 = vpop.f32.mrf.mxu1  ;;  %4780 = vmatmul.mubr.f32.gmra.mxu0 %v12400_v43 }
 0x499   : >> { %5116 = vmatmul.mubr.f32.gmra.mxu1 %v12490_v2  ;;  %7910 = vmatprep.mubr.msk.f32.mxu0 %vm16295_vm1, %v12406_v0  ;;  %vm16299_vm1 = vmmov %vm16185_vm0 }
 0x49a   : >> { %7984 = vmatprep.mubr.msk.f32.mxu1 %vm16296_vm12, %v12496_v38  ;;  %v4464_v48 = vpop.f32.mrf.mxu1  ;;  %vm16300_vm12 = vmmov %vm16185_vm0 }
 0x49b   : >> { %v16339_v48 = vld [vmem:[#allocation89_spill] sm:$0xff] }
 0x49c   : >> { %v12877_v59 = vpop.f32.mrf.mxu1  ;;  %4785 = vmatmul.mubr.f32.gmra.mxu0 %v12418_v1 }
 0x49d   : >> { %5121 = vmatmul.mubr.f32.gmra.mxu1 %v12507_v57  ;;  %7911 = vmatprep.mubr.msk.f32.mxu0 %vm16297_vm3, %v12424_v39  ;;  %vm16301_vm3 = vmmov %vm16185_vm0 }
 0x49e   : >> { %7985 = vmatprep.mubr.msk.f32.mxu1 %vm16298_vm14, %v12513_v26  ;;  %v4469_v43 = vpop.f32.mrf.mxu1  ;;  %vm16302_vm14 = vmmov %vm16185_vm0 }
 0x49f   : >> { %v16341_v43 = vld [vmem:[#allocation102_spill] sm:$0xff] }
 0x4a0   : >> { %v12885_v9 = vpop.f32.mrf.mxu1  ;;  %4790 = vmatmul.mubr.f32.gmra.mxu0 %v12436_v15 }
 0x4a1   : >> { %5126 = vmatmul.mubr.f32.gmra.mxu1 %v12522_v20  ;;  %7912 = vmatprep.mubr.msk.f32.mxu0 %vm16185_vm0, %v12442_v17 }
 0x4a2   : >> { %7986 = vmatprep.mubr.msk.f32.mxu1 %vm16299_vm1, %v12527_v46  ;;  %v4474_v1 = vpop.f32.mrf.mxu1  ;;  %vm16303_vm1 = vmmov %vm16185_vm0 }
 0x4a4   : >> { %v12893_v0 = vpop.f32.mrf.mxu1  ;;  %4795 = vmatmul.mubr.f32.gmra.mxu0 %v12454_v51 }
 0x4a5   : >> { %5131 = vmatmul.mubr.f32.gmra.mxu1 %v12532_v54  ;;  %7913 = vmatprep.mubr.msk.f32.mxu0 %vm16300_vm12, %v12460_v56  ;;  %vm16304_vm12 = vmmov %vm16185_vm0 }
 0x4a6   : >> { %7987 = vmatprep.mubr.msk.f32.mxu1 %vm16301_vm3, %v12536_v25  ;;  %v4479_v15 = vpop.f32.mrf.mxu1  ;;  %vm16305_vm3 = vmmov %vm16185_vm0 }
 0x4a8   : >> { %v12901_v39 = vpop.f32.mrf.mxu1  ;;  %4800 = vmatmul.mubr.f32.gmra.mxu0 %v12472_v8 }
 0x4a9   : >> { %5136 = vmatmul.mubr.f32.gmra.mxu1 %v12541_v31  ;;  %7914 = vmatprep.mubr.msk.f32.mxu0 %vm16302_vm14, %v12478_v16  ;;  %vm16306_vm14 = vmmov %vm16185_vm0 }
 0x4aa   : >> { %7988 = vmatprep.mubr.msk.f32.mxu1 %vm16185_vm0, %v12546_v10  ;;  %v4484_v51 = vpop.f32.mrf.mxu1 }
 0x4ab   : >> { %v16342_v51 = vld [vmem:[#allocation90_spill] sm:$0xff] }
 0x4ac   : >> { %v12909_v17 = vpop.f32.mrf.mxu1  ;;  %4805 = vmatmul.mubr.f32.gmra.mxu0 %v12490_v2 }
 0x4ad   : >> { %5141 = vmatmul.mubr.f32.gmra.mxu1 %v12551_v13  ;;  %7915 = vmatprep.mubr.msk.f32.mxu0 %vm16303_vm1, %v12496_v38  ;;  %vm16307_vm1 = vmmov %vm16185_vm0 }
 0x4ae   : >> { %7989 = vmatprep.mubr.msk.f32.mxu1 %vm16304_vm12, %v12556_v55  ;;  %v4489_v8 = vpop.f32.mrf.mxu1  ;;  %vm16308_vm12 = vmmov %vm16185_vm0 }
 0x4af   : >> { %v16344_v8 = vld [vmem:[#allocation93_spill] sm:$0xff] }
 0x4b0   : >> { %v12917_v56 = vpop.f32.mrf.mxu1  ;;  %4810 = vmatmul.mubr.f32.gmra.mxu0 %v12507_v57 }
 0x4b1   : >> { %5146 = vmatmul.mubr.f32.gmra.mxu1 %v12561_v7  ;;  %7916 = vmatprep.mubr.msk.f32.mxu0 %vm16305_vm3, %v12513_v26  ;;  %vm16309_vm3 = vmmov %vm16185_vm0 }
 0x4b2   : >> { %7990 = vmatprep.mubr.msk.f32.mxu1 %vm16306_vm14, %v12565_v52  ;;  %v4494_v2 = vpop.f32.mrf.mxu1  ;;  %vm16310_vm14 = vmmov %vm16185_vm0 }
 0x4b4   : >> { %4815 = vmatmul.mubr.f32.gmra.mxu0 %v12522_v20 }
 0x4b5   : >> { %v12926_v16 = vpop.f32.mrf.mxu1  ;;  %5151 = vmatmul.mubr.f32.gmra.mxu1 %v12570_v6  ;;  %7917 = vmatprep.mubr.msk.f32.mxu0 %vm16185_vm0, %v12527_v46 }
 0x4b6   : >> { %7991 = vmatprep.mubr.msk.f32.mxu1 %vm16307_vm1, %v12573_v3  ;;  %vm16311_vm1 = vmmov %vm16185_vm0 }
 0x4b7   : >> { %v4499_v57 = vpop.f32.mrf.mxu1 }
 0x4b8   : >> { %4820 = vmatmul.mubr.f32.gmra.mxu0 %v12532_v54 }
 0x4b9   : >> { %v12934_v38 = vpop.f32.mrf.mxu1  ;;  %5156 = vmatmul.mubr.f32.gmra.mxu1 %v12578_v30  ;;  %7918 = vmatprep.mubr.msk.f32.mxu0 %vm16308_vm12, %v12536_v25  ;;  %vm16312_vm12 = vmmov %vm16185_vm0 }
 0x4ba   : >> { %7992 = vmatprep.mubr.msk.f32.mxu1 %vm16309_vm3, %v12581_v63  ;;  %vm16313_vm3 = vmmov %vm16185_vm0 }
 0x4bb   : >> { %v4504_v26 = vpop.f32.mrf.mxu1 }
 0x4bc   : >> { %4825 = vmatmul.mubr.f32.gmra.mxu0 %v12541_v31  ;;  %v16346_v26 = vld [vmem:[#allocation95_spill] sm:$0xff] }
 0x4bd   : >> { %v12942_v20 = vpop.f32.mrf.mxu1  ;;  %5161 = vmatmul.mubr.f32.gmra.mxu1 %v12586_v50  ;;  %7919 = vmatprep.mubr.msk.f32.mxu0 %vm16310_vm14, %v12546_v10  ;;  %vm16314_vm14 = vmmov %vm16185_vm0 }
 0x4be   : >> { %7993 = vmatprep.mubr.msk.f32.mxu1 %vm16185_vm0, %v12589_v21 }
 0x4bf   : >> { %v4509_v46 = vpop.f32.mrf.mxu1 }
 0x4c0   : >> { %4830 = vmatmul.mubr.f32.gmra.mxu0 %v12551_v13  ;;  %v16348_v46 = vld [vmem:[#allocation96_spill] sm:$0xff] }
 0x4c1   : >> { %v12950_v54 = vpop.f32.mrf.mxu1  ;;  %5166 = vmatmul.mubr.f32.gmra.mxu1 %v12594_v42  ;;  %7920 = vmatprep.mubr.msk.f32.mxu0 %vm16311_vm1, %v12556_v55  ;;  %vm16316_vm1 = vmmov %vm16185_vm0 }
 0x4c2   : >> { %7994 = vmatprep.mubr.msk.f32.mxu1 %vm16312_vm12, %v12597_v40  ;;  %vm16318_vm12 = vmmov %vm16185_vm0 }
 0x4c3   : >> { %v4514_v25 = vpop.f32.mrf.mxu1 }
 0x4c4   : >> { %4835 = vmatmul.mubr.f32.gmra.mxu0 %v12561_v7  ;;  %v16315_v7 = vld [vmem:[#allocation115_spill] sm:$0xff] }
 0x4c5   : >> { %v12958_v31 = vpop.f32.mrf.mxu1  ;;  %5171 = vmatmul.mubr.f32.gmra.mxu1 %v12602_v12  ;;  %7921 = vmatprep.mubr.msk.f32.mxu0 %vm16313_vm3, %v12565_v52  ;;  %vm16320_vm3 = vmmov %vm16185_vm0 }
 0x4c6   : >> { %7995 = vmatprep.mubr.msk.f32.mxu1 %vm16314_vm14, %v12605_v33  ;;  %vm16322_vm14 = vmmov %vm16185_vm0 }
 0x4c7   : >> { %v4519_v13 = vpop.f32.mrf.mxu1 }
 0x4c8   : >> { %4840 = vmatmul.mubr.f32.gmra.mxu0 %v12570_v6  ;;  %v16319_v6 = vld [vmem:[#allocation117_spill] sm:$0xff] }
 0x4c9   : >> { %v12966_v10 = vpop.f32.mrf.mxu1  ;;  %5176 = vmatmul.mubr.f32.gmra.mxu1 %v12610_v11  ;;  %7922 = vmatprep.mubr.msk.f32.mxu0 %vm16185_vm0, %v12573_v3 }
 0x4ca   : >> { %7996 = vmatprep.mubr.msk.f32.mxu1 %vm16316_vm1, %v16315_v7  ;;  %vm16325_vm1 = vmmov %vm16185_vm0 }
 0x4cb   : >> { %v4524_v55 = vpop.f32.mrf.mxu1 }
 0x4cc   : >> { %4845 = vmatmul.mubr.f32.gmra.mxu0 %v12578_v30  ;;  %v16323_v30 = vld [vmem:[#allocation94_spill] sm:$0xff]  ;;  %v16351_v55 = vld [vmem:[#allocation100_spill] sm:$0xff] }
 0x4cd   : >> { %v12974_v52 = vpop.f32.mrf.mxu1  ;;  %5181 = vmatmul.mubr.f32.gmra.mxu1 %v16317_v32  ;;  %7923 = vmatprep.mubr.msk.f32.mxu0 %vm16318_vm12, %v12581_v63  ;;  %vm16327_vm12 = vmmov %vm16185_vm0 }
 0x4ce   : >> { %7997 = vmatprep.mubr.msk.f32.mxu1 %vm16320_vm3, %v16319_v6  ;;  %vm16329_vm3 = vmmov %vm16185_vm0 }
 0x4cf   : >> { %v4529_v37 = vpop.f32.mrf.mxu1 }
 0x4d0   : >> { %4850 = vmatmul.mubr.f32.gmra.mxu0 %v12586_v50  ;;  %v16326_v50 = vld [vmem:[#allocation83_spill] sm:$0xff] }
 0x4d1   : >> { %v12982_v3 = vpop.f32.mrf.mxu1  ;;  %5186 = vmatmul.mubr.f32.gmra.mxu1 %v16321_v36  ;;  %7924 = vmatprep.mubr.msk.f32.mxu0 %vm16322_vm14, %v12589_v21  ;;  %vm16331_vm14 = vmmov %vm16185_vm0  ;;  %v16353_v37 = vld [vmem:[#allocation103_spill] sm:$0xff] }
 0x4d2   : >> { %7998 = vmatprep.mubr.msk.f32.mxu1 %vm16185_vm0, %v16323_v30 }
 0x4d3   : >> { %v4534_v62 = vpop.f32.mrf.mxu1 }
 0x4d4   : >> { %4855 = vmatmul.mubr.f32.gmra.mxu0 %v12594_v42  ;;  %v16330_v42 = vld [vmem:[#allocation84_spill] sm:$0xff] }
 0x4d5   : >> { %v12990_v63 = vpop.f32.mrf.mxu1  ;;  %5191 = vmatmul.mubr.f32.gmra.mxu1 %v16324_v58  ;;  %7925 = vmatprep.mubr.msk.f32.mxu0 %vm16325_vm1, %v12597_v40  ;;  %vm16334_vm1 = vmmov %vm16185_vm0 }
 0x4d6   : >> { %7999 = vmatprep.mubr.msk.f32.mxu1 %vm16327_vm12, %v16326_v50  ;;  %vm16336_vm12 = vmmov %vm16185_vm0 }
 0x4d7   : >> { %v4539_v35 = vpop.f32.mrf.mxu1 }
 0x4d8   : >> { %4860 = vmatmul.mubr.f32.gmra.mxu0 %v12602_v12  ;;  %v16333_v12 = vld [vmem:[#allocation98_spill] sm:$0xff] }
 0x4d9   : >> { %v12998_v21 = vpop.f32.mrf.mxu1  ;;  %5196 = vmatmul.mubr.f32.gmra.mxu1 %v16328_v49  ;;  %7926 = vmatprep.mubr.msk.f32.mxu0 %vm16329_vm3, %v12605_v33  ;;  %vm16338_vm3 = vmmov %vm16185_vm0 }
 0x4da   : >> { %8000 = vmatprep.mubr.msk.f32.mxu1 %vm16331_vm14, %v16330_v42  ;;  %vm16340_vm14 = vmmov %vm16185_vm0 }
 0x4db   : >> { %v4544_v5 = vpop.f32.mrf.mxu1 }
 0x4dc   : >> { %4865 = vmatmul.mubr.f32.gmra.mxu0 %v12610_v11  ;;  %v16337_v11 = vld [vmem:[#allocation88_spill] sm:$0xff]  ;;  %v16362_v5 = vld [vmem:[#allocation106_spill] sm:$0xff] }
 0x4dd   : >> { %v13006_v40 = vpop.f32.mrf.mxu1  ;;  %5201 = vmatmul.mubr.f32.gmra.mxu1 %v16332_v23  ;;  %7927 = vmatprep.mubr.msk.f32.mxu0 %vm16185_vm0, %v16315_v7  ;;  %v16350_v7 = vld [vmem:[#allocation99_spill] sm:$0xff] }
 0x4de   : >> { %8001 = vmatprep.mubr.msk.f32.mxu1 %vm16334_vm1, %v16333_v12  ;;  %vm16343_vm1 = vmmov %vm16185_vm0 }
 0x4df   : >> { %v4549_v34 = vpop.f32.mrf.mxu1 }
 0x4e0   : >> { %4870 = vmatmul.mubr.f32.gmra.mxu0 %v16317_v32  ;;  %v16364_v34 = vld [vmem:[#allocation107_spill] sm:$0xff] }
 0x4e1   : >> { %v13014_v33 = vpop.f32.mrf.mxu1  ;;  %5206 = vmatmul.mubr.f32.gmra.mxu1 %v16335_v4  ;;  %7928 = vmatprep.mubr.msk.f32.mxu0 %vm16336_vm12, %v16319_v6  ;;  %vm16345_vm12 = vmmov %vm16185_vm0 }
 0x4e2   : >> { %8002 = vmatprep.mubr.msk.f32.mxu1 %vm16338_vm3, %v16337_v11  ;;  %vm16347_vm3 = vmmov %vm16185_vm0 }
 0x4e3   : >> { %v4554_v61 = vpop.f32.mrf.mxu1 }
 0x4e4   : >> { %4875 = vmatmul.mubr.f32.gmra.mxu0 %v16321_v36  ;;  %v16355_v36 = vld [vmem:[#allocation86_spill] sm:$0xff] }
 0x4e5   : >> { %v13022_v47 = vpop.f32.mrf.mxu1  ;;  %5211 = vmatmul.mubr.f32.gmra.mxu1 %v16339_v48  ;;  %7929 = vmatprep.mubr.msk.f32.mxu0 %vm16340_vm14, %v16323_v30  ;;  %vm16349_vm14 = vmmov %vm16185_vm0 }
 0x4e6   : >> { %8003 = vmatprep.mubr.msk.f32.mxu1 %vm16185_vm0, %v16341_v43 }
 0x4e7   : >> { %v4559_v1 = vpop.f32.mrf.mxu1 }
 0x4e8   : >> { %4880 = vmatmul.mubr.f32.gmra.mxu0 %v16324_v58  ;;  %v16357_v58 = vld [vmem:[#allocation104_spill] sm:$0xff] }
 0x4e9   : >> { %v13030_v15 = vpop.f32.mrf.mxu1  ;;  %5216 = vmatmul.mubr.f32.gmra.mxu1 %v16342_v51  ;;  %7930 = vmatprep.mubr.msk.f32.mxu0 %vm16343_vm1, %v16326_v50  ;;  %vm16352_vm1 = vmmov %vm16185_vm0  ;;  %v16359_v50 = vld [vmem:[#allocation87_spill] sm:$0xff] }
 0x4ea   : >> { %8004 = vmatprep.mubr.msk.f32.mxu1 %vm16345_vm12, %v16344_v8  ;;  %vm16354_vm12 = vmmov %vm16185_vm0 }
 0x4eb   : >> { %v4564_v2 = vpop.f32.mrf.mxu1 }
 0x4ec   : >> { %4885 = vmatmul.mubr.f32.gmra.mxu0 %v16328_v49  ;;  %v16373_v2 = vld [vmem:[#allocation110_spill] sm:$0xff] }
 0x4ed   : >> { %v13038_v57 = vpop.f32.mrf.mxu1  ;;  %5221 = vmatmul.mubr.f32.gmra.mxu1 %v16346_v26  ;;  %7931 = vmatprep.mubr.msk.f32.mxu0 %vm16347_vm3, %v16330_v42  ;;  %vm16356_vm3 = vmmov %vm16185_vm0  ;;  %v16360_v42 = vld [vmem:[#allocation105_spill] sm:$0xff] }
 0x4ee   : >> { %8005 = vmatprep.mubr.msk.f32.mxu1 %vm16349_vm14, %v16348_v46  ;;  %vm16358_vm14 = vmmov %vm16185_vm0 }
 0x4ef   : >> { %v4569_v25 = vpop.f32.mrf.mxu1 }
 0x4f0   : >> { %4890 = vmatmul.mubr.f32.gmra.mxu0 %v16332_v23  ;;  %v16375_v25 = vld [vmem:[#allocation111_spill] sm:$0xff] }
 0x4f1   : >> { %v13046_v13 = vpop.f32.mrf.mxu1  ;;  %5226 = vmatmul.mubr.f32.gmra.mxu1 %v16350_v7  ;;  %7932 = vmatprep.mubr.msk.f32.mxu0 %vm16185_vm0, %v16333_v12 }
 0x4f2   : >> { %8006 = vmatprep.mubr.msk.f32.mxu1 %vm16352_vm1, %v16351_v55  ;;  %vm16361_vm1 = vmmov %vm16185_vm0 }
 0x4f3   : >> { %v4574_v32 = vpop.f32.mrf.mxu1 }
 0x4f4   : >> { %4895 = vmatmul.mubr.f32.gmra.mxu0 %v16335_v4  ;;  %v16366_v4 = vld [vmem:[#allocation108_spill] sm:$0xff] }
 0x4f5   : >> { %v13054_v6 = vpop.f32.mrf.mxu1  ;;  %5231 = vmatmul.mubr.f32.gmra.mxu1 %v16353_v37  ;;  %7933 = vmatprep.mubr.msk.f32.mxu0 %vm16354_vm12, %v16337_v11  ;;  %vm16363_vm12 = vmmov %vm16185_vm0 }
 0x4f6   : >> { %8007 = vmatprep.mubr.msk.f32.mxu1 %vm16356_vm3, %v16355_v36  ;;  %vm16365_vm3 = vmmov %vm16185_vm0 }
 0x4f7   : >> { %v4579_v30 = vpop.f32.mrf.mxu1 }
 0x4f8   : >> { %4900 = vmatmul.mubr.f32.gmra.mxu0 %v16339_v48  ;;  %v16368_v48 = vld [vmem:[#allocation91_spill] sm:$0xff] }
 0x4f9   : >> { %v13062_v62 = vpop.f32.mrf.mxu1  ;;  %5236 = vmatmul.mubr.f32.gmra.mxu1 %v16357_v58  ;;  %7934 = vmatprep.mubr.msk.f32.mxu0 %vm16358_vm14, %v16341_v43  ;;  %vm16367_vm14 = vmmov %vm16185_vm0  ;;  %v16369_v43 = vld [vmem:[#allocation109_spill] sm:$0xff] }
 0x4fa   : >> { %8008 = vmatprep.mubr.msk.f32.mxu1 %vm16185_vm0, %v16359_v50 }
 0x4fb   : >> { %v4584_v35 = vpop.f32.mrf.mxu1 }
 0x4fc   : >> { %4905 = vmatmul.mubr.f32.gmra.mxu0 %v16342_v51  ;;  %v16384_v35 = vld [vmem:[#allocation119_spill] sm:$0xff] }
 0x4fd   : >> { %v13070_v49 = vpop.f32.mrf.mxu1  ;;  %5241 = vmatmul.mubr.f32.gmra.mxu1 %v16360_v42  ;;  %7935 = vmatprep.mubr.msk.f32.mxu0 %vm16361_vm1, %v16344_v8  ;;  %vm16370_vm1 = vmmov %vm16185_vm0  ;;  %v16371_v8 = vld [vmem:[#allocation92_spill] sm:$0xff] }
 0x4fe   : >> { %8009 = vmatprep.mubr.msk.f32.mxu1 %vm16363_vm12, %v16362_v5  ;;  %vm16372_vm12 = vmmov %vm16185_vm0 }
 0x4ff   : >> { %v4589_v23 = vpop.f32.mrf.mxu1 }
 0x500   : >> { %4910 = vmatmul.mubr.f32.gmra.mxu0 %v16346_v26  ;;  %v16386_v23 = vld [vmem:[#allocation120_spill] sm:$0xff] }
 0x501   : >> { %v13078_v12 = vpop.f32.mrf.mxu1  ;;  %5246 = vmatmul.mubr.f32.gmra.mxu1 %v16364_v34  ;;  %7936 = vmatprep.mubr.msk.f32.mxu0 %vm16365_vm3, %v16348_v46  ;;  %vm16374_vm3 = vmmov %vm16185_vm0 }
 0x502   : >> { %8010 = vmatprep.mubr.msk.f32.mxu1 %vm16367_vm14, %v16366_v4  ;;  %vm16376_vm14 = vmmov %vm16185_vm0 }
 0x503   : >> { %v4594_v11 = vpop.f32.mrf.mxu1 }
 0x504   : >> { %4915 = vmatmul.mubr.f32.gmra.mxu0 %v16350_v7  ;;  %v16377_v7 = vld [vmem:[#allocation112_spill] sm:$0xff] }
 0x505   : >> { %v13086_v61 = vpop.f32.mrf.mxu1  ;;  %5251 = vmatmul.mubr.f32.gmra.mxu1 %v16368_v48  ;;  %7937 = vmatprep.mubr.msk.f32.mxu0 %vm16185_vm0, %v16351_v55 }
 0x506   : >> { %8011 = vmatprep.mubr.msk.f32.mxu1 %vm16370_vm1, %v16369_v43  ;;  %vm16379_vm1 = vmmov %vm16185_vm0 }
 0x507   : >> { %v4599_v1 = vpop.f32.mrf.mxu1 }
 0x508   : >> { %4920 = vmatmul.mubr.f32.gmra.mxu0 %v16353_v37  ;;  %v16378_v37 = vld [vmem:[#allocation113_spill] sm:$0xff] }
 0x509   : >> { %v13094_v51 = vpop.f32.mrf.mxu1  ;;  %5256 = vmatmul.mubr.f32.gmra.mxu1 %v16371_v8  ;;  %7938 = vmatprep.mubr.msk.f32.mxu0 %vm16372_vm12, %v16355_v36  ;;  %v16380_v36 = vld [vmem:[#allocation114_spill] sm:$0xff]  ;;  %vm16381_vm12 = vmmov %vm16185_vm0  ;;  %v3870_v1 = vld [vmem:[#allocation3 + $0x19a] sm:$0xff] }
 0x50a   : >> { %8012 = vmatprep.mubr.msk.f32.mxu1 %vm16374_vm3, %v16373_v2  ;;  %vm16383_vm3 = vmmov %vm16185_vm0 }
 0x50b   : >> { %v4604_v26 = vpop.f32.mrf.mxu1 }
 0x50c   : >> { %4925 = vmatmul.mubr.f32.gmra.mxu0 %v16357_v58 }
 0x50d   : >> { %v13102_v46 = vpop.f32.mrf.mxu1  ;;  %5261 = vmatmul.mubr.f32.gmra.mxu1 %v16375_v25  ;;  %7939 = vmatprep.mubr.msk.f32.mxu0 %vm16376_vm14, %v16359_v50  ;;  %v16382_v50 = vld [vmem:[#allocation118_spill] sm:$0xff]  ;;  %vm16385_vm14 = vmmov %vm16185_vm0 }
 0x50e   : >> { %8013 = vmatprep.mubr.msk.f32.mxu1 %vm16185_vm0, %v16377_v7 }
 0x50f   : >> { %v4609_v55 = vpop.f32.mrf.mxu1 }
 0x510   : >> { %4930 = vmatmul.mubr.f32.gmra.mxu0 %v16360_v42 }
 0x511   : >> { %v13110_v32 = vpop.f32.mrf.mxu1  ;;  %5266 = vmatmul.mubr.f32.gmra.mxu1 %v16378_v37  ;;  %7940 = vmatprep.mubr.msk.f32.mxu0 %vm16379_vm1, %v16362_v5  ;;  %vm16388_vm1 = vmmov %vm16185_vm0 }
 0x512   : >> { %8014 = vmatprep.mubr.msk.f32.mxu1 %vm16381_vm12, %v16380_v36  ;;  %vm16389_vm12 = vmmov %vm16185_vm0  ;;  %v4032_v36 = vpop.permute.xlu0 %4031 }
 0x513   : >> { %v4614_v30 = vpop.f32.mrf.mxu1 }
 0x514   : >> { %4935 = vmatmul.mubr.f32.gmra.mxu0 %v16364_v34  ;;  %v16387_v34 = vld [vmem:[#allocation121_spill] sm:$0xff] }
 0x515   : >> { %v13118_v58 = vpop.f32.mrf.mxu1  ;;  %5271 = vmatmul.mubr.f32.gmra.mxu1 %v16382_v50  ;;  %7941 = vmatprep.mubr.msk.f32.mxu0 %vm16383_vm3, %v16366_v4  ;;  %v4030_v4 = vpop.permute.xlu1 %4029  ;;  %vm16390_vm3 = vmmov %vm16185_vm0  ;;  %v3871_v30 = vld [vmem:[#allocation3 + $0x1a2] sm:$0xff] }
 0x516   : >> { %8015 = vmatprep.mubr.msk.f32.mxu1 %vm16385_vm14, %v16384_v35  ;;  %vm16391_vm14 = vmmov %vm16185_vm0  ;;  %v3764_v35 = vld [vmem:[#allocation3 + $0x1a8] sm:$0xff] }
 0x517   : >> { %v4619_v42 = vpop.f32.mrf.mxu1 }
 0x518   : >> { %4940 = vmatmul.mubr.f32.gmra.mxu0 %v16368_v48  ;;  %v3762_v48 = vld [vmem:[#allocation3 + $0x198] sm:$0xff] }
 0x519   : >> { %v13126_v5 = vpop.f32.mrf.mxu1  ;;  %5276 = vmatmul.mubr.f32.gmra.mxu1 %v16386_v23  ;;  %7942 = vmatprep.mubr.msk.f32.mxu0 %vm16185_vm0, %v16369_v43  ;;  %v3763_v43 = vld [vmem:[#allocation3 + $0x1a0] sm:$0xff]  ;;  %v4140_v50 = vsel %vm16391_vm14, %v3762_v48, %v4030_v4  ;;  %v4034_v42 = vpop.permute.xlu1 %4033  ;;  %v3872_v23 = vld [vmem:[#allocation3 + $0x1aa] sm:$0xff]  ;;  %vm16396_vm14 = vmmov %vm16185_vm0 }
 0x51a   : >> { %8016 = vmatprep.mubr.msk.f32.mxu1 %vm16388_vm1, %v16387_v34  ;;  %vm16392_vm1 = vmmov %vm16185_vm0 }
 0x51b   : >> { %v4624_v11 = vpop.f32.mrf.mxu1 }
 0x51c   : >> { %4945 = vmatmul.mubr.f32.gmra.mxu0 %v16371_v8 }
 0x51d   : >> { %v13134_v26 = vpop.f32.mrf.mxu1  ;;  %5281 = vmatmul.mubr.f32.gmra.mxu1 %v12780_v41  ;;  %7943 = vmatprep.mubr.msk.f32.mxu0 %vm16389_vm12, %v16373_v2  ;;  %v4141_v41 = vsel %vm16392_vm1, %v3763_v43, %v4032_v36  ;;  %vm16393_vm12 = vmmov %vm16185_vm0 }
 0x51e   : >> { %8017 = vmatprep.mubr.msk.f32.mxu1 %vm16390_vm3, %v3870_v1  ;;  %vm16395_vm3 = vmmov %vm16185_vm0 }
 0x51f   : >> { %v4629_v55 = vpop.f32.mrf.mxu1  ;;  %vm16400_vm1 = vmmov %vm16185_vm0 }
 0x520   : >> { %4950 = vmatmul.mubr.f32.gmra.mxu0 %v16375_v25  ;;  %v4142_v25 = vsel %vm16395_vm3, %v3764_v35, %v4034_v42  ;;  %vm16406_vm3 = vmmov %vm16185_vm0 }
 0x521   : >> { %v13142_v8 = vpop.f32.mrf.mxu1  ;;  %5286 = vmatmul.mubr.f32.gmra.mxu1 %v4140_v50  ;;  %7944 = vmatprep.mubr.msk.f32.mxu0 %vm16185_vm0, %v16377_v7 }
 0x522   : >> { %8018 = vmatprep.mubr.msk.f32.mxu1 %vm16393_vm12, %v3871_v30  ;;  %vm16403_vm12 = vmmov %vm16185_vm0 }
 0x523   : >> { %v4634_v2 = vpop.f32.mrf.mxu1 }
 0x524   : >> { %4955 = vmatmul.mubr.f32.gmra.mxu0 %v16378_v37 }
 0x525   : >> { %v13149_v34 = vpop.f32.mrf.mxu1  ;;  %5291 = vmatmul.mubr.f32.gmra.mxu1 %v4141_v41 }
 0x526   : >> { %16394 = vst [vmem:[#allocation115_spill] sm:$0xff] %v13149_v34  ;;  %8019 = vmatprep.mubr.msk.f32.mxu1 %vm16396_vm14, %v3872_v23 }
 0x527   : >> { %v4639_v11 = vpop.f32.mrf.mxu1 }
 0x528   : >> { %v4721_v1 = vpop.f32.mrf.mxu0 }
 0x529   : >> { %v13153_v7 = vpop.f32.mrf.mxu1  ;;  %5296 = vmatmul.mubr.f32.gmra.mxu1 %v4142_v25  ;;  %v4722_v55 = vadd.f32 %v4721_v1, %v12788_v24 }
 0x52a   : >> { %16397 = vst [vmem:[#allocation116_spill] sm:$0xff] %v13153_v7  ;;  %v4723_v4 = vpop.f32.mrf.mxu0 }
 0x52b   : >> { %v4644_v48 = vpop.f32.mrf.mxu1 }
 0x52c   : >> { %v4726_v43 = vpop.f32.mrf.mxu0 }
 0x52d   : >> { %v5062_v36 = vpop.f32.mrf.mxu1  ;;  %v4727_v41 = vadd.f32 %v4726_v43, %v12795_v19 }
 0x52e   : >> { %v5301_v30 = vadd.f32 %v5062_v36, %v4722_v55  ;;  %v4728_v37 = vpop.f32.mrf.mxu0 }
 0x52f   : >> { %v5064_v50 = vpop.f32.mrf.mxu1 }
 0x530   : >> { %v5349_v2 = vmax.f32 %v5301_v30, 0.0  ;;  %v4731_v35 = vpop.f32.mrf.mxu0 }
 0x531   : >> { %v5067_v42 = vpop.f32.mrf.mxu1  ;;  %v4732_v24 = vadd.f32 %v4731_v35, %v12801_v22 }
 0x532   : >> { %v5397_v11 = vsel %vm16021_vm6, %v5349_v2, 0.0  ;;  %v5302_v34 = vadd.f32 %v5067_v42, %v4727_v41  ;;  %v4733_v7 = vpop.f32.mrf.mxu0  ;;  %v16401_v2 = vld [vmem:[#allocation13_spill] sm:$0xff] }
 0x533   : >> { %5445 = vst.msk [vmem:[#allocation2 + $0x19] sm:$0xff] %vm16185_vm0, %v5397_v11  ;;  %v5069_v25 = vpop.f32.mrf.mxu1  ;;  %vm16402_vm6 = vnez %v16401_v2 }
 0x534   : >> { %v5350_v1 = vmax.f32 %v5302_v34, 0.0  ;;  %v4736_v4 = vpop.f32.mrf.mxu0 }
 0x535   : >> { %v5072_v48 = vpop.f32.mrf.mxu1  ;;  %v4737_v37 = vadd.f32 %v4736_v4, %v12808_v29 }
 0x536   : >> { %v5398_v36 = vsel %vm16023_vm7, %v5350_v1, 0.0  ;;  %v5303_v19 = vadd.f32 %v5072_v48, %v4732_v24  ;;  %v4738_v43 = vpop.f32.mrf.mxu0  ;;  %v16404_v1 = vld [vmem:[#allocation77_spill] sm:$0xff] }
 0x537   : >> { %5446 = vst.msk [vmem:[#allocation2 + $0x21] sm:$0xff] %vm16400_vm1, %v5398_v36  ;;  %v5074_v30 = vpop.f32.mrf.mxu1  ;;  %vm16405_vm7 = vnez %v16404_v1 }
 0x538   : >> { %v5351_v50 = vmax.f32 %v5303_v19, 0.0  ;;  %v4741_v7 = vpop.f32.mrf.mxu0 }
 0x539   : >> { %v5077_v41 = vpop.f32.mrf.mxu1  ;;  %v4742_v23 = vadd.f32 %v4741_v7, %v12815_v18 }
 0x53a   : >> { %v5399_v42 = vsel %vm16402_vm6, %v5351_v50, 0.0  ;;  %v5304_v22 = vadd.f32 %v5077_v41, %v4737_v37  ;;  %v4743_v34 = vpop.f32.mrf.mxu0  ;;  %v16407_v37 = vld [vmem:[#allocation8_spill] sm:$0xff]  ;;  %vm16411_vm6 = vmmov %vm16185_vm0 }
 0x53b   : >> { %5447 = vst.msk [vmem:[#allocation2 + $0x29] sm:$0xff] %vm16403_vm12, %v5399_v42  ;;  %v5079_v35 = vpop.f32.mrf.mxu1  ;;  %vm16408_vm14 = vnez %v16407_v37 }
 0x53c   : >> { %v5352_v11 = vmax.f32 %v5304_v22, 0.0  ;;  %v4746_v25 = vpop.f32.mrf.mxu0  ;;  %v16409_v35 = vld [vmem:[#allocation10_spill] sm:$0xff] }
 0x53d   : >> { %v5082_v24 = vpop.f32.mrf.mxu1  ;;  %v4747_v36 = vadd.f32 %v4746_v25, %v12822_v45  ;;  %vm16410_vm1 = vnez %v16409_v35 }
 0x53e   : >> { %v5400_v48 = vsel %vm16405_vm7, %v5352_v11, 0.0  ;;  %v5305_v29 = vadd.f32 %v5082_v24, %v4742_v23  ;;  %v4748_v4 = vpop.f32.mrf.mxu0  ;;  %vm16414_vm7 = vmmov %vm16185_vm0 }
 0x53f   : >> { %5448 = vst.msk [vmem:[#allocation2 + $0x31] sm:$0xff] %vm16406_vm3, %v5400_v48  ;;  %v5084_v55 = vpop.f32.mrf.mxu1  ;;  %v16412_v4 = vld [vmem:[#allocation19_spill] sm:$0xff] }
 0x540   : >> { %v5353_v19 = vmax.f32 %v5305_v29, 0.0  ;;  %v4751_v43 = vpop.f32.mrf.mxu0  ;;  %vm16413_vm12 = vnez %v16412_v4  ;;  %v16421_v4 = vld [vmem:[#allocation11_spill] sm:$0xff] }
 0x541   : >> { %v5087_v30 = vpop.f32.mrf.mxu1  ;;  %v4752_v2 = vadd.f32 %v4751_v43, %v12829_v14 }
 0x542   : >> { %v5401_v50 = vsel %vm16408_vm14, %v5353_v19, 0.0  ;;  %v5306_v18 = vadd.f32 %v5087_v30, %v4747_v36  ;;  %v4753_v7 = vpop.f32.mrf.mxu0  ;;  %vm16417_vm14 = vmmov %vm16185_vm0 }
 0x543   : >> { %5449 = vst.msk [vmem:[#allocation2 + $0x39] sm:$0xff] %vm16185_vm0, %v5401_v50  ;;  %v5089_v41 = vpop.f32.mrf.mxu1 }
 0x544   : >> { %v5354_v42 = vmax.f32 %v5306_v18, 0.0  ;;  %v4756_v22 = vpop.f32.mrf.mxu0  ;;  %v16415_v18 = vld [vmem:[#allocation14_spill] sm:$0xff] }
 0x545   : >> { %v5092_v34 = vpop.f32.mrf.mxu1  ;;  %v4757_v24 = vadd.f32 %v4756_v22, %v12837_v53  ;;  %vm16416_vm3 = vnez %v16415_v18 }
 0x546   : >> { %v5402_v23 = vsel %vm16410_vm1, %v5354_v42, 0.0  ;;  %v5307_v45 = vadd.f32 %v5092_v34, %v4752_v2  ;;  %v4758_v11 = vpop.f32.mrf.mxu0  ;;  %vm16420_vm1 = vmmov %vm16411_vm6 }
 0x547   : >> { %5450 = vst.msk [vmem:[#allocation2 + $0x41] sm:$0xff] %vm16411_vm6, %v5402_v23  ;;  %v5094_v25 = vpop.f32.mrf.mxu1  ;;  %v16418_v23 = vld [vmem:[#allocation22_spill] sm:$0xff]  ;;  %vm16422_vm6 = vnez %v16421_v4 }
 0x548   : >> { %v5355_v1 = vmax.f32 %v5307_v45, 0.0  ;;  %v4761_v48 = vpop.f32.mrf.mxu0  ;;  %vm16419_vm0 = vnez %v16418_v23 }
 0x549   : >> { %v5097_v29 = vpop.f32.mrf.mxu1  ;;  %v4762_v43 = vadd.f32 %v4761_v48, %v12845_v28 }
 0x54a   : >> { %v5403_v55 = vsel %vm16413_vm12, %v5355_v1, 0.0  ;;  %v5308_v14 = vadd.f32 %v5097_v29, %v4757_v24  ;;  %v4763_v36 = vpop.f32.mrf.mxu0  ;;  %vm16423_vm12 = vmmov %vm16420_vm1 }
 0x54b   : >> { %5451 = vst.msk [vmem:[#allocation2 + $0x49] sm:$0xff] %vm16414_vm7, %v5403_v55  ;;  %v5099_v19 = vpop.f32.mrf.mxu1 }
 0x54c   : >> { %v5356_v30 = vmax.f32 %v5308_v14, 0.0  ;;  %v4766_v37 = vpop.f32.mrf.mxu0 }
 0x54d   : >> { %v5102_v50 = vpop.f32.mrf.mxu1  ;;  %v4767_v42 = vadd.f32 %v4766_v37, %v12853_v44 }
 0x54e   : >> { %v5404_v7 = vsel %vm16416_vm3, %v5356_v30, 0.0  ;;  %v5309_v53 = vadd.f32 %v5102_v50, %v4762_v43  ;;  %v4768_v41 = vpop.f32.mrf.mxu0  ;;  %v16424_v50 = vld [vmem:[#allocation21_spill] sm:$0xff]  ;;  %vm16426_vm3 = vmmov %vm16420_vm1 }
 0x54f   : >> { %5452 = vst.msk [vmem:[#allocation2 + $0x51] sm:$0xff] %vm16417_vm14, %v5404_v7  ;;  %v5104_v2 = vpop.f32.mrf.mxu1  ;;  %vm16425_vm7 = vnez %v16424_v50 }
 0x550   : >> { %v5357_v22 = vmax.f32 %v5309_v53, 0.0  ;;  %v4771_v34 = vpop.f32.mrf.mxu0 }
 0x551   : >> { %v5107_v35 = vpop.f32.mrf.mxu1  ;;  %v4772_v24 = vadd.f32 %v4771_v34, %v12861_v60  ;;  %v16427_v34 = vld [vmem:[#allocation32_spill] sm:$0xff] }
 0x552   : >> { %v5405_v45 = vsel %vm16419_vm0, %v5357_v22, 0.0  ;;  %v5310_v28 = vadd.f32 %v5107_v35, %v4767_v42  ;;  %v4773_v11 = vpop.f32.mrf.mxu0  ;;  %vm16428_vm14 = vnez %v16427_v34  ;;  %vm16429_vm0 = vmmov %vm16420_vm1 }
 0x553   : >> { %5453 = vst.msk [vmem:[#allocation2 + $0x59] sm:$0xff] %vm16420_vm1, %v5405_v45  ;;  %v5109_v25 = vpop.f32.mrf.mxu1 }
 0x554   : >> { %v5358_v1 = vmax.f32 %v5310_v28, 0.0  ;;  %v4776_v48 = vpop.f32.mrf.mxu0 }
 0x555   : >> { %v5112_v29 = vpop.f32.mrf.mxu1  ;;  %v4777_v19 = vadd.f32 %v4776_v48, %v12869_v27 }
 0x556   : >> { %v5406_v55 = vsel %vm16422_vm6, %v5358_v1, 0.0  ;;  %v5311_v44 = vadd.f32 %v5112_v29, %v4772_v24  ;;  %v4778_v14 = vpop.f32.mrf.mxu0  ;;  %v16430_v1 = vld [vmem:[#allocation36_spill] sm:$0xff]  ;;  %vm16432_vm6 = vmmov %vm16429_vm0 }
 0x557   : >> { %5454 = vst.msk [vmem:[#allocation2 + $0x61] sm:$0xff] %vm16423_vm12, %v5406_v55  ;;  %v5114_v36 = vpop.f32.mrf.mxu1  ;;  %vm16431_vm1 = vnez %v16430_v1 }
 0x558   : >> { %v5359_v43 = vmax.f32 %v5311_v44, 0.0  ;;  %v4781_v30 = vpop.f32.mrf.mxu0 }
 0x559   : >> { %v5117_v37 = vpop.f32.mrf.mxu1  ;;  %v4782_v41 = vadd.f32 %v4781_v30, %v12877_v59 }
 0x55a   : >> { %v5407_v18 = vsel %vm16425_vm7, %v5359_v43, 0.0  ;;  %v5312_v60 = vadd.f32 %v5117_v37, %v4777_v19  ;;  %v4783_v7 = vpop.f32.mrf.mxu0  ;;  %v16433_v19 = vld [vmem:[#allocation28_spill] sm:$0xff]  ;;  %vm16435_vm7 = vmmov %vm16429_vm0 }
 0x55b   : >> { %5455 = vst.msk [vmem:[#allocation2 + $0x69] sm:$0xff] %vm16426_vm3, %v5407_v18  ;;  %v5119_v53 = vpop.f32.mrf.mxu1  ;;  %vm16434_vm12 = vnez %v16433_v19  ;;  %vm16437_vm3 = vmmov %vm16429_vm0 }
 0x55c   : >> { %v5360_v2 = vmax.f32 %v5312_v60, 0.0  ;;  %v4786_v42 = vpop.f32.mrf.mxu0 }
 0x55d   : >> { %v5122_v22 = vpop.f32.mrf.mxu1  ;;  %v4787_v28 = vadd.f32 %v4786_v42, %v12885_v9 }
 0x55e   : >> { %v5408_v35 = vsel %vm16428_vm14, %v5360_v2, 0.0  ;;  %v5313_v27 = vadd.f32 %v5122_v22, %v4782_v41  ;;  %v4788_v23 = vpop.f32.mrf.mxu0  ;;  %vm16439_vm14 = vmmov %vm16429_vm0 }
 0x55f   : >> { %5456 = vst.msk [vmem:[#allocation2 + $0x71] sm:$0xff] %vm16429_vm0, %v5408_v35  ;;  %v5124_v45 = vpop.f32.mrf.mxu1 }
 0x560   : >> { %v5361_v11 = vmax.f32 %v5313_v27, 0.0  ;;  %v4791_v25 = vpop.f32.mrf.mxu0 }
 0x561   : >> { %v5127_v24 = vpop.f32.mrf.mxu1  ;;  %v4792_v55 = vadd.f32 %v4791_v25, %v12893_v0 }
 0x562   : >> { %v5409_v48 = vsel %vm16431_vm1, %v5361_v11, 0.0  ;;  %v5314_v59 = vadd.f32 %v5127_v24, %v4787_v28  ;;  %v4793_v29 = vpop.f32.mrf.mxu0  ;;  %vm16443_vm1 = vmmov %vm16429_vm0 }
 0x563   : >> { %5457 = vst.msk [vmem:[#allocation2 + $0x79] sm:$0xff] %vm16432_vm6, %v5409_v48  ;;  %v5129_v4 = vpop.f32.mrf.mxu1  ;;  %vm16445_vm6 = vmmov %vm16429_vm0 }
 0x564   : >> { %v5362_v44 = vmax.f32 %v5314_v59, 0.0  ;;  %v4796_v14 = vpop.f32.mrf.mxu0 }
 0x565   : >> { %v5132_v36 = vpop.f32.mrf.mxu1  ;;  %v4797_v50 = vadd.f32 %v4796_v14, %v12901_v39 }
 0x566   : >> { %v5410_v43 = vsel %vm16434_vm12, %v5362_v44, 0.0  ;;  %v5315_v9 = vadd.f32 %v5132_v36, %v4792_v55  ;;  %v4798_v30 = vpop.f32.mrf.mxu0  ;;  %vm16447_vm12 = vmmov %vm16429_vm0 }
 0x567   : >> { %5458 = vst.msk [vmem:[#allocation2 + $0x81] sm:$0xff] %vm16435_vm7, %v5410_v43  ;;  %v5134_v37 = vpop.f32.mrf.mxu1  ;;  %v16441_v43 = vld [vmem:[#allocation39_spill] sm:$0xff]  ;;  %vm16449_vm7 = vmmov %vm16429_vm0 }
 0x568   : >> { %v5363_v18 = vmax.f32 %v5315_v9, 0.0  ;;  %v4801_v60 = vpop.f32.mrf.mxu0 }
 0x569   : >> { %v5137_v7 = vpop.f32.mrf.mxu1  ;;  %v4802_v22 = vadd.f32 %v4801_v60, %v12909_v17 }
 0x56a   : >> { %v5411_v41 = vsel %vm16055_vm11, %v5363_v18, 0.0  ;;  %v5316_v0 = vadd.f32 %v5137_v7, %v4797_v50  ;;  %v4803_v2 = vpop.f32.mrf.mxu0 }
 0x56b   : >> { %5459 = vst.msk [vmem:[#allocation2 + $0x89] sm:$0xff] %vm16437_vm3, %v5411_v41  ;;  %v5139_v42 = vpop.f32.mrf.mxu1  ;;  %vm16451_vm3 = vmmov %vm16429_vm0 }
 0x56c   : >> { %v5364_v34 = vmax.f32 %v5316_v0, 0.0  ;;  %v4806_v35 = vpop.f32.mrf.mxu0 }
 0x56d   : >> { %v5142_v27 = vpop.f32.mrf.mxu1  ;;  %v4807_v25 = vadd.f32 %v4806_v35, %v12917_v56 }
 0x56e   : >> { %v5412_v45 = vsel %vm16058_vm2, %v5364_v34, 0.0  ;;  %v5317_v39 = vadd.f32 %v5142_v27, %v4802_v22  ;;  %v4808_v28 = vpop.f32.mrf.mxu0  ;;  %vm16442_vm2 = vnez %v16441_v43 }
 0x56f   : >> { %5460 = vst.msk [vmem:[#allocation2 + $0x91] sm:$0xff] %vm16439_vm14, %v5412_v45  ;;  %v5144_v11 = vpop.f32.mrf.mxu1  ;;  %vm16453_vm14 = vmmov %vm16429_vm0 }
 0x570   : >> { %v5365_v24 = vmax.f32 %v5317_v39, 0.0  ;;  %v4811_v1 = vpop.f32.mrf.mxu0 }
 0x571   : >> { %v5147_v48 = vpop.f32.mrf.mxu1  ;;  %v4812_v44 = vadd.f32 %v4811_v1, %v12926_v16 }
 0x572   : >> { %v5413_v29 = vsel %vm10517_vm9, %v5365_v24, 0.0  ;;  %v5318_v17 = vadd.f32 %v5147_v48, %v4807_v25  ;;  %v4813_v4 = vpop.f32.mrf.mxu0 }
 0x573   : >> { %5461 = vst.msk [vmem:[#allocation2 + $0x99] sm:$0xff] %vm16429_vm0, %v5413_v29  ;;  %v5149_v55 = vpop.f32.mrf.mxu1 }
 0x574   : >> { %v5366_v14 = vmax.f32 %v5318_v17, 0.0  ;;  %v4816_v36 = vpop.f32.mrf.mxu0 }
 0x575   : >> { %v5152_v19 = vpop.f32.mrf.mxu1  ;;  %v4817_v50 = vadd.f32 %v4816_v36, %v12934_v38 }
 0x576   : >> { %v5414_v9 = vsel %vm16442_vm2, %v5366_v14, 0.0  ;;  %v5319_v56 = vadd.f32 %v5152_v19, %v4812_v44  ;;  %v4818_v30 = vpop.f32.mrf.mxu0  ;;  %vm16456_vm2 = vmmov %vm16443_vm1 }
 0x577   : >> { %5462 = vst.msk [vmem:[#allocation2 + $0xa1] sm:$0xff] %vm16443_vm1, %v5414_v9  ;;  %v5154_v37 = vpop.f32.mrf.mxu1 }
 0x578   : >> { %v5367_v18 = vmax.f32 %v5319_v56, 0.0  ;;  %v4821_v60 = vpop.f32.mrf.mxu0 }
 0x579   : >> { %v5157_v7 = vpop.f32.mrf.mxu1  ;;  %v4822_v42 = vadd.f32 %v4821_v60, %v12942_v20 }
 0x57a   : >> { %v5415_v41 = vsel %vm10576_vm5, %v5367_v18, 0.0  ;;  %v5320_v16 = vadd.f32 %v5157_v7, %v4817_v50  ;;  %v4823_v0 = vpop.f32.mrf.mxu0  ;;  %v16466_v50 = vld [vmem:[#allocation4_spill] sm:$0xff] }
 0x57b   : >> { %5463 = vst.msk [vmem:[#allocation2 + $0xa9] sm:$0xff] %vm16445_vm6, %v5415_v41  ;;  %v5159_v2 = vpop.f32.mrf.mxu1  ;;  %vm16459_vm6 = vmmov %vm16456_vm2 }
 0x57c   : >> { %v5368_v22 = vmax.f32 %v5320_v16, 0.0  ;;  %v4826_v34 = vpop.f32.mrf.mxu0  ;;  %v16454_v2 = vld [vmem:[#allocation49_spill] sm:$0xff] }
 0x57d   : >> { %v5162_v35 = vpop.f32.mrf.mxu1  ;;  %v4827_v28 = vadd.f32 %v4826_v34, %v12950_v54  ;;  %vm16455_vm0 = vnez %v16454_v2 }
 0x57e   : >> { %v5416_v23 = vsel %vm10545_vm10, %v5368_v22, 0.0  ;;  %v5321_v38 = vadd.f32 %v5162_v35, %v4822_v42  ;;  %v4828_v45 = vpop.f32.mrf.mxu0  ;;  %vm16528_vm10 = vcmask (%p1923_p4), 523264  }
 0x57f   : >> { %5464 = vst.msk [vmem:[#allocation2 + $0xb1] sm:$0xff] %vm16447_vm12, %v5416_v23  ;;  %v5164_v39 = vpop.f32.mrf.mxu1  ;;  %v16457_v45 = vld [vmem:[#allocation72_spill] sm:$0xff]  ;;  %vm16529_vm9 = vmmov (%p1923_p4), %vm16528_vm10 }
 0x580   : >> { %v5369_v11 = vmax.f32 %v5321_v38, 0.0  ;;  %v4831_v25 = vpop.f32.mrf.mxu0  ;;  %vm16458_vm1 = vnez %v16457_v45  ;;  %vm16530_vm5 = vmmov (%p1923_p4), %vm16529_vm9 }
 0x581   : >> { %v5167_v24 = vpop.f32.mrf.mxu1  ;;  %v4832_v17 = vadd.f32 %v4831_v25, %v12958_v31  ;;  %vm16534_vm11 = vmmov (%p1923_p4), %vm16530_vm5 }
 0x582   : >> { %v5417_v48 = vsel %vm10731_vm13, %v5369_v11, 0.0  ;;  %v5322_v20 = vadd.f32 %v5167_v24, %v4827_v28  ;;  %v4833_v59 = vpop.f32.mrf.mxu0  ;;  %vm16532_vm13 = vmmov (%p1923_p4), %vm16530_vm5 }
 0x583   : >> { %5465 = vst.msk [vmem:[#allocation2 + $0xb9] sm:$0xff] %vm16449_vm7, %v5417_v48  ;;  %v5169_v29 = vpop.f32.mrf.mxu1  ;;  %vm16462_vm7 = vmmov %vm16456_vm2 }
 0x584   : >> { %v5370_v4 = vmax.f32 %v5322_v20, 0.0  ;;  %v4836_v55 = vpop.f32.mrf.mxu0  ;;  %v16460_v20 = vld [vmem:[#allocation68_spill] sm:$0xff] }
 0x585   : >> { %v5172_v44 = vpop.f32.mrf.mxu1  ;;  %v4837_v9 = vadd.f32 %v4836_v55, %v12966_v10  ;;  %vm16461_vm12 = vnez %v16460_v20 }
 0x586   : >> { %v5418_v36 = vsel %vm10706_vm15, %v5370_v4, 0.0  ;;  %v5323_v54 = vadd.f32 %v5172_v44, %v4832_v17  ;;  %v4838_v19 = vpop.f32.mrf.mxu0  ;;  %vm16531_vm15 = vmmov (%p1923_p4), %vm16530_vm5 }
 0x587   : >> { %5466 = vst.msk [vmem:[#allocation2 + $0xc1] sm:$0xff] %vm16451_vm3, %v5418_v36  ;;  %v5174_v43 = vpop.f32.mrf.mxu1  ;;  %v16463_v36 = vld [vmem:[#allocation7_spill] sm:$0xff] }
 0x588   : >> { %v5371_v56 = vmax.f32 %v5323_v54, 0.0  ;;  %v4841_v30 = vpop.f32.mrf.mxu0  ;;  %vm16464_vm3 = vnez %v16463_v36 }
 0x589   : >> { %v5177_v37 = vpop.f32.mrf.mxu1  ;;  %v4842_v53 = vadd.f32 %v4841_v30, %v12974_v52 }
 0x58a   : >> { %v5419_v18 = vsel %vm10765_vm8, %v5371_v56, 0.0  ;;  %v5324_v31 = vadd.f32 %v5177_v37, %v4837_v9  ;;  %v4843_v60 = vpop.f32.mrf.mxu0  ;;  %vm16533_vm8 = vmmov (%p1923_p4), %vm16530_vm5 }
 0x58b   : >> { %5467 = vst.msk [vmem:[#allocation2 + $0xc9] sm:$0xff] %vm16453_vm14, %v5419_v18  ;;  %v5179_v7 = vpop.f32.mrf.mxu1  ;;  %vm16465_vm14 = vmmov %vm16456_vm2 }
 0x58c   : >> { %v5372_v41 = vmax.f32 %v5324_v31, 0.0  ;;  %v4846_v16 = vpop.f32.mrf.mxu0 }
 0x58d   : >> { %v5182_v0 = vpop.f32.mrf.mxu1  ;;  %v4847_v35 = vadd.f32 %v4846_v16, %v12982_v3 }
 0x58e   : >> { %v5420_v42 = vsel %vm16455_vm0, %v5372_v41, 0.0  ;;  %v5325_v10 = vadd.f32 %v5182_v0, %v4842_v53  ;;  %v4848_v22 = vpop.f32.mrf.mxu0  ;;  %vm16467_vm0 = vnez %v16466_v50  ;;  %v16468_v0 = vld [vmem:[#allocation18_spill] sm:$0xff] }
 0x58f   : >> { %5468 = vst.msk [vmem:[#allocation2 + $0xd1] sm:$0xff] %vm16456_vm2, %v5420_v42  ;;  %v5184_v34 = vpop.f32.mrf.mxu1 }
 0x590   : >> { %v5373_v27 = vmax.f32 %v5325_v10, 0.0  ;;  %v4851_v23 = vpop.f32.mrf.mxu0 }
 0x591   : >> { %v5187_v38 = vpop.f32.mrf.mxu1  ;;  %v4852_v25 = vadd.f32 %v4851_v23, %v12990_v63  ;;  %v16471_v23 = vld [vmem:[#allocation6_spill] sm:$0xff] }
 0x592   : >> { %v5421_v39 = vsel %vm16458_vm1, %v5373_v27, 0.0  ;;  %v5326_v52 = vadd.f32 %v5187_v38, %v4847_v35  ;;  %v4853_v28 = vpop.f32.mrf.mxu0  ;;  %vm16469_vm1 = vnez %v16468_v0 }
 0x593   : >> { %5469 = vst.msk [vmem:[#allocation2 + $0xd9] sm:$0xff] %vm16459_vm6, %v5421_v39  ;;  %v5189_v11 = vpop.f32.mrf.mxu1  ;;  %vm16470_vm6 = vmmov %vm16456_vm2 }
 0x594   : >> { %v5374_v24 = vmax.f32 %v5326_v52, 0.0  ;;  %v4856_v1 = vpop.f32.mrf.mxu0 }
 0x595   : >> { %v5192_v48 = vpop.f32.mrf.mxu1  ;;  %v4857_v4 = vadd.f32 %v4856_v1, %v12998_v21 }
 0x596   : >> { %v5422_v59 = vsel %vm16461_vm12, %v5374_v24, 0.0  ;;  %v5327_v3 = vadd.f32 %v5192_v48, %v4852_v25  ;;  %v4858_v29 = vpop.f32.mrf.mxu0  ;;  %vm16472_vm12 = vnez %v16471_v23  ;;  %v16474_v24 = vld [vmem:[#allocation17_spill] sm:$0xff] }
 0x597   : >> { %5470 = vst.msk [vmem:[#allocation2 + $0xe1] sm:$0xff] %vm16462_vm7, %v5422_v59  ;;  %v5194_v17 = vpop.f32.mrf.mxu1  ;;  %vm16473_vm7 = vmmov %vm16456_vm2 }
 0x598   : >> { %v5375_v55 = vmax.f32 %v5327_v3, 0.0  ;;  %v4861_v44 = vpop.f32.mrf.mxu0 }
 0x599   : >> { %v5197_v14 = vpop.f32.mrf.mxu1  ;;  %v4862_v9 = vadd.f32 %v4861_v44, %v13006_v40 }
 0x59a   : >> { %v5423_v54 = vsel %vm16464_vm3, %v5375_v55, 0.0  ;;  %v5328_v63 = vadd.f32 %v5197_v14, %v4857_v4  ;;  %v4863_v19 = vpop.f32.mrf.mxu0  ;;  %vm16475_vm3 = vnez %v16474_v24  ;;  %v16477_v4 = vld [vmem:[#allocation9_spill] sm:$0xff]  ;;  %v16490_v24 = vld [vmem:[#allocation35_spill] sm:$0xff] }
 0x59b   : >> { %5471 = vst.msk [vmem:[#allocation2 + $0xe9] sm:$0xff] %vm16465_vm14, %v5423_v54  ;;  %v5199_v43 = vpop.f32.mrf.mxu1  ;;  %vm16476_vm14 = vmmov %vm16456_vm2 }
 0x59c   : >> { %v5376_v56 = vmax.f32 %v5328_v63, 0.0  ;;  %v4866_v30 = vpop.f32.mrf.mxu0  ;;  %v16479_v43 = vld [vmem:[#allocation20_spill] sm:$0xff] }
 0x59d   : >> { %v5202_v37 = vpop.f32.mrf.mxu1  ;;  %v4867_v7 = vadd.f32 %v4866_v30, %v13014_v33 }
 0x59e   : >> { %v5424_v18 = vsel %vm16467_vm0, %v5376_v56, 0.0  ;;  %v5329_v21 = vadd.f32 %v5202_v37, %v4862_v9  ;;  %v4868_v31 = vpop.f32.mrf.mxu0  ;;  %vm16478_vm0 = vnez %v16477_v4 }
 0x59f   : >> { %5472 = vst.msk [vmem:[#allocation2 + $0xf1] sm:$0xff] %vm16456_vm2, %v5424_v18  ;;  %v5204_v60 = vpop.f32.mrf.mxu1  ;;  %v16482_v31 = vld [vmem:[#allocation30_spill] sm:$0xff] }
 0x5a0   : >> { %v5377_v53 = vmax.f32 %v5329_v21, 0.0  ;;  %v4871_v41 = vpop.f32.mrf.mxu0 }
 0x5a1   : >> { %v5207_v16 = vpop.f32.mrf.mxu1  ;;  %v4872_v22 = vadd.f32 %v4871_v41, %v13022_v47 }
 0x5a2   : >> { %v5425_v2 = vsel %vm16469_vm1, %v5377_v53, 0.0  ;;  %v5330_v40 = vadd.f32 %v5207_v16, %v4867_v7  ;;  %v4873_v42 = vpop.f32.mrf.mxu0  ;;  %vm16480_vm1 = vnez %v16479_v43 }
 0x5a3   : >> { %5473 = vst.msk [vmem:[#allocation2 + $0xf9] sm:$0xff] %vm16470_vm6, %v5425_v2  ;;  %v5209_v10 = vpop.f32.mrf.mxu1  ;;  %vm16481_vm6 = vmmov %vm16456_vm2 }
 0x5a4   : >> { %v5378_v34 = vmax.f32 %v5330_v40, 0.0  ;;  %v4876_v35 = vpop.f32.mrf.mxu0  ;;  %v16485_v40 = vld [vmem:[#allocation34_spill] sm:$0xff] }
 0x5a5   : >> { %v5212_v27 = vpop.f32.mrf.mxu1  ;;  %v4877_v52 = vadd.f32 %v4876_v35, %v13030_v15 }
 0x5a6   : >> { %v5426_v38 = vsel %vm16472_vm12, %v5378_v34, 0.0  ;;  %v5331_v33 = vadd.f32 %v5212_v27, %v4872_v22  ;;  %v4878_v45 = vpop.f32.mrf.mxu0  ;;  %vm16483_vm12 = vnez %v16482_v31 }
 0x5a7   : >> { %5474 = vst.msk [vmem:[#allocation2 + $0x101] sm:$0xff] %vm16473_vm7, %v5426_v38  ;;  %v5214_v39 = vpop.f32.mrf.mxu1  ;;  %vm16484_vm7 = vmmov %vm16456_vm2  ;;  %v16488_v38 = vld [vmem:[#allocation26_spill] sm:$0xff] }
 0x5a8   : >> { %v5379_v28 = vmax.f32 %v5331_v33, 0.0  ;;  %v4881_v11 = vpop.f32.mrf.mxu0 }
 0x5a9   : >> { %v5217_v25 = vpop.f32.mrf.mxu1  ;;  %v4882_v59 = vadd.f32 %v4881_v11, %v13038_v57 }
 0x5aa   : >> { %v5427_v1 = vsel %vm16475_vm3, %v5379_v28, 0.0  ;;  %v5332_v47 = vadd.f32 %v5217_v25, %v4877_v52  ;;  %v4883_v48 = vpop.f32.mrf.mxu0  ;;  %vm16486_vm3 = vnez %v16485_v40 }
 0x5ab   : >> { %5475 = vst.msk [vmem:[#allocation2 + $0x109] sm:$0xff] %vm16476_vm14, %v5427_v1  ;;  %v5219_v20 = vpop.f32.mrf.mxu1  ;;  %vm16487_vm14 = vmmov %vm16456_vm2 }
 0x5ac   : >> { %v5380_v3 = vmax.f32 %v5332_v47, 0.0  ;;  %v4886_v29 = vpop.f32.mrf.mxu0 }
 0x5ad   : >> { %v5222_v17 = vpop.f32.mrf.mxu1  ;;  %v4887_v36 = vadd.f32 %v4886_v29, %v13046_v13 }
 0x5ae   : >> { %v5428_v55 = vsel %vm16478_vm0, %v5380_v3, 0.0  ;;  %v5333_v15 = vadd.f32 %v5222_v17, %v4882_v59  ;;  %v4888_v44 = vpop.f32.mrf.mxu0  ;;  %vm16489_vm0 = vnez %v16488_v38  ;;  %v16493_v17 = vld [vmem:[#allocation23_spill] sm:$0xff] }
 0x5af   : >> { %5476 = vst.msk [vmem:[#allocation2 + $0x111] sm:$0xff] %vm16456_vm2, %v5428_v55  ;;  %v5224_v14 = vpop.f32.mrf.mxu1 }
 0x5b0   : >> { %v5381_v54 = vmax.f32 %v5333_v15, 0.0  ;;  %v4891_v63 = vpop.f32.mrf.mxu0 }
 0x5b1   : >> { %v5227_v19 = vpop.f32.mrf.mxu1  ;;  %v4892_v37 = vadd.f32 %v4891_v63, %v13054_v6  ;;  %v16496_v63 = vld [vmem:[#allocation25_spill] sm:$0xff] }
 0x5b2   : >> { %v5429_v9 = vsel %vm16480_vm1, %v5381_v54, 0.0  ;;  %v5334_v57 = vadd.f32 %v5227_v19, %v4887_v36  ;;  %v4893_v56 = vpop.f32.mrf.mxu0  ;;  %vm16491_vm1 = vnez %v16490_v24 }
 0x5b3   : >> { %5477 = vst.msk [vmem:[#allocation2 + $0x119] sm:$0xff] %vm16481_vm6, %v5429_v9  ;;  %v5229_v30 = vpop.f32.mrf.mxu1  ;;  %vm16492_vm6 = vmmov %vm16456_vm2 }
 0x5b4   : >> { %v5382_v50 = vmax.f32 %v5334_v57, 0.0  ;;  %v4896_v18 = vpop.f32.mrf.mxu0 }
 0x5b5   : >> { %v5232_v21 = vpop.f32.mrf.mxu1  ;;  %v4897_v41 = vadd.f32 %v4896_v18, %v13062_v62 }
 0x5b6   : >> { %v5430_v60 = vsel %vm16483_vm12, %v5382_v50, 0.0  ;;  %v5335_v13 = vadd.f32 %v5232_v21, %v4892_v37  ;;  %v4898_v7 = vpop.f32.mrf.mxu0  ;;  %vm16494_vm12 = vnez %v16493_v17  ;;  %v16521_v50 = vld [vmem:[#allocation50_spill] sm:$0xff] }
 0x5b7   : >> { %5478 = vst.msk [vmem:[#allocation2 + $0x121] sm:$0xff] %vm16484_vm7, %v5430_v60  ;;  %v5234_v53 = vpop.f32.mrf.mxu1  ;;  %vm16495_vm7 = vmmov %vm16456_vm2 }
 0x5b8   : >> { %v5383_v16 = vmax.f32 %v5335_v13, 0.0  ;;  %v4901_v0 = vpop.f32.mrf.mxu0 }
 0x5b9   : >> { %v5237_v2 = vpop.f32.mrf.mxu1  ;;  %v4902_v34 = vadd.f32 %v4901_v0, %v13070_v49 }
 0x5ba   : >> { %v5431_v42 = vsel %vm16486_vm3, %v5383_v16, 0.0  ;;  %v5336_v6 = vadd.f32 %v5237_v2, %v4897_v41  ;;  %v4903_v10 = vpop.f32.mrf.mxu0  ;;  %vm16497_vm3 = vnez %v16496_v63  ;;  %v16501_v41 = vld [vmem:[#allocation41_spill] sm:$0xff] }
 0x5bb   : >> { %5479 = vst.msk [vmem:[#allocation2 + $0x129] sm:$0xff] %vm16487_vm14, %v5431_v42  ;;  %v5239_v22 = vpop.f32.mrf.mxu1  ;;  %vm16498_vm14 = vmmov %vm16456_vm2 }
 0x5bc   : >> { %v5384_v35 = vmax.f32 %v5336_v6, 0.0  ;;  %v4906_v27 = vpop.f32.mrf.mxu0  ;;  %v16504_v22 = vld [vmem:[#allocation40_spill] sm:$0xff] }
 0x5bd   : >> { %v5242_v23 = vpop.f32.mrf.mxu1  ;;  %v4907_v52 = vadd.f32 %v4906_v27, %v13078_v12 }
 0x5be   : >> { %v5432_v33 = vsel %vm16489_vm0, %v5384_v35, 0.0  ;;  %v5337_v62 = vadd.f32 %v5242_v23, %v4902_v34  ;;  %v4908_v45 = vpop.f32.mrf.mxu0  ;;  %vm16500_vm0 = vmmov %vm16456_vm2 }
 0x5bf   : >> { %5480 = vst.msk [vmem:[#allocation2 + $0x131] sm:$0xff] %vm16456_vm2, %v5432_v33  ;;  %v5244_v39 = vpop.f32.mrf.mxu1  ;;  %vm16502_vm2 = vnez %v16501_v41  ;;  %v16507_v45 = vld [vmem:[#allocation44_spill] sm:$0xff]  ;;  %v16527_v41 = vmov (%p1923_p4), 0.0  }
 0x5c0   : >> { %v5385_v28 = vmax.f32 %v5337_v62, 0.0  ;;  %v4911_v11 = vpop.f32.mrf.mxu0  ;;  %8359 = vmatprep.subr.mxu1 (%p1923_p4), %v16527_v41  ;;  %6118 = vmatprep.subr.mxu0 (%p1923_p4), %v16527_v41 }
 0x5c1   : >> { %v5247_v25 = vpop.f32.mrf.mxu1  ;;  %v4912_v20 = vadd.f32 %v4911_v11, %v13086_v61 }
 0x5c2   : >> { %v5433_v1 = vsel %vm16491_vm1, %v5385_v28, 0.0  ;;  %v5338_v49 = vadd.f32 %v5247_v25, %v4907_v52  ;;  %v4913_v47 = vpop.f32.mrf.mxu0  ;;  %vm16503_vm1 = vmmov %vm16500_vm0 }
 0x5c3   : >> { %5481 = vst.msk [vmem:[#allocation2 + $0x139] sm:$0xff] %vm16492_vm6, %v5433_v1  ;;  %v5249_v48 = vpop.f32.mrf.mxu1  ;;  %vm16506_vm6 = vmmov %vm16500_vm0 }
 0x5c4   : >> { %v5386_v59 = vmax.f32 %v5338_v49, 0.0  ;;  %v4916_v3 = vpop.f32.mrf.mxu0  ;;  %v16510_v49 = vld [vmem:[#allocation29_spill] sm:$0xff] }
 0x5c5   : >> { %v5252_v29 = vpop.f32.mrf.mxu1  ;;  %v4917_v44 = vadd.f32 %v4916_v3, %v13094_v51 }
 0x5c6   : >> { %v5434_v4 = vsel %vm16494_vm12, %v5386_v59, 0.0  ;;  %v5339_v12 = vadd.f32 %v5252_v29, %v4912_v20  ;;  %v4918_v55 = vpop.f32.mrf.mxu0  ;;  %vm16508_vm12 = vnez %v16507_v45  ;;  %v8030_v45 = vld [vmem:[%s14660_s3 + $0x110] sm:$0xff] (%p1923_p4) }
 0x5c7   : >> { %5482 = vst.msk [vmem:[#allocation2 + $0x141] sm:$0xff] %vm16495_vm7, %v5434_v4  ;;  %v5254_v15 = vpop.f32.mrf.mxu1  ;;  %vm16509_vm7 = vmmov %vm16500_vm0  ;;  %v16513_v4 = vld [vmem:[#allocation33_spill] sm:$0xff] }
 0x5c8   : >> { %v5387_v14 = vmax.f32 %v5339_v12, 0.0  ;;  %v4921_v36 = vpop.f32.mrf.mxu0 }
 0x5c9   : >> { %v5257_v54 = vpop.f32.mrf.mxu1  ;;  %v4922_v57 = vadd.f32 %v4921_v36, %v13102_v46 }
 0x5ca   : >> { %v5435_v19 = vsel %vm16497_vm3, %v5387_v14, 0.0  ;;  %v5340_v61 = vadd.f32 %v5257_v54, %v4917_v44  ;;  %v4923_v43 = vpop.f32.mrf.mxu0  ;;  %vm16511_vm3 = vnez %v16510_v49  ;;  %v16516_v44 = vld [vmem:[#allocation115_spill] sm:$0xff] }
 0x5cb   : >> { %5483 = vst.msk [vmem:[#allocation2 + $0x149] sm:$0xff] %vm16498_vm14, %v5435_v19  ;;  %v5259_v9 = vpop.f32.mrf.mxu1  ;;  %vm16512_vm14 = vmmov %vm16500_vm0  ;;  %v16517_v19 = vld [vmem:[#allocation46_spill] sm:$0xff] }
 0x5cc   : >> { %v5388_v56 = vmax.f32 %v5340_v61, 0.0  ;;  %v4926_v30 = vpop.f32.mrf.mxu0  ;;  %v5583_v49 = vld [vmem:[#allocation2 + $0x121] sm:$0xff] (%p1923_p4) }
 0x5cd   : >> { %v5262_v37 = vpop.f32.mrf.mxu1  ;;  %v4927_v60 = vadd.f32 %v4926_v30, %v13110_v32 }
 0x5ce   : >> { %v5436_v18 = vsel %vm16144_vm4, %v5388_v56, 0.0  ;;  %v5341_v51 = vadd.f32 %v5262_v37, %v4922_v57  ;;  %v4928_v21 = vpop.f32.mrf.mxu0  ;;  %vm16505_vm4 = vnez %v16504_v22  ;;  %v16520_v57 = vld [vmem:[#allocation116_spill] sm:$0xff]  ;;  %v5578_v22 = vld [vmem:[#allocation2 + $0xf9] sm:$0xff] (%p1923_p4) }
 0x5cf   : >> { %5484 = vst.msk [vmem:[#allocation2 + $0x151] sm:$0xff] %vm16500_vm0, %v5436_v18  ;;  %v5264_v31 = vpop.f32.mrf.mxu1  ;;  %vm16514_vm0 = vnez %v16513_v4  ;;  %v8022_v4 = vld [vmem:[%s14660_s3 + $0xd0] sm:$0xff] (%p1923_p4) }
 0x5d0   : >> { %v5389_v13 = vmax.f32 %v5341_v51, 0.0  ;;  %v4931_v7 = vpop.f32.mrf.mxu0 }
 0x5d1   : >> { %v5267_v53 = vpop.f32.mrf.mxu1  ;;  %v4932_v40 = vadd.f32 %v4931_v7, %v13118_v58  ;;  %v5574_v7 = vld [vmem:[#allocation2 + $0xd9] sm:$0xff] (%p1923_p4) }
 0x5d2   : >> { %v5437_v16 = vsel %vm16502_vm2, %v5389_v13, 0.0  ;;  %v5342_v46 = vadd.f32 %v5267_v53, %v4927_v60  ;;  %v4933_v0 = vpop.f32.mrf.mxu0  ;;  %vm16515_vm2 = vmmov %vm16503_vm1  ;;  %v16524_v60 = vld [vmem:[#allocation47_spill] sm:$0xff]  ;;  %5763 = vrot.lane.b32.xlu0 (%p1923_p4), %v5574_v7, %s8565_s14  ;;  %v13508_v7 = vld [vmem:[#allocation2 + $0x1a] sm:$0xff] (%p1923_p4) }
 0x5d3   : >> { %5485 = vst.msk [vmem:[#allocation2 + $0x159] sm:$0xff] %vm16503_vm1, %v5437_v16  ;;  %v5269_v2 = vpop.f32.mrf.mxu1  ;;  %vm16518_vm1 = vnez %v16517_v19  ;;  %v5575_v53 = vld [vmem:[#allocation2 + $0xe1] sm:$0xff] (%p1923_p4)  ;;  %v5550_v16 = vld [vmem:[#allocation2 + $0x19] sm:$0xff] (%p1923_p4)  ;;  %v5576_v0 = vld [vmem:[#allocation2 + $0xe9] sm:$0xff] (%p1923_p4)  ;;  %8044 = vmatprep.mubr.msk.f32.mxu0 (%p1923_p4), %vm16529_vm9, %v13508_v7 }
 0x5d4   : >> { %v5390_v42 = vmax.f32 %v5342_v46, 0.0  ;;  %v4936_v6 = vpop.f32.mrf.mxu0  ;;  %5765 = vrot.lane.b32.xlu1 (%p1923_p4), %v5575_v53, %s8565_s14  ;;  %v5551_v46 = vld [vmem:[#allocation2 + $0x21] sm:$0xff] (%p1923_p4)  ;;  %v5552_v2 = vld [vmem:[#allocation2 + $0x29] sm:$0xff] (%p1923_p4) }
 0x5d5   : >> { %v5272_v10 = vpop.f32.mrf.mxu1  ;;  %v4937_v23 = vadd.f32 %v4936_v6, %v13126_v5  ;;  %v8035_v6 = vld [vmem:[%s14660_s3 + $0x138] sm:$0xff] (%p1923_p4)  ;;  %v8042_v19 = vld [vmem:[%s14660_s3 + $0x170] sm:$0xff] (%p1923_p4) }
 0x5d6   : >> { %v5438_v34 = vsel %vm16505_vm4, %v5390_v42, 0.0  ;;  %v5343_v32 = vadd.f32 %v5272_v10, %v4932_v40  ;;  %v4938_v35 = vpop.f32.mrf.mxu0  ;;  %vm16519_vm4 = vmmov %vm16515_vm2  ;;  %5715 = vrot.lane.b32.xlu0 (%p1923_p4), %v5550_v16, %s8565_s14  ;;  %v5577_v40 = vld [vmem:[#allocation2 + $0xf1] sm:$0xff] (%p1923_p4)  ;;  %8383 = vmatpush1.msra.mxu1 (%p1923_p4), %v8035_v6 }
 0x5d7   : >> { %5486 = vst.msk [vmem:[#allocation2 + $0x161] sm:$0xff] %vm16506_vm6, %v5438_v34  ;;  %v5274_v27 = vpop.f32.mrf.mxu1  ;;  %vm16522_vm6 = vnez %v16521_v50  ;;  %v5553_v42 = vld [vmem:[#allocation2 + $0x31] sm:$0xff] (%p1923_p4)  ;;  %6119 = vmatpush1.msra.mxu0 (%p1923_p4), %v8035_v6  ;;  %v5554_v34 = vld [vmem:[#allocation2 + $0x39] sm:$0xff] (%p1923_p4)  ;;  %8360 = vmatprep.subr.mxu1 (%p1923_p4), %v16527_v41  ;;  %v5572_v6 = vld [vmem:[#allocation2 + $0xc9] sm:$0xff] (%p1923_p4) }
 0x5d8   : >> { %v5391_v38 = vmax.f32 %v5343_v32, 0.0  ;;  %v4941_v33 = vpop.f32.mrf.mxu0  ;;  %5717 = vrot.lane.b32.xlu1 (%p1923_p4), %v5551_v46, %s8565_s14  ;;  %v8034_v10 = vld [vmem:[%s14660_s3 + $0x130] sm:$0xff] (%p1923_p4)  ;;  %6120 = vmatprep.subr.mxu0 (%p1923_p4), %v16527_v41  ;;  %v8033_v32 = vld [vmem:[%s14660_s3 + $0x128] sm:$0xff] (%p1923_p4)  ;;  %v8032_v35 = vld [vmem:[%s14660_s3 + $0x120] sm:$0xff] (%p1923_p4) }
 0x5d9   : >> { %v5277_v62 = vpop.f32.mrf.mxu1  ;;  %v4942_v11 = vadd.f32 %v4941_v33, %v13134_v26  ;;  %8384 = vmatpush1.msra.mxu1 (%p1923_p4), %v8034_v10  ;;  %6121 = vmatpush1.msra.mxu0 (%p1923_p4), %v8034_v10  ;;  %v5579_v27 = vld [vmem:[#allocation2 + $0x101] sm:$0xff] (%p1923_p4)  ;;  %v5580_v33 = vld [vmem:[#allocation2 + $0x109] sm:$0xff] (%p1923_p4)  ;;  %v5569_v16 = vld [vmem:[#allocation2 + $0xb1] sm:$0xff] (%p1923_p4) }
 0x5da   : >> { %v5439_v39 = vsel %vm16508_vm12, %v5391_v38, 0.0  ;;  %v5344_v58 = vadd.f32 %v5277_v62, %v4937_v23  ;;  %v4943_v52 = vpop.f32.mrf.mxu0  ;;  %vm16523_vm12 = vmmov %vm16515_vm2  ;;  %5767 = vrot.lane.b32.xlu0 (%p1923_p4), %v5576_v0, %s8565_s14  ;;  %8361 = vmatprep.subr.mxu1 (%p1923_p4), %v16527_v41  ;;  %v5555_v23 = vld [vmem:[#allocation2 + $0x41] sm:$0xff] (%p1923_p4)  ;;  %v8031_v38 = vld [vmem:[%s14660_s3 + $0x118] sm:$0xff] (%p1923_p4) }
 0x5db   : >> { %5487 = vst.msk [vmem:[#allocation2 + $0x169] sm:$0xff] %vm16509_vm7, %v5439_v39  ;;  %v5279_v28 = vpop.f32.mrf.mxu1  ;;  %vm16525_vm7 = vnez %v16524_v60  ;;  %6122 = vmatprep.subr.mxu0 (%p1923_p4), %v16527_v41  ;;  %8385 = vmatpush1.msra.mxu1 (%p1923_p4), %v8033_v32  ;;  %v5556_v62 = vld [vmem:[#allocation2 + $0x49] sm:$0xff] (%p1923_p4)  ;;  %v5557_v52 = vld [vmem:[#allocation2 + $0x51] sm:$0xff] (%p1923_p4)  ;;  %v5570_v0 = vld [vmem:[#allocation2 + $0xb9] sm:$0xff] (%p1923_p4) }
 0x5dc   : >> { %v5392_v25 = vmax.f32 %v5344_v58, 0.0  ;;  %v4946_v24 = vpop.f32.mrf.mxu0  ;;  %5719 = vrot.lane.b32.xlu1 (%p1923_p4), %v5552_v2, %s8565_s14  ;;  %6123 = vmatpush1.msra.mxu0 (%p1923_p4), %v8033_v32  ;;  %v8029_v39 = vld [vmem:[%s14660_s3 + $0x108] sm:$0xff] (%p1923_p4)  ;;  %v5581_v58 = vld [vmem:[#allocation2 + $0x111] sm:$0xff] (%p1923_p4)  ;;  %v8028_v28 = vld [vmem:[%s14660_s3 + $0x100] sm:$0xff] (%p1923_p4) }
 0x5dd   : >> { %v5282_v1 = vpop.f32.mrf.mxu1  ;;  %v4947_v59 = vadd.f32 %v4946_v24, %v13142_v8  ;;  %8362 = vmatprep.subr.mxu1 (%p1923_p4), %v16527_v41  ;;  %6124 = vmatprep.subr.mxu0 (%p1923_p4), %v16527_v41  ;;  %v8027_v24 = vld [vmem:[%s14660_s3 + $0xf8] sm:$0xff] (%p1923_p4)  ;;  %v5568_v60 = vld [vmem:[#allocation2 + $0xa9] sm:$0xff] (%p1923_p4) }
 0x5de   : >> { %v5440_v47 = vsel %vm16511_vm3, %v5392_v25, 0.0  ;;  %v5345_v5 = vadd.f32 %v5282_v1, %v4942_v11  ;;  %v4948_v48 = vpop.f32.mrf.mxu0  ;;  %vm16526_vm3 = vmmov %vm16515_vm2  ;;  %5769 = vrot.lane.b32.xlu0 (%p1923_p4), %v5577_v40, %s8565_s14  ;;  %8386 = vmatpush1.msra.mxu1 (%p1923_p4), %v8032_v35  ;;  %v5582_v11 = vld [vmem:[#allocation2 + $0x119] sm:$0xff] (%p1923_p4)  ;;  %v8026_v1 = vld [vmem:[%s14660_s3 + $0xf0] sm:$0xff] (%p1923_p4) }
 0x5df   : >> { %5488 = vst.msk [vmem:[#allocation2 + $0x171] sm:$0xff] %vm16512_vm14, %v5440_v47  ;;  %v5284_v20 = vpop.f32.mrf.mxu1  ;;  %6125 = vmatpush1.msra.mxu0 (%p1923_p4), %v8032_v35  ;;  %8363 = vmatprep.subr.mxu1 (%p1923_p4), %v16527_v41  ;;  %v5558_v25 = vld [vmem:[#allocation2 + $0x59] sm:$0xff] (%p1923_p4)  ;;  %v5559_v47 = vld [vmem:[#allocation2 + $0x61] sm:$0xff] (%p1923_p4)  ;;  %v5584_v48 = vld [vmem:[#allocation2 + $0x129] sm:$0xff] (%p1923_p4) }
 0x5e0   : >> { %v5393_v3 = vmax.f32 %v5345_v5, 0.0  ;;  %v4951_v29 = vpop.f32.mrf.mxu0  ;;  %5721 = vrot.lane.b32.xlu1 (%p1923_p4), %v5553_v42, %s8565_s14  ;;  %6126 = vmatprep.subr.mxu0 (%p1923_p4), %v16527_v41  ;;  %v8025_v5 = vld [vmem:[%s14660_s3 + $0xe8] sm:$0xff] (%p1923_p4)  ;;  %v5549_v35 = vld [vmem:[#allocation2 + $0x11] sm:$0xff] (%p1923_p4)  ;;  %vm16535_vm14 = vmmov (%p1923_p4), %vm16530_vm5 }
 0x5e1   : >> { %v5287_v17 = vpop.f32.mrf.mxu1  ;;  %v4952_v14 = vadd.f32 %v4951_v29, %v16516_v44  ;;  %8387 = vmatpush1.msra.mxu1 (%p1923_p4), %v8031_v38  ;;  %6127 = vmatpush1.msra.mxu0 (%p1923_p4), %v8031_v38  ;;  %v5560_v20 = vld [vmem:[#allocation2 + $0x69] sm:$0xff] (%p1923_p4)  ;;  %v5585_v29 = vld [vmem:[#allocation2 + $0x131] sm:$0xff] (%p1923_p4)  ;;  %v5587_v44 = vld [vmem:[#allocation2 + $0x141] sm:$0xff] (%p1923_p4) }
 0x5e2   : >> { %v5441_v12 = vsel %vm16514_vm0, %v5393_v3, 0.0  ;;  %v5346_v26 = vadd.f32 %v5287_v17, %v4947_v59  ;;  %v4953_v55 = vpop.f32.mrf.mxu0  ;;  %5771 = vrot.lane.b32.xlu0 (%p1923_p4), %v5578_v22, %s8565_s14  ;;  %8364 = vmatprep.subr.mxu1 (%p1923_p4), %v16527_v41  ;;  %v8024_v59 = vld [vmem:[%s14660_s3 + $0xe0] sm:$0xff] (%p1923_p4)  ;;  %v8023_v3 = vld [vmem:[%s14660_s3 + $0xd8] sm:$0xff] (%p1923_p4)  ;;  %v5548_v32 = vld [vmem:[#allocation2 + $0x9] sm:$0xff] (%p1923_p4) }
 0x5e3   : >> { %5489 = vst.msk [vmem:[#allocation2 + $0x179] sm:$0xff] %vm16515_vm2, %v5441_v12  ;;  %v5289_v15 = vpop.f32.mrf.mxu1  ;;  %6128 = vmatprep.subr.mxu0 (%p1923_p4), %v16527_v41  ;;  %8388 = vmatpush1.msra.mxu1 (%p1923_p4), %v8030_v45  ;;  %v5561_v17 = vld [vmem:[#allocation2 + $0x71] sm:$0xff] (%p1923_p4)  ;;  %v5586_v12 = vld [vmem:[#allocation2 + $0x139] sm:$0xff] (%p1923_p4)  ;;  %v8021_v55 = vld [vmem:[%s14660_s3 + $0xc8] sm:$0xff] (%p1923_p4) }
 0x5e4   : >> { %v5394_v36 = vmax.f32 %v5346_v26, 0.0  ;;  %v4956_v54 = vpop.f32.mrf.mxu0  ;;  %5723 = vrot.lane.b32.xlu1 (%p1923_p4), %v5554_v34, %s8565_s14  ;;  %6129 = vmatpush1.msra.mxu0 (%p1923_p4), %v8030_v45  ;;  %v5562_v26 = vld [vmem:[#allocation2 + $0x79] sm:$0xff] (%p1923_p4)  ;;  %v5591_v50 = vld [vmem:[#allocation2 + $0x161] sm:$0xff] (%p1923_p4)  ;;  %v5573_v22 = vld [vmem:[#allocation2 + $0xd1] sm:$0xff] (%p1923_p4) }
 0x5e5   : >> { %v5292_v63 = vpop.f32.mrf.mxu1  ;;  %v4957_v56 = vadd.f32 %v4956_v54, %v16520_v57  ;;  %8365 = vmatprep.subr.mxu1 (%p1923_p4), %v16527_v41  ;;  %6130 = vmatprep.subr.mxu0 (%p1923_p4), %v16527_v41  ;;  %v8020_v15 = vld [vmem:[%s14660_s3 + $0xc0] sm:$0xff] (%p1923_p4)  ;;  %v5588_v54 = vld [vmem:[#allocation2 + $0x149] sm:$0xff] (%p1923_p4)  ;;  %vm16536_vm0 = vmmov (%p1923_p4), %vm16530_vm5 }
 0x5e6   : >> { %v5442_v61 = vsel %vm16518_vm1, %v5394_v36, 0.0  ;;  %v5347_v8 = vadd.f32 %v5292_v63, %v4952_v14  ;;  %v4958_v43 = vpop.f32.mrf.mxu0  ;;  %5773 = vrot.lane.b32.xlu0 (%p1923_p4), %v5579_v27, %s8565_s14  ;;  %8389 = vmatpush1.msra.mxu1 (%p1923_p4), %v8029_v39  ;;  %v5563_v14 = vld [vmem:[#allocation2 + $0x81] sm:$0xff] (%p1923_p4)  ;;  %v8043_v36 = vld [vmem:[%s14660_s3 + $0x178] sm:$0xff] (%p1923_p4)  ;;  %v5564_v63 = vld [vmem:[#allocation2 + $0x89] sm:$0xff] (%p1923_p4) }
 0x5e7   : >> { %5490 = vst.msk [vmem:[#allocation2 + $0x181] sm:$0xff] %vm16519_vm4, %v5442_v61  ;;  %v5294_v9 = vpop.f32.mrf.mxu1  ;;  %6131 = vmatpush1.msra.mxu0 (%p1923_p4), %v8029_v39  ;;  %8366 = vmatprep.subr.mxu1 (%p1923_p4), %v16527_v41  ;;  %v8041_v61 = vld [vmem:[%s14660_s3 + $0x168] sm:$0xff] (%p1923_p4)  ;;  %v5565_v43 = vld [vmem:[#allocation2 + $0x91] sm:$0xff] (%p1923_p4)  ;;  %v5590_v57 = vld [vmem:[#allocation2 + $0x159] sm:$0xff] (%p1923_p4) }
 0x5e8   : >> { %v5395_v30 = vmax.f32 %v5347_v8, 0.0  ;;  %5725 = vrot.lane.b32.xlu1 (%p1923_p4), %v5555_v23, %s8565_s14  ;;  %6132 = vmatprep.subr.mxu0 (%p1923_p4), %v16527_v41  ;;  %v5589_v8 = vld [vmem:[#allocation2 + $0x151] sm:$0xff] (%p1923_p4)  ;;  %v8040_v9 = vld [vmem:[%s14660_s3 + $0x160] sm:$0xff] (%p1923_p4)  ;;  %vm16537_vm2 = vmmov (%p1923_p4), %vm16536_vm0 }
 0x5e9   : >> { %v5297_v37 = vpop.f32.mrf.mxu1  ;;  %8390 = vmatpush1.msra.mxu1 (%p1923_p4), %v8028_v28  ;;  %6133 = vmatpush1.msra.mxu0 (%p1923_p4), %v8028_v28  ;;  %v5593_v53 = vld [vmem:[#allocation2 + $0x171] sm:$0xff] (%p1923_p4)  ;;  %v5571_v40 = vld [vmem:[#allocation2 + $0xc1] sm:$0xff] (%p1923_p4)  ;;  %vm16538_vm1 = vmmov (%p1923_p4), %vm16536_vm0 }
 0x5ea   : >> { %v5443_v18 = vsel %vm16522_vm6, %v5395_v30, 0.0  ;;  %v5348_v51 = vadd.f32 %v5297_v37, %v4957_v56  ;;  %5775 = vrot.lane.b32.xlu0 (%p1923_p4), %v5580_v33, %s8565_s14  ;;  %8367 = vmatprep.subr.mxu1 (%p1923_p4), %v16527_v41  ;;  %v5566_v56 = vld [vmem:[#allocation2 + $0x99] sm:$0xff] (%p1923_p4)  ;;  %v8038_v37 = vld [vmem:[%s14660_s3 + $0x150] sm:$0xff] (%p1923_p4)  ;;  %v5547_v34 = vld [vmem:[#allocation2 + $0x1] sm:$0xff] (%p1923_p4) }
 0x5eb   : >> { %5491 = vst.msk [vmem:[#allocation2 + $0x189] sm:$0xff] %vm16523_vm12, %v5443_v18  ;;  %v5299_v21 = vpop.f32.mrf.mxu1  ;;  %1925 = sbr.rel (!%p1923_p4) target bundleno = 309 (0x135), region = 81  ;;  %6134 = vmatprep.subr.mxu0 (%p1923_p4), %v16527_v41  ;;  %8391 = vmatpush1.msra.mxu1 (%p1923_p4), %v8027_v24  ;;  %v8039_v30 = vld [vmem:[%s14660_s3 + $0x158] sm:$0xff] (%p1923_p4)  ;;  %v5567_v18 = vld [vmem:[#allocation2 + $0xa1] sm:$0xff] (%p1923_p4)  ;;  %vm16539_vm4 = vmmov (%p1923_p4), %vm16536_vm0 }
 0x5ec   : >> { %v5396_v31 = vmax.f32 %v5348_v51, 0.0  ;;  %5727 = vrot.lane.b32.xlu1 (%p1923_p4), %v5556_v62, %s8565_s14  ;;  %6135 = vmatpush1.msra.mxu0 (%p1923_p4), %v8027_v24  ;;  %v8037_v51 = vld [vmem:[%s14660_s3 + $0x148] sm:$0xff] (%p1923_p4)  ;;  %v5628_v21 = vld [vmem:[#allocation2 + $0xda] sm:$0xff] (%p1923_p4)  ;;  %vm16540_vm6 = vmmov (%p1923_p4), %vm16536_vm0 }
 0x5ed   : > { %8368 = vmatprep.subr.mxu1 (%p1923_p4), %v16527_v41  ;;  %6136 = vmatprep.subr.mxu0 (%p1923_p4), %v16527_v41  ;;  %v5594_v46 = vld [vmem:[#allocation2 + $0x179] sm:$0xff] (%p1923_p4)  ;;  %v5629_v62 = vld [vmem:[#allocation2 + $0xe2] sm:$0xff] (%p1923_p4)  ;;  %vm16541_vm12 = vmmov (%p1923_p4), %vm16536_vm0 }
 0x5ee   : >> { %v5444_v13 = vsel %vm16525_vm7, %v5396_v31, 0.0  ;;  %5777 = vrot.lane.b32.xlu0 (%p1923_p4), %v5581_v58, %s8565_s14  ;;  %8392 = vmatpush1.msra.mxu1 (%p1923_p4), %v8026_v1  ;;  %v5592_v31 = vld [vmem:[#allocation2 + $0x169] sm:$0xff] (%p1923_p4)  ;;  %v5595_v2 = vld [vmem:[#allocation2 + $0x181] sm:$0xff] (%p1923_p4)  ;;  %v5520_v27 = vld [vmem:[#allocation2 + $0xd8] sm:$0xff] (%p1923_p4) }
 0x5ef   : >> { %5492 = vst.msk [vmem:[#allocation2 + $0x191] sm:$0xff] %vm16526_vm3, %v5444_v13  ;;  %6137 = vmatpush1.msra.mxu0 (%p1923_p4), %v8026_v1  ;;  %8369 = vmatprep.subr.mxu1 (%p1923_p4), %v16527_v41  ;;  %v8036_v13 = vld [vmem:[%s14660_s3 + $0x140] sm:$0xff] (%p1923_p4)  ;;  %v5940_v33 = vld [vmem:[%s14660_s3 + $0x78] sm:$0xff] (%p1923_p4)  ;;  %vm16543_vm7 = vmmov (%p1923_p4), %vm16536_vm0 }
 0x5f0   : > { %5729 = vrot.lane.b32.xlu1 %v5557_v52, %s8565_s14  ;;  %6138 = vmatprep.subr.mxu0 %v16527_v41  ;;  %v5521_v45 = vld [vmem:[#allocation2 + $0xe0] sm:$0xff]  ;;  %v5496_v58 = vld [vmem:[#allocation2 + $0x18] sm:$0xff]  ;;  %v5939_v52 = vld [vmem:[%s14660_s3 + $0x70] sm:$0xff] }
 0x5f1   : > { %8393 = vmatpush1.msra.mxu1 %v8025_v5  ;;  %6139 = vmatpush1.msra.mxu0 %v8025_v5  ;;  %v13546_v1 = vld [vmem:[#allocation2 + $0x22] sm:$0xff]  ;;  %v5630_v5 = vld [vmem:[#allocation2 + $0xea] sm:$0xff]  ;;  %vm16544_vm3 = vmmov %vm16536_vm0 }
 0x5f2   : > { %5779 = vrot.lane.b32.xlu0 %v5582_v11, %s8565_s14  ;;  %8370 = vmatprep.subr.mxu1 %v16527_v41  ;;  %v5596_v42 = vld [vmem:[#allocation2 + $0x189] sm:$0xff]  ;;  %vm16546_vm9 = vmmov %vm16536_vm0 }
 0x5f3   : > { %6140 = vmatprep.subr.mxu0 %v16527_v41  ;;  %8394 = vmatpush1.msra.mxu1 %v8024_v59 }
 0x5f4   : > { %5731 = vrot.lane.b32.xlu1 %v5558_v25, %s8565_s14  ;;  %6141 = vmatpush1.msra.mxu0 %v8024_v59  ;;  %v8155_v25 = vld [vmem:[%s14660_s3 + $0x1f8] sm:$0xff] }
 0x5f5   : > { %8371 = vmatprep.subr.mxu1 %v16527_v41  ;;  %6142 = vmatprep.subr.mxu0 %v16527_v41 }
 0x5f6   : > { %5781 = vrot.lane.b32.xlu0 %v5583_v49, %s8565_s14  ;;  %8395 = vmatpush1.msra.mxu1 %v8023_v3  ;;  %v5597_v10 = vld [vmem:[#allocation2 + $0x191] sm:$0xff]  ;;  %v5497_v49 = vld [vmem:[#allocation2 + $0x20] sm:$0xff] }
 0x5f7   : > { %6143 = vmatpush1.msra.mxu0 %v8023_v3  ;;  %8372 = vmatprep.subr.mxu1 %v16527_v41 }
 0x5f8   : > { %5733 = vrot.lane.b32.xlu1 %v5559_v47, %s8565_s14  ;;  %6144 = vmatprep.subr.mxu0 %v16527_v41 }
 0x5f9   : > { %8396 = vmatpush1.msra.mxu1 %v8022_v4  ;;  %6145 = vmatpush1.msra.mxu0 %v8022_v4  ;;  %v5938_v4 = vld [vmem:[%s14660_s3 + $0x68] sm:$0xff] }
 0x5fa   : > { %5783 = vrot.lane.b32.xlu0 %v5584_v48, %s8565_s14  ;;  %8373 = vmatprep.subr.mxu1 %v16527_v41  ;;  %v5522_v48 = vld [vmem:[#allocation2 + $0xe8] sm:$0xff] }
 0x5fb   : > { %6146 = vmatprep.subr.mxu0 %v16527_v41  ;;  %8397 = vmatpush1.msra.mxu1 %v8021_v55 }
 0x5fc   : > { %5735 = vrot.lane.b32.xlu1 %v5560_v20, %s8565_s14  ;;  %6147 = vmatpush1.msra.mxu0 %v8021_v55  ;;  %v8154_v20 = vld [vmem:[%s14660_s3 + $0x1f0] sm:$0xff] }
 0x5fd   : > { %8374 = vmatprep.subr.mxu1 %v16527_v41  ;;  %6148 = vmatprep.subr.mxu0 %v16527_v41  ;;  %v5631_v55 = vld [vmem:[#allocation2 + $0xf2] sm:$0xff] }
 0x5fe   : > { %5785 = vrot.lane.b32.xlu0 %v5585_v29, %s8565_s14  ;;  %8398 = vmatpush1.msra.mxu1 %v8020_v15 }
 0x5ff   : > { %6149 = vmatpush1.msra.mxu0 %v8020_v15  ;;  %8375 = vmatprep.subr.mxu1 %v16527_v41  ;;  %v5523_v15 = vld [vmem:[#allocation2 + $0xf0] sm:$0xff] }
 0x600   : > { %5737 = vrot.lane.b32.xlu1 %v5561_v17, %s8565_s14  ;;  %6166 = vmatprep.subr.mxu0 %v16527_v41  ;;  %v5498_v17 = vld [vmem:[#allocation2 + $0x28] sm:$0xff] }
 0x601   : > { %8399 = vmatpush2.msra.mxu1 %v8043_v36  ;;  %6167 = vmatpush2.msra.mxu0 %v8043_v36 }
 0x602   : > { %5787 = vrot.lane.b32.xlu0 %v5586_v12, %s8565_s14  ;;  %8376 = vmatprep.subr.mxu1 %v16527_v41  ;;  %v13566_v12 = vld [vmem:[#allocation2 + $0x2a] sm:$0xff] }
 0x603   : > { %6168 = vmatprep.subr.mxu0 %v16527_v41  ;;  %8400 = vmatpush2.msra.mxu1 %v8042_v19 }
 0x604   : > { %5739 = vrot.lane.b32.xlu1 %v5562_v26, %s8565_s14  ;;  %6169 = vmatpush2.msra.mxu0 %v8042_v19  ;;  %v5937_v19 = vld [vmem:[%s14660_s3 + $0x60] sm:$0xff] }
 0x605   : > { %8377 = vmatprep.subr.mxu1 %v16527_v41  ;;  %6170 = vmatprep.subr.mxu0 %v16527_v41 }
 0x606   : > { %5789 = vrot.lane.b32.xlu0 %v5587_v44, %s8565_s14  ;;  %8401 = vmatpush2.msra.mxu1 %v8041_v61  ;;  %v8153_v44 = vld [vmem:[%s14660_s3 + $0x1e8] sm:$0xff] }
 0x607   : > { %6171 = vmatpush2.msra.mxu0 %v8041_v61  ;;  %8378 = vmatprep.subr.mxu1 %v16527_v41  ;;  %v13587_v61 = vld [vmem:[#allocation2 + $0x32] sm:$0xff] }
 0x608   : > { %5741 = vrot.lane.b32.xlu1 %v5563_v14, %s8565_s14  ;;  %6172 = vmatprep.subr.mxu0 %v16527_v41 }
 0x609   : > { %8402 = vmatpush2.msra.mxu1 %v8040_v9  ;;  %6173 = vmatpush2.msra.mxu0 %v8040_v9  ;;  %v5524_v9 = vld [vmem:[#allocation2 + $0xf8] sm:$0xff] }
 0x60a   : > { %5791 = vrot.lane.b32.xlu0 %v5588_v54, %s8565_s14  ;;  %8379 = vmatprep.subr.mxu1 %v16527_v41 }
 0x60b   : > { %6174 = vmatprep.subr.mxu0 %v16527_v41  ;;  %8403 = vmatpush2.msra.mxu1 %v8039_v30 }
 0x60c   : > { %5743 = vrot.lane.b32.xlu1 %v5564_v63, %s8565_s14  ;;  %6175 = vmatpush2.msra.mxu0 %v8039_v30  ;;  %v5499_v63 = vld [vmem:[#allocation2 + $0x30] sm:$0xff] }
 0x60d   : > { %8380 = vmatprep.subr.mxu1 %v16527_v41  ;;  %6176 = vmatprep.subr.mxu0 %v16527_v41 }
 0x60e   : > { %5793 = vrot.lane.b32.xlu0 %v5589_v8, %s8565_s14  ;;  %8404 = vmatpush2.msra.mxu1 %v8038_v37 }
 0x60f   : > { %6177 = vmatpush2.msra.mxu0 %v8038_v37  ;;  %8381 = vmatprep.subr.mxu1 %v16527_v41 }
 0x610   : > { %5745 = vrot.lane.b32.xlu1 %v5565_v43, %s8565_s14  ;;  %6178 = vmatprep.subr.mxu0 %v16527_v41  ;;  %v5632_v43 = vld [vmem:[#allocation2 + $0xfa] sm:$0xff] }
 0x611   : > { %8405 = vmatpush2.msra.mxu1 %v8037_v51  ;;  %8068 = vmatprep.mubr.msk.f32.mxu1 %vm16528_vm10, %v5628_v21  ;;  %vm16545_vm10 = vmmov %vm16536_vm0 }
 0x612   : > { %5795 = vrot.lane.b32.xlu0 %v5590_v57, %s8565_s14  ;;  %8382 = vmatprep.subr.mxu1 %v16527_v41  ;;  %v8152_v57 = vld [vmem:[%s14660_s3 + $0x1e0] sm:$0xff] }
 0x613   : > { %6179 = vmatpush2.msra.mxu0 %v8037_v51  ;;  %8406 = vmatpush2.msra.mxu1 %v8036_v13  ;;  %v13608_v51 = vld [vmem:[#allocation2 + $0x3a] sm:$0xff] }
 0x614   : > { %5747 = vrot.lane.b32.xlu1 %v5566_v56, %s8565_s14  ;;  %6180 = vmatprep.subr.mxu0 %v16527_v41 }
 0x615   : > { %6432 = vmatprep.subr.mxu1 %v16527_v41  ;;  %6181 = vmatpush2.msra.mxu0 %v8036_v13  ;;  %v8151_v13 = vld [vmem:[%s14660_s3 + $0x1d8] sm:$0xff] }
 0x616   : > { %5797 = vrot.lane.b32.xlu0 %v5591_v50, %s8565_s14  ;;  %6771 = vmatprep.subr.mxu0 %v16527_v41  ;;  %v5500_v50 = vld [vmem:[#allocation2 + $0x38] sm:$0xff] }
 0x618   : > { %5749 = vrot.lane.b32.xlu1 %v5567_v18, %s8565_s14  ;;  %v5936_v18 = vld [vmem:[%s14660_s3 + $0x58] sm:$0xff] }
 0x61a   : > { %5799 = vrot.lane.b32.xlu0 %v5592_v31, %s8565_s14  ;;  %v5633_v31 = vld [vmem:[#allocation2 + $0x102] sm:$0xff] }
 0x61c   : > { %5751 = vrot.lane.b32.xlu1 %v5568_v60, %s8565_s14  ;;  %v5525_v60 = vld [vmem:[#allocation2 + $0x100] sm:$0xff] }
 0x61e   : > { %5801 = vrot.lane.b32.xlu0 %v5593_v53, %s8565_s14 }
 0x620   : > { %5753 = vrot.lane.b32.xlu1 %v5569_v16, %s8565_s14 }
 0x622   : > { %5803 = vrot.lane.b32.xlu0 %v5594_v46, %s8565_s14 }
 0x624   : > { %5755 = vrot.lane.b32.xlu1 %v5570_v0, %s8565_s14  ;;  %v5501_v0 = vld [vmem:[#allocation2 + $0x40] sm:$0xff] }
 0x626   : > { %5805 = vrot.lane.b32.xlu0 %v5595_v2, %s8565_s14  ;;  %v5935_v2 = vld [vmem:[%s14660_s3 + $0x50] sm:$0xff] }
 0x628   : > { %5757 = vrot.lane.b32.xlu1 %v5571_v40, %s8565_s14  ;;  %v13629_v40 = vld [vmem:[#allocation2 + $0x42] sm:$0xff] }
 0x62a   : > { %5807 = vrot.lane.b32.xlu0 %v5596_v42, %s8565_s14 }
 0x62c   : > { %5759 = vrot.lane.b32.xlu1 %v5572_v6, %s8565_s14  ;;  %v5634_v6 = vld [vmem:[#allocation2 + $0x10a] sm:$0xff] }
 0x62e   : > { %5809 = vrot.lane.b32.xlu0 %v5597_v10, %s8565_s14  ;;  %v5526_v10 = vld [vmem:[#allocation2 + $0x108] sm:$0xff] }
 0x630   : > { %5761 = vrot.lane.b32.xlu1 %v5573_v22, %s8565_s14  ;;  %v8150_v22 = vld [vmem:[%s14660_s3 + $0x1d0] sm:$0xff] }
 0x632   : > { %5709 = vrot.lane.b32.xlu0 %v5547_v34, %s8565_s14 }
 0x634   : > { %5711 = vrot.lane.b32.xlu1 %v5548_v32, %s8565_s14 }
 0x636   : > { %5713 = vrot.lane.b32.xlu0 %v5549_v35, %s8565_s14 }
 0x644   : > { %v5764_v23 = vpop.permute.xlu0 %5763 }
 0x645   : > { %v13532_v39 = vsel %vm16530_vm5, %v5520_v27, %v5764_v23  ;;  %vm16548_vm5 = vmmov %vm16536_vm0  ;;  %v5502_v27 = vld [vmem:[#allocation2 + $0x48] sm:$0xff] }
 0x646   : > { %v5766_v38 = vpop.permute.xlu1 %5765  ;;  %6303 = vmatmul.mubr.f32.vlgmr.msra.gmra.mxu1 %v13532_v39  ;;  %v5934_v23 = vld [vmem:[%s14660_s3 + $0x48] sm:$0xff] }
 0x647   : > { %6433 = vmatpush1.msra.mxu1 %v5940_v33  ;;  %8069 = vmatprep.mubr.msk.f32.mxu1 %vm16531_vm15, %v5629_v62  ;;  %v13540_v28 = vsel %vm16532_vm13, %v5521_v45, %v5766_v38  ;;  %vm16549_vm15 = vmmov %vm16536_vm0  ;;  %v13650_v38 = vld [vmem:[#allocation2 + $0x4a] sm:$0xff]  ;;  %v5635_v62 = vld [vmem:[#allocation2 + $0x112] sm:$0xff] }
 0x648   : > { %v5716_v11 = vpop.permute.xlu0 %5715  ;;  %6434 = vmatprep.subr.mxu1 %v16527_v41  ;;  %vm16550_vm13 = vmmov %vm16536_vm0  ;;  %v5527_v45 = vld [vmem:[#allocation2 + $0x110] sm:$0xff] }
 0x649   : > { %v13549_v47 = vsel %vm16533_vm8, %v5496_v58, %v5716_v11  ;;  %6435 = vmatpush1.msra.mxu1 %v5939_v52  ;;  %vm16551_vm8 = vmmov %vm16536_vm0  ;;  %v8149_v58 = vld [vmem:[%s14660_s3 + $0x1c8] sm:$0xff] }
 0x64a   : > { %v5718_v24 = vpop.permute.xlu1 %5717  ;;  %6183 = vmatmul.mubr.f32.vlgmr.msra.gmra.mxu0 %v13549_v47  ;;  %6308 = vmatmul.mubr.f32.gmra.mxu1 %v13540_v28 }
 0x64b   : > { %6772 = vmatpush1.msra.mxu0 %v8155_v25  ;;  %8045 = vmatprep.mubr.msk.f32.mxu0 %vm16534_vm11, %v13546_v1  ;;  %v13559_v59 = vsel %vm16535_vm14, %v5497_v49, %v5718_v24  ;;  %vm16553_vm11 = vmmov %vm16536_vm0  ;;  %v5503_v24 = vld [vmem:[#allocation2 + $0x50] sm:$0xff]  ;;  %v5933_v49 = vld [vmem:[%s14660_s3 + $0x40] sm:$0xff] }
 0x64c   : > { %v5768_v3 = vpop.permute.xlu0 %5767  ;;  %8070 = vmatprep.mubr.msk.f32.mxu1 %vm16536_vm0, %v5630_v5  ;;  %6773 = vmatprep.subr.mxu0 %v16527_v41  ;;  %vm16554_vm14 = vmmov %vm16536_vm0  ;;  %v13671_v5 = vld [vmem:[#allocation2 + $0x52] sm:$0xff] }
 0x64d   : > { %v13569_v26 = vsel %vm16537_vm2, %v5522_v48, %v5768_v3  ;;  %6774 = vmatpush1.msra.mxu0 %v8154_v20  ;;  %6436 = vmatprep.subr.mxu1 %v16527_v41  ;;  %vm16555_vm2 = vmmov %vm16536_vm0  ;;  %v5636_v20 = vld [vmem:[#allocation2 + $0x11a] sm:$0xff] }
 0x64e   : > { %v5720_v29 = vpop.permute.xlu1 %5719  ;;  %6188 = vmatmul.mubr.f32.gmra.mxu0 %v13559_v59  ;;  %6313 = vmatmul.mubr.f32.gmra.mxu1 %v13569_v26  ;;  %v5528_v3 = vld [vmem:[#allocation2 + $0x118] sm:$0xff] }
 0x64f   : > { %v13578_v14 = vsel %vm16538_vm1, %v5498_v17, %v5720_v29  ;;  %6437 = vmatpush1.msra.mxu1 %v5938_v4  ;;  %8046 = vmatprep.mubr.msk.f32.mxu0 %vm16539_vm4, %v13566_v12  ;;  %vm16557_vm1 = vmmov %vm16536_vm0  ;;  %v8148_v29 = vld [vmem:[%s14660_s3 + $0x1c0] sm:$0xff] }
 0x650   : > { %v5770_v36 = vpop.permute.xlu0 %5769  ;;  %8071 = vmatprep.mubr.msk.f32.mxu1 %vm16540_vm6, %v5631_v55  ;;  %6775 = vmatprep.subr.mxu0 %v16527_v41  ;;  %vm16558_vm4 = vmmov %vm16536_vm0 }
 0x651   : > { %v13590_v8 = vsel %vm16541_vm12, %v5523_v15, %v5770_v36  ;;  %6776 = vmatpush1.msra.mxu0 %v8153_v44  ;;  %6438 = vmatprep.subr.mxu1 %v16527_v41  ;;  %vm16559_vm6 = vmmov %vm16536_vm0  ;;  %v5504_v15 = vld [vmem:[#allocation2 + $0x58] sm:$0xff] }
 0x652   : > { %v5722_v54 = vpop.permute.xlu1 %5721  ;;  %16542 = vst [vmem:[#allocation48_spill] sm:$0xff] %v13590_v8  ;;  %6193 = vmatmul.mubr.f32.gmra.mxu0 %v13578_v14  ;;  %6318 = vmatmul.mubr.f32.gmra.mxu1 %v13590_v8  ;;  %vm16560_vm12 = vmmov %vm16536_vm0  ;;  %v5932_v44 = vld [vmem:[%s14660_s3 + $0x38] sm:$0xff] }
 0x653   : > { %v13599_v56 = vsel %vm16543_vm7, %v5499_v63, %v5722_v54  ;;  %6439 = vmatpush1.msra.mxu1 %v5937_v19  ;;  %8047 = vmatprep.mubr.msk.f32.mxu0 %vm16544_vm3, %v13587_v61  ;;  %vm16562_vm7 = vmmov %vm16536_vm0  ;;  %v13692_v36 = vld [vmem:[#allocation2 + $0x5a] sm:$0xff]  ;;  %v5637_v63 = vld [vmem:[#allocation2 + $0x122] sm:$0xff] }
 0x654   : > { %v5772_v30 = vpop.permute.xlu0 %5771  ;;  %8072 = vmatprep.mubr.msk.f32.mxu1 %vm16545_vm10, %v5632_v43  ;;  %6777 = vmatprep.subr.mxu0 %v16527_v41  ;;  %vm16563_vm3 = vmmov %vm16536_vm0  ;;  %v5529_v19 = vld [vmem:[#allocation2 + $0x120] sm:$0xff]  ;;  %v8147_v43 = vld [vmem:[%s14660_s3 + $0x1b8] sm:$0xff] }
 0x655   : > { %v13611_v21 = vsel %vm16546_vm9, %v5524_v9, %v5772_v30  ;;  %6778 = vmatpush1.msra.mxu0 %v8152_v57  ;;  %6440 = vmatprep.subr.mxu1 %v16527_v41  ;;  %vm16564_vm10 = vmmov %vm16536_vm0 }
 0x656   : > { %v5724_v37 = vpop.permute.xlu1 %5723  ;;  %16547 = vst [vmem:[#allocation54_spill] sm:$0xff] %v13611_v21  ;;  %6198 = vmatmul.mubr.f32.gmra.mxu0 %v13599_v56  ;;  %6323 = vmatmul.mubr.f32.gmra.mxu1 %v13611_v21  ;;  %vm16565_vm9 = vmmov %vm16536_vm0 }
 0x657   : > { %v13620_v53 = vsel %vm16548_vm5, %v5500_v50, %v5724_v37  ;;  %6441 = vmatpush1.msra.mxu1 %v5936_v18  ;;  %8048 = vmatprep.mubr.msk.f32.mxu0 %vm16549_vm15, %v13608_v51  ;;  %vm16567_vm5 = vmmov %vm16536_vm0  ;;  %v5505_v37 = vld [vmem:[#allocation2 + $0x60] sm:$0xff]  ;;  %v5931_v50 = vld [vmem:[%s14660_s3 + $0x30] sm:$0xff] }
 0x658   : > { %v5774_v16 = vpop.permute.xlu0 %5773  ;;  %8073 = vmatprep.mubr.msk.f32.mxu1 %vm16550_vm13, %v5633_v31  ;;  %6779 = vmatprep.subr.mxu0 %v16527_v41  ;;  %vm16568_vm15 = vmmov %vm16536_vm0  ;;  %v13713_v18 = vld [vmem:[#allocation2 + $0x62] sm:$0xff] }
 0x659   : > { %v13632_v42 = vsel %vm16551_vm8, %v5525_v60, %v5774_v16  ;;  %6780 = vmatpush1.msra.mxu0 %v8151_v13  ;;  %6442 = vmatprep.subr.mxu1 %v16527_v41  ;;  %vm16569_vm13 = vmmov %vm16536_vm0  ;;  %v5638_v60 = vld [vmem:[#allocation2 + $0x12a] sm:$0xff] }
 0x65a   : > { %v5726_v46 = vpop.permute.xlu1 %5725  ;;  %16552 = vst [vmem:[#allocation53_spill] sm:$0xff] %v13632_v42  ;;  %6203 = vmatmul.mubr.f32.gmra.mxu0 %v13620_v53  ;;  %6328 = vmatmul.mubr.f32.gmra.mxu1 %v13632_v42  ;;  %vm16570_vm8 = vmmov %vm16536_vm0  ;;  %v5530_v13 = vld [vmem:[#allocation2 + $0x128] sm:$0xff]  ;;  %v8146_v16 = vld [vmem:[%s14660_s3 + $0x1b0] sm:$0xff] }
 0x65b   : > { %v13641_v34 = vsel %vm16553_vm11, %v5501_v0, %v5726_v46  ;;  %6443 = vmatpush1.msra.mxu1 %v5935_v2  ;;  %8049 = vmatprep.mubr.msk.f32.mxu0 %vm16554_vm14, %v13629_v40  ;;  %vm16572_vm11 = vmmov %vm16536_vm0  ;;  %v5598_v42 = vld [vmem:[#allocation2 + $0x199] sm:$0xff] }
 0x65c   : > { %v5776_v32 = vpop.permute.xlu0 %5775  ;;  %8074 = vmatprep.mubr.msk.f32.mxu1 %vm16536_vm0, %v5634_v6  ;;  %6781 = vmatprep.subr.mxu0 %v16527_v41  ;;  %vm16573_vm14 = vmmov %vm16536_vm0  ;;  %v5506_v6 = vld [vmem:[#allocation2 + $0x68] sm:$0xff] }
 0x65d   : > { %v13653_v33 = vsel %vm16555_vm2, %v5526_v10, %v5776_v32  ;;  %6782 = vmatpush1.msra.mxu0 %v8150_v22  ;;  %6444 = vmatprep.subr.mxu1 %v16527_v41  ;;  %v5930_v10 = vld [vmem:[%s14660_s3 + $0x28] sm:$0xff]  ;;  %vm16574_vm2 = vmmov %vm16536_vm0 }
 0x65e   : > { %v5728_v35 = vpop.permute.xlu1 %5727  ;;  %16556 = vst [vmem:[#allocation51_spill] sm:$0xff] %v13653_v33  ;;  %6208 = vmatmul.mubr.f32.gmra.mxu0 %v13641_v34  ;;  %6333 = vmatmul.mubr.f32.gmra.mxu1 %v13653_v33  ;;  %v13734_v22 = vld [vmem:[#allocation2 + $0x6a] sm:$0xff]  ;;  %v14043_v33 = vld [vmem:[#allocation2 + $0xd2] sm:$0xff] }
 0x65f   : > { %v13662_v52 = vsel %vm16557_vm1, %v5502_v27, %v5728_v35  ;;  %6445 = vmatpush1.msra.mxu1 %v5934_v23  ;;  %8050 = vmatprep.mubr.msk.f32.mxu0 %vm16558_vm4, %v13650_v38  ;;  %v5639_v35 = vld [vmem:[#allocation2 + $0x132] sm:$0xff]  ;;  %v8145_v23 = vld [vmem:[%s14660_s3 + $0x1a8] sm:$0xff]  ;;  %vm16576_vm1 = vmmov %vm16536_vm0 }
 0x660   : > { %v5778_v11 = vpop.permute.xlu0 %5777  ;;  %8075 = vmatprep.mubr.msk.f32.mxu1 %vm16559_vm6, %v5635_v62  ;;  %6783 = vmatprep.subr.mxu0 %v16527_v41  ;;  %v5531_v27 = vld [vmem:[#allocation2 + $0x130] sm:$0xff]  ;;  %vm16577_vm4 = vmmov %vm16536_vm0 }
 0x661   : > { %v13674_v48 = vsel %vm16560_vm12, %v5527_v45, %v5778_v11  ;;  %6784 = vmatpush1.msra.mxu0 %v8149_v58  ;;  %6446 = vmatprep.subr.mxu1 %v16527_v41  ;;  %vm16578_vm6 = vmmov %vm16536_vm0  ;;  %v5507_v11 = vld [vmem:[#allocation2 + $0x70] sm:$0xff] }
 0x662   : > { %v5730_v25 = vpop.permute.xlu1 %5729  ;;  %16561 = vst [vmem:[#allocation63_spill] sm:$0xff] %v13674_v48  ;;  %6213 = vmatmul.mubr.f32.gmra.mxu0 %v13662_v52  ;;  %6338 = vmatmul.mubr.f32.gmra.mxu1 %v13674_v48  ;;  %vm16579_vm12 = vmmov %vm16536_vm0 }
 0x663   : > { %v13683_v17 = vsel %vm16562_vm7, %v5503_v24, %v5730_v25  ;;  %6447 = vmatpush1.msra.mxu1 %v5933_v49  ;;  %8051 = vmatprep.mubr.msk.f32.mxu0 %vm16563_vm3, %v13671_v5  ;;  %v5929_v25 = vld [vmem:[%s14660_s3 + $0x20] sm:$0xff]  ;;  %v13755_v24 = vld [vmem:[#allocation2 + $0x72] sm:$0xff]  ;;  %vm16582_vm7 = vmmov %vm16536_vm0 }
 0x664   : > { %v5780_v4 = vpop.permute.xlu0 %5779  ;;  %8076 = vmatprep.mubr.msk.f32.mxu1 %vm16564_vm10, %v5636_v20  ;;  %6785 = vmatprep.subr.mxu0 %v16527_v41  ;;  %v13761_v20 = vld [vmem:[#allocation2 + $0x13a] sm:$0xff]  ;;  %vm16583_vm3 = vmmov %vm16536_vm0 }
 0x665   : > { %v13695_v54 = vsel %vm16565_vm9, %v5528_v3, %v5780_v4  ;;  %6786 = vmatpush1.msra.mxu0 %v8148_v29  ;;  %6448 = vmatprep.subr.mxu1 %v16527_v41  ;;  %16581 = vst [vmem:[#allocation64_spill] sm:$0xff] %v13761_v20  ;;  %v5532_v3 = vld [vmem:[#allocation2 + $0x138] sm:$0xff]  ;;  %v8144_v29 = vld [vmem:[%s14660_s3 + $0x1a0] sm:$0xff]  ;;  %vm16584_vm10 = vmmov %vm16536_vm0 }
 0x666   : > { %v5732_v55 = vpop.permute.xlu1 %5731  ;;  %16566 = vst [vmem:[#allocation57_spill] sm:$0xff] %v13695_v54  ;;  %6218 = vmatmul.mubr.f32.gmra.mxu0 %v13683_v17  ;;  %6343 = vmatmul.mubr.f32.gmra.mxu1 %v13695_v54  ;;  %vm16585_vm9 = vmmov %vm16536_vm0  ;;  %v14019_v54 = vld [vmem:[#allocation2 + $0xca] sm:$0xff] }
 0x667   : > { %v13704_v9 = vsel %vm16567_vm5, %v5504_v15, %v5732_v55  ;;  %6449 = vmatpush1.msra.mxu1 %v5932_v44  ;;  %8052 = vmatprep.mubr.msk.f32.mxu0 %vm16568_vm15, %v13692_v36  ;;  %v5508_v44 = vld [vmem:[#allocation2 + $0x78] sm:$0xff]  ;;  %vm16588_vm5 = vmmov %vm16536_vm0 }
 0x668   : > { %v5782_v57 = vpop.permute.xlu0 %5781  ;;  %8077 = vmatprep.mubr.msk.f32.mxu1 %vm16569_vm13, %v5637_v63  ;;  %6787 = vmatprep.subr.mxu0 %v16527_v41  ;;  %v5928_v63 = vld [vmem:[%s14660_s3 + $0x18] sm:$0xff]  ;;  %vm16589_vm15 = vmmov %vm16536_vm0 }
 0x669   : > { %v13716_v31 = vsel %vm16570_vm8, %v5529_v19, %v5782_v57  ;;  %6788 = vmatpush1.msra.mxu0 %v8147_v43  ;;  %6450 = vmatprep.subr.mxu1 %v16527_v41  ;;  %v13779_v19 = vld [vmem:[#allocation2 + $0x7a] sm:$0xff]  ;;  %v13785_v57 = vld [vmem:[#allocation2 + $0x142] sm:$0xff]  ;;  %vm16590_vm13 = vmmov %vm16536_vm0 }
 0x66a   : > { %v5734_v30 = vpop.permute.xlu1 %5733  ;;  %16571 = vst [vmem:[#allocation55_spill] sm:$0xff] %v13716_v31  ;;  %6223 = vmatmul.mubr.f32.gmra.mxu0 %v13704_v9  ;;  %6348 = vmatmul.mubr.f32.gmra.mxu1 %v13716_v31  ;;  %16587 = vst [vmem:[#allocation73_spill] sm:$0xff] %v13785_v57 }
 0x66b   : > { %v13725_v46 = vsel %vm16572_vm11, %v5505_v37, %v5734_v30  ;;  %6451 = vmatpush1.msra.mxu1 %v5931_v50  ;;  %8053 = vmatprep.mubr.msk.f32.mxu0 %vm16573_vm14, %v13713_v18  ;;  %v5533_v30 = vld [vmem:[#allocation2 + $0x140] sm:$0xff]  ;;  %v8143_v37 = vld [vmem:[%s14660_s3 + $0x198] sm:$0xff]  ;;  %vm16591_vm8 = vmmov %vm16536_vm0 }
 0x66c   : > { %v5784_v0 = vpop.permute.xlu0 %5783  ;;  %8078 = vmatprep.mubr.msk.f32.mxu1 %vm16536_vm0, %v5638_v60  ;;  %6789 = vmatprep.subr.mxu0 %v16527_v41  ;;  %vm16594_vm11 = vmmov %vm16536_vm0 }
 0x66d   : > { %v13737_v32 = vsel %vm16574_vm2, %v5530_v13, %v5784_v0  ;;  %6790 = vmatpush1.msra.mxu0 %v8146_v16  ;;  %6452 = vmatprep.subr.mxu1 %v16527_v41  ;;  %v5509_v16 = vld [vmem:[#allocation2 + $0x80] sm:$0xff]  ;;  %v5927_v0 = vld [vmem:[%s14660_s3 + $0x10] sm:$0xff]  ;;  %vm16595_vm14 = vmmov %vm16536_vm0 }
 0x66e   : > { %v5736_v2 = vpop.permute.xlu1 %5735  ;;  %16575 = vst [vmem:[#allocation56_spill] sm:$0xff] %v13737_v32  ;;  %6228 = vmatmul.mubr.f32.gmra.mxu0 %v13725_v46  ;;  %6353 = vmatmul.mubr.f32.gmra.mxu1 %v13737_v32  ;;  %vm16596_vm2 = vmmov %vm16536_vm0  ;;  %v13995_v32 = vld [vmem:[#allocation2 + $0xc2] sm:$0xff] }
 0x66f   : > { %v13746_v62 = vsel %vm16576_vm1, %v5506_v6, %v5736_v2  ;;  %6453 = vmatpush1.msra.mxu1 %v5930_v10  ;;  %8054 = vmatprep.mubr.msk.f32.mxu0 %vm16577_vm4, %v13734_v22  ;;  %v13803_v2 = vld [vmem:[#allocation2 + $0x82] sm:$0xff]  ;;  %v13809_v10 = vld [vmem:[#allocation2 + $0x14a] sm:$0xff]  ;;  %vm16599_vm1 = vmmov %vm16536_vm0 }
 0x670   : > { %v5786_v45 = vpop.permute.xlu0 %5785  ;;  %8079 = vmatprep.mubr.msk.f32.mxu1 %vm16578_vm6, %v5639_v35  ;;  %6791 = vmatprep.subr.mxu0 %v16527_v41  ;;  %16593 = vst [vmem:[#allocation59_spill] sm:$0xff] %v13809_v10  ;;  %v5534_v35 = vld [vmem:[#allocation2 + $0x148] sm:$0xff]  ;;  %vm16600_vm4 = vmmov %vm16536_vm0 }
 0x671   : > { %v13758_v49 = vsel %vm16579_vm12, %v5531_v27, %v5786_v45  ;;  %6792 = vmatpush1.msra.mxu0 %v8145_v23  ;;  %6454 = vmatprep.subr.mxu1 %v16527_v41  ;;  %v8142_v27 = vld [vmem:[%s14660_s3 + $0x190] sm:$0xff]  ;;  %vm16601_vm6 = vmmov %vm16536_vm0 }
 0x672   : > { %v5738_v58 = vpop.permute.xlu1 %5737  ;;  %16580 = vst [vmem:[#allocation70_spill] sm:$0xff] %v13758_v49  ;;  %6233 = vmatmul.mubr.f32.gmra.mxu0 %v13746_v62  ;;  %6358 = vmatmul.mubr.f32.gmra.mxu1 %v13758_v49  ;;  %vm16602_vm12 = vmmov %vm16536_vm0 }
 0x673   : > { %v13769_v4 = vsel %vm16582_vm7, %v5507_v11, %v5738_v58  ;;  %6455 = vmatpush1.msra.mxu1 %v5929_v25  ;;  %8055 = vmatprep.mubr.msk.f32.mxu0 %vm16583_vm3, %v13755_v24  ;;  %v5510_v11 = vld [vmem:[#allocation2 + $0x88] sm:$0xff]  ;;  %vm16605_vm7 = vmmov %vm16536_vm0 }
 0x674   : > { %v5788_v55 = vpop.permute.xlu0 %5787  ;;  %8080 = vmatprep.mubr.msk.f32.mxu1 %vm16584_vm10, %v13761_v20  ;;  %6793 = vmatprep.subr.mxu0 %v16527_v41  ;;  %v5926_v25 = vld [vmem:[%s14660_s3 + $0x8] sm:$0xff]  ;;  %vm16606_vm3 = vmmov %vm16536_vm0  ;;  %v13971_v20 = vld [vmem:[#allocation2 + $0xba] sm:$0xff] }
 0x675   : > { %v13782_v43 = vsel %vm16585_vm9, %v5532_v3, %v5788_v55  ;;  %6794 = vmatpush1.msra.mxu0 %v8144_v29  ;;  %6456 = vmatprep.subr.mxu1 %v16527_v41  ;;  %v13827_v3 = vld [vmem:[#allocation2 + $0x8a] sm:$0xff]  ;;  %v13833_v55 = vld [vmem:[#allocation2 + $0x152] sm:$0xff]  ;;  %vm16607_vm10 = vmmov %vm16536_vm0 }
 0x676   : > { %v5740_v15 = vpop.permute.xlu1 %5739  ;;  %16586 = vst [vmem:[#allocation58_spill] sm:$0xff] %v13782_v43  ;;  %6238 = vmatmul.mubr.f32.gmra.mxu0 %v13769_v4  ;;  %6363 = vmatmul.mubr.f32.gmra.mxu1 %v13782_v43  ;;  %16598 = vst [vmem:[#allocation60_spill] sm:$0xff] %v13833_v55 }
 0x677   : > { %v13793_v50 = vsel %vm16588_vm5, %v5508_v44, %v5740_v15  ;;  %6457 = vmatpush1.msra.mxu1 %v5928_v63  ;;  %8056 = vmatprep.mubr.msk.f32.mxu0 %vm16589_vm15, %v13779_v19  ;;  %v5535_v15 = vld [vmem:[#allocation2 + $0x150] sm:$0xff]  ;;  %v8141_v44 = vld [vmem:[%s14660_s3 + $0x188] sm:$0xff]  ;;  %vm16608_vm9 = vmmov %vm16536_vm0 }
 0x678   : > { %v5790_v60 = vpop.permute.xlu0 %5789  ;;  %8081 = vmatprep.mubr.msk.f32.mxu1 %vm16590_vm13, %v13785_v57  ;;  %6795 = vmatprep.subr.mxu0 %v16527_v41  ;;  %vm16611_vm5 = vmmov %vm16536_vm0  ;;  %v13947_v57 = vld [vmem:[#allocation2 + $0xb2] sm:$0xff] }
 0x679   : > { %v13806_v6 = vsel %vm16591_vm8, %v5533_v30, %v5790_v60  ;;  %6796 = vmatpush1.msra.mxu0 %v8143_v37  ;;  %6458 = vmatprep.subr.mxu1 %v16527_v41  ;;  %v5511_v60 = vld [vmem:[#allocation2 + $0x90] sm:$0xff]  ;;  %vm16612_vm15 = vmmov %vm16536_vm0 }
 0x67a   : > { %v5742_v13 = vpop.permute.xlu1 %5741  ;;  %16592 = vst [vmem:[#allocation65_spill] sm:$0xff] %v13806_v6  ;;  %6243 = vmatmul.mubr.f32.gmra.mxu0 %v13793_v50  ;;  %6368 = vmatmul.mubr.f32.gmra.mxu1 %v13806_v6  ;;  %vm16613_vm13 = vmmov %vm16536_vm0 }
 0x67b   : > { %v13817_v23 = vsel %vm16594_vm11, %v5509_v16, %v5742_v13  ;;  %6459 = vmatpush1.msra.mxu1 %v5927_v0  ;;  %8057 = vmatprep.mubr.msk.f32.mxu0 %vm16595_vm14, %v13803_v2  ;;  %v5925_v13 = vld [vmem:[%s14660_s3] sm:$0xff]  ;;  %v13851_v16 = vld [vmem:[#allocation2 + $0x92] sm:$0xff]  ;;  %vm16614_vm8 = vmmov %vm16536_vm0 }
 0x67c   : > { %v5792_v45 = vpop.permute.xlu0 %5791  ;;  %8082 = vmatprep.mubr.msk.f32.mxu1 %vm16536_vm0, %v13809_v10  ;;  %6797 = vmatprep.subr.mxu0 %v16527_v41  ;;  %vm16617_vm11 = vmmov %vm16536_vm0  ;;  %v13923_v10 = vld [vmem:[#allocation2 + $0xaa] sm:$0xff] }
 0x67d   : > { %v13830_v29 = vsel %vm16596_vm2, %v5534_v35, %v5792_v45  ;;  %6798 = vmatpush1.msra.mxu0 %v8142_v27  ;;  %6460 = vmatprep.subr.mxu1 %v16527_v41  ;;  %v13857_v35 = vld [vmem:[#allocation2 + $0x15a] sm:$0xff]  ;;  %vm16618_vm14 = vmmov %vm16536_vm0 }
 0x67e   : > { %v5744_v58 = vpop.permute.xlu1 %5743  ;;  %16597 = vst [vmem:[#allocation75_spill] sm:$0xff] %v13830_v29  ;;  %6248 = vmatmul.mubr.f32.gmra.mxu0 %v13817_v23  ;;  %6373 = vmatmul.mubr.f32.gmra.mxu1 %v13830_v29  ;;  %16604 = vst [vmem:[#allocation76_spill] sm:$0xff] %v13857_v35  ;;  %v5536_v27 = vld [vmem:[#allocation2 + $0x158] sm:$0xff]  ;;  %v8140_v45 = vld [vmem:[%s14660_s3 + $0x180] sm:$0xff] }
 0x67f   : > { %v13841_v63 = vsel %vm16599_vm1, %v5510_v11, %v5744_v58  ;;  %6461 = vmatpush1.msra.mxu1 %v5926_v25  ;;  %8058 = vmatprep.mubr.msk.f32.mxu0 %vm16600_vm4, %v13827_v3  ;;  %vm16619_vm2 = vmmov %vm16536_vm0 }
 0x680   : > { %v5794_v30 = vpop.permute.xlu0 %5793  ;;  %8083 = vmatprep.mubr.msk.f32.mxu1 %vm16601_vm6, %v13833_v55  ;;  %6799 = vmatprep.subr.mxu0 %v16527_v41  ;;  %v13899_v55 = vld [vmem:[#allocation2 + $0xa2] sm:$0xff]  ;;  %vm16622_vm1 = vmmov %vm16536_vm0 }
 0x681   : > { %v13854_v0 = vsel %vm16602_vm12, %v5535_v15, %v5794_v30  ;;  %6800 = vmatpush1.msra.mxu0 %v8141_v44  ;;  %6462 = vmatprep.subr.mxu1 %v16527_v41  ;;  %v5512_v15 = vld [vmem:[#allocation2 + $0x98] sm:$0xff]  ;;  %vm16623_vm4 = vmmov %vm16536_vm0 }
 0x682   : > { %v5746_v37 = vpop.permute.xlu1 %5745  ;;  %16603 = vst [vmem:[#allocation78_spill] sm:$0xff] %v13854_v0  ;;  %6253 = vmatmul.mubr.f32.gmra.mxu0 %v13841_v63  ;;  %6378 = vmatmul.mubr.f32.gmra.mxu1 %v13854_v0  ;;  %v5948_v44 = vld [vmem:[%s14660_s3 + $0xb8] sm:$0xff]  ;;  %vm16624_vm6 = vmmov %vm16536_vm0 }
 0x683   : > { %v13865_v58 = vsel %vm16605_vm7, %v5511_v60, %v5746_v37  ;;  %6463 = vmatpush1.msra.mxu1 %v5925_v13  ;;  %8059 = vmatprep.mubr.msk.f32.mxu0 %vm16606_vm3, %v13851_v16  ;;  %v13875_v30 = vld [vmem:[#allocation2 + $0x9a] sm:$0xff]  ;;  %v13881_v60 = vld [vmem:[#allocation2 + $0x162] sm:$0xff]  ;;  %vm16625_vm12 = vmmov %vm16536_vm0 }
 0x684   : > { %v5796_v11 = vpop.permute.xlu0 %5795  ;;  %8084 = vmatprep.mubr.msk.f32.mxu1 %vm16607_vm10, %v13857_v35  ;;  %6801 = vmatprep.subr.mxu0 %v16527_v41  ;;  %16610 = vst [vmem:[#allocation79_spill] sm:$0xff] %v13881_v60  ;;  %v5537_v13 = vld [vmem:[#allocation2 + $0x160] sm:$0xff]  ;;  %v8163_v35 = vld [vmem:[%s14660_s3 + $0x238] sm:$0xff]  ;;  %vm16628_vm7 = vmmov %vm16536_vm0 }
 0x685   : > { %v13878_v37 = vsel %vm16608_vm9, %v5536_v27, %v5796_v11  ;;  %6802 = vmatpush1.msra.mxu0 %v8140_v45  ;;  %6480 = vmatprep.subr.mxu1 %v16527_v41  ;;  %v5513_v11 = vld [vmem:[#allocation2 + $0xa0] sm:$0xff]  ;;  %vm16629_vm3 = vmmov %vm16536_vm0 }
 0x686   : > { %v5748_v25 = vpop.permute.xlu1 %5747  ;;  %16609 = vst [vmem:[#allocation61_spill] sm:$0xff] %v13878_v37  ;;  %6258 = vmatmul.mubr.f32.gmra.mxu0 %v13865_v58  ;;  %6383 = vmatmul.mubr.f32.gmra.mxu1 %v13878_v37  ;;  %v5947_v37 = vld [vmem:[%s14660_s3 + $0xb0] sm:$0xff]  ;;  %vm16630_vm10 = vmmov %vm16536_vm0 }
 0x687   : > { %v13889_v0 = vsel %vm16611_vm5, %v5512_v15, %v5748_v25  ;;  %6481 = vmatpush2.msra.mxu1 %v5948_v44  ;;  %8060 = vmatprep.mubr.msk.f32.mxu0 %vm16612_vm15, %v13875_v30  ;;  %v13905_v15 = vld [vmem:[#allocation2 + $0x16a] sm:$0xff]  ;;  %vm16631_vm9 = vmmov %vm16536_vm0 }
 0x688   : > { %v5798_v27 = vpop.permute.xlu0 %5797  ;;  %8085 = vmatprep.mubr.msk.f32.mxu1 %vm16613_vm13, %v13881_v60  ;;  %6819 = vmatprep.subr.mxu0 %v16527_v41  ;;  %16616 = vst [vmem:[#allocation62_spill] sm:$0xff] %v13905_v15  ;;  %v5538_v44 = vld [vmem:[#allocation2 + $0x168] sm:$0xff]  ;;  %v8162_v60 = vld [vmem:[%s14660_s3 + $0x230] sm:$0xff]  ;;  %vm16634_vm5 = vmmov %vm16536_vm0 }
 0x689   : > { %v13902_v25 = vsel %vm16614_vm8, %v5537_v13, %v5798_v27  ;;  %6820 = vmatpush2.msra.mxu0 %v8163_v35  ;;  %6482 = vmatprep.subr.mxu1 %v16527_v41  ;;  %v5514_v27 = vld [vmem:[#allocation2 + $0xa8] sm:$0xff]  ;;  %vm16635_vm15 = vmmov %vm16536_vm0 }
 0x68a   : > { %v5750_v45 = vpop.permute.xlu1 %5749  ;;  %16615 = vst [vmem:[#allocation80_spill] sm:$0xff] %v13902_v25  ;;  %6263 = vmatmul.mubr.f32.gmra.mxu0 %v13889_v0  ;;  %6388 = vmatmul.mubr.f32.gmra.mxu1 %v13902_v25  ;;  %v5946_v25 = vld [vmem:[%s14660_s3 + $0xa8] sm:$0xff]  ;;  %vm16636_vm13 = vmmov %vm16536_vm0 }
 0x68b   : > { %v13913_v29 = vsel %vm16617_vm11, %v5513_v11, %v5750_v45  ;;  %6483 = vmatpush2.msra.mxu1 %v5947_v37  ;;  %8061 = vmatprep.mubr.msk.f32.mxu0 %vm16618_vm14, %v13899_v55  ;;  %v13929_v37 = vld [vmem:[#allocation2 + $0x172] sm:$0xff]  ;;  %vm16637_vm8 = vmmov %vm16536_vm0 }
 0x68c   : > { %v5800_v35 = vpop.permute.xlu0 %5799  ;;  %8086 = vmatprep.mubr.msk.f32.mxu1 %vm16536_vm0, %v13905_v15  ;;  %6821 = vmatprep.subr.mxu0 %v16527_v41  ;;  %16621 = vst [vmem:[#allocation15_spill] sm:$0xff] %v13929_v37  ;;  %v5539_v11 = vld [vmem:[#allocation2 + $0x170] sm:$0xff]  ;;  %v8161_v15 = vld [vmem:[%s14660_s3 + $0x228] sm:$0xff]  ;;  %vm16640_vm11 = vmmov %vm16536_vm0 }
 0x68d   : > { %v13926_v45 = vsel %vm16619_vm2, %v5538_v44, %v5800_v35  ;;  %6822 = vmatpush2.msra.mxu0 %v8162_v60  ;;  %6484 = vmatprep.subr.mxu1 %v16527_v41  ;;  %v5515_v35 = vld [vmem:[#allocation2 + $0xb0] sm:$0xff]  ;;  %vm16641_vm14 = vmmov %vm16536_vm0 }
 0x68e   : > { %v5752_v13 = vpop.permute.xlu1 %5751  ;;  %16620 = vst [vmem:[#allocation66_spill] sm:$0xff] %v13926_v45  ;;  %6268 = vmatmul.mubr.f32.gmra.mxu0 %v13913_v29  ;;  %6393 = vmatmul.mubr.f32.gmra.mxu1 %v13926_v45  ;;  %v5945_v45 = vld [vmem:[%s14660_s3 + $0xa0] sm:$0xff]  ;;  %vm16642_vm2 = vmmov %vm16536_vm0 }
 0x68f   : > { %v13937_v6 = vsel %vm16622_vm1, %v5514_v27, %v5752_v13  ;;  %6485 = vmatpush2.msra.mxu1 %v5946_v25  ;;  %8062 = vmatprep.mubr.msk.f32.mxu0 %vm16623_vm4, %v13923_v10  ;;  %v13953_v25 = vld [vmem:[#allocation2 + $0x17a] sm:$0xff]  ;;  %vm16645_vm1 = vmmov %vm16536_vm0 }
 0x690   : > { %v5802_v60 = vpop.permute.xlu0 %5801  ;;  %8087 = vmatprep.mubr.msk.f32.mxu1 %vm16624_vm6, %v13929_v37  ;;  %6823 = vmatprep.subr.mxu0 %v16527_v41  ;;  %16627 = vst [vmem:[#allocation69_spill] sm:$0xff] %v13953_v25  ;;  %v5540_v27 = vld [vmem:[#allocation2 + $0x178] sm:$0xff]  ;;  %v8160_v37 = vld [vmem:[%s14660_s3 + $0x220] sm:$0xff]  ;;  %vm16646_vm4 = vmmov %vm16536_vm0 }
 0x691   : > { %v13950_v13 = vsel %vm16625_vm12, %v5539_v11, %v5802_v60  ;;  %6824 = vmatpush2.msra.mxu0 %v8161_v15  ;;  %6486 = vmatprep.subr.mxu1 %v16527_v41  ;;  %v5516_v60 = vld [vmem:[#allocation2 + $0xb8] sm:$0xff]  ;;  %vm16647_vm6 = vmmov %vm16536_vm0 }
 0x692   : > { %v5754_v44 = vpop.permute.xlu1 %5753  ;;  %16626 = vst [vmem:[#allocation5_spill] sm:$0xff] %v13950_v13  ;;  %6273 = vmatmul.mubr.f32.gmra.mxu0 %v13937_v6  ;;  %6398 = vmatmul.mubr.f32.gmra.mxu1 %v13950_v13  ;;  %v5944_v13 = vld [vmem:[%s14660_s3 + $0x98] sm:$0xff]  ;;  %vm16648_vm12 = vmmov %vm16536_vm0 }
 0x693   : > { %v13961_v43 = vsel %vm16628_vm7, %v5515_v35, %v5754_v44  ;;  %6487 = vmatpush2.msra.mxu1 %v5945_v45  ;;  %8063 = vmatprep.mubr.msk.f32.mxu0 %vm16629_vm3, %v13947_v57  ;;  %v13977_v45 = vld [vmem:[#allocation2 + $0x182] sm:$0xff]  ;;  %vm16650_vm7 = vmmov %vm16536_vm0 }
 0x694   : > { %v5804_v15 = vpop.permute.xlu0 %5803  ;;  %8088 = vmatprep.mubr.msk.f32.mxu1 %vm16630_vm10, %v13953_v25  ;;  %6825 = vmatprep.subr.mxu0 %v16527_v41  ;;  %16633 = vst [vmem:[#allocation16_spill] sm:$0xff] %v13977_v45  ;;  %v5541_v35 = vld [vmem:[#allocation2 + $0x180] sm:$0xff]  ;;  %v8159_v25 = vld [vmem:[%s14660_s3 + $0x218] sm:$0xff]  ;;  %vm16651_vm3 = vmmov %vm16536_vm0 }
 0x695   : > { %v13974_v44 = vsel %vm16631_vm9, %v5540_v27, %v5804_v15  ;;  %6826 = vmatpush2.msra.mxu0 %v8160_v37  ;;  %6488 = vmatprep.subr.mxu1 %v16527_v41  ;;  %v5517_v15 = vld [vmem:[#allocation2 + $0xc0] sm:$0xff]  ;;  %vm16652_vm10 = vmmov %vm16536_vm0 }
 0x696   : > { %v5756_v11 = vpop.permute.xlu1 %5755  ;;  %16632 = vst [vmem:[#allocation12_spill] sm:$0xff] %v13974_v44  ;;  %6278 = vmatmul.mubr.f32.gmra.mxu0 %v13961_v43  ;;  %6403 = vmatmul.mubr.f32.gmra.mxu1 %v13974_v44  ;;  %v5943_v44 = vld [vmem:[%s14660_s3 + $0x90] sm:$0xff]  ;;  %vm16653_vm9 = vmmov %vm16536_vm0 }
 0x697   : > { %v13985_v49 = vsel %vm16634_vm5, %v5516_v60, %v5756_v11  ;;  %6489 = vmatpush2.msra.mxu1 %v5944_v13  ;;  %8064 = vmatprep.mubr.msk.f32.mxu0 %vm16635_vm15, %v13971_v20  ;;  %v14001_v13 = vld [vmem:[#allocation2 + $0x18a] sm:$0xff]  ;;  %vm16654_vm5 = vmmov %vm16536_vm0 }
 0x698   : > { %v5806_v37 = vpop.permute.xlu0 %5805  ;;  %8089 = vmatprep.mubr.msk.f32.mxu1 %vm16636_vm13, %v13977_v45  ;;  %6827 = vmatprep.subr.mxu0 %v16527_v41  ;;  %16639 = vst [vmem:[#allocation4_spill] sm:$0xff] %v14001_v13  ;;  %v5542_v60 = vld [vmem:[#allocation2 + $0x188] sm:$0xff]  ;;  %v8158_v45 = vld [vmem:[%s14660_s3 + $0x210] sm:$0xff]  ;;  %vm16655_vm15 = vmmov %vm16536_vm0 }
 0x699   : > { %v13998_v11 = vsel %vm16637_vm8, %v5541_v35, %v5806_v37  ;;  %6828 = vmatpush2.msra.mxu0 %v8159_v25  ;;  %6490 = vmatprep.subr.mxu1 %v16527_v41  ;;  %v5518_v37 = vld [vmem:[#allocation2 + $0xc8] sm:$0xff]  ;;  %vm16656_vm13 = vmmov %vm16536_vm0 }
 0x69a   : > { %v5758_v27 = vpop.permute.xlu1 %5757  ;;  %16638 = vst [vmem:[#allocation74_spill] sm:$0xff] %v13998_v11  ;;  %6283 = vmatmul.mubr.f32.gmra.mxu0 %v13985_v49  ;;  %6408 = vmatmul.mubr.f32.gmra.mxu1 %v13998_v11  ;;  %v5942_v11 = vld [vmem:[%s14660_s3 + $0x88] sm:$0xff]  ;;  %vm16657_vm8 = vmmov %vm16536_vm0 }
 0x69b   : > { %v14009_v31 = vsel %vm16640_vm11, %v5517_v15, %v5758_v27  ;;  %6491 = vmatpush2.msra.mxu1 %v5943_v44  ;;  %8065 = vmatprep.mubr.msk.f32.mxu0 %vm16641_vm14, %v13995_v32  ;;  %v14025_v44 = vld [vmem:[#allocation2 + $0x192] sm:$0xff]  ;;  %vm16658_vm11 = vmmov %vm16536_vm0 }
 0x69c   : > { %v5808_v25 = vpop.permute.xlu0 %5807  ;;  %8090 = vmatprep.mubr.msk.f32.mxu1 %vm16536_vm0, %v14001_v13  ;;  %6829 = vmatprep.subr.mxu0 %v16527_v41  ;;  %16644 = vst [vmem:[#allocation7_spill] sm:$0xff] %v14025_v44  ;;  %v5543_v15 = vld [vmem:[#allocation2 + $0x190] sm:$0xff]  ;;  %v8157_v13 = vld [vmem:[%s14660_s3 + $0x208] sm:$0xff]  ;;  %vm16659_vm14 = vmmov %vm16536_vm0 }
 0x69d   : > { %v14022_v27 = vsel %vm16642_vm2, %v5542_v60, %v5808_v25  ;;  %6830 = vmatpush2.msra.mxu0 %v8158_v45  ;;  %6492 = vmatprep.subr.mxu1 %v16527_v41  ;;  %v5519_v25 = vld [vmem:[#allocation2 + $0xd0] sm:$0xff]  ;;  %vm16660_vm2 = vmmov %vm16536_vm0 }
 0x69e   : > { %v5760_v35 = vpop.permute.xlu1 %5759  ;;  %16643 = vst [vmem:[#allocation6_spill] sm:$0xff] %v14022_v27  ;;  %6288 = vmatmul.mubr.f32.gmra.mxu0 %v14009_v31  ;;  %6413 = vmatmul.mubr.f32.gmra.mxu1 %v14022_v27  ;;  %v5941_v27 = vld [vmem:[%s14660_s3 + $0x80] sm:$0xff] }
 0x69f   : > { %v14033_v48 = vsel %vm16645_vm1, %v5518_v37, %v5760_v35  ;;  %6493 = vmatpush2.msra.mxu1 %v5942_v11  ;;  %8066 = vmatprep.mubr.msk.f32.mxu0 %vm16646_vm4, %v14019_v54  ;;  %v5601_v11 = vld [vmem:[#allocation2 + $0x2] sm:$0xff]  ;;  %vm16661_vm1 = vmmov %vm16536_vm0 }
 0x6a0   : > { %v5810_v45 = vpop.permute.xlu0 %5809  ;;  %8091 = vmatprep.mubr.msk.f32.mxu1 %vm16647_vm6, %v14025_v44  ;;  %6831 = vmatprep.subr.mxu0 %v16527_v41  ;;  %v5493_v37 = vld [vmem:[#allocation2] sm:$0xff]  ;;  %vm16662_vm4 = vmmov %vm16536_vm0 }
 0x6a1   : > { %v14046_v35 = vsel %vm16648_vm12, %v5543_v15, %v5810_v45  ;;  %6832 = vmatpush2.msra.mxu0 %v8157_v13  ;;  %6494 = vmatprep.subr.mxu1 %v16527_v41  ;;  %v8156_v44 = vld [vmem:[%s14660_s3 + $0x200] sm:$0xff]  ;;  %v5494_v45 = vld [vmem:[#allocation2 + $0x8] sm:$0xff]  ;;  %vm16663_vm6 = vmmov %vm16536_vm0 }
 0x6a2   : > { %v5762_v60 = vpop.permute.xlu1 %5761  ;;  %16649 = vst [vmem:[#allocation8_spill] sm:$0xff] %v14046_v35  ;;  %6293 = vmatmul.mubr.f32.gmra.mxu0 %v14033_v48  ;;  %6418 = vmatmul.mubr.f32.gmra.mxu1 %v14046_v35  ;;  %v5602_v35 = vld [vmem:[#allocation2 + $0xa] sm:$0xff]  ;;  %vm16664_vm12 = vmmov %vm16536_vm0 }
 0x6a3   : > { %v14055_v21 = vsel %vm16650_vm7, %v5519_v25, %v5762_v60  ;;  %6495 = vmatpush2.msra.mxu1 %v5941_v27  ;;  %8067 = vmatprep.mubr.msk.f32.mxu0 %vm16651_vm3, %v14043_v33  ;;  %v5599_v60 = vld [vmem:[#allocation2 + $0x1a1] sm:$0xff]  ;;  %v5600_v27 = vld [vmem:[#allocation2 + $0x1a9] sm:$0xff]  ;;  %vm16665_vm7 = vmmov %vm16536_vm0 }
 0x6a4   : > { %v5710_v13 = vpop.permute.xlu0 %5709  ;;  %8092 = vmatprep.mubr.msk.f32.mxu1 %vm16652_vm10, %v5601_v11  ;;  %6833 = vmatprep.subr.mxu0 %v16527_v41  ;;  %v5495_v11 = vld [vmem:[#allocation2 + $0x10] sm:$0xff]  ;;  %vm16666_vm3 = vmmov %vm16536_vm0 }
 0x6a5   : > { %v5871_v8 = vsel %vm16653_vm9, %v5493_v37, %v5710_v13  ;;  %6834 = vmatpush2.msra.mxu0 %v8156_v44  ;;  %5811 = vrot.lane.b32.xlu1 %v5598_v42, %s8565_s14  ;;  %v5603_v37 = vld [vmem:[#allocation2 + $0x12] sm:$0xff]  ;;  %v7124_v42 = vld [vmem:[%s8853_s30] sm:$0xff]  ;;  %vm16667_vm10 = vmmov %vm16536_vm0 }
 0x6a6   : > { %v5712_v15 = vpop.permute.xlu1 %5711  ;;  %6298 = vmatmul.mubr.f32.gmra.mxu0 %v14055_v21  ;;  %6497 = vmatmul.mubr.f32.vlgmr.msra.gmra.mxu1 %v5871_v8  ;;  %v7125_v8 = vld [vmem:[%s8853_s30 + $0x8] sm:$0xff]  ;;  %v7127_v13 = vld [vmem:[%s8853_s30 + $0x18] sm:$0xff]  ;;  %vm16668_vm9 = vmmov %vm16536_vm0 }
 0x6a7   : > { %v5872_v25 = vsel %vm16654_vm5, %v5494_v45, %v5712_v15  ;;  %8093 = vmatprep.mubr.msk.f32.mxu1 %vm16655_vm15, %v5602_v35  ;;  %8164 = vmatprep.mubr.msk.f32.mxu0 %vm16656_vm13, %v13587_v61  ;;  %v7126_v35 = vld [vmem:[%s8853_s30 + $0x10] sm:$0xff]  ;;  %v7128_v15 = vld [vmem:[%s8853_s30 + $0x20] sm:$0xff]  ;;  %v7129_v45 = vld [vmem:[%s8853_s30 + $0x28] sm:$0xff] }
 0x6a8   : > { %v5714_v41 = vpop.permute.xlu0 %5713  ;;  %5813 = vrot.lane.b32.xlu0 %v5599_v60, %s8565_s14  ;;  %vm16669_vm5 = vmmov %vm16536_vm0 }
 0x6a9   : > { %5815 = vrot.lane.b32.xlu1 %v5600_v27, %s8565_s14  ;;  %v5873_v44 = vsel %vm16657_vm8, %v5495_v11, %v5714_v41  ;;  %vm16670_vm15 = vmmov %vm16536_vm0  ;;  %v7162_v41 = vld [vmem:[%s8853_s30 + $0x130] sm:$0xff] }
 0x6aa   : > { %6502 = vmatmul.mubr.f32.gmra.mxu1 %v5872_v25  ;;  %6836 = vmatmul.mubr.f32.vlgmr.msra.gmra.mxu0 %v13599_v56  ;;  %vm16671_vm13 = vmmov %vm16536_vm0 }
 0x6ab   : > { %8094 = vmatprep.mubr.msk.f32.mxu1 %vm16658_vm11, %v5603_v37  ;;  %8165 = vmatprep.mubr.msk.f32.mxu0 %vm16659_vm14, %v13608_v51  ;;  %vm16672_vm8 = vmmov %vm16536_vm0 }
 0x6ac   : > { %7220 = vrot.lane.b32.xlu0 %v7124_v42, %s8566_s28  ;;  %vm16673_vm11 = vmmov %vm16536_vm0  ;;  %v8536_v42 = vld [vmem:[#allocation2 + $0x10a] sm:$0xff] }
 0x6ad   : > { %7222 = vrot.lane.b32.xlu1 %v7125_v8, %s8566_s28  ;;  %vm16674_vm14 = vmmov %vm16536_vm0 }
 0x6ae   : > { %6507 = vmatmul.mubr.f32.gmra.mxu1 %v5873_v44  ;;  %6841 = vmatmul.mubr.f32.gmra.mxu0 %v13620_v53 }
 0x6af   : > { %8095 = vmatprep.mubr.msk.f32.mxu1 %vm16536_vm0, %v13508_v7  ;;  %8166 = vmatprep.mubr.msk.f32.mxu0 %vm16660_vm2, %v13629_v40  ;;  %v7130_v7 = vld [vmem:[%s8853_s30 + $0x30] sm:$0xff]  ;;  %vm16675_vm2 = vmmov %vm16536_vm0 }
 0x6b0   : > { %7224 = vrot.lane.b32.xlu0 %v7126_v35, %s8566_s28  ;;  %v7163_v35 = vld [vmem:[%s8853_s30 + $0x138] sm:$0xff] }
 0x6b1   : > { %7226 = vrot.lane.b32.xlu1 %v7127_v13, %s8566_s28 }
 0x6b2   : > { %6512 = vmatmul.mubr.f32.gmra.mxu1 %v13549_v47  ;;  %6846 = vmatmul.mubr.f32.gmra.mxu0 %v13641_v34  ;;  %v7131_v47 = vld [vmem:[%s8853_s30 + $0x38] sm:$0xff] }
 0x6b3   : > { %8096 = vmatprep.mubr.msk.f32.mxu1 %vm16661_vm1, %v13546_v1  ;;  %8167 = vmatprep.mubr.msk.f32.mxu0 %vm16662_vm4, %v13650_v38  ;;  %v7132_v1 = vld [vmem:[%s8853_s30 + $0x40] sm:$0xff]  ;;  %vm16676_vm1 = vmmov %vm16536_vm0 }
 0x6b4   : > { %7228 = vrot.lane.b32.xlu0 %v7128_v15, %s8566_s28  ;;  %vm16677_vm4 = vmmov %vm16536_vm0 }
 0x6b5   : > { %7230 = vrot.lane.b32.xlu1 %v7129_v45, %s8566_s28  ;;  %v8537_v45 = vld [vmem:[#allocation2 + $0x112] sm:$0xff] }
 0x6b6   : > { %6517 = vmatmul.mubr.f32.gmra.mxu1 %v13559_v59  ;;  %6851 = vmatmul.mubr.f32.gmra.mxu0 %v13662_v52  ;;  %v7133_v59 = vld [vmem:[%s8853_s30 + $0x48] sm:$0xff] }
 0x6b7   : > { %8097 = vmatprep.mubr.msk.f32.mxu1 %vm16663_vm6, %v13566_v12  ;;  %8168 = vmatprep.mubr.msk.f32.mxu0 %vm16664_vm12, %v13671_v5  ;;  %v7134_v12 = vld [vmem:[%s8853_s30 + $0x50] sm:$0xff]  ;;  %vm16678_vm6 = vmmov %vm16536_vm0 }
 0x6b8   : > { %7232 = vrot.lane.b32.xlu0 %v7130_v7, %s8566_s28  ;;  %vm16679_vm12 = vmmov %vm16536_vm0 }
 0x6b9   : > { %7234 = vrot.lane.b32.xlu1 %v7131_v47, %s8566_s28 }
 0x6ba   : > { %6522 = vmatmul.mubr.f32.gmra.mxu1 %v13578_v14  ;;  %6856 = vmatmul.mubr.f32.gmra.mxu0 %v13683_v17  ;;  %v7135_v14 = vld [vmem:[%s8853_s30 + $0x58] sm:$0xff] }
 0x6bb   : > { %8098 = vmatprep.mubr.msk.f32.mxu1 %vm16665_vm7, %v13587_v61  ;;  %8169 = vmatprep.mubr.msk.f32.mxu0 %vm16666_vm3, %v13692_v36  ;;  %v7136_v61 = vld [vmem:[%s8853_s30 + $0x60] sm:$0xff]  ;;  %vm16680_vm7 = vmmov %vm16536_vm0 }
 0x6bc   : > { %7236 = vrot.lane.b32.xlu0 %v7132_v1, %s8566_s28  ;;  %vm16681_vm3 = vmmov %vm16536_vm0  ;;  %v7164_v1 = vld [vmem:[%s8853_s30 + $0x140] sm:$0xff] }
 0x6bd   : > { %7238 = vrot.lane.b32.xlu1 %v7133_v59, %s8566_s28 }
 0x6be   : > { %6527 = vmatmul.mubr.f32.gmra.mxu1 %v13599_v56  ;;  %6861 = vmatmul.mubr.f32.gmra.mxu0 %v13704_v9  ;;  %v7137_v56 = vld [vmem:[%s8853_s30 + $0x68] sm:$0xff] }
 0x6bf   : > { %8099 = vmatprep.mubr.msk.f32.mxu1 %vm16667_vm10, %v13608_v51  ;;  %8170 = vmatprep.mubr.msk.f32.mxu0 %vm16668_vm9, %v13713_v18  ;;  %v7138_v51 = vld [vmem:[%s8853_s30 + $0x70] sm:$0xff]  ;;  %vm16682_vm10 = vmmov %vm16536_vm0 }
 0x6c0   : > { %7240 = vrot.lane.b32.xlu0 %v7134_v12, %s8566_s28  ;;  %vm16683_vm9 = vmmov %vm16536_vm0 }
 0x6c1   : > { %7242 = vrot.lane.b32.xlu1 %v7135_v14, %s8566_s28  ;;  %v8538_v14 = vld [vmem:[#allocation2 + $0x11a] sm:$0xff] }
 0x6c2   : > { %6532 = vmatmul.mubr.f32.gmra.mxu1 %v13620_v53  ;;  %6866 = vmatmul.mubr.f32.gmra.mxu0 %v13725_v46  ;;  %v7139_v53 = vld [vmem:[%s8853_s30 + $0x78] sm:$0xff] }
 0x6c3   : > { %8100 = vmatprep.mubr.msk.f32.mxu1 %vm16669_vm5, %v13629_v40  ;;  %8171 = vmatprep.mubr.msk.f32.mxu0 %vm16670_vm15, %v13734_v22  ;;  %v7140_v40 = vld [vmem:[%s8853_s30 + $0x80] sm:$0xff]  ;;  %vm16684_vm5 = vmmov %vm16536_vm0 }
 0x6c4   : > { %7244 = vrot.lane.b32.xlu0 %v7136_v61, %s8566_s28  ;;  %vm16685_vm15 = vmmov %vm16536_vm0 }
 0x6c5   : > { %7246 = vrot.lane.b32.xlu1 %v7137_v56, %s8566_s28 }
 0x6c6   : > { %6537 = vmatmul.mubr.f32.gmra.mxu1 %v13641_v34  ;;  %6871 = vmatmul.mubr.f32.gmra.mxu0 %v13746_v62  ;;  %v7141_v34 = vld [vmem:[%s8853_s30 + $0x88] sm:$0xff] }
 0x6c7   : > { %8101 = vmatprep.mubr.msk.f32.mxu1 %vm16671_vm13, %v13650_v38  ;;  %8172 = vmatprep.mubr.msk.f32.mxu0 %vm16672_vm8, %v13755_v24  ;;  %v7142_v38 = vld [vmem:[%s8853_s30 + $0x90] sm:$0xff]  ;;  %vm16686_vm13 = vmmov %vm16536_vm0 }
 0x6c8   : > { %7248 = vrot.lane.b32.xlu0 %v7138_v51, %s8566_s28  ;;  %vm16687_vm8 = vmmov %vm16536_vm0  ;;  %v7165_v51 = vld [vmem:[%s8853_s30 + $0x148] sm:$0xff] }
 0x6c9   : > { %7250 = vrot.lane.b32.xlu1 %v7139_v53, %s8566_s28 }
 0x6ca   : > { %6542 = vmatmul.mubr.f32.gmra.mxu1 %v13662_v52  ;;  %6876 = vmatmul.mubr.f32.gmra.mxu0 %v13769_v4  ;;  %v7143_v52 = vld [vmem:[%s8853_s30 + $0x98] sm:$0xff] }
 0x6cb   : > { %8102 = vmatprep.mubr.msk.f32.mxu1 %vm16673_vm11, %v13671_v5  ;;  %8173 = vmatprep.mubr.msk.f32.mxu0 %vm16674_vm14, %v13779_v19  ;;  %v7144_v5 = vld [vmem:[%s8853_s30 + $0xa0] sm:$0xff]  ;;  %vm16688_vm11 = vmmov %vm16536_vm0 }
 0x6cc   : > { %7252 = vrot.lane.b32.xlu0 %v7140_v40, %s8566_s28  ;;  %vm16689_vm14 = vmmov %vm16536_vm0 }
 0x6cd   : > { %7254 = vrot.lane.b32.xlu1 %v7141_v34, %s8566_s28  ;;  %v8539_v34 = vld [vmem:[#allocation2 + $0x122] sm:$0xff] }
 0x6ce   : > { %6547 = vmatmul.mubr.f32.gmra.mxu1 %v13683_v17  ;;  %6881 = vmatmul.mubr.f32.gmra.mxu0 %v13793_v50  ;;  %v7145_v17 = vld [vmem:[%s8853_s30 + $0xa8] sm:$0xff] }
 0x6cf   : > { %8103 = vmatprep.mubr.msk.f32.mxu1 %vm16536_vm0, %v13692_v36  ;;  %8174 = vmatprep.mubr.msk.f32.mxu0 %vm16675_vm2, %v13803_v2  ;;  %v7146_v36 = vld [vmem:[%s8853_s30 + $0xb0] sm:$0xff]  ;;  %vm16690_vm2 = vmmov %vm16536_vm0 }
 0x6d0   : > { %7256 = vrot.lane.b32.xlu0 %v7142_v38, %s8566_s28 }
 0x6d1   : > { %7258 = vrot.lane.b32.xlu1 %v7143_v52, %s8566_s28 }
 0x6d2   : > { %6552 = vmatmul.mubr.f32.gmra.mxu1 %v13704_v9  ;;  %6886 = vmatmul.mubr.f32.gmra.mxu0 %v13817_v23  ;;  %v7147_v9 = vld [vmem:[%s8853_s30 + $0xb8] sm:$0xff] }
 0x6d3   : > { %8104 = vmatprep.mubr.msk.f32.mxu1 %vm16676_vm1, %v13713_v18  ;;  %8175 = vmatprep.mubr.msk.f32.mxu0 %vm16677_vm4, %v13827_v3  ;;  %v7148_v18 = vld [vmem:[%s8853_s30 + $0xc0] sm:$0xff]  ;;  %vm16691_vm1 = vmmov %vm16536_vm0 }
 0x6d4   : > { %7260 = vrot.lane.b32.xlu0 %v7144_v5, %s8566_s28  ;;  %vm16692_vm4 = vmmov %vm16536_vm0  ;;  %v7166_v5 = vld [vmem:[%s8853_s30 + $0x150] sm:$0xff] }
 0x6d5   : > { %7262 = vrot.lane.b32.xlu1 %v7145_v17, %s8566_s28 }
 0x6d6   : > { %6557 = vmatmul.mubr.f32.gmra.mxu1 %v13725_v46  ;;  %6891 = vmatmul.mubr.f32.gmra.mxu0 %v13841_v63  ;;  %v7149_v46 = vld [vmem:[%s8853_s30 + $0xc8] sm:$0xff] }
 0x6d7   : > { %8105 = vmatprep.mubr.msk.f32.mxu1 %vm16678_vm6, %v13734_v22  ;;  %8176 = vmatprep.mubr.msk.f32.mxu0 %vm16679_vm12, %v13851_v16  ;;  %v7150_v22 = vld [vmem:[%s8853_s30 + $0xd0] sm:$0xff]  ;;  %vm16693_vm6 = vmmov %vm16536_vm0 }
 0x6d8   : > { %7264 = vrot.lane.b32.xlu0 %v7146_v36, %s8566_s28  ;;  %vm16694_vm12 = vmmov %vm16536_vm0 }
 0x6d9   : > { %7266 = vrot.lane.b32.xlu1 %v7147_v9, %s8566_s28  ;;  %v16720_v9 = vld [vmem:[#allocation55_spill] sm:$0xff] }
 0x6da   : > { %6562 = vmatmul.mubr.f32.gmra.mxu1 %v13746_v62  ;;  %6896 = vmatmul.mubr.f32.gmra.mxu0 %v13865_v58  ;;  %v7151_v62 = vld [vmem:[%s8853_s30 + $0xd8] sm:$0xff] }
 0x6db   : > { %8106 = vmatprep.mubr.msk.f32.mxu1 %vm16680_vm7, %v13755_v24  ;;  %8177 = vmatprep.mubr.msk.f32.mxu0 %vm16681_vm3, %v13875_v30  ;;  %v7152_v24 = vld [vmem:[%s8853_s30 + $0xe0] sm:$0xff]  ;;  %vm16695_vm7 = vmmov %vm16536_vm0 }
 0x6dc   : > { %7268 = vrot.lane.b32.xlu0 %v7148_v18, %s8566_s28  ;;  %vm16696_vm3 = vmmov %vm16536_vm0  ;;  %v8540_v18 = vld [vmem:[#allocation2 + $0x12a] sm:$0xff] }
 0x6dd   : > { %7270 = vrot.lane.b32.xlu1 %v7149_v46, %s8566_s28 }
 0x6de   : > { %6567 = vmatmul.mubr.f32.gmra.mxu1 %v13769_v4  ;;  %6901 = vmatmul.mubr.f32.gmra.mxu0 %v13889_v0  ;;  %v7153_v4 = vld [vmem:[%s8853_s30 + $0xe8] sm:$0xff] }
 0x6df   : > { %8107 = vmatprep.mubr.msk.f32.mxu1 %vm16682_vm10, %v13779_v19  ;;  %8178 = vmatprep.mubr.msk.f32.mxu0 %vm16683_vm9, %v13899_v55  ;;  %v7154_v19 = vld [vmem:[%s8853_s30 + $0xf0] sm:$0xff]  ;;  %vm16697_vm10 = vmmov %vm16536_vm0 }
 0x6e0   : > { %7272 = vrot.lane.b32.xlu0 %v7150_v22, %s8566_s28  ;;  %vm16698_vm9 = vmmov %vm16536_vm0 }
 0x6e1   : > { %7274 = vrot.lane.b32.xlu1 %v7151_v62, %s8566_s28  ;;  %v7167_v62 = vld [vmem:[%s8853_s30 + $0x158] sm:$0xff] }
 0x6e2   : > { %6572 = vmatmul.mubr.f32.gmra.mxu1 %v13793_v50  ;;  %6906 = vmatmul.mubr.f32.gmra.mxu0 %v13913_v29  ;;  %v7155_v50 = vld [vmem:[%s8853_s30 + $0xf8] sm:$0xff] }
 0x6e3   : > { %8108 = vmatprep.mubr.msk.f32.mxu1 %vm16684_vm5, %v13803_v2  ;;  %8179 = vmatprep.mubr.msk.f32.mxu0 %vm16685_vm15, %v13923_v10  ;;  %v7156_v2 = vld [vmem:[%s8853_s30 + $0x100] sm:$0xff]  ;;  %vm16699_vm5 = vmmov %vm16536_vm0 }
 0x6e4   : > { %7276 = vrot.lane.b32.xlu0 %v7152_v24, %s8566_s28  ;;  %vm16700_vm15 = vmmov %vm16536_vm0 }
 0x6e5   : > { %7278 = vrot.lane.b32.xlu1 %v7153_v4, %s8566_s28 }
 0x6e6   : > { %6577 = vmatmul.mubr.f32.gmra.mxu1 %v13817_v23  ;;  %6911 = vmatmul.mubr.f32.gmra.mxu0 %v13937_v6  ;;  %v8530_v23 = vld [vmem:[#allocation2 + $0xda] sm:$0xff] }
 0x6e7   : > { %8109 = vmatprep.mubr.msk.f32.mxu1 %vm16686_vm13, %v13827_v3  ;;  %8180 = vmatprep.mubr.msk.f32.mxu0 %vm16687_vm8, %v13947_v57  ;;  %vm16701_vm13 = vmmov %vm16536_vm0 }
 0x6e8   : > { %7280 = vrot.lane.b32.xlu0 %v7154_v19, %s8566_s28  ;;  %vm16702_vm8 = vmmov %vm16536_vm0  ;;  %v16723_v19 = vld [vmem:[#allocation56_spill] sm:$0xff] }
 0x6e9   : > { %7282 = vrot.lane.b32.xlu1 %v7155_v50, %s8566_s28  ;;  %v8541_v50 = vld [vmem:[#allocation2 + $0x132] sm:$0xff] }
 0x6ea   : > { %6582 = vmatmul.mubr.f32.gmra.mxu1 %v13841_v63  ;;  %6916 = vmatmul.mubr.f32.gmra.mxu0 %v13961_v43 }
 0x6eb   : > { %8110 = vmatprep.mubr.msk.f32.mxu1 %vm16688_vm11, %v13851_v16  ;;  %8181 = vmatprep.mubr.msk.f32.mxu0 %vm16689_vm14, %v13971_v20  ;;  %vm16704_vm11 = vmmov %vm16536_vm0 }
 0x6ec   : > { %7284 = vrot.lane.b32.xlu0 %v7156_v2, %s8566_s28  ;;  %vm16705_vm14 = vmmov %vm16536_vm0 }
 0x6ee   : > { %6587 = vmatmul.mubr.f32.gmra.mxu1 %v13865_v58  ;;  %6921 = vmatmul.mubr.f32.gmra.mxu0 %v13985_v49  ;;  %v7161_v58 = vld [vmem:[%s8853_s30 + $0x128] sm:$0xff] }
 0x6ef   : > { %8111 = vmatprep.mubr.msk.f32.mxu1 %vm16536_vm0, %v13875_v30  ;;  %8182 = vmatprep.mubr.msk.f32.mxu0 %vm16690_vm2, %v13995_v32  ;;  %vm16707_vm2 = vmmov %vm16536_vm0 }
 0x6f2   : > { %6592 = vmatmul.mubr.f32.gmra.mxu1 %v13889_v0  ;;  %6926 = vmatmul.mubr.f32.gmra.mxu0 %v14009_v31 }
 0x6f3   : > { %8112 = vmatprep.mubr.msk.f32.mxu1 %vm16691_vm1, %v13899_v55  ;;  %8183 = vmatprep.mubr.msk.f32.mxu0 %vm16692_vm4, %v14019_v54  ;;  %vm16709_vm1 = vmmov %vm16536_vm0 }
 0x6f4   : > { %vm16710_vm4 = vmmov %vm16536_vm0 }
 0x6f6   : > { %6597 = vmatmul.mubr.f32.gmra.mxu1 %v13913_v29  ;;  %6931 = vmatmul.mubr.f32.gmra.mxu0 %v14033_v48  ;;  %v7160_v29 = vld [vmem:[%s8853_s30 + $0x120] sm:$0xff] }
 0x6f7   : > { %8113 = vmatprep.mubr.msk.f32.mxu1 %vm16693_vm6, %v13923_v10  ;;  %8184 = vmatprep.mubr.msk.f32.mxu0 %vm16694_vm12, %v14043_v33  ;;  %v7157_v10 = vld [vmem:[%s8853_s30 + $0x108] sm:$0xff]  ;;  %vm16712_vm6 = vmmov %vm16536_vm0 }
 0x6f8   : > { %7286 = vrot.lane.b32.xlu1 %v7157_v10, %s8566_s28  ;;  %vm16713_vm12 = vmmov %vm16536_vm0  ;;  %v7168_v10 = vld [vmem:[%s8853_s30 + $0x160] sm:$0xff] }
 0x6fa   : > { %6602 = vmatmul.mubr.f32.gmra.mxu1 %v13937_v6  ;;  %6936 = vmatmul.mubr.f32.gmra.mxu0 %v14055_v21  ;;  %v8531_v6 = vld [vmem:[#allocation2 + $0xe2] sm:$0xff] }
 0x6fb   : > { %8114 = vmatprep.mubr.msk.f32.mxu1 %vm16695_vm7, %v13947_v57  ;;  %8185 = vmatprep.mubr.msk.f32.mxu0 %vm16696_vm3, %v8530_v23  ;;  %v7158_v57 = vld [vmem:[%s8853_s30 + $0x110] sm:$0xff]  ;;  %vm16715_vm7 = vmmov %vm16536_vm0 }
 0x6fc   : > { %7288 = vrot.lane.b32.xlu0 %v7158_v57, %s8566_s28  ;;  %vm16716_vm3 = vmmov %vm16536_vm0 }
 0x6fe   : > { %6607 = vmatmul.mubr.f32.gmra.mxu1 %v13961_v43  ;;  %6941 = vmatmul.mubr.f32.gmra.mxu0 %v13532_v39  ;;  %v8532_v43 = vld [vmem:[#allocation2 + $0xea] sm:$0xff] }
 0x6ff   : > { %8115 = vmatprep.mubr.msk.f32.mxu1 %vm16697_vm10, %v13971_v20  ;;  %8186 = vmatprep.mubr.msk.f32.mxu0 %vm16698_vm9, %v8531_v6  ;;  %v7159_v20 = vld [vmem:[%s8853_s30 + $0x118] sm:$0xff]  ;;  %vm16718_vm10 = vmmov %vm16536_vm0 }
 0x700   : > { %7290 = vrot.lane.b32.xlu1 %v7159_v20, %s8566_s28  ;;  %7292 = vrot.lane.b32.xlu0 %v7160_v29, %s8566_s28  ;;  %vm16719_vm9 = vmmov %vm16536_vm0  ;;  %v16728_v20 = vld [vmem:[#allocation64_spill] sm:$0xff]  ;;  %v7169_v29 = vld [vmem:[%s8853_s30 + $0x168] sm:$0xff] }
 0x702   : > { %6612 = vmatmul.mubr.f32.gmra.mxu1 %v13985_v49  ;;  %6946 = vmatmul.mubr.f32.gmra.mxu0 %v13540_v28  ;;  %v8533_v49 = vld [vmem:[#allocation2 + $0xf2] sm:$0xff] }
 0x703   : > { %8116 = vmatprep.mubr.msk.f32.mxu1 %vm16699_vm5, %v13995_v32  ;;  %8187 = vmatprep.mubr.msk.f32.mxu0 %vm16700_vm15, %v8532_v43  ;;  %vm16721_vm5 = vmmov %vm16536_vm0 }
 0x704   : > { %7294 = vrot.lane.b32.xlu1 %v7161_v58, %s8566_s28  ;;  %7296 = vrot.lane.b32.xlu0 %v7162_v41, %s8566_s28  ;;  %vm16722_vm15 = vmmov %vm16536_vm0  ;;  %v16733_v41 = vld [vmem:[#allocation65_spill] sm:$0xff] }
 0x706   : > { %v14274_v3 = vpop.f32.mrf.mxu1  ;;  %6617 = vmatmul.mubr.f32.gmra.mxu1 %v14009_v31  ;;  %6951 = vmatmul.mubr.f32.gmra.mxu0 %v13569_v26  ;;  %v16703_v31 = vld [vmem:[#allocation48_spill] sm:$0xff] }
 0x707   : > { %8117 = vmatprep.mubr.msk.f32.mxu1 %vm16701_vm13, %v14019_v54  ;;  %8188 = vmatprep.mubr.msk.f32.mxu0 %vm16702_vm8, %v8533_v49  ;;  %v8534_v54 = vld [vmem:[#allocation2 + $0xfa] sm:$0xff]  ;;  %vm16724_vm13 = vmmov %vm16536_vm0 }
 0x708   : > { %v6306_v32 = vpop.f32.mrf.mxu1  ;;  %7298 = vrot.lane.b32.xlu1 %v7163_v35, %s8566_s28  ;;  %7300 = vrot.lane.b32.xlu0 %v7164_v1, %s8566_s28  ;;  %vm16725_vm8 = vmmov %vm16536_vm0 }
 0x70a   : > { %v14283_v55 = vpop.f32.mrf.mxu0  ;;  %v14285_v63 = vpop.f32.mrf.mxu1  ;;  %6622 = vmatmul.mubr.f32.gmra.mxu1 %v14033_v48  ;;  %6956 = vmatmul.mubr.f32.gmra.mxu0 %v16703_v31  ;;  %v16706_v48 = vld [vmem:[#allocation54_spill] sm:$0xff] }
 0x70b   : > { %8118 = vmatprep.mubr.msk.f32.mxu1 %vm16704_vm11, %v14043_v33  ;;  %8189 = vmatprep.mubr.msk.f32.mxu0 %vm16705_vm14, %v8534_v54  ;;  %v8535_v33 = vld [vmem:[#allocation2 + $0x102] sm:$0xff]  ;;  %vm16727_vm11 = vmmov %vm16536_vm0 }
 0x70c   : > { %v6186_v16 = vpop.f32.mrf.mxu0  ;;  %v6311_v0 = vpop.f32.mrf.mxu1  ;;  %7302 = vrot.lane.b32.xlu1 %v7165_v51, %s8566_s28  ;;  %7304 = vrot.lane.b32.xlu0 %v7166_v5, %s8566_s28  ;;  %vm16729_vm14 = vmmov %vm16536_vm0  ;;  %v8542_v5 = vld [vmem:[#allocation2 + $0x13a] sm:$0xff] }
 0x70d   : > { %v16730_v16 = vld [vmem:[#allocation58_spill] sm:$0xff]  ;;  %v16731_v0 = vld [vmem:[#allocation73_spill] sm:$0xff] }
 0x70e   : > { %v14294_v30 = vpop.f32.mrf.mxu0  ;;  %v14296_v60 = vpop.f32.mrf.mxu1  ;;  %6627 = vmatmul.mubr.f32.gmra.mxu1 %v14055_v21  ;;  %6961 = vmatmul.mubr.f32.gmra.mxu0 %v16706_v48  ;;  %v16708_v21 = vld [vmem:[#allocation53_spill] sm:$0xff] }
 0x70f   : > { %8119 = vmatprep.mubr.msk.f32.mxu1 %vm16536_vm0, %v8530_v23  ;;  %8190 = vmatprep.mubr.msk.f32.mxu0 %vm16707_vm2, %v8535_v33  ;;  %vm16732_vm2 = vmmov %vm16536_vm0 }
 0x710   : > { %v6191_v27 = vpop.f32.mrf.mxu0  ;;  %v6316_v25 = vpop.f32.mrf.mxu1  ;;  %7306 = vrot.lane.b32.xlu1 %v7167_v62, %s8566_s28  ;;  %7308 = vrot.lane.b32.xlu0 %v7168_v10, %s8566_s28 }
 0x712   : > { %v14304_v11 = vpop.f32.mrf.mxu0  ;;  %v14306_v37 = vpop.f32.mrf.mxu1  ;;  %6632 = vmatmul.mubr.f32.gmra.mxu1 %v13532_v39  ;;  %6966 = vmatmul.mubr.f32.gmra.mxu0 %v16708_v21  ;;  %v16711_v39 = vld [vmem:[#allocation51_spill] sm:$0xff] }
 0x713   : > { %8120 = vmatprep.mubr.msk.f32.mxu1 %vm16709_vm1, %v8531_v6  ;;  %8191 = vmatprep.mubr.msk.f32.mxu0 %vm16710_vm4, %v8536_v42  ;;  %vm16734_vm1 = vmmov %vm16536_vm0 }
 0x714   : > { %v6196_v8 = vpop.f32.mrf.mxu0  ;;  %v6321_v44 = vpop.f32.mrf.mxu1  ;;  %7310 = vrot.lane.b32.xlu1 %v7169_v29, %s8566_s28  ;;  %vm16736_vm4 = vmmov %vm16536_vm0  ;;  %v16755_v29 = vld [vmem:[#allocation15_spill] sm:$0xff] }
 0x715   : > { %v7171_v44 = vld [vmem:[%s8853_s30 + $0x178] sm:$0xff] }
 0x716   : > { %v14314_v13 = vpop.f32.mrf.mxu0  ;;  %v14316_v15 = vpop.f32.mrf.mxu1  ;;  %6637 = vmatmul.mubr.f32.gmra.mxu1 %v13540_v28  ;;  %6971 = vmatmul.mubr.f32.gmra.mxu0 %v16711_v39  ;;  %v16714_v28 = vld [vmem:[#allocation63_spill] sm:$0xff] }
 0x717   : > { %8121 = vmatprep.mubr.msk.f32.mxu1 %vm16712_vm6, %v8532_v43  ;;  %8192 = vmatprep.mubr.msk.f32.mxu0 %vm16713_vm12, %v8537_v45  ;;  %v16726_v43 = vld [vmem:[#allocation70_spill] sm:$0xff]  ;;  %vm16738_vm6 = vmmov %vm16536_vm0 }
 0x718   : > { %v6201_v7 = vpop.f32.mrf.mxu0  ;;  %v6326_v47 = vpop.f32.mrf.mxu1  ;;  %vm16740_vm12 = vmmov %vm16536_vm0  ;;  %7314 = vrot.lane.b32.xlu1 %v7171_v44, %s8566_s28 }
 0x719   : > { %v16739_v7 = vld [vmem:[#allocation60_spill] sm:$0xff] }
 0x71a   : > { %v14324_v59 = vpop.f32.mrf.mxu0  ;;  %v14326_v12 = vpop.f32.mrf.mxu1  ;;  %6642 = vmatmul.mubr.f32.gmra.mxu1 %v13569_v26  ;;  %6976 = vmatmul.mubr.f32.gmra.mxu0 %v16714_v28  ;;  %v16717_v26 = vld [vmem:[#allocation57_spill] sm:$0xff] }
 0x71b   : > { %8122 = vmatprep.mubr.msk.f32.mxu1 %vm16715_vm7, %v8533_v49  ;;  %8193 = vmatprep.mubr.msk.f32.mxu0 %vm16716_vm3, %v8538_v14  ;;  %vm16742_vm7 = vmmov %vm16536_vm0 }
 0x71c   : > { %v6206_v61 = vpop.f32.mrf.mxu0  ;;  %v6331_v56 = vpop.f32.mrf.mxu1  ;;  %vm16744_vm3 = vmmov %vm16536_vm0 }
 0x71d   : > { %v16741_v61 = vld [vmem:[#allocation78_spill] sm:$0xff]  ;;  %v16743_v56 = vld [vmem:[#allocation76_spill] sm:$0xff] }
 0x71e   : > { %v14334_v53 = vpop.f32.mrf.mxu0  ;;  %v14336_v40 = vpop.f32.mrf.mxu1  ;;  %6647 = vmatmul.mubr.f32.gmra.mxu1 %v16703_v31  ;;  %6981 = vmatmul.mubr.f32.gmra.mxu0 %v16717_v26 }
 0x71f   : > { %8123 = vmatprep.mubr.msk.f32.mxu1 %vm16718_vm10, %v8534_v54  ;;  %8194 = vmatprep.mubr.msk.f32.mxu0 %vm16719_vm9, %v8539_v34  ;;  %vm16746_vm10 = vmmov %vm16536_vm0 }
 0x720   : > { %v6211_v38 = vpop.f32.mrf.mxu0  ;;  %v6336_v52 = vpop.f32.mrf.mxu1  ;;  %vm16748_vm9 = vmmov %vm16536_vm0 }
 0x721   : > { %v16745_v52 = vld [vmem:[#allocation61_spill] sm:$0xff] }
 0x722   : > { %v14344_v17 = vpop.f32.mrf.mxu0  ;;  %v14346_v36 = vpop.f32.mrf.mxu1  ;;  %6652 = vmatmul.mubr.f32.gmra.mxu1 %v16706_v48  ;;  %6986 = vmatmul.mubr.f32.gmra.mxu0 %v16720_v9 }
 0x723   : > { %8124 = vmatprep.mubr.msk.f32.mxu1 %vm16721_vm5, %v8535_v33  ;;  %8195 = vmatprep.mubr.msk.f32.mxu0 %vm16722_vm15, %v8540_v18  ;;  %v7170_v33 = vld [vmem:[%s8853_s30 + $0x170] sm:$0xff]  ;;  %vm16750_vm5 = vmmov %vm16536_vm0 }
 0x724   : > { %v6216_v46 = vpop.f32.mrf.mxu0  ;;  %v6341_v22 = vpop.f32.mrf.mxu1  ;;  %7312 = vrot.lane.b32.xlu0 %v7170_v33, %s8566_s28  ;;  %vm16752_vm15 = vmmov %vm16536_vm0  ;;  %v16757_v33 = vld [vmem:[#allocation5_spill] sm:$0xff] }
 0x726   : > { %v14354_v24 = vpop.f32.mrf.mxu0  ;;  %v14356_v4 = vpop.f32.mrf.mxu1  ;;  %6657 = vmatmul.mubr.f32.gmra.mxu1 %v16708_v21  ;;  %6991 = vmatmul.mubr.f32.gmra.mxu0 %v16723_v19  ;;  %v16735_v21 = vld [vmem:[#allocation59_spill] sm:$0xff] }
 0x727   : > { %8125 = vmatprep.mubr.msk.f32.mxu1 %vm16724_vm13, %v8536_v42  ;;  %8196 = vmatprep.mubr.msk.f32.mxu0 %vm16725_vm8, %v8541_v50  ;;  %vm16754_vm13 = vmmov %vm16536_vm0 }
 0x728   : > { %v6221_v2 = vpop.f32.mrf.mxu0  ;;  %v6346_v23 = vpop.f32.mrf.mxu1  ;;  %vm16756_vm8 = vmmov %vm16536_vm0 }
 0x729   : > { %v16751_v2 = vld [vmem:[#allocation62_spill] sm:$0xff] }
 0x72a   : > { %v14364_v6 = vpop.f32.mrf.mxu0  ;;  %v14366_v57 = vpop.f32.mrf.mxu1  ;;  %6662 = vmatmul.mubr.f32.gmra.mxu1 %v16711_v39  ;;  %6996 = vmatmul.mubr.f32.gmra.mxu0 %v16726_v43 }
 0x72b   : > { %8126 = vmatprep.mubr.msk.f32.mxu1 %vm16727_vm11, %v8537_v45  ;;  %8197 = vmatprep.mubr.msk.f32.mxu0 %vm16729_vm14, %v16728_v20  ;;  %v16737_v45 = vld [vmem:[#allocation75_spill] sm:$0xff]  ;;  %vm16758_vm11 = vmmov %vm16536_vm0 }
 0x72c   : > { %v6226_v49 = vpop.f32.mrf.mxu0  ;;  %v6351_v32 = vpop.f32.mrf.mxu1  ;;  %vm16760_vm14 = vmmov %vm16536_vm0 }
 0x72d   : > { %v16753_v49 = vld [vmem:[#allocation66_spill] sm:$0xff]  ;;  %v8544_v32 = vld [vmem:[#allocation2 + $0x14a] sm:$0xff] }
 0x72e   : > { %v14375_v31 = vpop.f32.mrf.mxu0  ;;  %v14377_v54 = vpop.f32.mrf.mxu1  ;;  %6667 = vmatmul.mubr.f32.gmra.mxu1 %v16714_v28  ;;  %7001 = vmatmul.mubr.f32.gmra.mxu0 %v16730_v16 }
 0x72f   : > { %8127 = vmatprep.mubr.msk.f32.mxu1 %vm16536_vm0, %v8538_v14  ;;  %8198 = vmatprep.mubr.msk.f32.mxu0 %vm16732_vm2, %v16731_v0  ;;  %vm16763_vm2 = vmmov %vm16536_vm0 }
 0x730   : > { %v6231_v58 = vpop.f32.mrf.mxu0  ;;  %v6356_v48 = vpop.f32.mrf.mxu1 }
 0x732   : > { %v14386_v27 = vpop.f32.mrf.mxu0  ;;  %v14388_v25 = vpop.f32.mrf.mxu1  ;;  %6672 = vmatmul.mubr.f32.gmra.mxu1 %v16717_v26  ;;  %7006 = vmatmul.mubr.f32.gmra.mxu0 %v16733_v41 }
 0x733   : > { %8128 = vmatprep.mubr.msk.f32.mxu1 %vm16734_vm1, %v8539_v34  ;;  %8199 = vmatprep.mubr.msk.f32.mxu0 %vm16736_vm4, %v16735_v21  ;;  %v8545_v21 = vld [vmem:[#allocation2 + $0x152] sm:$0xff]  ;;  %vm16765_vm1 = vmmov %vm16536_vm0 }
 0x734   : > { %v6236_v42 = vpop.f32.mrf.mxu0  ;;  %v6361_v8 = vpop.f32.mrf.mxu1  ;;  %vm16767_vm4 = vmmov %vm16536_vm0 }
 0x736   : > { %v14397_v35 = vpop.f32.mrf.mxu0  ;;  %v14399_v39 = vpop.f32.mrf.mxu1  ;;  %6677 = vmatmul.mubr.f32.gmra.mxu1 %v16720_v9  ;;  %7011 = vmatmul.mubr.f32.gmra.mxu0 %v16737_v45  ;;  %v16747_v9 = vld [vmem:[#allocation79_spill] sm:$0xff] }
 0x737   : > { %8129 = vmatprep.mubr.msk.f32.mxu1 %vm16738_vm6, %v8540_v18  ;;  %8200 = vmatprep.mubr.msk.f32.mxu0 %vm16740_vm12, %v16739_v7  ;;  %vm16769_vm6 = vmmov %vm16536_vm0 }
 0x738   : > { %v6241_v47 = vpop.f32.mrf.mxu0  ;;  %v6366_v1 = vpop.f32.mrf.mxu1  ;;  %vm16771_vm12 = vmmov %vm16536_vm0 }
 0x739   : > { %v16761_v47 = vld [vmem:[#allocation12_spill] sm:$0xff] }
 0x73a   : > { %v14407_v28 = vpop.f32.mrf.mxu0  ;;  %v14409_v14 = vpop.f32.mrf.mxu1  ;;  %6682 = vmatmul.mubr.f32.gmra.mxu1 %v16723_v19  ;;  %7016 = vmatmul.mubr.f32.gmra.mxu0 %v16741_v61  ;;  %v16749_v19 = vld [vmem:[#allocation80_spill] sm:$0xff] }
 0x73b   : > { %8130 = vmatprep.mubr.msk.f32.mxu1 %vm16742_vm7, %v8541_v50  ;;  %8201 = vmatprep.mubr.msk.f32.mxu0 %vm16744_vm3, %v16743_v56  ;;  %v8543_v50 = vld [vmem:[#allocation2 + $0x142] sm:$0xff]  ;;  %vm16773_vm7 = vmmov %vm16536_vm0 }
 0x73c   : > { %v6246_v51 = vpop.f32.mrf.mxu0  ;;  %v6371_v26 = vpop.f32.mrf.mxu1  ;;  %vm16774_vm3 = vmmov %vm16536_vm0 }
 0x73e   : > { %v14416_v34 = vpop.f32.mrf.mxu0  ;;  %v14418_v38 = vpop.f32.mrf.mxu1  ;;  %6687 = vmatmul.mubr.f32.gmra.mxu1 %v16726_v43  ;;  %7021 = vmatmul.mubr.f32.gmra.mxu0 %v16745_v52 }
 0x73f   : > { %8131 = vmatprep.mubr.msk.f32.mxu1 %vm16746_vm10, %v8542_v5  ;;  %8202 = vmatprep.mubr.msk.f32.mxu0 %vm16748_vm9, %v16747_v9  ;;  %vm16775_vm10 = vmmov %vm16536_vm0 }
 0x740   : > { %v6251_v18 = vpop.f32.mrf.mxu0  ;;  %v6376_v46 = vpop.f32.mrf.mxu1  ;;  %vm16776_vm9 = vmmov %vm16536_vm0 }
 0x741   : > { %v16764_v18 = vld [vmem:[#allocation74_spill] sm:$0xff] }
 0x742   : > { %v14425_v22 = vpop.f32.mrf.mxu0  ;;  %v14427_v62 = vpop.f32.mrf.mxu1  ;;  %6692 = vmatmul.mubr.f32.gmra.mxu1 %v16730_v16  ;;  %7026 = vmatmul.mubr.f32.gmra.mxu0 %v16749_v19 }
 0x743   : > { %8132 = vmatprep.mubr.msk.f32.mxu1 %vm16750_vm5, %v8543_v50  ;;  %8203 = vmatprep.mubr.msk.f32.mxu0 %vm16752_vm15, %v16751_v2  ;;  %vm16777_vm5 = vmmov %vm16536_vm0 }
 0x744   : > { %v6256_v23 = vpop.f32.mrf.mxu0  ;;  %v6381_v10 = vpop.f32.mrf.mxu1  ;;  %vm16778_vm15 = vmmov %vm16536_vm0 }
 0x745   : > { %v16768_v10 = vld [vmem:[#allocation6_spill] sm:$0xff] }
 0x746   : > { %v14434_v43 = vpop.f32.mrf.mxu0  ;;  %v14436_v20 = vpop.f32.mrf.mxu1  ;;  %6697 = vmatmul.mubr.f32.gmra.mxu1 %v16733_v41  ;;  %7031 = vmatmul.mubr.f32.gmra.mxu0 %v16753_v49  ;;  %v16759_v41 = vld [vmem:[#allocation69_spill] sm:$0xff] }
 0x747   : > { %8133 = vmatprep.mubr.msk.f32.mxu1 %vm16754_vm13, %v8544_v32  ;;  %8204 = vmatprep.mubr.msk.f32.mxu0 %vm16756_vm8, %v16755_v29  ;;  %vm16779_vm13 = vmmov %vm16536_vm0 }
 0x748   : > { %v6261_v16 = vpop.f32.mrf.mxu0  ;;  %v6386_v0 = vpop.f32.mrf.mxu1  ;;  %vm16780_vm8 = vmmov %vm16536_vm0 }
 0x749   : > { %v5544_v0 = vld [vmem:[#allocation2 + $0x198] sm:$0xff] }
 0x74a   : > { %v14443_v58 = vpop.f32.mrf.mxu0  ;;  %v14445_v48 = vpop.f32.mrf.mxu1  ;;  %6702 = vmatmul.mubr.f32.gmra.mxu1 %v16737_v45  ;;  %7036 = vmatmul.mubr.f32.gmra.mxu0 %v16757_v33  ;;  %v16762_v45 = vld [vmem:[#allocation16_spill] sm:$0xff] }
 0x74b   : > { %8134 = vmatprep.mubr.msk.f32.mxu1 %vm16758_vm11, %v8545_v21  ;;  %8205 = vmatprep.mubr.msk.f32.mxu0 %vm16760_vm14, %v16759_v41  ;;  %v5652_v21 = vld [vmem:[#allocation2 + $0x19a] sm:$0xff]  ;;  %vm7412_vm11 = vcmask 31744  }
 0x74c   : > { %v6266_v42 = vpop.f32.mrf.mxu0  ;;  %v6391_v8 = vpop.f32.mrf.mxu1 }
 0x74e   : > { %v14452_v44 = vpop.f32.mrf.mxu0  ;;  %v14454_v7 = vpop.f32.mrf.mxu1  ;;  %6707 = vmatmul.mubr.f32.gmra.mxu1 %v16741_v61  ;;  %7041 = vmatmul.mubr.f32.gmra.mxu0 %v16761_v47  ;;  %v16766_v61 = vld [vmem:[#allocation4_spill] sm:$0xff] }
 0x74f   : > { %8135 = vmatprep.mubr.msk.f32.mxu1 %vm16536_vm0, %v16743_v56  ;;  %8206 = vmatprep.mubr.msk.f32.mxu0 %vm16763_vm2, %v16762_v45 }
 0x750   : > { %v6271_v1 = vpop.f32.mrf.mxu0  ;;  %v6396_v51 = vpop.f32.mrf.mxu1 }
 0x752   : > { %v14462_v26 = vpop.f32.mrf.mxu0  ;;  %v14464_v5 = vpop.f32.mrf.mxu1  ;;  %6712 = vmatmul.mubr.f32.gmra.mxu1 %v16745_v52  ;;  %7046 = vmatmul.mubr.f32.gmra.mxu0 %v16764_v18  ;;  %v16770_v52 = vld [vmem:[#allocation7_spill] sm:$0xff]  ;;  %v5545_v18 = vld [vmem:[#allocation2 + $0x1a0] sm:$0xff] }
 0x753   : > { %8136 = vmatprep.mubr.msk.f32.mxu1 %vm16765_vm1, %v16747_v9  ;;  %8207 = vmatprep.mubr.msk.f32.mxu0 %vm16767_vm4, %v16766_v61  ;;  %v5812_v9 = vpop.permute.xlu1 %5811  ;;  %v5653_v61 = vld [vmem:[#allocation2 + $0x1a2] sm:$0xff] }
 0x754   : > { %v6276_v56 = vpop.f32.mrf.mxu0  ;;  %v6401_v46 = vpop.f32.mrf.mxu1  ;;  %v5922_v45 = vsel %vm16773_vm7, %v5544_v0, %v5812_v9  ;;  %v5546_v9 = vld [vmem:[#allocation2 + $0x1a8] sm:$0xff] }
 0x756   : > { %v14472_v50 = vpop.f32.mrf.mxu0  ;;  %v14474_v23 = vpop.f32.mrf.mxu1  ;;  %6717 = vmatmul.mubr.f32.gmra.mxu1 %v16749_v19  ;;  %7051 = vmatmul.mubr.f32.gmra.mxu0 %v16768_v10  ;;  %v16772_v19 = vld [vmem:[#allocation8_spill] sm:$0xff] }
 0x757   : > { %8137 = vmatprep.mubr.msk.f32.mxu1 %vm16769_vm6, %v16751_v2  ;;  %8208 = vmatprep.mubr.msk.f32.mxu0 %vm16771_vm12, %v16770_v52  ;;  %v5814_v2 = vpop.permute.xlu0 %5813 }
 0x758   : > { %v6281_v32 = vpop.f32.mrf.mxu0  ;;  %v6406_v16 = vpop.f32.mrf.mxu1 }
 0x759   : > { %v5654_v32 = vld [vmem:[#allocation2 + $0x1aa] sm:$0xff] }
 0x75a   : > { %v14482_v42 = vpop.f32.mrf.mxu0  ;;  %v14484_v8 = vpop.f32.mrf.mxu1  ;;  %6722 = vmatmul.mubr.f32.gmra.mxu1 %v16753_v49  ;;  %7056 = vmatmul.mubr.f32.gmra.mxu0 %v16772_v19  ;;  %v5923_v49 = vsel %vm16776_vm9, %v5545_v18, %v5814_v2 }
 0x75b   : > { %8138 = vmatprep.mubr.msk.f32.mxu1 %vm16774_vm3, %v16755_v29  ;;  %8209 = vmatprep.mubr.msk.f32.mxu0 %vm16775_vm10, %v5652_v21  ;;  %v5816_v29 = vpop.permute.xlu1 %5815  ;;  %v7221_v18 = vpop.permute.xlu0 %7220 }
 0x75c   : > { %v6286_v1 = vpop.f32.mrf.mxu0  ;;  %v6411_v51 = vpop.f32.mrf.mxu1 }
 0x75e   : > { %v14492_v56 = vpop.f32.mrf.mxu0  ;;  %v14494_v46 = vpop.f32.mrf.mxu1  ;;  %6727 = vmatmul.mubr.f32.gmra.mxu1 %v16757_v33  ;;  %7061 = vmatmul.mubr.f32.gmra.mxu0 %v5922_v45  ;;  %v5924_v33 = vsel %vm16779_vm13, %v5546_v9, %v5816_v29 }
 0x75f   : > { %8139 = vmatprep.mubr.msk.f32.mxu1 %vm16777_vm5, %v16759_v41  ;;  %8210 = vmatprep.mubr.msk.f32.mxu0 %vm16778_vm15, %v5653_v61 }
 0x760   : > { %v6291_v10 = vpop.f32.mrf.mxu0  ;;  %v6416_v52 = vpop.f32.mrf.mxu1 }
 0x762   : > { %v14501_v16 = vpop.f32.mrf.mxu0  ;;  %v14503_v0 = vpop.f32.mrf.mxu1  ;;  %6732 = vmatmul.mubr.f32.gmra.mxu1 %v16761_v47  ;;  %7066 = vmatmul.mubr.f32.gmra.mxu0 %v5923_v49 }
 0x763   : > { %8211 = vmatprep.mubr.msk.f32.mxu0 %vm16780_vm8, %v5654_v32  ;;  %v7223_v32 = vpop.permute.xlu1 %7222 }
 0x764   : > { %v6296_v21 = vpop.f32.mrf.mxu0  ;;  %v6421_v41 = vpop.f32.mrf.mxu1 }
 0x766   : > { %v14508_v19 = vpop.f32.mrf.mxu0  ;;  %v6498_v45 = vpop.f32.mrf.mxu1  ;;  %7071 = vmatmul.mubr.f32.gmra.mxu0 %v5924_v33 }
 0x767   : > { %v6499_v51 = vadd.f32 %v6498_v45, %v14283_v55 }
 0x768   : > { %v6301_v2 = vpop.f32.mrf.mxu0  ;;  %v6500_v1 = vpop.f32.mrf.mxu1 }
 0x76a   : > { %v6503_v61 = vpop.f32.mrf.mxu1  ;;  %v6837_v10 = vpop.f32.mrf.mxu0 }
 0x76b   : > { %v7076_v47 = vadd.f32 %v6837_v10, %v6499_v51  ;;  %v6504_v52 = vadd.f32 %v6503_v61, %v14294_v30  ;;  %v7225_v51 = vpop.permute.xlu0 %7224 }
 0x76c   : > { %v6505_v49 = vpop.f32.mrf.mxu1  ;;  %v6839_v29 = vpop.f32.mrf.mxu0 }
 0x76d   : > { %v7364_v9 = vadd.f32 %v7221_v18, %v7076_v47 }
 0x76e   : > { %v6508_v21 = vpop.f32.mrf.mxu1  ;;  %v6842_v41 = vpop.f32.mrf.mxu0 }
 0x76f   : > { %7413 = vst.msk [vmem:[%s8858_s7] sm:$0xff] %vm7412_vm11, %v7364_v9  ;;  %v7077_v33 = vadd.f32 %v6842_v41, %v6504_v52  ;;  %v6509_v45 = vadd.f32 %v6508_v21, %v14304_v11  ;;  %v7227_v9 = vpop.permute.xlu1 %7226 }
 0x770   : > { %v6510_v2 = vpop.f32.mrf.mxu1  ;;  %v6844_v55 = vpop.f32.mrf.mxu0 }
 0x771   : > { %v7365_v1 = vadd.f32 %v7223_v32, %v7077_v33  ;;  %v7229_v55 = vpop.permute.xlu0 %7228 }
 0x772   : > { %v6513_v10 = vpop.f32.mrf.mxu1  ;;  %v6847_v49 = vpop.f32.mrf.mxu0 }
 0x773   : > { %7414 = vst.msk [vmem:[%s8858_s7 + $0x8] sm:$0xff] %vm7412_vm11, %v7365_v1  ;;  %v7078_v29 = vadd.f32 %v6847_v49, %v6509_v45  ;;  %v6514_v61 = vadd.f32 %v6513_v10, %v14314_v13 }
 0x774   : > { %v6515_v30 = vpop.f32.mrf.mxu1  ;;  %v6849_v18 = vpop.f32.mrf.mxu0 }
 0x775   : > { %v7366_v47 = vadd.f32 %v7225_v51, %v7078_v29  ;;  %v7231_v30 = vpop.permute.xlu1 %7230 }
 0x776   : > { %v6518_v52 = vpop.f32.mrf.mxu1  ;;  %v6852_v41 = vpop.f32.mrf.mxu0 }
 0x777   : > { %7415 = vst.msk [vmem:[%s8858_s7 + $0x10] sm:$0xff] %vm7412_vm11, %v7366_v47  ;;  %v7079_v2 = vadd.f32 %v6852_v41, %v6514_v61  ;;  %v6519_v21 = vadd.f32 %v6518_v52, %v14324_v59 }
 0x778   : > { %v6520_v11 = vpop.f32.mrf.mxu1  ;;  %v6854_v32 = vpop.f32.mrf.mxu0 }
 0x779   : > { %v7367_v33 = vadd.f32 %v7227_v9, %v7079_v2  ;;  %v7233_v2 = vpop.permute.xlu0 %7232 }
 0x77a   : > { %v6523_v45 = vpop.f32.mrf.mxu1  ;;  %v6857_v1 = vpop.f32.mrf.mxu0 }
 0x77b   : > { %7416 = vst.msk [vmem:[%s8858_s7 + $0x18] sm:$0xff] %vm7412_vm11, %v7367_v33  ;;  %v7080_v49 = vadd.f32 %v6857_v1, %v6519_v21  ;;  %v6524_v10 = vadd.f32 %v6523_v45, %v14334_v53  ;;  %v7235_v1 = vpop.permute.xlu1 %7234 }
 0x77c   : > { %v6525_v13 = vpop.f32.mrf.mxu1  ;;  %v6859_v51 = vpop.f32.mrf.mxu0 }
 0x77d   : > { %v7368_v29 = vadd.f32 %v7229_v55, %v7080_v49 }
 0x77e   : > { %v6528_v18 = vpop.f32.mrf.mxu1  ;;  %v6862_v61 = vpop.f32.mrf.mxu0 }
 0x77f   : > { %7417 = vst.msk [vmem:[%s8858_s7 + $0x20] sm:$0xff] %vm7412_vm11, %v7368_v29  ;;  %v7081_v47 = vadd.f32 %v6862_v61, %v6524_v10  ;;  %v6529_v52 = vadd.f32 %v6528_v18, %v14344_v17  ;;  %v7237_v18 = vpop.permute.xlu0 %7236 }
 0x780   : > { %v6530_v59 = vpop.f32.mrf.mxu1  ;;  %v6864_v9 = vpop.f32.mrf.mxu0 }
 0x781   : > { %v7369_v41 = vadd.f32 %v7231_v30, %v7081_v47 }
 0x782   : > { %v6533_v11 = vpop.f32.mrf.mxu1  ;;  %v6867_v32 = vpop.f32.mrf.mxu0 }
 0x783   : > { %7418 = vst.msk [vmem:[%s8858_s7 + $0x28] sm:$0xff] %vm7412_vm11, %v7369_v41  ;;  %v7082_v21 = vadd.f32 %v6867_v32, %v6529_v52  ;;  %v6534_v55 = vadd.f32 %v6533_v11, %v14354_v24 }
 0x784   : > { %v6535_v53 = vpop.f32.mrf.mxu1  ;;  %v6869_v33 = vpop.f32.mrf.mxu0 }
 0x785   : > { %v7370_v45 = vadd.f32 %v7233_v2, %v7082_v21  ;;  %v7239_v2 = vpop.permute.xlu1 %7238 }
 0x786   : > { %v6538_v49 = vpop.f32.mrf.mxu1  ;;  %v6872_v13 = vpop.f32.mrf.mxu0 }
 0x787   : > { %7419 = vst.msk [vmem:[%s8858_s7 + $0x30] sm:$0xff] %vm7412_vm11, %v7370_v45  ;;  %v7083_v51 = vadd.f32 %v6872_v13, %v6534_v55  ;;  %v6539_v29 = vadd.f32 %v6538_v49, %v14364_v6  ;;  %v7241_v45 = vpop.permute.xlu0 %7240 }
 0x788   : > { %v6540_v17 = vpop.f32.mrf.mxu1  ;;  %v6874_v10 = vpop.f32.mrf.mxu0 }
 0x789   : > { %v7371_v30 = vadd.f32 %v7235_v1, %v7083_v51 }
 0x78a   : > { %v6543_v61 = vpop.f32.mrf.mxu1  ;;  %v6877_v47 = vpop.f32.mrf.mxu0 }
 0x78b   : > { %7420 = vst.msk [vmem:[%s8858_s7 + $0x38] sm:$0xff] %vm7412_vm11, %v7371_v30  ;;  %v7084_v59 = vadd.f32 %v6877_v47, %v6539_v29  ;;  %v6544_v52 = vadd.f32 %v6543_v61, %v14375_v31  ;;  %v7243_v29 = vpop.permute.xlu1 %7242 }
 0x78c   : > { %v6545_v24 = vpop.f32.mrf.mxu1  ;;  %v6879_v9 = vpop.f32.mrf.mxu0 }
 0x78d   : > { %v7372_v41 = vadd.f32 %v7237_v18, %v7084_v59  ;;  %v7245_v9 = vpop.permute.xlu0 %7244 }
 0x78e   : > { %v6548_v11 = vpop.f32.mrf.mxu1  ;;  %v6882_v32 = vpop.f32.mrf.mxu0 }
 0x78f   : > { %7421 = vst.msk [vmem:[%s8858_s7 + $0x40] sm:$0xff] %vm7412_vm11, %v7372_v41  ;;  %v7085_v21 = vadd.f32 %v6882_v32, %v6544_v52  ;;  %v6549_v33 = vadd.f32 %v6548_v11, %v14386_v27 }
 0x790   : > { %v6550_v6 = vpop.f32.mrf.mxu1  ;;  %v6884_v53 = vpop.f32.mrf.mxu0 }
 0x791   : > { %v7373_v55 = vadd.f32 %v7239_v2, %v7085_v21  ;;  %v7247_v6 = vpop.permute.xlu1 %7246 }
 0x792   : > { %v6553_v1 = vpop.f32.mrf.mxu1  ;;  %v6887_v49 = vpop.f32.mrf.mxu0 }
 0x793   : > { %7422 = vst.msk [vmem:[%s8858_s7 + $0x48] sm:$0xff] %vm7412_vm11, %v7373_v55  ;;  %v7086_v13 = vadd.f32 %v6887_v49, %v6549_v33  ;;  %v6554_v17 = vadd.f32 %v6553_v1, %v14397_v35 }
 0x794   : > { %v6555_v31 = vpop.f32.mrf.mxu1  ;;  %v6889_v51 = vpop.f32.mrf.mxu0 }
 0x795   : > { %v7374_v10 = vadd.f32 %v7241_v45, %v7086_v13  ;;  %v7249_v13 = vpop.permute.xlu0 %7248 }
 0x796   : > { %v6558_v30 = vpop.f32.mrf.mxu1  ;;  %v6892_v18 = vpop.f32.mrf.mxu0 }
 0x797   : > { %7423 = vst.msk [vmem:[%s8858_s7 + $0x50] sm:$0xff] %vm7412_vm11, %v7374_v10  ;;  %v7087_v61 = vadd.f32 %v6892_v18, %v6554_v17  ;;  %v6559_v59 = vadd.f32 %v6558_v30, %v14407_v28  ;;  %v7251_v18 = vpop.permute.xlu1 %7250 }
 0x798   : > { %v6560_v27 = vpop.f32.mrf.mxu1  ;;  %v6894_v47 = vpop.f32.mrf.mxu0 }
 0x799   : > { %v7375_v24 = vadd.f32 %v7243_v29, %v7087_v61 }
 0x79a   : > { %v6563_v52 = vpop.f32.mrf.mxu1  ;;  %v6897_v41 = vpop.f32.mrf.mxu0 }
 0x79b   : > { %7424 = vst.msk [vmem:[%s8858_s7 + $0x58] sm:$0xff] %vm7412_vm11, %v7375_v24  ;;  %v7088_v2 = vadd.f32 %v6897_v41, %v6559_v59  ;;  %v6564_v32 = vadd.f32 %v6563_v52, %v14416_v34  ;;  %v7253_v52 = vpop.permute.xlu0 %7252 }
 0x79c   : > { %v6565_v35 = vpop.f32.mrf.mxu1  ;;  %v6899_v11 = vpop.f32.mrf.mxu0 }
 0x79d   : > { %v7376_v21 = vadd.f32 %v7245_v9, %v7088_v2 }
 0x79e   : > { %v6568_v53 = vpop.f32.mrf.mxu1  ;;  %v6902_v33 = vpop.f32.mrf.mxu0 }
 0x79f   : > { %7425 = vst.msk [vmem:[%s8858_s7 + $0x60] sm:$0xff] %vm7412_vm11, %v7376_v21  ;;  %v7089_v55 = vadd.f32 %v6902_v33, %v6564_v32  ;;  %v6569_v1 = vadd.f32 %v6568_v53, %v14425_v22 }
 0x7a0   : > { %v6570_v28 = vpop.f32.mrf.mxu1  ;;  %v6904_v45 = vpop.f32.mrf.mxu0 }
 0x7a1   : > { %v7377_v49 = vadd.f32 %v7247_v6, %v7089_v55  ;;  %v7255_v6 = vpop.permute.xlu1 %7254 }
 0x7a2   : > { %v6573_v31 = vpop.f32.mrf.mxu1  ;;  %v6907_v51 = vpop.f32.mrf.mxu0 }
 0x7a3   : > { %7426 = vst.msk [vmem:[%s8858_s7 + $0x68] sm:$0xff] %vm7412_vm11, %v7377_v49  ;;  %v7090_v17 = vadd.f32 %v6907_v51, %v6569_v1  ;;  %v6574_v29 = vadd.f32 %v6573_v31, %v14434_v43  ;;  %v7257_v49 = vpop.permute.xlu0 %7256 }
 0x7a4   : > { %v6575_v34 = vpop.f32.mrf.mxu1  ;;  %v6909_v10 = vpop.f32.mrf.mxu0 }
 0x7a5   : > { %v7378_v30 = vadd.f32 %v7249_v13, %v7090_v17 }
 0x7a6   : > { %v6578_v61 = vpop.f32.mrf.mxu1  ;;  %v6912_v27 = vpop.f32.mrf.mxu0 }
 0x7a7   : > { %7427 = vst.msk [vmem:[%s8858_s7 + $0x70] sm:$0xff] %vm7412_vm11, %v7378_v30  ;;  %v7091_v47 = vadd.f32 %v6912_v27, %v6574_v29  ;;  %v6579_v24 = vadd.f32 %v6578_v61, %v14443_v58  ;;  %v7259_v29 = vpop.permute.xlu1 %7258 }
 0x7a8   : > { %v6580_v22 = vpop.f32.mrf.mxu1  ;;  %v6914_v59 = vpop.f32.mrf.mxu0 }
 0x7a9   : > { %v7379_v9 = vadd.f32 %v7251_v18, %v7091_v47  ;;  %v7261_v59 = vpop.permute.xlu0 %7260 }
 0x7aa   : > { %v6583_v41 = vpop.f32.mrf.mxu1  ;;  %v6917_v2 = vpop.f32.mrf.mxu0 }
 0x7ab   : > { %7428 = vst.msk [vmem:[%s8858_s7 + $0x78] sm:$0xff] %vm7412_vm11, %v7379_v9  ;;  %v7092_v35 = vadd.f32 %v6917_v2, %v6579_v24  ;;  %v6584_v32 = vadd.f32 %v6583_v41, %v14452_v44 }
 0x7ac   : > { %v6585_v43 = vpop.f32.mrf.mxu1  ;;  %v6919_v11 = vpop.f32.mrf.mxu0 }
 0x7ad   : > { %v7380_v21 = vadd.f32 %v7253_v52, %v7092_v35  ;;  %v7263_v43 = vpop.permute.xlu1 %7262 }
 0x7ae   : > { %v6588_v53 = vpop.f32.mrf.mxu1  ;;  %v6922_v33 = vpop.f32.mrf.mxu0 }
 0x7af   : > { %7429 = vst.msk [vmem:[%s8858_s7 + $0x80] sm:$0xff] %vm7412_vm11, %v7380_v21  ;;  %v7093_v55 = vadd.f32 %v6922_v33, %v6584_v32  ;;  %v6589_v45 = vadd.f32 %v6588_v53, %v14462_v26 }
 0x7b0   : > { %v6590_v58 = vpop.f32.mrf.mxu1  ;;  %v6924_v28 = vpop.f32.mrf.mxu0 }
 0x7b1   : > { %v7381_v1 = vadd.f32 %v7255_v6, %v7093_v55  ;;  %v7265_v55 = vpop.permute.xlu0 %7264 }
 0x7b2   : > { %v6593_v13 = vpop.f32.mrf.mxu1  ;;  %v6927_v31 = vpop.f32.mrf.mxu0 }
 0x7b3   : > { %7430 = vst.msk [vmem:[%s8858_s7 + $0x88] sm:$0xff] %vm7412_vm11, %v7381_v1  ;;  %v7094_v51 = vadd.f32 %v6927_v31, %v6589_v45  ;;  %v6594_v34 = vadd.f32 %v6593_v13, %v14472_v50  ;;  %v7267_v31 = vpop.permute.xlu1 %7266 }
 0x7b4   : > { %v6595_v44 = vpop.f32.mrf.mxu1  ;;  %v6929_v17 = vpop.f32.mrf.mxu0 }
 0x7b5   : > { %v7382_v10 = vadd.f32 %v7257_v49, %v7094_v51 }
 0x7b6   : > { %v6598_v30 = vpop.f32.mrf.mxu1  ;;  %v6932_v18 = vpop.f32.mrf.mxu0 }
 0x7b7   : > { %7431 = vst.msk [vmem:[%s8858_s7 + $0x90] sm:$0xff] %vm7412_vm11, %v7382_v10  ;;  %v7095_v61 = vadd.f32 %v6932_v18, %v6594_v34  ;;  %v6599_v47 = vadd.f32 %v6598_v30, %v14482_v42  ;;  %v7269_v30 = vpop.permute.xlu0 %7268 }
 0x7b8   : > { %v6600_v26 = vpop.f32.mrf.mxu1  ;;  %v6934_v27 = vpop.f32.mrf.mxu0 }
 0x7b9   : > { %v7383_v22 = vadd.f32 %v7259_v29, %v7095_v61 }
 0x7ba   : > { %v6603_v24 = vpop.f32.mrf.mxu1  ;;  %v6937_v9 = vpop.f32.mrf.mxu0 }
 0x7bb   : > { %7432 = vst.msk [vmem:[%s8858_s7 + $0x98] sm:$0xff] %vm7412_vm11, %v7383_v22  ;;  %v7096_v52 = vadd.f32 %v6937_v9, %v6599_v47  ;;  %v6604_v2 = vadd.f32 %v6603_v24, %v14492_v56 }
 0x7bc   : > { %v6605_v50 = vpop.f32.mrf.mxu1  ;;  %v6939_v41 = vpop.f32.mrf.mxu0 }
 0x7bd   : > { %v7384_v35 = vadd.f32 %v7261_v59, %v7096_v52  ;;  %v7271_v59 = vpop.permute.xlu1 %7270 }
 0x7be   : > { %v6608_v11 = vpop.f32.mrf.mxu1  ;;  %v6942_v32 = vpop.f32.mrf.mxu0 }
 0x7bf   : > { %7433 = vst.msk [vmem:[%s8858_s7 + $0xa0] sm:$0xff] %vm7412_vm11, %v7384_v35  ;;  %v7097_v21 = vadd.f32 %v6942_v32, %v6604_v2  ;;  %v6609_v53 = vadd.f32 %v6608_v11, %v14501_v16  ;;  %v7273_v35 = vpop.permute.xlu0 %7272 }
 0x7c0   : > { %v6610_v42 = vpop.f32.mrf.mxu1  ;;  %v6944_v6 = vpop.f32.mrf.mxu0 }
 0x7c1   : > { %v7385_v33 = vadd.f32 %v7263_v43, %v7097_v21 }
 0x7c2   : > { %v6613_v58 = vpop.f32.mrf.mxu1  ;;  %v6947_v28 = vpop.f32.mrf.mxu0 }
 0x7c3   : > { %7434 = vst.msk [vmem:[%s8858_s7 + $0xa8] sm:$0xff] %vm7412_vm11, %v7385_v33  ;;  %v7098_v45 = vadd.f32 %v6947_v28, %v6609_v53  ;;  %v6614_v49 = vadd.f32 %v6613_v58, %v14508_v19  ;;  %v7275_v53 = vpop.permute.xlu1 %7274 }
 0x7c4   : > { %v6615_v56 = vpop.f32.mrf.mxu1  ;;  %v6949_v1 = vpop.f32.mrf.mxu0 }
 0x7c5   : > { %v7386_v13 = vadd.f32 %v7265_v55, %v7098_v45  ;;  %v7277_v1 = vpop.permute.xlu0 %7276 }
 0x7c6   : > { %v6618_v51 = vpop.f32.mrf.mxu1  ;;  %v6952_v44 = vpop.f32.mrf.mxu0 }
 0x7c7   : > { %7435 = vst.msk [vmem:[%s8858_s7 + $0xb0] sm:$0xff] %vm7412_vm11, %v7386_v13  ;;  %v7099_v17 = vadd.f32 %v6952_v44, %v6614_v49  ;;  %v6619_v10 = vadd.f32 %v6618_v51, %v14274_v3 }
 0x7c8   : > { %v6620_v16 = vpop.f32.mrf.mxu1  ;;  %v6954_v34 = vpop.f32.mrf.mxu0 }
 0x7c9   : > { %v7387_v29 = vadd.f32 %v7267_v31, %v7099_v17  ;;  %v7279_v16 = vpop.permute.xlu1 %7278 }
 0x7ca   : > { %v6623_v18 = vpop.f32.mrf.mxu1  ;;  %v6957_v61 = vpop.f32.mrf.mxu0 }
 0x7cb   : > { %7436 = vst.msk [vmem:[%s8858_s7 + $0xb8] sm:$0xff] %vm7412_vm11, %v7387_v29  ;;  %v7100_v26 = vadd.f32 %v6957_v61, %v6619_v10  ;;  %v6624_v47 = vadd.f32 %v6623_v18, %v14285_v63 }
 0x7cc   : > { %v6625_v19 = vpop.f32.mrf.mxu1  ;;  %v6959_v27 = vpop.f32.mrf.mxu0 }
 0x7cd   : > { %v7388_v22 = vadd.f32 %v7269_v30, %v7100_v26  ;;  %v7281_v26 = vpop.permute.xlu0 %7280 }
 0x7ce   : > { %v6628_v24 = vpop.f32.mrf.mxu1  ;;  %v6962_v9 = vpop.f32.mrf.mxu0 }
 0x7cf   : > { %7437 = vst.msk [vmem:[%s8858_s7 + $0xc0] sm:$0xff] %vm7412_vm11, %v7388_v22  ;;  %v7101_v52 = vadd.f32 %v6962_v9, %v6624_v47  ;;  %v6629_v41 = vadd.f32 %v6628_v24, %v14296_v60  ;;  %v7283_v9 = vpop.permute.xlu1 %7282 }
 0x7d0   : > { %v6630_v3 = vpop.f32.mrf.mxu1  ;;  %v6964_v50 = vpop.f32.mrf.mxu0 }
 0x7d1   : > { %v7389_v2 = vadd.f32 %v7271_v59, %v7101_v52 }
 0x7d2   : > { %v6633_v43 = vpop.f32.mrf.mxu1  ;;  %v6967_v11 = vpop.f32.mrf.mxu0 }
 0x7d3   : > { %7438 = vst.msk [vmem:[%s8858_s7 + $0xc8] sm:$0xff] %vm7412_vm11, %v7389_v2  ;;  %v7102_v32 = vadd.f32 %v6967_v11, %v6629_v41  ;;  %v6634_v42 = vadd.f32 %v6633_v43, %v14306_v37  ;;  %v7285_v43 = vpop.permute.xlu0 %7284 }
 0x7d4   : > { %v6635_v63 = vpop.f32.mrf.mxu1  ;;  %v6969_v21 = vpop.f32.mrf.mxu0 }
 0x7d5   : > { %v7390_v6 = vadd.f32 %v7273_v35, %v7102_v32 }
 0x7d6   : > { %v6638_v33 = vpop.f32.mrf.mxu1  ;;  %v6972_v55 = vpop.f32.mrf.mxu0 }
 0x7d7   : > { %7439 = vst.msk [vmem:[%s8858_s7 + $0xd0] sm:$0xff] %vm7412_vm11, %v7390_v6  ;;  %v7103_v58 = vadd.f32 %v6972_v55, %v6634_v42  ;;  %v6639_v45 = vadd.f32 %v6638_v33, %v14316_v15 }
 0x7d8   : > { %v6640_v60 = vpop.f32.mrf.mxu1  ;;  %v6974_v28 = vpop.f32.mrf.mxu0 }
 0x7d9   : > { %v7391_v56 = vadd.f32 %v7275_v53, %v7103_v58  ;;  %v7287_v53 = vpop.permute.xlu1 %7286 }
 0x7da   : > { %v6643_v49 = vpop.f32.mrf.mxu1  ;;  %v6977_v13 = vpop.f32.mrf.mxu0 }
 0x7db   : > { %7440 = vst.msk [vmem:[%s8858_s7 + $0xd8] sm:$0xff] %vm7412_vm11, %v7391_v56  ;;  %v7104_v31 = vadd.f32 %v6977_v13, %v6639_v45  ;;  %v6644_v44 = vadd.f32 %v6643_v49, %v14326_v12  ;;  %v7289_v56 = vpop.permute.xlu0 %7288 }
 0x7dc   : > { %v6645_v37 = vpop.f32.mrf.mxu1  ;;  %v6979_v51 = vpop.f32.mrf.mxu0 }
 0x7dd   : > { %v7392_v17 = vadd.f32 %v7277_v1, %v7104_v31 }
 0x7de   : > { %v6648_v34 = vpop.f32.mrf.mxu1  ;;  %v6982_v10 = vpop.f32.mrf.mxu0 }
 0x7df   : > { %7441 = vst.msk [vmem:[%s8858_s7 + $0xe0] sm:$0xff] %vm7412_vm11, %v7392_v17  ;;  %v7105_v29 = vadd.f32 %v6982_v10, %v6644_v44  ;;  %v6649_v18 = vadd.f32 %v6648_v34, %v14336_v40  ;;  %v7291_v44 = vpop.permute.xlu1 %7290 }
 0x7e0   : > { %v6650_v15 = vpop.f32.mrf.mxu1  ;;  %v6984_v30 = vpop.f32.mrf.mxu0 }
 0x7e1   : > { %v7393_v61 = vadd.f32 %v7279_v16, %v7105_v29  ;;  %v7293_v30 = vpop.permute.xlu0 %7292 }
 0x7e2   : > { %v6653_v19 = vpop.f32.mrf.mxu1  ;;  %v6987_v27 = vpop.f32.mrf.mxu0 }
 0x7e3   : > { %7442 = vst.msk [vmem:[%s8858_s7 + $0xe8] sm:$0xff] %vm7412_vm11, %v7393_v61  ;;  %v7106_v47 = vadd.f32 %v6987_v27, %v6649_v18  ;;  %v6654_v59 = vadd.f32 %v6653_v19, %v14346_v36 }
 0x7e4   : > { %v6655_v12 = vpop.f32.mrf.mxu1  ;;  %v6989_v22 = vpop.f32.mrf.mxu0 }
 0x7e5   : > { %v7394_v24 = vadd.f32 %v7281_v26, %v7106_v47  ;;  %v7295_v12 = vpop.permute.xlu1 %7294 }
 0x7e6   : > { %v6658_v52 = vpop.f32.mrf.mxu1  ;;  %v6992_v3 = vpop.f32.mrf.mxu0 }
 0x7e7   : > { %7443 = vst.msk [vmem:[%s8858_s7 + $0xf0] sm:$0xff] %vm7412_vm11, %v7394_v24  ;;  %v7107_v50 = vadd.f32 %v6992_v3, %v6654_v59  ;;  %v6659_v2 = vadd.f32 %v6658_v52, %v14356_v4 }
 0x7e8   : > { %v6660_v40 = vpop.f32.mrf.mxu1  ;;  %v6994_v41 = vpop.f32.mrf.mxu0 }
 0x7e9   : > { %v7395_v35 = vadd.f32 %v7283_v9, %v7107_v50  ;;  %v7297_v50 = vpop.permute.xlu0 %7296 }
 0x7ea   : > { %v6663_v11 = vpop.f32.mrf.mxu1  ;;  %v6997_v32 = vpop.f32.mrf.mxu0 }
 0x7eb   : > { %7444 = vst.msk [vmem:[%s8858_s7 + $0xf8] sm:$0xff] %vm7412_vm11, %v7395_v35  ;;  %v7108_v63 = vadd.f32 %v6997_v32, %v6659_v2  ;;  %v6664_v42 = vadd.f32 %v6663_v11, %v14366_v57  ;;  %v7299_v32 = vpop.permute.xlu1 %7298 }
 0x7ec   : > { %v6665_v36 = vpop.f32.mrf.mxu1  ;;  %v6999_v21 = vpop.f32.mrf.mxu0 }
 0x7ed   : > { %v7396_v6 = vadd.f32 %v7285_v43, %v7108_v63 }
 0x7ee   : > { %v6668_v33 = vpop.f32.mrf.mxu1  ;;  %v7002_v55 = vpop.f32.mrf.mxu0 }
 0x7ef   : > { %7445 = vst.msk [vmem:[%s8858_s7 + $0x100] sm:$0xff] %vm7412_vm11, %v7396_v6  ;;  %v7109_v58 = vadd.f32 %v7002_v55, %v6664_v42  ;;  %v6669_v28 = vadd.f32 %v6668_v33, %v14377_v54  ;;  %v7301_v33 = vpop.permute.xlu0 %7300 }
 0x7f0   : > { %v6670_v4 = vpop.f32.mrf.mxu1  ;;  %v7004_v60 = vpop.f32.mrf.mxu0 }
 0x7f1   : > { %v7397_v45 = vadd.f32 %v7287_v53, %v7109_v58 }
 0x7f2   : > { %v6673_v1 = vpop.f32.mrf.mxu1  ;;  %v7007_v49 = vpop.f32.mrf.mxu0 }
 0x7f3   : > { %7446 = vst.msk [vmem:[%s8858_s7 + $0x108] sm:$0xff] %vm7412_vm11, %v7397_v45  ;;  %v7110_v13 = vadd.f32 %v7007_v49, %v6669_v28  ;;  %v6674_v37 = vadd.f32 %v6673_v1, %v14388_v25 }
 0x7f4   : > { %v6675_v57 = vpop.f32.mrf.mxu1  ;;  %v7009_v31 = vpop.f32.mrf.mxu0 }
 0x7f5   : > { %v7398_v51 = vadd.f32 %v7289_v56, %v7110_v13  ;;  %v7303_v56 = vpop.permute.xlu1 %7302 }
 0x7f6   : > { %v6678_v17 = vpop.f32.mrf.mxu1  ;;  %v7012_v16 = vpop.f32.mrf.mxu0 }
 0x7f7   : > { %7447 = vst.msk [vmem:[%s8858_s7 + $0x110] sm:$0xff] %vm7412_vm11, %v7398_v51  ;;  %v7111_v34 = vadd.f32 %v7012_v16, %v6674_v37  ;;  %v6679_v29 = vadd.f32 %v6678_v17, %v14399_v39  ;;  %v7305_v51 = vpop.permute.xlu0 %7304 }
 0x7f8   : > { %v6680_v54 = vpop.f32.mrf.mxu1  ;;  %v7014_v10 = vpop.f32.mrf.mxu0 }
 0x7f9   : > { %v7399_v15 = vadd.f32 %v7291_v44, %v7111_v34 }
 0x7fa   : > { %v6683_v18 = vpop.f32.mrf.mxu1  ;;  %v7017_v61 = vpop.f32.mrf.mxu0 }
 0x7fb   : > { %7448 = vst.msk [vmem:[%s8858_s7 + $0x118] sm:$0xff] %vm7412_vm11, %v7399_v15  ;;  %v7112_v26 = vadd.f32 %v7017_v61, %v6679_v29  ;;  %v6684_v27 = vadd.f32 %v6683_v18, %v14409_v14  ;;  %v7307_v29 = vpop.permute.xlu1 %7306 }
 0x7fc   : > { %v6685_v25 = vpop.f32.mrf.mxu1  ;;  %v7019_v19 = vpop.f32.mrf.mxu0 }
 0x7fd   : > { %v7400_v47 = vadd.f32 %v7293_v30, %v7112_v26  ;;  %v7309_v19 = vpop.permute.xlu0 %7308 }
 0x7fe   : > { %v6688_v22 = vpop.f32.mrf.mxu1  ;;  %v7022_v59 = vpop.f32.mrf.mxu0 }
 0x7ff   : > { %7449 = vst.msk [vmem:[%s8858_s7 + $0x120] sm:$0xff] %vm7412_vm11, %v7400_v47  ;;  %v7113_v24 = vadd.f32 %v7022_v59, %v6684_v27  ;;  %v6689_v52 = vadd.f32 %v6688_v22, %v14418_v38 }
 0x800   : > { %v6690_v39 = vpop.f32.mrf.mxu1  ;;  %v7024_v9 = vpop.f32.mrf.mxu0 }
 0x801   : > { %v7401_v3 = vadd.f32 %v7295_v12, %v7113_v24  ;;  %v7311_v39 = vpop.permute.xlu1 %7310 }
 0x802   : > { %v6693_v40 = vpop.f32.mrf.mxu1  ;;  %v7027_v41 = vpop.f32.mrf.mxu0 }
 0x803   : > { %7450 = vst.msk [vmem:[%s8858_s7 + $0x128] sm:$0xff] %vm7412_vm11, %v7401_v3  ;;  %v7114_v2 = vadd.f32 %v7027_v41, %v6689_v52  ;;  %v6694_v43 = vadd.f32 %v6693_v40, %v14427_v62 }
 0x804   : > { %v6695_v14 = vpop.f32.mrf.mxu1  ;;  %v7029_v35 = vpop.f32.mrf.mxu0 }
 0x805   : > { %v7402_v11 = vadd.f32 %v7297_v50, %v7114_v2  ;;  %v7313_v2 = vpop.permute.xlu0 %7312 }
 0x806   : > { %v6698_v63 = vpop.f32.mrf.mxu1  ;;  %v7032_v36 = vpop.f32.mrf.mxu0 }
 0x807   : > { %7451 = vst.msk [vmem:[%s8858_s7 + $0x130] sm:$0xff] %vm7412_vm11, %v7402_v11  ;;  %v7115_v21 = vadd.f32 %v7032_v36, %v6694_v43  ;;  %v6699_v6 = vadd.f32 %v6698_v63, %v14436_v20 }
 0x808   : > { %v6700_v38 = vpop.f32.mrf.mxu1  ;;  %v7034_v42 = vpop.f32.mrf.mxu0 }
 0x809   : > { %v7403_v53 = vadd.f32 %v7299_v32, %v7115_v21  ;;  %v7315_v21 = vpop.permute.xlu1 %7314 }
 0x80a   : > { %v6703_v55 = vpop.f32.mrf.mxu1  ;;  %v7037_v58 = vpop.f32.mrf.mxu0 }
 0x80b   : > { %7452 = vst.msk [vmem:[%s8858_s7 + $0x138] sm:$0xff] %vm7412_vm11, %v7403_v53  ;;  %v7116_v4 = vadd.f32 %v7037_v58, %v6699_v6  ;;  %v6704_v28 = vadd.f32 %v6703_v55, %v14445_v48 }
 0x80c   : > { %v6705_v62 = vpop.f32.mrf.mxu1  ;;  %v7039_v60 = vpop.f32.mrf.mxu0 }
 0x80d   : > { %v7404_v45 = vadd.f32 %v7301_v33, %v7116_v4 }
 0x80e   : > { %v6708_v1 = vpop.f32.mrf.mxu1  ;;  %v7042_v49 = vpop.f32.mrf.mxu0 }
 0x80f   : > { %7453 = vst.msk [vmem:[%s8858_s7 + $0x140] sm:$0xff] %vm7412_vm11, %v7404_v45  ;;  %v7117_v13 = vadd.f32 %v7042_v49, %v6704_v28  ;;  %v6709_v31 = vadd.f32 %v6708_v1, %v14454_v7 }
 0x810   : > { %v6710_v20 = vpop.f32.mrf.mxu1  ;;  %v7044_v57 = vpop.f32.mrf.mxu0 }
 0x811   : > { %v7405_v37 = vadd.f32 %v7303_v56, %v7117_v13 }
 0x812   : > { %v6713_v44 = vpop.f32.mrf.mxu1  ;;  %v7047_v17 = vpop.f32.mrf.mxu0 }
 0x813   : > { %7454 = vst.msk [vmem:[%s8858_s7 + $0x148] sm:$0xff] %vm7412_vm11, %v7405_v37  ;;  %v7118_v16 = vadd.f32 %v7047_v17, %v6709_v31  ;;  %v6714_v54 = vadd.f32 %v6713_v44, %v14464_v5 }
 0x814   : > { %v6715_v48 = vpop.f32.mrf.mxu1  ;;  %v7049_v34 = vpop.f32.mrf.mxu0 }
 0x815   : > { %v7406_v10 = vadd.f32 %v7305_v51, %v7118_v16 }
 0x816   : > { %v6718_v15 = vpop.f32.mrf.mxu1  ;;  %v7052_v30 = vpop.f32.mrf.mxu0 }
 0x817   : > { %7455 = vst.msk [vmem:[%s8858_s7 + $0x150] sm:$0xff] %vm7412_vm11, %v7406_v10  ;;  %v7119_v18 = vadd.f32 %v7052_v30, %v6714_v54  ;;  %v6719_v26 = vadd.f32 %v6718_v15, %v14474_v23 }
 0x818   : > { %v6720_v7 = vpop.f32.mrf.mxu1  ;;  %v7054_v61 = vpop.f32.mrf.mxu0 }
 0x819   : > { %v7407_v25 = vadd.f32 %v7307_v29, %v7119_v18 }
 0x81a   : > { %v6723_v27 = vpop.f32.mrf.mxu1  ;;  %v7057_v47 = vpop.f32.mrf.mxu0 }
 0x81b   : > { %7456 = vst.msk [vmem:[%s8858_s7 + $0x158] sm:$0xff] %vm7412_vm11, %v7407_v25  ;;  %v7120_v12 = vadd.f32 %v7057_v47, %v6719_v26  ;;  %v6724_v59 = vadd.f32 %v6723_v27, %v14484_v8 }
 0x81c   : > { %v6725_v5 = vpop.f32.mrf.mxu1  ;;  %v7059_v22 = vpop.f32.mrf.mxu0 }
 0x81d   : > { %v7408_v24 = vadd.f32 %v7309_v19, %v7120_v12 }
 0x81e   : > { %v6728_v9 = vpop.f32.mrf.mxu1  ;;  %v7062_v52 = vpop.f32.mrf.mxu0 }
 0x81f   : > { %7457 = vst.msk [vmem:[%s8858_s7 + $0x160] sm:$0xff] %vm7412_vm11, %v7408_v24  ;;  %v7121_v3 = vadd.f32 %v7062_v52, %v6724_v59  ;;  %v6729_v40 = vadd.f32 %v6728_v9, %v14494_v46 }
 0x820   : > { %v6730_v23 = vpop.f32.mrf.mxu1  ;;  %v7064_v50 = vpop.f32.mrf.mxu0 }
 0x821   : > { %v7409_v41 = vadd.f32 %v7311_v39, %v7121_v3 }
 0x822   : > { %v6733_v14 = vpop.f32.mrf.mxu1  ;;  %v7067_v35 = vpop.f32.mrf.mxu0 }
 0x823   : > { %7458 = vst.msk [vmem:[%s8858_s7 + $0x168] sm:$0xff] %vm7412_vm11, %v7409_v41  ;;  %v7122_v8 = vadd.f32 %v7067_v35, %v6729_v40  ;;  %v6734_v32 = vadd.f32 %v6733_v14, %v14503_v0 }
 0x824   : > { %v6735_v43 = vpop.f32.mrf.mxu1  ;;  %v7069_v11 = vpop.f32.mrf.mxu0 }
 0x825   : > { %v7410_v63 = vadd.f32 %v7313_v2, %v7122_v8 }
 0x826   : > { %v7072_v36 = vpop.f32.mrf.mxu0 }
 0x827   : > { %7459 = vst.msk [vmem:[%s8858_s7 + $0x170] sm:$0xff] %vm7412_vm11, %v7410_v63  ;;  %v7123_v38 = vadd.f32 %v7072_v36, %v6734_v32 }
 0x828   : > { %v7074_v42 = vpop.f32.mrf.mxu0 }
 0x829   : > { %v7411_v46 = vadd.f32 %v7315_v21, %v7123_v38 }
 0x82b   : > { %7460 = vst.msk [vmem:[%s8858_s7 + $0x178] sm:$0xff] %vm7412_vm11, %v7411_v46 }
 0x82c PF: > { %s14_s15 = sadd.s32 1, %s8556_s15  }
 0x82d   : > { %p11_p5 = scmp.ge.s32.totalorder %s14_s15, 4  }
 0x82f   :  { %13 = sbr.rel (!%p11_p5) target bundleno = 1 (0x1), region = 92 }

</bundles_post_ra>
